<compile_context>
chip_gen: v7x
topology: tpu7x:2x2x1
jax: 0.10.0
libtpu: 0.0.40
codegen_flags: <defaults>
</compile_context>

<pallas_src>
import functools
import math

import jax
import jax.numpy as jnp
from jax.experimental import pallas as pl
from jax.experimental.pallas import tpu as pltpu

_EPS = 1e-5  # nn.InstanceNorm2d default eps


# ----------------------------------------------------------------------------
# In-kernel math helpers (all f32; v5e has no bf16 VPU/EUP)
# ----------------------------------------------------------------------------
def _erf(x):
    # Abramowitz & Stegun 7.1.26 (max abs error ~1.5e-7), built only from ops
    # with guaranteed Mosaic lowerings (exp, mul, add, select).
    a1, a2, a3, a4, a5 = 0.254829592, -0.284496736, 1.421413741, -1.453152027, 1.061405429
    p = 0.3275911
    ax = jnp.abs(x)
    t = 1.0 / (1.0 + p * ax)
    poly = ((((a5 * t + a4) * t + a3) * t + a2) * t + a1) * t
    y = 1.0 - poly * jnp.exp(-ax * ax)
    return jnp.where(x < 0.0, -y, y)


def _gelu(x):
    # Exact (erf-based) GELU, matching torch.nn.functional.gelu default.
    return 0.5 * x * (1.0 + _erf(x * (1.0 / math.sqrt(2.0))))


# ----------------------------------------------------------------------------
# Fused Pallas kernel: one grid step == one image
# ----------------------------------------------------------------------------
def _fused_kernel(*refs, H, W, identity_shortcut):
    if identity_shortcut:
        (x_ref, mask_ref, w1_ref, w2_ref, vec_ref,
         o_ref, xflat_ref, ypad_ref, t1_ref, t2_ref) = refs
        wsc_ref = None
    else:
        (x_ref, mask_ref, w1_ref, w2_ref, vec_ref, wsc_ref,
         o_ref, xflat_ref, ypad_ref, t1_ref, t2_ref) = refs

    Wp = W + 4                    # padded row width (2-px conv halo each side)
    Lc = H * Wp                   # full-width output window (lane dim everywhere)
    base = 3 * Wp                 # window start inside the flat padded buffers
    cin = x_ref.shape[1]
    cout = w1_ref.shape[0]
    inv_hw = 1.0 / float(H * W)

    mask = mask_ref[...]          # (1, Lc) f32; 1.0 on the W valid columns per row
    vec = vec_ref[...]            # (Cout, 8) packed per-channel vectors
    b1, g1, be1 = vec[:, 0:1], vec[:, 1:2], vec[:, 2:3]
    b2, g2, be2 = vec[:, 3:4], vec[:, 4:5], vec[:, 5:6]
    bsc = vec[:, 6:7]

    # ---- fused 2-px zero pad: scatter the (Cin, H, W) image rows into a flat
    # zero-padded (Cin, (H+6)*Wp) f32 buffer (3 margin rows top/bottom give all
    # 25 tap slices in-range static offsets).
    xflat_ref[...] = jnp.zeros(xflat_ref.shape, xflat_ref.dtype)
    for r in range(H):
        off = base + r * Wp + 2
        xflat_ref[:, off:off + W] = x_ref[0, :, r, :]

    def build_taps(src_ref, t_ref, c):
        # In-VMEM im2col: every 5x5 tap is a *contiguous* lane-slice of the
        # flat padded source (no reshapes / relayouts).  Out-of-row reads only
        # land in the discarded pad columns of the full-width window.
        for kh in range(5):
            for kw in range(5):
                t = kh * 5 + kw
                b = (kh + 1) * Wp + (kw - 2)
                t_ref[t * c:(t + 1) * c, :] = src_ref[:, b:b + Lc]

    def fold_conv(w_ref, t_ref, c):
        # K-folded conv: (Cout, 25*c) @ (25*c, H*Wp) bf16 MXU dots with f32
        # accumulation, chunked so every MXU pass has K <= 128.
        taps_per = max(1, 128 // c)
        acc = None
        for t0 in range(0, 25, taps_per):
            r0, r1 = t0 * c, min(25, t0 + taps_per) * c
            part = jnp.dot(w_ref[:, r0:r1],
                           t_ref[r0:r1, :].astype(jnp.bfloat16),
                           preferred_element_type=jnp.float32)
            acc = part if acc is None else acc + part
        return acc

    def inorm_gelu(acc, gamma, beta):
        # InstanceNorm2d (biased variance, eps=1e-5, affine) + GELU; statistics
        # are masked to the H*W valid columns of the full-width window.
        mean = jnp.sum(acc * mask, axis=1, keepdims=True) * inv_hw
        cent = acc - mean
        var = jnp.sum(jnp.square(cent) * mask, axis=1, keepdims=True) * inv_hw
        xhat = cent * jax.lax.rsqrt(var + _EPS)
        return _gelu(xhat * gamma + beta)

    # ---- conv1 -> InstanceNorm -> GELU (bias cancels under IN; kept for
    # faithfulness, it is a single broadcast add).
    build_taps(xflat_ref, t1_ref, cin)
    y1 = inorm_gelu(fold_conv(w1_ref, t1_ref, cin) + b1, g1, be1)   # (Cout, Lc)

    # ---- stash y1 into the flat zero-padded conv2 halo buffer.  The mask
    # multiply writes zeros into the in-row pad columns, so only the 3-row
    # top/bottom margins need an explicit zero fill.
    flat_len = ypad_ref.shape[1]
    ypad_ref[:, 0:base] = jnp.zeros((cout, base), jnp.float32)
    ypad_ref[:, base + Lc:flat_len] = jnp.zeros((cout, flat_len - base - Lc), jnp.float32)
    ypad_ref[:, base:base + Lc] = y1 * mask

    # ---- conv2 -> InstanceNorm -> GELU
    build_taps(ypad_ref, t2_ref, cout)
    y2 = inorm_gelu(fold_conv(w2_ref, t2_ref, cout) + b2, g2, be2)

    # ---- shortcut (exact-f32 identity, or 1x1 conv on the bf16 MXU) +
    # residual add + final GELU.
    x_win = xflat_ref[:, base:base + Lc]                            # (Cin, Lc) f32
    if identity_shortcut:
        sc = x_win
    else:
        sc = jnp.dot(wsc_ref[...], x_win.astype(jnp.bfloat16),
                     preferred_element_type=jnp.float32) + bsc

    o_ref[0] = _gelu(y2 + sc).astype(o_ref.dtype)


def _fused_block_call(up, mask, w1, w2, vecs, wsc, ho, wo):
    n, cin, _, _ = up.shape
    cout = w1.shape[0]
    wp = wo + 4
    lc = ho * wp
    flat_len = (ho + 6) * wp
    identity = wsc is None
    kernel = functools.partial(_fused_kernel, H=ho, W=wo,
                               identity_shortcut=identity)

    in_specs = [
        pl.BlockSpec((1, cin, ho, wo), lambda i: (i, 0, 0, 0)),   # unpadded upsampled image (f32)
        pl.BlockSpec((1, lc), lambda i: (0, 0)),                  # valid-column mask
        pl.BlockSpec((cout, 25 * cin), lambda i: (0, 0)),         # conv1 weights (Cout, K)
        pl.BlockSpec((cout, 25 * cout), lambda i: (0, 0)),        # conv2 weights (Cout, K)
        pl.BlockSpec((cout, 8), lambda i: (0, 0)),                # packed bias/affine vectors
    ]
    operands = [up, mask, w1, w2, vecs]
    if not identity:
        in_specs.append(pl.BlockSpec((cout, cin), lambda i: (0, 0)))  # 1x1 shortcut weights
        operands.append(wsc)

    return pl.pallas_call(
        kernel,
        out_shape=jax.ShapeDtypeStruct((n, cout, lc), jnp.float32),   # lane-dense output
        grid=(n,),
        in_specs=in_specs,
        out_specs=pl.BlockSpec((1, cout, lc), lambda i: (i, 0, 0)),
        scratch_shapes=[
            pltpu.VMEM((cin, flat_len), jnp.float32),     # flat zero-padded input (fused pad)
            pltpu.VMEM((cout, flat_len), jnp.float32),    # flat zero-padded y1 (conv2 halo)
            pltpu.VMEM((25 * cin, lc), jnp.float32),      # conv1 tap matrix (im2col in VMEM)
            pltpu.VMEM((25 * cout, lc), jnp.float32),     # conv2 tap matrix
        ],
        compiler_params=pltpu.CompilerParams(
            dimension_semantics=("parallel",),
            vmem_limit_bytes=32 * 1024 * 1024,
        ),
    )(*operands)


# ----------------------------------------------------------------------------
# Plain-JAX glue: bilinear 2x upsample (align_corners=False, PyTorch semantics)
# ----------------------------------------------------------------------------
def _bilinear_upsample_nchw(x, scale):
    n, c, h, w = x.shape
    sh, sw = scale
    ho, wo = int(h * sh), int(w * sw)

    def src_idx(out_size, in_size, s):
        coord = (jnp.arange(out_size, dtype=jnp.float32) + 0.5) / float(s) - 0.5
        coord = jnp.maximum(coord, 0.0)          # PyTorch clamps negative source coords
        i0 = jnp.floor(coord)
        frac = coord - i0
        i0 = jnp.minimum(i0.astype(jnp.int32), in_size - 1)
        i1 = jnp.minimum(i0 + 1, in_size - 1)
        return i0, i1, frac

    y0, y1i, fy = src_idx(ho, h, sh)
    x0, x1i, fx = src_idx(wo, w, sw)

    top, bot = x[:, :, y0, :], x[:, :, y1i, :]

    def lerp_w(img):
        left, right = img[:, :, :, x0], img[:, :, :, x1i]
        return left * (1.0 - fx)[None, None, None, :] + right * fx[None, None, None, :]

    t, b = lerp_w(top), lerp_w(bot)
    return t * (1.0 - fy)[None, None, :, None] + b * fy[None, None, :, None]


def _valid_col_mask(ho, wo):
    wp = wo + 4
    col = jnp.arange(wp, dtype=jnp.int32)
    row = ((col >= 2) & (col < 2 + wo)).astype(jnp.float32)           # (wp,)
    return jnp.broadcast_to(row[None, :], (ho, wp)).reshape(1, ho * wp)


# ----------------------------------------------------------------------------
# Module forward + deterministic parameter init
# ----------------------------------------------------------------------------
def init_params(in_channels, out_channels, key):
    ks = jax.random.split(key, 6)

    def conv_w(k, cout, cin, scale=0.05):
        # torch layout (Cout, Cin, 5, 5) -> kernel layout (Cout, 25*Cin),
        # K index = (kh*5 + kw)*Cin + ci (matches the in-kernel tap rows).
        w = jax.random.normal(k, (cout, cin, 5, 5), jnp.float32) * scale
        return jnp.transpose(w, (0, 2, 3, 1)).reshape(cout, 25 * cin)

    b1 = jax.random.normal(ks[1], (out_channels,), jnp.float32) * 0.05
    b2 = jax.random.normal(ks[3], (out_channels,), jnp.float32) * 0.05
    ones = jnp.ones((out_channels,), jnp.float32)     # InstanceNorm affine defaults
    zeros = jnp.zeros((out_channels,), jnp.float32)

    params = {
        "w1": conv_w(ks[0], out_channels, in_channels),
        "w2": conv_w(ks[2], out_channels, out_channels),
    }
    if in_channels != out_channels:
        wsc = jax.random.normal(ks[4], (out_channels, in_channels, 1, 1), jnp.float32) * 0.05
        params["wsc"] = wsc[:, :, 0, 0]                               # (Cout, Cin)
        bsc = jax.random.normal(ks[5], (out_channels,), jnp.float32) * 0.05
    else:
        params["wsc"] = None   # identity shortcut handled in-kernel (exact f32 residual)
        bsc = zeros

    # Packed per-channel vectors, one (Cout, 8) f32 tile (channels on sublanes):
    # cols = [b1, gamma1, beta1, b2, gamma2, beta2, bsc, pad]
    params["vecs"] = jnp.stack([b1, ones, zeros, b2, ones, zeros, bsc, zeros], axis=1)
    return params


def residual_block_up(x_nchw, params, scale_factor=(2, 2)):
    x = x_nchw.astype(jnp.float32)
    up = _bilinear_upsample_nchw(x, scale_factor)          # (N, Cin, Ho, Wo) f32, NCHW
    n, _, ho, wo = up.shape
    cout = params["w1"].shape[0]

    w1 = params["w1"].astype(jnp.bfloat16)
    w2 = params["w2"].astype(jnp.bfloat16)
    wsc = params["wsc"]
    if wsc is not None:
        wsc = wsc.astype(jnp.bfloat16)
    mask = _valid_col_mask(ho, wo)

    out_flat = _fused_block_call(up, mask, w1, w2, params["vecs"], wsc, ho, wo)
    wp = wo + 4
    # Drop the 4 pad columns of the full-width window; cheap XLA reshape/slice.
    out = out_flat.reshape(n, cout, ho, wp)[:, :, :, 2:2 + wo]
    return out                                              # (N, Cout, Ho, Wo), NCHW


if __name__ == "__main__":
    in_channels, out_channels = 4, 8
    batch, height, width = 2, 16, 16

    x = jax.random.normal(jax.random.PRNGKey(0),
                          (batch, in_channels, height, width), jnp.float32)
    params = init_params(in_channels, out_channels, jax.random.PRNGKey(1))

    fwd = jax.jit(residual_block_up)
    out = jax.block_until_ready(fwd(x, params))

    assert out.shape == (batch, out_channels, 2 * height, 2 * width), out.shape
    assert bool(jnp.all(jnp.isfinite(out)))
    print("KERNEL_OK")
</pallas_src>

<mosaic_0001>
module attributes {stable_mosaic.version = 11 : i64} {
  func.func @_fused_kernel(%arg0: i32, %arg1: memref<1x4x32x32xf32, #tpu.memory_space<vmem>>, %arg2: memref<1x1152xf32, #tpu.memory_space<vmem>>, %arg3: memref<8x100xbf16, #tpu.memory_space<vmem>>, %arg4: memref<8x200xbf16, #tpu.memory_space<vmem>>, %arg5: memref<8x8xf32, #tpu.memory_space<vmem>>, %arg6: memref<8x4xbf16, #tpu.memory_space<vmem>>, %arg7: memref<1x8x1152xf32, #tpu.memory_space<vmem>>, %arg8: memref<4x1368xf32, #tpu.memory_space<vmem>>, %arg9: memref<8x1368xf32, #tpu.memory_space<vmem>>, %arg10: memref<100x1152xf32, #tpu.memory_space<vmem>>, %arg11: memref<200x1152xf32, #tpu.memory_space<vmem>>) attributes {dimension_semantics = [#tpu.dimension_semantics<parallel>], iteration_bounds = array<i64: 2>, scalar_prefetch = 0 : i64, scratch_operands = 4 : i64, tpu.core_type = #tpu.core_type<tc>, window_params = [{transform_indices = @transform_0, window_bounds = array<i64: 1, 4, 32, 32>}, {pipeline_mode = #tpu.pipeline_mode<synchronous>, transform_indices = @transform_1, window_bounds = array<i64: 1, 1152>}, {pipeline_mode = #tpu.pipeline_mode<synchronous>, transform_indices = @transform_2, window_bounds = array<i64: 8, 100>}, {pipeline_mode = #tpu.pipeline_mode<synchronous>, transform_indices = @transform_3, window_bounds = array<i64: 8, 200>}, {pipeline_mode = #tpu.pipeline_mode<synchronous>, transform_indices = @transform_4, window_bounds = array<i64: 8, 8>}, {pipeline_mode = #tpu.pipeline_mode<synchronous>, transform_indices = @transform_5, window_bounds = array<i64: 8, 4>}, {transform_indices = @transform_6, window_bounds = array<i64: 1, 8, 1152>}]} {
    %c0 = arith.constant 0 : index
    %c0_0 = arith.constant 0 : index
    %0 = vector.load %arg2[%c0, %c0_0] : memref<1x1152xf32, #tpu.memory_space<vmem>>, vector<1x1152xf32>
    %c0_1 = arith.constant 0 : index
    %c0_2 = arith.constant 0 : index
    %1 = vector.load %arg5[%c0_1, %c0_2] : memref<8x8xf32, #tpu.memory_space<vmem>>, vector<8x8xf32>
    %2 = vector.extract_strided_slice %1 {offsets = [0, 0], sizes = [8, 1], strides = [1, 1]} : vector<8x8xf32> to vector<8x1xf32>
    %3 = vector.extract_strided_slice %1 {offsets = [0, 1], sizes = [8, 1], strides = [1, 1]} : vector<8x8xf32> to vector<8x1xf32>
    %4 = vector.extract_strided_slice %1 {offsets = [0, 2], sizes = [8, 1], strides = [1, 1]} : vector<8x8xf32> to vector<8x1xf32>
    %5 = vector.extract_strided_slice %1 {offsets = [0, 3], sizes = [8, 1], strides = [1, 1]} : vector<8x8xf32> to vector<8x1xf32>
    %6 = vector.extract_strided_slice %1 {offsets = [0, 4], sizes = [8, 1], strides = [1, 1]} : vector<8x8xf32> to vector<8x1xf32>
    %7 = vector.extract_strided_slice %1 {offsets = [0, 5], sizes = [8, 1], strides = [1, 1]} : vector<8x8xf32> to vector<8x1xf32>
    %8 = vector.extract_strided_slice %1 {offsets = [0, 6], sizes = [8, 1], strides = [1, 1]} : vector<8x8xf32> to vector<8x1xf32>
    %cst = arith.constant 0.000000e+00 : f32
    %9 = vector.broadcast %cst : f32 to vector<4x1368xf32>
    %c0_3 = arith.constant 0 : index
    %c0_4 = arith.constant 0 : index
    %10 = vector.load %arg8[%c0_3, %c0_4] : memref<4x1368xf32, #tpu.memory_space<vmem>>, vector<4x1368xf32>
    tpu.vector_store %arg8[%c0_3, %c0_4], %9 {strides = array<i32>} : memref<4x1368xf32, #tpu.memory_space<vmem>>, vector<4x1368xf32>,
    %c0_5 = arith.constant 0 : index
    %c0_6 = arith.constant 0 : index
    %c0_7 = arith.constant 0 : index
    %c0_8 = arith.constant 0 : index
    %11 = vector.load %arg1[%c0_5, %c0_6, %c0_7, %c0_8] : memref<1x4x32x32xf32, #tpu.memory_space<vmem>>, vector<1x4x1x32xf32>
    %12 = vector.shape_cast %11 : vector<1x4x1x32xf32> to vector<4x32xf32>
    %c0_9 = arith.constant 0 : index
    %c110 = arith.constant 110 : index
    %13 = vector.load %arg8[%c0_9, %c110] : memref<4x1368xf32, #tpu.memory_space<vmem>>, vector<4x32xf32>
    tpu.vector_store %arg8[%c0_9, %c110], %12 {strides = array<i32>} : memref<4x1368xf32, #tpu.memory_space<vmem>>, vector<4x32xf32>,
    %c0_10 = arith.constant 0 : index
    %c0_11 = arith.constant 0 : index
    %c1 = arith.constant 1 : index
    %c0_12 = arith.constant 0 : index
    %14 = vector.load %arg1[%c0_10, %c0_11, %c1, %c0_12] : memref<1x4x32x32xf32, #tpu.memory_space<vmem>>, vector<1x4x1x32xf32>
    %15 = vector.shape_cast %14 : vector<1x4x1x32xf32> to vector<4x32xf32>
    %c0_13 = arith.constant 0 : index
    %c146 = arith.constant 146 : index
    %16 = vector.load %arg8[%c0_13, %c146] : memref<4x1368xf32, #tpu.memory_space<vmem>>, vector<4x32xf32>
    tpu.vector_store %arg8[%c0_13, %c146], %15 {strides = array<i32>} : memref<4x1368xf32, #tpu.memory_space<vmem>>, vector<4x32xf32>,
    %c0_14 = arith.constant 0 : index
    %c0_15 = arith.constant 0 : index
    %c2 = arith.constant 2 : index
    %c0_16 = arith.constant 0 : index
    %17 = vector.load %arg1[%c0_14, %c0_15, %c2, %c0_16] : memref<1x4x32x32xf32, #tpu.memory_space<vmem>>, vector<1x4x1x32xf32>
    %18 = vector.shape_cast %17 : vector<1x4x1x32xf32> to vector<4x32xf32>
    %c0_17 = arith.constant 0 : index
    %c182 = arith.constant 182 : index
    %19 = vector.load %arg8[%c0_17, %c182] : memref<4x1368xf32, #tpu.memory_space<vmem>>, vector<4x32xf32>
    tpu.vector_store %arg8[%c0_17, %c182], %18 {strides = array<i32>} : memref<4x1368xf32, #tpu.memory_space<vmem>>, vector<4x32xf32>,
    %c0_18 = arith.constant 0 : index
    %c0_19 = arith.constant 0 : index
    %c3 = arith.constant 3 : index
    %c0_20 = arith.constant 0 : index
    %20 = vector.load %arg1[%c0_18, %c0_19, %c3, %c0_20] : memref<1x4x32x32xf32, #tpu.memory_space<vmem>>, vector<1x4x1x32xf32>
    %21 = vector.shape_cast %20 : vector<1x4x1x32xf32> to vector<4x32xf32>
    %c0_21 = arith.constant 0 : index
    %c218 = arith.constant 218 : index
    %22 = vector.load %arg8[%c0_21, %c218] : memref<4x1368xf32, #tpu.memory_space<vmem>>, vector<4x32xf32>
    tpu.vector_store %arg8[%c0_21, %c218], %21 {strides = array<i32>} : memref<4x1368xf32, #tpu.memory_space<vmem>>, vector<4x32xf32>,
    %c0_22 = arith.constant 0 : index
    %c0_23 = arith.constant 0 : index
    %c4 = arith.constant 4 : index
    %c0_24 = arith.constant 0 : index
    %23 = vector.load %arg1[%c0_22, %c0_23, %c4, %c0_24] : memref<1x4x32x32xf32, #tpu.memory_space<vmem>>, vector<1x4x1x32xf32>
    %24 = vector.shape_cast %23 : vector<1x4x1x32xf32> to vector<4x32xf32>
    %c0_25 = arith.constant 0 : index
    %c254 = arith.constant 254 : index
    %25 = vector.load %arg8[%c0_25, %c254] : memref<4x1368xf32, #tpu.memory_space<vmem>>, vector<4x32xf32>
    tpu.vector_store %arg8[%c0_25, %c254], %24 {strides = array<i32>} : memref<4x1368xf32, #tpu.memory_space<vmem>>, vector<4x32xf32>,
    %c0_26 = arith.constant 0 : index
    %c0_27 = arith.constant 0 : index
    %c5 = arith.constant 5 : index
    %c0_28 = arith.constant 0 : index
    %26 = vector.load %arg1[%c0_26, %c0_27, %c5, %c0_28] : memref<1x4x32x32xf32, #tpu.memory_space<vmem>>, vector<1x4x1x32xf32>
    %27 = vector.shape_cast %26 : vector<1x4x1x32xf32> to vector<4x32xf32>
    %c0_29 = arith.constant 0 : index
    %c290 = arith.constant 290 : index
    %28 = vector.load %arg8[%c0_29, %c290] : memref<4x1368xf32, #tpu.memory_space<vmem>>, vector<4x32xf32>
    tpu.vector_store %arg8[%c0_29, %c290], %27 {strides = array<i32>} : memref<4x1368xf32, #tpu.memory_space<vmem>>, vector<4x32xf32>,
    %c0_30 = arith.constant 0 : index
    %c0_31 = arith.constant 0 : index
    %c6 = arith.constant 6 : index
    %c0_32 = arith.constant 0 : index
    %29 = vector.load %arg1[%c0_30, %c0_31, %c6, %c0_32] : memref<1x4x32x32xf32, #tpu.memory_space<vmem>>, vector<1x4x1x32xf32>
    %30 = vector.shape_cast %29 : vector<1x4x1x32xf32> to vector<4x32xf32>
    %c0_33 = arith.constant 0 : index
    %c326 = arith.constant 326 : index
    %31 = vector.load %arg8[%c0_33, %c326] : memref<4x1368xf32, #tpu.memory_space<vmem>>, vector<4x32xf32>
    tpu.vector_store %arg8[%c0_33, %c326], %30 {strides = array<i32>} : memref<4x1368xf32, #tpu.memory_space<vmem>>, vector<4x32xf32>,
    %c0_34 = arith.constant 0 : index
    %c0_35 = arith.constant 0 : index
    %c7 = arith.constant 7 : index
    %c0_36 = arith.constant 0 : index
    %32 = vector.load %arg1[%c0_34, %c0_35, %c7, %c0_36] : memref<1x4x32x32xf32, #tpu.memory_space<vmem>>, vector<1x4x1x32xf32>
    %33 = vector.shape_cast %32 : vector<1x4x1x32xf32> to vector<4x32xf32>
    %c0_37 = arith.constant 0 : index
    %c362 = arith.constant 362 : index
    %34 = vector.load %arg8[%c0_37, %c362] : memref<4x1368xf32, #tpu.memory_space<vmem>>, vector<4x32xf32>
    tpu.vector_store %arg8[%c0_37, %c362], %33 {strides = array<i32>} : memref<4x1368xf32, #tpu.memory_space<vmem>>, vector<4x32xf32>,
    %c0_38 = arith.constant 0 : index
    %c0_39 = arith.constant 0 : index
    %c8 = arith.constant 8 : index
    %c0_40 = arith.constant 0 : index
    %35 = vector.load %arg1[%c0_38, %c0_39, %c8, %c0_40] : memref<1x4x32x32xf32, #tpu.memory_space<vmem>>, vector<1x4x1x32xf32>
    %36 = vector.shape_cast %35 : vector<1x4x1x32xf32> to vector<4x32xf32>
    %c0_41 = arith.constant 0 : index
    %c398 = arith.constant 398 : index
    %37 = vector.load %arg8[%c0_41, %c398] : memref<4x1368xf32, #tpu.memory_space<vmem>>, vector<4x32xf32>
    tpu.vector_store %arg8[%c0_41, %c398], %36 {strides = array<i32>} : memref<4x1368xf32, #tpu.memory_space<vmem>>, vector<4x32xf32>,
    %c0_42 = arith.constant 0 : index
    %c0_43 = arith.constant 0 : index
    %c9 = arith.constant 9 : index
    %c0_44 = arith.constant 0 : index
    %38 = vector.load %arg1[%c0_42, %c0_43, %c9, %c0_44] : memref<1x4x32x32xf32, #tpu.memory_space<vmem>>, vector<1x4x1x32xf32>
    %39 = vector.shape_cast %38 : vector<1x4x1x32xf32> to vector<4x32xf32>
    %c0_45 = arith.constant 0 : index
    %c434 = arith.constant 434 : index
    %40 = vector.load %arg8[%c0_45, %c434] : memref<4x1368xf32, #tpu.memory_space<vmem>>, vector<4x32xf32>
    tpu.vector_store %arg8[%c0_45, %c434], %39 {strides = array<i32>} : memref<4x1368xf32, #tpu.memory_space<vmem>>, vector<4x32xf32>,
    %c0_46 = arith.constant 0 : index
    %c0_47 = arith.constant 0 : index
    %c10 = arith.constant 10 : index
    %c0_48 = arith.constant 0 : index
    %41 = vector.load %arg1[%c0_46, %c0_47, %c10, %c0_48] : memref<1x4x32x32xf32, #tpu.memory_space<vmem>>, vector<1x4x1x32xf32>
    %42 = vector.shape_cast %41 : vector<1x4x1x32xf32> to vector<4x32xf32>
    %c0_49 = arith.constant 0 : index
    %c470 = arith.constant 470 : index
    %43 = vector.load %arg8[%c0_49, %c470] : memref<4x1368xf32, #tpu.memory_space<vmem>>, vector<4x32xf32>
    tpu.vector_store %arg8[%c0_49, %c470], %42 {strides = array<i32>} : memref<4x1368xf32, #tpu.memory_space<vmem>>, vector<4x32xf32>,
    %c0_50 = arith.constant 0 : index
    %c0_51 = arith.constant 0 : index
    %c11 = arith.constant 11 : index
    %c0_52 = arith.constant 0 : index
    %44 = vector.load %arg1[%c0_50, %c0_51, %c11, %c0_52] : memref<1x4x32x32xf32, #tpu.memory_space<vmem>>, vector<1x4x1x32xf32>
    %45 = vector.shape_cast %44 : vector<1x4x1x32xf32> to vector<4x32xf32>
    %c0_53 = arith.constant 0 : index
    %c506 = arith.constant 506 : index
    %46 = vector.load %arg8[%c0_53, %c506] : memref<4x1368xf32, #tpu.memory_space<vmem>>, vector<4x32xf32>
    tpu.vector_store %arg8[%c0_53, %c506], %45 {strides = array<i32>} : memref<4x1368xf32, #tpu.memory_space<vmem>>, vector<4x32xf32>,
    %c0_54 = arith.constant 0 : index
    %c0_55 = arith.constant 0 : index
    %c12 = arith.constant 12 : index
    %c0_56 = arith.constant 0 : index
    %47 = vector.load %arg1[%c0_54, %c0_55, %c12, %c0_56] : memref<1x4x32x32xf32, #tpu.memory_space<vmem>>, vector<1x4x1x32xf32>
    %48 = vector.shape_cast %47 : vector<1x4x1x32xf32> to vector<4x32xf32>
    %c0_57 = arith.constant 0 : index
    %c542 = arith.constant 542 : index
    %49 = vector.load %arg8[%c0_57, %c542] : memref<4x1368xf32, #tpu.memory_space<vmem>>, vector<4x32xf32>
    tpu.vector_store %arg8[%c0_57, %c542], %48 {strides = array<i32>} : memref<4x1368xf32, #tpu.memory_space<vmem>>, vector<4x32xf32>,
    %c0_58 = arith.constant 0 : index
    %c0_59 = arith.constant 0 : index
    %c13 = arith.constant 13 : index
    %c0_60 = arith.constant 0 : index
    %50 = vector.load %arg1[%c0_58, %c0_59, %c13, %c0_60] : memref<1x4x32x32xf32, #tpu.memory_space<vmem>>, vector<1x4x1x32xf32>
    %51 = vector.shape_cast %50 : vector<1x4x1x32xf32> to vector<4x32xf32>
    %c0_61 = arith.constant 0 : index
    %c578 = arith.constant 578 : index
    %52 = vector.load %arg8[%c0_61, %c578] : memref<4x1368xf32, #tpu.memory_space<vmem>>, vector<4x32xf32>
    tpu.vector_store %arg8[%c0_61, %c578], %51 {strides = array<i32>} : memref<4x1368xf32, #tpu.memory_space<vmem>>, vector<4x32xf32>,
    %c0_62 = arith.constant 0 : index
    %c0_63 = arith.constant 0 : index
    %c14 = arith.constant 14 : index
    %c0_64 = arith.constant 0 : index
    %53 = vector.load %arg1[%c0_62, %c0_63, %c14, %c0_64] : memref<1x4x32x32xf32, #tpu.memory_space<vmem>>, vector<1x4x1x32xf32>
    %54 = vector.shape_cast %53 : vector<1x4x1x32xf32> to vector<4x32xf32>
    %c0_65 = arith.constant 0 : index
    %c614 = arith.constant 614 : index
    %55 = vector.load %arg8[%c0_65, %c614] : memref<4x1368xf32, #tpu.memory_space<vmem>>, vector<4x32xf32>
    tpu.vector_store %arg8[%c0_65, %c614], %54 {strides = array<i32>} : memref<4x1368xf32, #tpu.memory_space<vmem>>, vector<4x32xf32>,
    %c0_66 = arith.constant 0 : index
    %c0_67 = arith.constant 0 : index
    %c15 = arith.constant 15 : index
    %c0_68 = arith.constant 0 : index
    %56 = vector.load %arg1[%c0_66, %c0_67, %c15, %c0_68] : memref<1x4x32x32xf32, #tpu.memory_space<vmem>>, vector<1x4x1x32xf32>
    %57 = vector.shape_cast %56 : vector<1x4x1x32xf32> to vector<4x32xf32>
    %c0_69 = arith.constant 0 : index
    %c650 = arith.constant 650 : index
    %58 = vector.load %arg8[%c0_69, %c650] : memref<4x1368xf32, #tpu.memory_space<vmem>>, vector<4x32xf32>
    tpu.vector_store %arg8[%c0_69, %c650], %57 {strides = array<i32>} : memref<4x1368xf32, #tpu.memory_space<vmem>>, vector<4x32xf32>,
    %c0_70 = arith.constant 0 : index
    %c0_71 = arith.constant 0 : index
    %c16 = arith.constant 16 : index
    %c0_72 = arith.constant 0 : index
    %59 = vector.load %arg1[%c0_70, %c0_71, %c16, %c0_72] : memref<1x4x32x32xf32, #tpu.memory_space<vmem>>, vector<1x4x1x32xf32>
    %60 = vector.shape_cast %59 : vector<1x4x1x32xf32> to vector<4x32xf32>
    %c0_73 = arith.constant 0 : index
    %c686 = arith.constant 686 : index
    %61 = vector.load %arg8[%c0_73, %c686] : memref<4x1368xf32, #tpu.memory_space<vmem>>, vector<4x32xf32>
    tpu.vector_store %arg8[%c0_73, %c686], %60 {strides = array<i32>} : memref<4x1368xf32, #tpu.memory_space<vmem>>, vector<4x32xf32>,
    %c0_74 = arith.constant 0 : index
    %c0_75 = arith.constant 0 : index
    %c17 = arith.constant 17 : index
    %c0_76 = arith.constant 0 : index
    %62 = vector.load %arg1[%c0_74, %c0_75, %c17, %c0_76] : memref<1x4x32x32xf32, #tpu.memory_space<vmem>>, vector<1x4x1x32xf32>
    %63 = vector.shape_cast %62 : vector<1x4x1x32xf32> to vector<4x32xf32>
    %c0_77 = arith.constant 0 : index
    %c722 = arith.constant 722 : index
    %64 = vector.load %arg8[%c0_77, %c722] : memref<4x1368xf32, #tpu.memory_space<vmem>>, vector<4x32xf32>
    tpu.vector_store %arg8[%c0_77, %c722], %63 {strides = array<i32>} : memref<4x1368xf32, #tpu.memory_space<vmem>>, vector<4x32xf32>,
    %c0_78 = arith.constant 0 : index
    %c0_79 = arith.constant 0 : index
    %c18 = arith.constant 18 : index
    %c0_80 = arith.constant 0 : index
    %65 = vector.load %arg1[%c0_78, %c0_79, %c18, %c0_80] : memref<1x4x32x32xf32, #tpu.memory_space<vmem>>, vector<1x4x1x32xf32>
    %66 = vector.shape_cast %65 : vector<1x4x1x32xf32> to vector<4x32xf32>
    %c0_81 = arith.constant 0 : index
    %c758 = arith.constant 758 : index
    %67 = vector.load %arg8[%c0_81, %c758] : memref<4x1368xf32, #tpu.memory_space<vmem>>, vector<4x32xf32>
    tpu.vector_store %arg8[%c0_81, %c758], %66 {strides = array<i32>} : memref<4x1368xf32, #tpu.memory_space<vmem>>, vector<4x32xf32>,
    %c0_82 = arith.constant 0 : index
    %c0_83 = arith.constant 0 : index
    %c19 = arith.constant 19 : index
    %c0_84 = arith.constant 0 : index
    %68 = vector.load %arg1[%c0_82, %c0_83, %c19, %c0_84] : memref<1x4x32x32xf32, #tpu.memory_space<vmem>>, vector<1x4x1x32xf32>
    %69 = vector.shape_cast %68 : vector<1x4x1x32xf32> to vector<4x32xf32>
    %c0_85 = arith.constant 0 : index
    %c794 = arith.constant 794 : index
    %70 = vector.load %arg8[%c0_85, %c794] : memref<4x1368xf32, #tpu.memory_space<vmem>>, vector<4x32xf32>
    tpu.vector_store %arg8[%c0_85, %c794], %69 {strides = array<i32>} : memref<4x1368xf32, #tpu.memory_space<vmem>>, vector<4x32xf32>,
    %c0_86 = arith.constant 0 : index
    %c0_87 = arith.constant 0 : index
    %c20 = arith.constant 20 : index
    %c0_88 = arith.constant 0 : index
    %71 = vector.load %arg1[%c0_86, %c0_87, %c20, %c0_88] : memref<1x4x32x32xf32, #tpu.memory_space<vmem>>, vector<1x4x1x32xf32>
    %72 = vector.shape_cast %71 : vector<1x4x1x32xf32> to vector<4x32xf32>
    %c0_89 = arith.constant 0 : index
    %c830 = arith.constant 830 : index
    %73 = vector.load %arg8[%c0_89, %c830] : memref<4x1368xf32, #tpu.memory_space<vmem>>, vector<4x32xf32>
    tpu.vector_store %arg8[%c0_89, %c830], %72 {strides = array<i32>} : memref<4x1368xf32, #tpu.memory_space<vmem>>, vector<4x32xf32>,
    %c0_90 = arith.constant 0 : index
    %c0_91 = arith.constant 0 : index
    %c21 = arith.constant 21 : index
    %c0_92 = arith.constant 0 : index
    %74 = vector.load %arg1[%c0_90, %c0_91, %c21, %c0_92] : memref<1x4x32x32xf32, #tpu.memory_space<vmem>>, vector<1x4x1x32xf32>
    %75 = vector.shape_cast %74 : vector<1x4x1x32xf32> to vector<4x32xf32>
    %c0_93 = arith.constant 0 : index
    %c866 = arith.constant 866 : index
    %76 = vector.load %arg8[%c0_93, %c866] : memref<4x1368xf32, #tpu.memory_space<vmem>>, vector<4x32xf32>
    tpu.vector_store %arg8[%c0_93, %c866], %75 {strides = array<i32>} : memref<4x1368xf32, #tpu.memory_space<vmem>>, vector<4x32xf32>,
    %c0_94 = arith.constant 0 : index
    %c0_95 = arith.constant 0 : index
    %c22 = arith.constant 22 : index
    %c0_96 = arith.constant 0 : index
    %77 = vector.load %arg1[%c0_94, %c0_95, %c22, %c0_96] : memref<1x4x32x32xf32, #tpu.memory_space<vmem>>, vector<1x4x1x32xf32>
    %78 = vector.shape_cast %77 : vector<1x4x1x32xf32> to vector<4x32xf32>
    %c0_97 = arith.constant 0 : index
    %c902 = arith.constant 902 : index
    %79 = vector.load %arg8[%c0_97, %c902] : memref<4x1368xf32, #tpu.memory_space<vmem>>, vector<4x32xf32>
    tpu.vector_store %arg8[%c0_97, %c902], %78 {strides = array<i32>} : memref<4x1368xf32, #tpu.memory_space<vmem>>, vector<4x32xf32>,
    %c0_98 = arith.constant 0 : index
    %c0_99 = arith.constant 0 : index
    %c23 = arith.constant 23 : index
    %c0_100 = arith.constant 0 : index
    %80 = vector.load %arg1[%c0_98, %c0_99, %c23, %c0_100] : memref<1x4x32x32xf32, #tpu.memory_space<vmem>>, vector<1x4x1x32xf32>
    %81 = vector.shape_cast %80 : vector<1x4x1x32xf32> to vector<4x32xf32>
    %c0_101 = arith.constant 0 : index
    %c938 = arith.constant 938 : index
    %82 = vector.load %arg8[%c0_101, %c938] : memref<4x1368xf32, #tpu.memory_space<vmem>>, vector<4x32xf32>
    tpu.vector_store %arg8[%c0_101, %c938], %81 {strides = array<i32>} : memref<4x1368xf32, #tpu.memory_space<vmem>>, vector<4x32xf32>,
    %c0_102 = arith.constant 0 : index
    %c0_103 = arith.constant 0 : index
    %c24 = arith.constant 24 : index
    %c0_104 = arith.constant 0 : index
    %83 = vector.load %arg1[%c0_102, %c0_103, %c24, %c0_104] : memref<1x4x32x32xf32, #tpu.memory_space<vmem>>, vector<1x4x1x32xf32>
    %84 = vector.shape_cast %83 : vector<1x4x1x32xf32> to vector<4x32xf32>
    %c0_105 = arith.constant 0 : index
    %c974 = arith.constant 974 : index
    %85 = vector.load %arg8[%c0_105, %c974] : memref<4x1368xf32, #tpu.memory_space<vmem>>, vector<4x32xf32>
    tpu.vector_store %arg8[%c0_105, %c974], %84 {strides = array<i32>} : memref<4x1368xf32, #tpu.memory_space<vmem>>, vector<4x32xf32>,
    %c0_106 = arith.constant 0 : index
    %c0_107 = arith.constant 0 : index
    %c25 = arith.constant 25 : index
    %c0_108 = arith.constant 0 : index
    %86 = vector.load %arg1[%c0_106, %c0_107, %c25, %c0_108] : memref<1x4x32x32xf32, #tpu.memory_space<vmem>>, vector<1x4x1x32xf32>
    %87 = vector.shape_cast %86 : vector<1x4x1x32xf32> to vector<4x32xf32>
    %c0_109 = arith.constant 0 : index
    %c1010 = arith.constant 1010 : index
    %88 = vector.load %arg8[%c0_109, %c1010] : memref<4x1368xf32, #tpu.memory_space<vmem>>, vector<4x32xf32>
    tpu.vector_store %arg8[%c0_109, %c1010], %87 {strides = array<i32>} : memref<4x1368xf32, #tpu.memory_space<vmem>>, vector<4x32xf32>,
    %c0_110 = arith.constant 0 : index
    %c0_111 = arith.constant 0 : index
    %c26 = arith.constant 26 : index
    %c0_112 = arith.constant 0 : index
    %89 = vector.load %arg1[%c0_110, %c0_111, %c26, %c0_112] : memref<1x4x32x32xf32, #tpu.memory_space<vmem>>, vector<1x4x1x32xf32>
    %90 = vector.shape_cast %89 : vector<1x4x1x32xf32> to vector<4x32xf32>
    %c0_113 = arith.constant 0 : index
    %c1046 = arith.constant 1046 : index
    %91 = vector.load %arg8[%c0_113, %c1046] : memref<4x1368xf32, #tpu.memory_space<vmem>>, vector<4x32xf32>
    tpu.vector_store %arg8[%c0_113, %c1046], %90 {strides = array<i32>} : memref<4x1368xf32, #tpu.memory_space<vmem>>, vector<4x32xf32>,
    %c0_114 = arith.constant 0 : index
    %c0_115 = arith.constant 0 : index
    %c27 = arith.constant 27 : index
    %c0_116 = arith.constant 0 : index
    %92 = vector.load %arg1[%c0_114, %c0_115, %c27, %c0_116] : memref<1x4x32x32xf32, #tpu.memory_space<vmem>>, vector<1x4x1x32xf32>
    %93 = vector.shape_cast %92 : vector<1x4x1x32xf32> to vector<4x32xf32>
    %c0_117 = arith.constant 0 : index
    %c1082 = arith.constant 1082 : index
    %94 = vector.load %arg8[%c0_117, %c1082] : memref<4x1368xf32, #tpu.memory_space<vmem>>, vector<4x32xf32>
    tpu.vector_store %arg8[%c0_117, %c1082], %93 {strides = array<i32>} : memref<4x1368xf32, #tpu.memory_space<vmem>>, vector<4x32xf32>,
    %c0_118 = arith.constant 0 : index
    %c0_119 = arith.constant 0 : index
    %c28 = arith.constant 28 : index
    %c0_120 = arith.constant 0 : index
    %95 = vector.load %arg1[%c0_118, %c0_119, %c28, %c0_120] : memref<1x4x32x32xf32, #tpu.memory_space<vmem>>, vector<1x4x1x32xf32>
    %96 = vector.shape_cast %95 : vector<1x4x1x32xf32> to vector<4x32xf32>
    %c0_121 = arith.constant 0 : index
    %c1118 = arith.constant 1118 : index
    %97 = vector.load %arg8[%c0_121, %c1118] : memref<4x1368xf32, #tpu.memory_space<vmem>>, vector<4x32xf32>
    tpu.vector_store %arg8[%c0_121, %c1118], %96 {strides = array<i32>} : memref<4x1368xf32, #tpu.memory_space<vmem>>, vector<4x32xf32>,
    %c0_122 = arith.constant 0 : index
    %c0_123 = arith.constant 0 : index
    %c29 = arith.constant 29 : index
    %c0_124 = arith.constant 0 : index
    %98 = vector.load %arg1[%c0_122, %c0_123, %c29, %c0_124] : memref<1x4x32x32xf32, #tpu.memory_space<vmem>>, vector<1x4x1x32xf32>
    %99 = vector.shape_cast %98 : vector<1x4x1x32xf32> to vector<4x32xf32>
    %c0_125 = arith.constant 0 : index
    %c1154 = arith.constant 1154 : index
    %100 = vector.load %arg8[%c0_125, %c1154] : memref<4x1368xf32, #tpu.memory_space<vmem>>, vector<4x32xf32>
    tpu.vector_store %arg8[%c0_125, %c1154], %99 {strides = array<i32>} : memref<4x1368xf32, #tpu.memory_space<vmem>>, vector<4x32xf32>,
    %c0_126 = arith.constant 0 : index
    %c0_127 = arith.constant 0 : index
    %c30 = arith.constant 30 : index
    %c0_128 = arith.constant 0 : index
    %101 = vector.load %arg1[%c0_126, %c0_127, %c30, %c0_128] : memref<1x4x32x32xf32, #tpu.memory_space<vmem>>, vector<1x4x1x32xf32>
    %102 = vector.shape_cast %101 : vector<1x4x1x32xf32> to vector<4x32xf32>
    %c0_129 = arith.constant 0 : index
    %c1190 = arith.constant 1190 : index
    %103 = vector.load %arg8[%c0_129, %c1190] : memref<4x1368xf32, #tpu.memory_space<vmem>>, vector<4x32xf32>
    tpu.vector_store %arg8[%c0_129, %c1190], %102 {strides = array<i32>} : memref<4x1368xf32, #tpu.memory_space<vmem>>, vector<4x32xf32>,
    %c0_130 = arith.constant 0 : index
    %c0_131 = arith.constant 0 : index
    %c31 = arith.constant 31 : index
    %c0_132 = arith.constant 0 : index
    %104 = vector.load %arg1[%c0_130, %c0_131, %c31, %c0_132] : memref<1x4x32x32xf32, #tpu.memory_space<vmem>>, vector<1x4x1x32xf32>
    %105 = vector.shape_cast %104 : vector<1x4x1x32xf32> to vector<4x32xf32>
    %c0_133 = arith.constant 0 : index
    %c1226 = arith.constant 1226 : index
    %106 = vector.load %arg8[%c0_133, %c1226] : memref<4x1368xf32, #tpu.memory_space<vmem>>, vector<4x32xf32>
    tpu.vector_store %arg8[%c0_133, %c1226], %105 {strides = array<i32>} : memref<4x1368xf32, #tpu.memory_space<vmem>>, vector<4x32xf32>,
    %c0_134 = arith.constant 0 : index
    %c34 = arith.constant 34 : index
    %107 = vector.load %arg8[%c0_134, %c34] : memref<4x1368xf32, #tpu.memory_space<vmem>>, vector<4x1152xf32>
    %c0_135 = arith.constant 0 : index
    %c0_136 = arith.constant 0 : index
    %108 = vector.load %arg10[%c0_135, %c0_136] : memref<100x1152xf32, #tpu.memory_space<vmem>>, vector<4x1152xf32>
    tpu.vector_store %arg10[%c0_135, %c0_136], %107 {strides = array<i32>} : memref<100x1152xf32, #tpu.memory_space<vmem>>, vector<4x1152xf32>,
    %c0_137 = arith.constant 0 : index
    %c35 = arith.constant 35 : index
    %109 = vector.load %arg8[%c0_137, %c35] : memref<4x1368xf32, #tpu.memory_space<vmem>>, vector<4x1152xf32>
    %c4_138 = arith.constant 4 : index
    %c0_139 = arith.constant 0 : index
    %110 = vector.load %arg10[%c4_138, %c0_139] : memref<100x1152xf32, #tpu.memory_space<vmem>>, vector<4x1152xf32>
    tpu.vector_store %arg10[%c4_138, %c0_139], %109 {strides = array<i32>} : memref<100x1152xf32, #tpu.memory_space<vmem>>, vector<4x1152xf32>,
    %c0_140 = arith.constant 0 : index
    %c36 = arith.constant 36 : index
    %111 = vector.load %arg8[%c0_140, %c36] : memref<4x1368xf32, #tpu.memory_space<vmem>>, vector<4x1152xf32>
    %c8_141 = arith.constant 8 : index
    %c0_142 = arith.constant 0 : index
    %112 = vector.load %arg10[%c8_141, %c0_142] : memref<100x1152xf32, #tpu.memory_space<vmem>>, vector<4x1152xf32>
    tpu.vector_store %arg10[%c8_141, %c0_142], %111 {strides = array<i32>} : memref<100x1152xf32, #tpu.memory_space<vmem>>, vector<4x1152xf32>,
    %c0_143 = arith.constant 0 : index
    %c37 = arith.constant 37 : index
    %113 = vector.load %arg8[%c0_143, %c37] : memref<4x1368xf32, #tpu.memory_space<vmem>>, vector<4x1152xf32>
    %c12_144 = arith.constant 12 : index
    %c0_145 = arith.constant 0 : index
    %114 = vector.load %arg10[%c12_144, %c0_145] : memref<100x1152xf32, #tpu.memory_space<vmem>>, vector<4x1152xf32>
    tpu.vector_store %arg10[%c12_144, %c0_145], %113 {strides = array<i32>} : memref<100x1152xf32, #tpu.memory_space<vmem>>, vector<4x1152xf32>,
    %c0_146 = arith.constant 0 : index
    %c38 = arith.constant 38 : index
    %115 = vector.load %arg8[%c0_146, %c38] : memref<4x1368xf32, #tpu.memory_space<vmem>>, vector<4x1152xf32>
    %c16_147 = arith.constant 16 : index
    %c0_148 = arith.constant 0 : index
    %116 = vector.load %arg10[%c16_147, %c0_148] : memref<100x1152xf32, #tpu.memory_space<vmem>>, vector<4x1152xf32>
    tpu.vector_store %arg10[%c16_147, %c0_148], %115 {strides = array<i32>} : memref<100x1152xf32, #tpu.memory_space<vmem>>, vector<4x1152xf32>,
    %c0_149 = arith.constant 0 : index
    %c70 = arith.constant 70 : index
    %117 = vector.load %arg8[%c0_149, %c70] : memref<4x1368xf32, #tpu.memory_space<vmem>>, vector<4x1152xf32>
    %c20_150 = arith.constant 20 : index
    %c0_151 = arith.constant 0 : index
    %118 = vector.load %arg10[%c20_150, %c0_151] : memref<100x1152xf32, #tpu.memory_space<vmem>>, vector<4x1152xf32>
    tpu.vector_store %arg10[%c20_150, %c0_151], %117 {strides = array<i32>} : memref<100x1152xf32, #tpu.memory_space<vmem>>, vector<4x1152xf32>,
    %c0_152 = arith.constant 0 : index
    %c71 = arith.constant 71 : index
    %119 = vector.load %arg8[%c0_152, %c71] : memref<4x1368xf32, #tpu.memory_space<vmem>>, vector<4x1152xf32>
    %c24_153 = arith.constant 24 : index
    %c0_154 = arith.constant 0 : index
    %120 = vector.load %arg10[%c24_153, %c0_154] : memref<100x1152xf32, #tpu.memory_space<vmem>>, vector<4x1152xf32>
    tpu.vector_store %arg10[%c24_153, %c0_154], %119 {strides = array<i32>} : memref<100x1152xf32, #tpu.memory_space<vmem>>, vector<4x1152xf32>,
    %c0_155 = arith.constant 0 : index
    %c72 = arith.constant 72 : index
    %121 = vector.load %arg8[%c0_155, %c72] : memref<4x1368xf32, #tpu.memory_space<vmem>>, vector<4x1152xf32>
    %c28_156 = arith.constant 28 : index
    %c0_157 = arith.constant 0 : index
    %122 = vector.load %arg10[%c28_156, %c0_157] : memref<100x1152xf32, #tpu.memory_space<vmem>>, vector<4x1152xf32>
    tpu.vector_store %arg10[%c28_156, %c0_157], %121 {strides = array<i32>} : memref<100x1152xf32, #tpu.memory_space<vmem>>, vector<4x1152xf32>,
    %c0_158 = arith.constant 0 : index
    %c73 = arith.constant 73 : index
    %123 = vector.load %arg8[%c0_158, %c73] : memref<4x1368xf32, #tpu.memory_space<vmem>>, vector<4x1152xf32>
    %c32 = arith.constant 32 : index
    %c0_159 = arith.constant 0 : index
    %124 = vector.load %arg10[%c32, %c0_159] : memref<100x1152xf32, #tpu.memory_space<vmem>>, vector<4x1152xf32>
    tpu.vector_store %arg10[%c32, %c0_159], %123 {strides = array<i32>} : memref<100x1152xf32, #tpu.memory_space<vmem>>, vector<4x1152xf32>,
    %c0_160 = arith.constant 0 : index
    %c74 = arith.constant 74 : index
    %125 = vector.load %arg8[%c0_160, %c74] : memref<4x1368xf32, #tpu.memory_space<vmem>>, vector<4x1152xf32>
    %c36_161 = arith.constant 36 : index
    %c0_162 = arith.constant 0 : index
    %126 = vector.load %arg10[%c36_161, %c0_162] : memref<100x1152xf32, #tpu.memory_space<vmem>>, vector<4x1152xf32>
    tpu.vector_store %arg10[%c36_161, %c0_162], %125 {strides = array<i32>} : memref<100x1152xf32, #tpu.memory_space<vmem>>, vector<4x1152xf32>,
    %c0_163 = arith.constant 0 : index
    %c106 = arith.constant 106 : index
    %127 = vector.load %arg8[%c0_163, %c106] : memref<4x1368xf32, #tpu.memory_space<vmem>>, vector<4x1152xf32>
    %c40 = arith.constant 40 : index
    %c0_164 = arith.constant 0 : index
    %128 = vector.load %arg10[%c40, %c0_164] : memref<100x1152xf32, #tpu.memory_space<vmem>>, vector<4x1152xf32>
    tpu.vector_store %arg10[%c40, %c0_164], %127 {strides = array<i32>} : memref<100x1152xf32, #tpu.memory_space<vmem>>, vector<4x1152xf32>,
    %c0_165 = arith.constant 0 : index
    %c107 = arith.constant 107 : index
    %129 = vector.load %arg8[%c0_165, %c107] : memref<4x1368xf32, #tpu.memory_space<vmem>>, vector<4x1152xf32>
    %c44 = arith.constant 44 : index
    %c0_166 = arith.constant 0 : index
    %130 = vector.load %arg10[%c44, %c0_166] : memref<100x1152xf32, #tpu.memory_space<vmem>>, vector<4x1152xf32>
    tpu.vector_store %arg10[%c44, %c0_166], %129 {strides = array<i32>} : memref<100x1152xf32, #tpu.memory_space<vmem>>, vector<4x1152xf32>,
    %c0_167 = arith.constant 0 : index
    %c108 = arith.constant 108 : index
    %131 = vector.load %arg8[%c0_167, %c108] : memref<4x1368xf32, #tpu.memory_space<vmem>>, vector<4x1152xf32>
    %c48 = arith.constant 48 : index
    %c0_168 = arith.constant 0 : index
    %132 = vector.load %arg10[%c48, %c0_168] : memref<100x1152xf32, #tpu.memory_space<vmem>>, vector<4x1152xf32>
    tpu.vector_store %arg10[%c48, %c0_168], %131 {strides = array<i32>} : memref<100x1152xf32, #tpu.memory_space<vmem>>, vector<4x1152xf32>,
    %c0_169 = arith.constant 0 : index
    %c109 = arith.constant 109 : index
    %133 = vector.load %arg8[%c0_169, %c109] : memref<4x1368xf32, #tpu.memory_space<vmem>>, vector<4x1152xf32>
    %c52 = arith.constant 52 : index
    %c0_170 = arith.constant 0 : index
    %134 = vector.load %arg10[%c52, %c0_170] : memref<100x1152xf32, #tpu.memory_space<vmem>>, vector<4x1152xf32>
    tpu.vector_store %arg10[%c52, %c0_170], %133 {strides = array<i32>} : memref<100x1152xf32, #tpu.memory_space<vmem>>, vector<4x1152xf32>,
    %c0_171 = arith.constant 0 : index
    %c110_172 = arith.constant 110 : index
    %135 = vector.load %arg8[%c0_171, %c110_172] : memref<4x1368xf32, #tpu.memory_space<vmem>>, vector<4x1152xf32>
    %c56 = arith.constant 56 : index
    %c0_173 = arith.constant 0 : index
    %136 = vector.load %arg10[%c56, %c0_173] : memref<100x1152xf32, #tpu.memory_space<vmem>>, vector<4x1152xf32>
    tpu.vector_store %arg10[%c56, %c0_173], %135 {strides = array<i32>} : memref<100x1152xf32, #tpu.memory_space<vmem>>, vector<4x1152xf32>,
    %c0_174 = arith.constant 0 : index
    %c142 = arith.constant 142 : index
    %137 = vector.load %arg8[%c0_174, %c142] : memref<4x1368xf32, #tpu.memory_space<vmem>>, vector<4x1152xf32>
    %c60 = arith.constant 60 : index
    %c0_175 = arith.constant 0 : index
    %138 = vector.load %arg10[%c60, %c0_175] : memref<100x1152xf32, #tpu.memory_space<vmem>>, vector<4x1152xf32>
    tpu.vector_store %arg10[%c60, %c0_175], %137 {strides = array<i32>} : memref<100x1152xf32, #tpu.memory_space<vmem>>, vector<4x1152xf32>,
    %c0_176 = arith.constant 0 : index
    %c143 = arith.constant 143 : index
    %139 = vector.load %arg8[%c0_176, %c143] : memref<4x1368xf32, #tpu.memory_space<vmem>>, vector<4x1152xf32>
    %c64 = arith.constant 64 : index
    %c0_177 = arith.constant 0 : index
    %140 = vector.load %arg10[%c64, %c0_177] : memref<100x1152xf32, #tpu.memory_space<vmem>>, vector<4x1152xf32>
    tpu.vector_store %arg10[%c64, %c0_177], %139 {strides = array<i32>} : memref<100x1152xf32, #tpu.memory_space<vmem>>, vector<4x1152xf32>,
    %c0_178 = arith.constant 0 : index
    %c144 = arith.constant 144 : index
    %141 = vector.load %arg8[%c0_178, %c144] : memref<4x1368xf32, #tpu.memory_space<vmem>>, vector<4x1152xf32>
    %c68 = arith.constant 68 : index
    %c0_179 = arith.constant 0 : index
    %142 = vector.load %arg10[%c68, %c0_179] : memref<100x1152xf32, #tpu.memory_space<vmem>>, vector<4x1152xf32>
    tpu.vector_store %arg10[%c68, %c0_179], %141 {strides = array<i32>} : memref<100x1152xf32, #tpu.memory_space<vmem>>, vector<4x1152xf32>,
    %c0_180 = arith.constant 0 : index
    %c145 = arith.constant 145 : index
    %143 = vector.load %arg8[%c0_180, %c145] : memref<4x1368xf32, #tpu.memory_space<vmem>>, vector<4x1152xf32>
    %c72_181 = arith.constant 72 : index
    %c0_182 = arith.constant 0 : index
    %144 = vector.load %arg10[%c72_181, %c0_182] : memref<100x1152xf32, #tpu.memory_space<vmem>>, vector<4x1152xf32>
    tpu.vector_store %arg10[%c72_181, %c0_182], %143 {strides = array<i32>} : memref<100x1152xf32, #tpu.memory_space<vmem>>, vector<4x1152xf32>,
    %c0_183 = arith.constant 0 : index
    %c146_184 = arith.constant 146 : index
    %145 = vector.load %arg8[%c0_183, %c146_184] : memref<4x1368xf32, #tpu.memory_space<vmem>>, vector<4x1152xf32>
    %c76 = arith.constant 76 : index
    %c0_185 = arith.constant 0 : index
    %146 = vector.load %arg10[%c76, %c0_185] : memref<100x1152xf32, #tpu.memory_space<vmem>>, vector<4x1152xf32>
    tpu.vector_store %arg10[%c76, %c0_185], %145 {strides = array<i32>} : memref<100x1152xf32, #tpu.memory_space<vmem>>, vector<4x1152xf32>,
    %c0_186 = arith.constant 0 : index
    %c178 = arith.constant 178 : index
    %147 = vector.load %arg8[%c0_186, %c178] : memref<4x1368xf32, #tpu.memory_space<vmem>>, vector<4x1152xf32>
    %c80 = arith.constant 80 : index
    %c0_187 = arith.constant 0 : index
    %148 = vector.load %arg10[%c80, %c0_187] : memref<100x1152xf32, #tpu.memory_space<vmem>>, vector<4x1152xf32>
    tpu.vector_store %arg10[%c80, %c0_187], %147 {strides = array<i32>} : memref<100x1152xf32, #tpu.memory_space<vmem>>, vector<4x1152xf32>,
    %c0_188 = arith.constant 0 : index
    %c179 = arith.constant 179 : index
    %149 = vector.load %arg8[%c0_188, %c179] : memref<4x1368xf32, #tpu.memory_space<vmem>>, vector<4x1152xf32>
    %c84 = arith.constant 84 : index
    %c0_189 = arith.constant 0 : index
    %150 = vector.load %arg10[%c84, %c0_189] : memref<100x1152xf32, #tpu.memory_space<vmem>>, vector<4x1152xf32>
    tpu.vector_store %arg10[%c84, %c0_189], %149 {strides = array<i32>} : memref<100x1152xf32, #tpu.memory_space<vmem>>, vector<4x1152xf32>,
    %c0_190 = arith.constant 0 : index
    %c180 = arith.constant 180 : index
    %151 = vector.load %arg8[%c0_190, %c180] : memref<4x1368xf32, #tpu.memory_space<vmem>>, vector<4x1152xf32>
    %c88 = arith.constant 88 : index
    %c0_191 = arith.constant 0 : index
    %152 = vector.load %arg10[%c88, %c0_191] : memref<100x1152xf32, #tpu.memory_space<vmem>>, vector<4x1152xf32>
    tpu.vector_store %arg10[%c88, %c0_191], %151 {strides = array<i32>} : memref<100x1152xf32, #tpu.memory_space<vmem>>, vector<4x1152xf32>,
    %c0_192 = arith.constant 0 : index
    %c181 = arith.constant 181 : index
    %153 = vector.load %arg8[%c0_192, %c181] : memref<4x1368xf32, #tpu.memory_space<vmem>>, vector<4x1152xf32>
    %c92 = arith.constant 92 : index
    %c0_193 = arith.constant 0 : index
    %154 = vector.load %arg10[%c92, %c0_193] : memref<100x1152xf32, #tpu.memory_space<vmem>>, vector<4x1152xf32>
    tpu.vector_store %arg10[%c92, %c0_193], %153 {strides = array<i32>} : memref<100x1152xf32, #tpu.memory_space<vmem>>, vector<4x1152xf32>,
    %c0_194 = arith.constant 0 : index
    %c182_195 = arith.constant 182 : index
    %155 = vector.load %arg8[%c0_194, %c182_195] : memref<4x1368xf32, #tpu.memory_space<vmem>>, vector<4x1152xf32>
    %c96 = arith.constant 96 : index
    %c0_196 = arith.constant 0 : index
    %156 = vector.load %arg10[%c96, %c0_196] : memref<100x1152xf32, #tpu.memory_space<vmem>>, vector<4x1152xf32>
    tpu.vector_store %arg10[%c96, %c0_196], %155 {strides = array<i32>} : memref<100x1152xf32, #tpu.memory_space<vmem>>, vector<4x1152xf32>,
    %c0_197 = arith.constant 0 : index
    %c0_198 = arith.constant 0 : index
    %157 = vector.load %arg3[%c0_197, %c0_198] : memref<8x100xbf16, #tpu.memory_space<vmem>>, vector<8x100xbf16>
    %c0_199 = arith.constant 0 : index
    %c0_200 = arith.constant 0 : index
    %158 = vector.load %arg10[%c0_199, %c0_200] : memref<100x1152xf32, #tpu.memory_space<vmem>>, vector<100x1152xf32>
    %159 = arith.truncf %158 : vector<100x1152xf32> to vector<100x1152xbf16>
    %cst_201 = arith.constant dense<0.000000e+00> : vector<8x1152xf32>
    %160 = tpu.matmul %157, %159, %cst_201 {dimension_numbers = #tpu.dot_dimension_numbers<[1], [0], [0], [1], [0, 0, 1, 1], [], []>} : vector<8x100xbf16>, vector<100x1152xbf16>, vector<8x1152xf32> -> vector<8x1152xf32>
    %161 = vector.broadcast %2 : vector<8x1xf32> to vector<8x1152xf32>
    %162 = arith.addf %160, %161 : vector<8x1152xf32>
    %163 = vector.broadcast %0 : vector<1x1152xf32> to vector<8x1152xf32>
    %164 = arith.mulf %162, %163 : vector<8x1152xf32>
    %cst_202 = arith.constant dense<0.000000e+00> : vector<8xf32>
    %165 = vector.multi_reduction <add>, %164, %cst_202 [1] : vector<8x1152xf32> to vector<8xf32>
    %166 = vector.shape_cast %165 : vector<8xf32> to vector<8x1xf32>
    %cst_203 = arith.constant 9.765625E-4 : f32
    %167 = vector.broadcast %cst_203 : f32 to vector<8x1xf32>
    %168 = arith.mulf %166, %167 : vector<8x1xf32>
    %169 = vector.broadcast %168 : vector<8x1xf32> to vector<8x1152xf32>
    %170 = arith.subf %162, %169 : vector<8x1152xf32>
    %171 = arith.mulf %170, %170 : vector<8x1152xf32>
    %172 = vector.broadcast %0 : vector<1x1152xf32> to vector<8x1152xf32>
    %173 = arith.mulf %171, %172 : vector<8x1152xf32>
    %cst_204 = arith.constant dense<0.000000e+00> : vector<8xf32>
    %174 = vector.multi_reduction <add>, %173, %cst_204 [1] : vector<8x1152xf32> to vector<8xf32>
    %175 = vector.shape_cast %174 : vector<8xf32> to vector<8x1xf32>
    %cst_205 = arith.constant 9.765625E-4 : f32
    %176 = vector.broadcast %cst_205 : f32 to vector<8x1xf32>
    %177 = arith.mulf %175, %176 : vector<8x1xf32>
    %cst_206 = arith.constant 9.99999974E-6 : f32
    %178 = vector.broadcast %cst_206 : f32 to vector<8x1xf32>
    %179 = arith.addf %177, %178 : vector<8x1xf32>
    %180 = math.rsqrt %179 : vector<8x1xf32>
    %181 = vector.broadcast %180 : vector<8x1xf32> to vector<8x1152xf32>
    %182 = arith.mulf %170, %181 : vector<8x1152xf32>
    %183 = vector.broadcast %3 : vector<8x1xf32> to vector<8x1152xf32>
    %184 = arith.mulf %182, %183 : vector<8x1152xf32>
    %185 = vector.broadcast %4 : vector<8x1xf32> to vector<8x1152xf32>
    %186 = arith.addf %184, %185 : vector<8x1152xf32>
    %cst_207 = arith.constant 5.000000e-01 : f32
    %187 = vector.broadcast %cst_207 : f32 to vector<8x1152xf32>
    %188 = arith.mulf %187, %186 : vector<8x1152xf32>
    %cst_208 = arith.constant 0.707106769 : f32
    %189 = vector.broadcast %cst_208 : f32 to vector<8x1152xf32>
    %190 = arith.mulf %186, %189 : vector<8x1152xf32>
    %191 = math.absf %190 : vector<8x1152xf32>
    %cst_209 = arith.constant 0.327591091 : f32
    %192 = vector.broadcast %cst_209 : f32 to vector<8x1152xf32>
    %193 = arith.mulf %192, %191 : vector<8x1152xf32>
    %cst_210 = arith.constant 1.000000e+00 : f32
    %194 = vector.broadcast %cst_210 : f32 to vector<8x1152xf32>
    %195 = arith.addf %194, %193 : vector<8x1152xf32>
    %cst_211 = arith.constant 1.000000e+00 : f32
    %196 = vector.broadcast %cst_211 : f32 to vector<8x1152xf32>
    %197 = arith.divf %196, %195 : vector<8x1152xf32>
    %cst_212 = arith.constant 1.06140542 : f32
    %198 = vector.broadcast %cst_212 : f32 to vector<8x1152xf32>
    %199 = arith.mulf %198, %197 : vector<8x1152xf32>
    %cst_213 = arith.constant -1.45315206 : f32
    %200 = vector.broadcast %cst_213 : f32 to vector<8x1152xf32>
    %201 = arith.addf %199, %200 : vector<8x1152xf32>
    %202 = arith.mulf %201, %197 : vector<8x1152xf32>
    %cst_214 = arith.constant 1.42141378 : f32
    %203 = vector.broadcast %cst_214 : f32 to vector<8x1152xf32>
    %204 = arith.addf %202, %203 : vector<8x1152xf32>
    %205 = arith.mulf %204, %197 : vector<8x1152xf32>
    %cst_215 = arith.constant -0.284496725 : f32
    %206 = vector.broadcast %cst_215 : f32 to vector<8x1152xf32>
    %207 = arith.addf %205, %206 : vector<8x1152xf32>
    %208 = arith.mulf %207, %197 : vector<8x1152xf32>
    %cst_216 = arith.constant 0.254829586 : f32
    %209 = vector.broadcast %cst_216 : f32 to vector<8x1152xf32>
    %210 = arith.addf %208, %209 : vector<8x1152xf32>
    %211 = arith.mulf %210, %197 : vector<8x1152xf32>
    %cst_217 = arith.constant 0.000000e+00 : f32
    %212 = vector.broadcast %cst_217 : f32 to vector<8x1152xf32>
    %213 = arith.subf %212, %191 : vector<8x1152xf32>
    %214 = arith.mulf %213, %191 : vector<8x1152xf32>
    %215 = math.exp %214 : vector<8x1152xf32>
    %216 = arith.mulf %211, %215 : vector<8x1152xf32>
    %cst_218 = arith.constant 1.000000e+00 : f32
    %217 = vector.broadcast %cst_218 : f32 to vector<8x1152xf32>
    %218 = arith.subf %217, %216 : vector<8x1152xf32>
    %cst_219 = arith.constant 0.000000e+00 : f32
    %219 = vector.broadcast %cst_219 : f32 to vector<8x1152xf32>
    %220 = arith.cmpf olt, %190, %219 : vector<8x1152xf32>
    %cst_220 = arith.constant 0.000000e+00 : f32
    %221 = vector.broadcast %cst_220 : f32 to vector<8x1152xf32>
    %222 = arith.subf %221, %218 : vector<8x1152xf32>
    %223 = arith.select %220, %222, %218 : vector<8x1152xi1>, vector<8x1152xf32>
    %cst_221 = arith.constant 1.000000e+00 : f32
    %224 = vector.broadcast %cst_221 : f32 to vector<8x1152xf32>
    %225 = arith.addf %224, %223 : vector<8x1152xf32>
    %226 = arith.mulf %188, %225 : vector<8x1152xf32>
    %cst_222 = arith.constant 0.000000e+00 : f32
    %227 = vector.broadcast %cst_222 : f32 to vector<8x108xf32>
    %c0_223 = arith.constant 0 : index
    %c0_224 = arith.constant 0 : index
    %228 = vector.load %arg9[%c0_223, %c0_224] : memref<8x1368xf32, #tpu.memory_space<vmem>>, vector<8x108xf32>
    tpu.vector_store %arg9[%c0_223, %c0_224], %227 {strides = array<i32>} : memref<8x1368xf32, #tpu.memory_space<vmem>>, vector<8x108xf32>,
    %cst_225 = arith.constant 0.000000e+00 : f32
    %229 = vector.broadcast %cst_225 : f32 to vector<8x108xf32>
    %c0_226 = arith.constant 0 : index
    %c1260 = arith.constant 1260 : index
    %230 = vector.load %arg9[%c0_226, %c1260] : memref<8x1368xf32, #tpu.memory_space<vmem>>, vector<8x108xf32>
    tpu.vector_store %arg9[%c0_226, %c1260], %229 {strides = array<i32>} : memref<8x1368xf32, #tpu.memory_space<vmem>>, vector<8x108xf32>,
    %231 = vector.broadcast %0 : vector<1x1152xf32> to vector<8x1152xf32>
    %232 = arith.mulf %226, %231 : vector<8x1152xf32>
    %c0_227 = arith.constant 0 : index
    %c108_228 = arith.constant 108 : index
    %233 = vector.load %arg9[%c0_227, %c108_228] : memref<8x1368xf32, #tpu.memory_space<vmem>>, vector<8x1152xf32>
    tpu.vector_store %arg9[%c0_227, %c108_228], %232 {strides = array<i32>} : memref<8x1368xf32, #tpu.memory_space<vmem>>, vector<8x1152xf32>,
    %c0_229 = arith.constant 0 : index
    %c34_230 = arith.constant 34 : index
    %234 = vector.load %arg9[%c0_229, %c34_230] : memref<8x1368xf32, #tpu.memory_space<vmem>>, vector<8x1152xf32>
    %c0_231 = arith.constant 0 : index
    %c0_232 = arith.constant 0 : index
    %235 = vector.load %arg11[%c0_231, %c0_232] : memref<200x1152xf32, #tpu.memory_space<vmem>>, vector<8x1152xf32>
    tpu.vector_store %arg11[%c0_231, %c0_232], %234 {strides = array<i32>} : memref<200x1152xf32, #tpu.memory_space<vmem>>, vector<8x1152xf32>,
    %c0_233 = arith.constant 0 : index
    %c35_234 = arith.constant 35 : index
    %236 = vector.load %arg9[%c0_233, %c35_234] : memref<8x1368xf32, #tpu.memory_space<vmem>>, vector<8x1152xf32>
    %c8_235 = arith.constant 8 : index
    %c0_236 = arith.constant 0 : index
    %237 = vector.load %arg11[%c8_235, %c0_236] : memref<200x1152xf32, #tpu.memory_space<vmem>>, vector<8x1152xf32>
    tpu.vector_store %arg11[%c8_235, %c0_236], %236 {strides = array<i32>} : memref<200x1152xf32, #tpu.memory_space<vmem>>, vector<8x1152xf32>,
    %c0_237 = arith.constant 0 : index
    %c36_238 = arith.constant 36 : index
    %238 = vector.load %arg9[%c0_237, %c36_238] : memref<8x1368xf32, #tpu.memory_space<vmem>>, vector<8x1152xf32>
    %c16_239 = arith.constant 16 : index
    %c0_240 = arith.constant 0 : index
    %239 = vector.load %arg11[%c16_239, %c0_240] : memref<200x1152xf32, #tpu.memory_space<vmem>>, vector<8x1152xf32>
    tpu.vector_store %arg11[%c16_239, %c0_240], %238 {strides = array<i32>} : memref<200x1152xf32, #tpu.memory_space<vmem>>, vector<8x1152xf32>,
    %c0_241 = arith.constant 0 : index
    %c37_242 = arith.constant 37 : index
    %240 = vector.load %arg9[%c0_241, %c37_242] : memref<8x1368xf32, #tpu.memory_space<vmem>>, vector<8x1152xf32>
    %c24_243 = arith.constant 24 : index
    %c0_244 = arith.constant 0 : index
    %241 = vector.load %arg11[%c24_243, %c0_244] : memref<200x1152xf32, #tpu.memory_space<vmem>>, vector<8x1152xf32>
    tpu.vector_store %arg11[%c24_243, %c0_244], %240 {strides = array<i32>} : memref<200x1152xf32, #tpu.memory_space<vmem>>, vector<8x1152xf32>,
    %c0_245 = arith.constant 0 : index
    %c38_246 = arith.constant 38 : index
    %242 = vector.load %arg9[%c0_245, %c38_246] : memref<8x1368xf32, #tpu.memory_space<vmem>>, vector<8x1152xf32>
    %c32_247 = arith.constant 32 : index
    %c0_248 = arith.constant 0 : index
    %243 = vector.load %arg11[%c32_247, %c0_248] : memref<200x1152xf32, #tpu.memory_space<vmem>>, vector<8x1152xf32>
    tpu.vector_store %arg11[%c32_247, %c0_248], %242 {strides = array<i32>} : memref<200x1152xf32, #tpu.memory_space<vmem>>, vector<8x1152xf32>,
    %c0_249 = arith.constant 0 : index
    %c70_250 = arith.constant 70 : index
    %244 = vector.load %arg9[%c0_249, %c70_250] : memref<8x1368xf32, #tpu.memory_space<vmem>>, vector<8x1152xf32>
    %c40_251 = arith.constant 40 : index
    %c0_252 = arith.constant 0 : index
    %245 = vector.load %arg11[%c40_251, %c0_252] : memref<200x1152xf32, #tpu.memory_space<vmem>>, vector<8x1152xf32>
    tpu.vector_store %arg11[%c40_251, %c0_252], %244 {strides = array<i32>} : memref<200x1152xf32, #tpu.memory_space<vmem>>, vector<8x1152xf32>,
    %c0_253 = arith.constant 0 : index
    %c71_254 = arith.constant 71 : index
    %246 = vector.load %arg9[%c0_253, %c71_254] : memref<8x1368xf32, #tpu.memory_space<vmem>>, vector<8x1152xf32>
    %c48_255 = arith.constant 48 : index
    %c0_256 = arith.constant 0 : index
    %247 = vector.load %arg11[%c48_255, %c0_256] : memref<200x1152xf32, #tpu.memory_space<vmem>>, vector<8x1152xf32>
    tpu.vector_store %arg11[%c48_255, %c0_256], %246 {strides = array<i32>} : memref<200x1152xf32, #tpu.memory_space<vmem>>, vector<8x1152xf32>,
    %c0_257 = arith.constant 0 : index
    %c72_258 = arith.constant 72 : index
    %248 = vector.load %arg9[%c0_257, %c72_258] : memref<8x1368xf32, #tpu.memory_space<vmem>>, vector<8x1152xf32>
    %c56_259 = arith.constant 56 : index
    %c0_260 = arith.constant 0 : index
    %249 = vector.load %arg11[%c56_259, %c0_260] : memref<200x1152xf32, #tpu.memory_space<vmem>>, vector<8x1152xf32>
    tpu.vector_store %arg11[%c56_259, %c0_260], %248 {strides = array<i32>} : memref<200x1152xf32, #tpu.memory_space<vmem>>, vector<8x1152xf32>,
    %c0_261 = arith.constant 0 : index
    %c73_262 = arith.constant 73 : index
    %250 = vector.load %arg9[%c0_261, %c73_262] : memref<8x1368xf32, #tpu.memory_space<vmem>>, vector<8x1152xf32>
    %c64_263 = arith.constant 64 : index
    %c0_264 = arith.constant 0 : index
    %251 = vector.load %arg11[%c64_263, %c0_264] : memref<200x1152xf32, #tpu.memory_space<vmem>>, vector<8x1152xf32>
    tpu.vector_store %arg11[%c64_263, %c0_264], %250 {strides = array<i32>} : memref<200x1152xf32, #tpu.memory_space<vmem>>, vector<8x1152xf32>,
    %c0_265 = arith.constant 0 : index
    %c74_266 = arith.constant 74 : index
    %252 = vector.load %arg9[%c0_265, %c74_266] : memref<8x1368xf32, #tpu.memory_space<vmem>>, vector<8x1152xf32>
    %c72_267 = arith.constant 72 : index
    %c0_268 = arith.constant 0 : index
    %253 = vector.load %arg11[%c72_267, %c0_268] : memref<200x1152xf32, #tpu.memory_space<vmem>>, vector<8x1152xf32>
    tpu.vector_store %arg11[%c72_267, %c0_268], %252 {strides = array<i32>} : memref<200x1152xf32, #tpu.memory_space<vmem>>, vector<8x1152xf32>,
    %c0_269 = arith.constant 0 : index
    %c106_270 = arith.constant 106 : index
    %254 = vector.load %arg9[%c0_269, %c106_270] : memref<8x1368xf32, #tpu.memory_space<vmem>>, vector<8x1152xf32>
    %c80_271 = arith.constant 80 : index
    %c0_272 = arith.constant 0 : index
    %255 = vector.load %arg11[%c80_271, %c0_272] : memref<200x1152xf32, #tpu.memory_space<vmem>>, vector<8x1152xf32>
    tpu.vector_store %arg11[%c80_271, %c0_272], %254 {strides = array<i32>} : memref<200x1152xf32, #tpu.memory_space<vmem>>, vector<8x1152xf32>,
    %c0_273 = arith.constant 0 : index
    %c107_274 = arith.constant 107 : index
    %256 = vector.load %arg9[%c0_273, %c107_274] : memref<8x1368xf32, #tpu.memory_space<vmem>>, vector<8x1152xf32>
    %c88_275 = arith.constant 88 : index
    %c0_276 = arith.constant 0 : index
    %257 = vector.load %arg11[%c88_275, %c0_276] : memref<200x1152xf32, #tpu.memory_space<vmem>>, vector<8x1152xf32>
    tpu.vector_store %arg11[%c88_275, %c0_276], %256 {strides = array<i32>} : memref<200x1152xf32, #tpu.memory_space<vmem>>, vector<8x1152xf32>,
    %c0_277 = arith.constant 0 : index
    %c108_278 = arith.constant 108 : index
    %258 = vector.load %arg9[%c0_277, %c108_278] : memref<8x1368xf32, #tpu.memory_space<vmem>>, vector<8x1152xf32>
    %c96_279 = arith.constant 96 : index
    %c0_280 = arith.constant 0 : index
    %259 = vector.load %arg11[%c96_279, %c0_280] : memref<200x1152xf32, #tpu.memory_space<vmem>>, vector<8x1152xf32>
    tpu.vector_store %arg11[%c96_279, %c0_280], %258 {strides = array<i32>} : memref<200x1152xf32, #tpu.memory_space<vmem>>, vector<8x1152xf32>,
    %c0_281 = arith.constant 0 : index
    %c109_282 = arith.constant 109 : index
    %260 = vector.load %arg9[%c0_281, %c109_282] : memref<8x1368xf32, #tpu.memory_space<vmem>>, vector<8x1152xf32>
    %c104 = arith.constant 104 : index
    %c0_283 = arith.constant 0 : index
    %261 = vector.load %arg11[%c104, %c0_283] : memref<200x1152xf32, #tpu.memory_space<vmem>>, vector<8x1152xf32>
    tpu.vector_store %arg11[%c104, %c0_283], %260 {strides = array<i32>} : memref<200x1152xf32, #tpu.memory_space<vmem>>, vector<8x1152xf32>,
    %c0_284 = arith.constant 0 : index
    %c110_285 = arith.constant 110 : index
    %262 = vector.load %arg9[%c0_284, %c110_285] : memref<8x1368xf32, #tpu.memory_space<vmem>>, vector<8x1152xf32>
    %c112 = arith.constant 112 : index
    %c0_286 = arith.constant 0 : index
    %263 = vector.load %arg11[%c112, %c0_286] : memref<200x1152xf32, #tpu.memory_space<vmem>>, vector<8x1152xf32>
    tpu.vector_store %arg11[%c112, %c0_286], %262 {strides = array<i32>} : memref<200x1152xf32, #tpu.memory_space<vmem>>, vector<8x1152xf32>,
    %c0_287 = arith.constant 0 : index
    %c142_288 = arith.constant 142 : index
    %264 = vector.load %arg9[%c0_287, %c142_288] : memref<8x1368xf32, #tpu.memory_space<vmem>>, vector<8x1152xf32>
    %c120 = arith.constant 120 : index
    %c0_289 = arith.constant 0 : index
    %265 = vector.load %arg11[%c120, %c0_289] : memref<200x1152xf32, #tpu.memory_space<vmem>>, vector<8x1152xf32>
    tpu.vector_store %arg11[%c120, %c0_289], %264 {strides = array<i32>} : memref<200x1152xf32, #tpu.memory_space<vmem>>, vector<8x1152xf32>,
    %c0_290 = arith.constant 0 : index
    %c143_291 = arith.constant 143 : index
    %266 = vector.load %arg9[%c0_290, %c143_291] : memref<8x1368xf32, #tpu.memory_space<vmem>>, vector<8x1152xf32>
    %c128 = arith.constant 128 : index
    %c0_292 = arith.constant 0 : index
    %267 = vector.load %arg11[%c128, %c0_292] : memref<200x1152xf32, #tpu.memory_space<vmem>>, vector<8x1152xf32>
    tpu.vector_store %arg11[%c128, %c0_292], %266 {strides = array<i32>} : memref<200x1152xf32, #tpu.memory_space<vmem>>, vector<8x1152xf32>,
    %c0_293 = arith.constant 0 : index
    %c144_294 = arith.constant 144 : index
    %268 = vector.load %arg9[%c0_293, %c144_294] : memref<8x1368xf32, #tpu.memory_space<vmem>>, vector<8x1152xf32>
    %c136 = arith.constant 136 : index
    %c0_295 = arith.constant 0 : index
    %269 = vector.load %arg11[%c136, %c0_295] : memref<200x1152xf32, #tpu.memory_space<vmem>>, vector<8x1152xf32>
    tpu.vector_store %arg11[%c136, %c0_295], %268 {strides = array<i32>} : memref<200x1152xf32, #tpu.memory_space<vmem>>, vector<8x1152xf32>,
    %c0_296 = arith.constant 0 : index
    %c145_297 = arith.constant 145 : index
    %270 = vector.load %arg9[%c0_296, %c145_297] : memref<8x1368xf32, #tpu.memory_space<vmem>>, vector<8x1152xf32>
    %c144_298 = arith.constant 144 : index
    %c0_299 = arith.constant 0 : index
    %271 = vector.load %arg11[%c144_298, %c0_299] : memref<200x1152xf32, #tpu.memory_space<vmem>>, vector<8x1152xf32>
    tpu.vector_store %arg11[%c144_298, %c0_299], %270 {strides = array<i32>} : memref<200x1152xf32, #tpu.memory_space<vmem>>, vector<8x1152xf32>,
    %c0_300 = arith.constant 0 : index
    %c146_301 = arith.constant 146 : index
    %272 = vector.load %arg9[%c0_300, %c146_301] : memref<8x1368xf32, #tpu.memory_space<vmem>>, vector<8x1152xf32>
    %c152 = arith.constant 152 : index
    %c0_302 = arith.constant 0 : index
    %273 = vector.load %arg11[%c152, %c0_302] : memref<200x1152xf32, #tpu.memory_space<vmem>>, vector<8x1152xf32>
    tpu.vector_store %arg11[%c152, %c0_302], %272 {strides = array<i32>} : memref<200x1152xf32, #tpu.memory_space<vmem>>, vector<8x1152xf32>,
    %c0_303 = arith.constant 0 : index
    %c178_304 = arith.constant 178 : index
    %274 = vector.load %arg9[%c0_303, %c178_304] : memref<8x1368xf32, #tpu.memory_space<vmem>>, vector<8x1152xf32>
    %c160 = arith.constant 160 : index
    %c0_305 = arith.constant 0 : index
    %275 = vector.load %arg11[%c160, %c0_305] : memref<200x1152xf32, #tpu.memory_space<vmem>>, vector<8x1152xf32>
    tpu.vector_store %arg11[%c160, %c0_305], %274 {strides = array<i32>} : memref<200x1152xf32, #tpu.memory_space<vmem>>, vector<8x1152xf32>,
    %c0_306 = arith.constant 0 : index
    %c179_307 = arith.constant 179 : index
    %276 = vector.load %arg9[%c0_306, %c179_307] : memref<8x1368xf32, #tpu.memory_space<vmem>>, vector<8x1152xf32>
    %c168 = arith.constant 168 : index
    %c0_308 = arith.constant 0 : index
    %277 = vector.load %arg11[%c168, %c0_308] : memref<200x1152xf32, #tpu.memory_space<vmem>>, vector<8x1152xf32>
    tpu.vector_store %arg11[%c168, %c0_308], %276 {strides = array<i32>} : memref<200x1152xf32, #tpu.memory_space<vmem>>, vector<8x1152xf32>,
    %c0_309 = arith.constant 0 : index
    %c180_310 = arith.constant 180 : index
    %278 = vector.load %arg9[%c0_309, %c180_310] : memref<8x1368xf32, #tpu.memory_space<vmem>>, vector<8x1152xf32>
    %c176 = arith.constant 176 : index
    %c0_311 = arith.constant 0 : index
    %279 = vector.load %arg11[%c176, %c0_311] : memref<200x1152xf32, #tpu.memory_space<vmem>>, vector<8x1152xf32>
    tpu.vector_store %arg11[%c176, %c0_311], %278 {strides = array<i32>} : memref<200x1152xf32, #tpu.memory_space<vmem>>, vector<8x1152xf32>,
    %c0_312 = arith.constant 0 : index
    %c181_313 = arith.constant 181 : index
    %280 = vector.load %arg9[%c0_312, %c181_313] : memref<8x1368xf32, #tpu.memory_space<vmem>>, vector<8x1152xf32>
    %c184 = arith.constant 184 : index
    %c0_314 = arith.constant 0 : index
    %281 = vector.load %arg11[%c184, %c0_314] : memref<200x1152xf32, #tpu.memory_space<vmem>>, vector<8x1152xf32>
    tpu.vector_store %arg11[%c184, %c0_314], %280 {strides = array<i32>} : memref<200x1152xf32, #tpu.memory_space<vmem>>, vector<8x1152xf32>,
    %c0_315 = arith.constant 0 : index
    %c182_316 = arith.constant 182 : index
    %282 = vector.load %arg9[%c0_315, %c182_316] : memref<8x1368xf32, #tpu.memory_space<vmem>>, vector<8x1152xf32>
    %c192 = arith.constant 192 : index
    %c0_317 = arith.constant 0 : index
    %283 = vector.load %arg11[%c192, %c0_317] : memref<200x1152xf32, #tpu.memory_space<vmem>>, vector<8x1152xf32>
    tpu.vector_store %arg11[%c192, %c0_317], %282 {strides = array<i32>} : memref<200x1152xf32, #tpu.memory_space<vmem>>, vector<8x1152xf32>,
    %c0_318 = arith.constant 0 : index
    %c0_319 = arith.constant 0 : index
    %284 = vector.load %arg4[%c0_318, %c0_319] : memref<8x200xbf16, #tpu.memory_space<vmem>>, vector<8x128xbf16>
    %c0_320 = arith.constant 0 : index
    %c0_321 = arith.constant 0 : index
    %285 = vector.load %arg11[%c0_320, %c0_321] : memref<200x1152xf32, #tpu.memory_space<vmem>>, vector<128x1152xf32>
    %286 = arith.truncf %285 : vector<128x1152xf32> to vector<128x1152xbf16>
    %cst_322 = arith.constant dense<0.000000e+00> : vector<8x1152xf32>
    %287 = tpu.matmul %284, %286, %cst_322 {dimension_numbers = #tpu.dot_dimension_numbers<[1], [0], [0], [1], [0, 0, 1, 1], [], []>} : vector<8x128xbf16>, vector<128x1152xbf16>, vector<8x1152xf32> -> vector<8x1152xf32>
    %c0_323 = arith.constant 0 : index
    %c128_324 = arith.constant 128 : index
    %288 = vector.load %arg4[%c0_323, %c128_324] : memref<8x200xbf16, #tpu.memory_space<vmem>>, vector<8x72xbf16>
    %c128_325 = arith.constant 128 : index
    %c0_326 = arith.constant 0 : index
    %289 = vector.load %arg11[%c128_325, %c0_326] : memref<200x1152xf32, #tpu.memory_space<vmem>>, vector<72x1152xf32>
    %290 = arith.truncf %289 : vector<72x1152xf32> to vector<72x1152xbf16>
    %cst_327 = arith.constant dense<0.000000e+00> : vector<8x1152xf32>
    %291 = tpu.matmul %288, %290, %cst_327 {dimension_numbers = #tpu.dot_dimension_numbers<[1], [0], [0], [1], [0, 0, 1, 1], [], []>} : vector<8x72xbf16>, vector<72x1152xbf16>, vector<8x1152xf32> -> vector<8x1152xf32>
    %292 = arith.addf %287, %291 : vector<8x1152xf32>
    %293 = vector.broadcast %5 : vector<8x1xf32> to vector<8x1152xf32>
    %294 = arith.addf %292, %293 : vector<8x1152xf32>
    %295 = vector.broadcast %0 : vector<1x1152xf32> to vector<8x1152xf32>
    %296 = arith.mulf %294, %295 : vector<8x1152xf32>
    %cst_328 = arith.constant dense<0.000000e+00> : vector<8xf32>
    %297 = vector.multi_reduction <add>, %296, %cst_328 [1] : vector<8x1152xf32> to vector<8xf32>
    %298 = vector.shape_cast %297 : vector<8xf32> to vector<8x1xf32>
    %cst_329 = arith.constant 9.765625E-4 : f32
    %299 = vector.broadcast %cst_329 : f32 to vector<8x1xf32>
    %300 = arith.mulf %298, %299 : vector<8x1xf32>
    %301 = vector.broadcast %300 : vector<8x1xf32> to vector<8x1152xf32>
    %302 = arith.subf %294, %301 : vector<8x1152xf32>
    %303 = arith.mulf %302, %302 : vector<8x1152xf32>
    %304 = vector.broadcast %0 : vector<1x1152xf32> to vector<8x1152xf32>
    %305 = arith.mulf %303, %304 : vector<8x1152xf32>
    %cst_330 = arith.constant dense<0.000000e+00> : vector<8xf32>
    %306 = vector.multi_reduction <add>, %305, %cst_330 [1] : vector<8x1152xf32> to vector<8xf32>
    %307 = vector.shape_cast %306 : vector<8xf32> to vector<8x1xf32>
    %cst_331 = arith.constant 9.765625E-4 : f32
    %308 = vector.broadcast %cst_331 : f32 to vector<8x1xf32>
    %309 = arith.mulf %307, %308 : vector<8x1xf32>
    %cst_332 = arith.constant 9.99999974E-6 : f32
    %310 = vector.broadcast %cst_332 : f32 to vector<8x1xf32>
    %311 = arith.addf %309, %310 : vector<8x1xf32>
    %312 = math.rsqrt %311 : vector<8x1xf32>
    %313 = vector.broadcast %312 : vector<8x1xf32> to vector<8x1152xf32>
    %314 = arith.mulf %302, %313 : vector<8x1152xf32>
    %315 = vector.broadcast %6 : vector<8x1xf32> to vector<8x1152xf32>
    %316 = arith.mulf %314, %315 : vector<8x1152xf32>
    %317 = vector.broadcast %7 : vector<8x1xf32> to vector<8x1152xf32>
    %318 = arith.addf %316, %317 : vector<8x1152xf32>
    %cst_333 = arith.constant 5.000000e-01 : f32
    %319 = vector.broadcast %cst_333 : f32 to vector<8x1152xf32>
    %320 = arith.mulf %319, %318 : vector<8x1152xf32>
    %cst_334 = arith.constant 0.707106769 : f32
    %321 = vector.broadcast %cst_334 : f32 to vector<8x1152xf32>
    %322 = arith.mulf %318, %321 : vector<8x1152xf32>
    %323 = math.absf %322 : vector<8x1152xf32>
    %cst_335 = arith.constant 0.327591091 : f32
    %324 = vector.broadcast %cst_335 : f32 to vector<8x1152xf32>
    %325 = arith.mulf %324, %323 : vector<8x1152xf32>
    %cst_336 = arith.constant 1.000000e+00 : f32
    %326 = vector.broadcast %cst_336 : f32 to vector<8x1152xf32>
    %327 = arith.addf %326, %325 : vector<8x1152xf32>
    %cst_337 = arith.constant 1.000000e+00 : f32
    %328 = vector.broadcast %cst_337 : f32 to vector<8x1152xf32>
    %329 = arith.divf %328, %327 : vector<8x1152xf32>
    %cst_338 = arith.constant 1.06140542 : f32
    %330 = vector.broadcast %cst_338 : f32 to vector<8x1152xf32>
    %331 = arith.mulf %330, %329 : vector<8x1152xf32>
    %cst_339 = arith.constant -1.45315206 : f32
    %332 = vector.broadcast %cst_339 : f32 to vector<8x1152xf32>
    %333 = arith.addf %331, %332 : vector<8x1152xf32>
    %334 = arith.mulf %333, %329 : vector<8x1152xf32>
    %cst_340 = arith.constant 1.42141378 : f32
    %335 = vector.broadcast %cst_340 : f32 to vector<8x1152xf32>
    %336 = arith.addf %334, %335 : vector<8x1152xf32>
    %337 = arith.mulf %336, %329 : vector<8x1152xf32>
    %cst_341 = arith.constant -0.284496725 : f32
    %338 = vector.broadcast %cst_341 : f32 to vector<8x1152xf32>
    %339 = arith.addf %337, %338 : vector<8x1152xf32>
    %340 = arith.mulf %339, %329 : vector<8x1152xf32>
    %cst_342 = arith.constant 0.254829586 : f32
    %341 = vector.broadcast %cst_342 : f32 to vector<8x1152xf32>
    %342 = arith.addf %340, %341 : vector<8x1152xf32>
    %343 = arith.mulf %342, %329 : vector<8x1152xf32>
    %cst_343 = arith.constant 0.000000e+00 : f32
    %344 = vector.broadcast %cst_343 : f32 to vector<8x1152xf32>
    %345 = arith.subf %344, %323 : vector<8x1152xf32>
    %346 = arith.mulf %345, %323 : vector<8x1152xf32>
    %347 = math.exp %346 : vector<8x1152xf32>
    %348 = arith.mulf %343, %347 : vector<8x1152xf32>
    %cst_344 = arith.constant 1.000000e+00 : f32
    %349 = vector.broadcast %cst_344 : f32 to vector<8x1152xf32>
    %350 = arith.subf %349, %348 : vector<8x1152xf32>
    %cst_345 = arith.constant 0.000000e+00 : f32
    %351 = vector.broadcast %cst_345 : f32 to vector<8x1152xf32>
    %352 = arith.cmpf olt, %322, %351 : vector<8x1152xf32>
    %cst_346 = arith.constant 0.000000e+00 : f32
    %353 = vector.broadcast %cst_346 : f32 to vector<8x1152xf32>
    %354 = arith.subf %353, %350 : vector<8x1152xf32>
    %355 = arith.select %352, %354, %350 : vector<8x1152xi1>, vector<8x1152xf32>
    %cst_347 = arith.constant 1.000000e+00 : f32
    %356 = vector.broadcast %cst_347 : f32 to vector<8x1152xf32>
    %357 = arith.addf %356, %355 : vector<8x1152xf32>
    %358 = arith.mulf %320, %357 : vector<8x1152xf32>
    %c0_348 = arith.constant 0 : index
    %c108_349 = arith.constant 108 : index
    %359 = vector.load %arg8[%c0_348, %c108_349] : memref<4x1368xf32, #tpu.memory_space<vmem>>, vector<4x1152xf32>
    %c0_350 = arith.constant 0 : index
    %c0_351 = arith.constant 0 : index
    %360 = vector.load %arg6[%c0_350, %c0_351] : memref<8x4xbf16, #tpu.memory_space<vmem>>, vector<8x4xbf16>
    %361 = arith.truncf %359 : vector<4x1152xf32> to vector<4x1152xbf16>
    %cst_352 = arith.constant dense<0.000000e+00> : vector<8x1152xf32>
    %362 = tpu.matmul %360, %361, %cst_352 {dimension_numbers = #tpu.dot_dimension_numbers<[1], [0], [0], [1], [0, 0, 1, 1], [], []>} : vector<8x4xbf16>, vector<4x1152xbf16>, vector<8x1152xf32> -> vector<8x1152xf32>
    %363 = vector.broadcast %8 : vector<8x1xf32> to vector<8x1152xf32>
    %364 = arith.addf %362, %363 : vector<8x1152xf32>
    %365 = arith.addf %358, %364 : vector<8x1152xf32>
    %cst_353 = arith.constant 5.000000e-01 : f32
    %366 = vector.broadcast %cst_353 : f32 to vector<8x1152xf32>
    %367 = arith.mulf %366, %365 : vector<8x1152xf32>
    %cst_354 = arith.constant 0.707106769 : f32
    %368 = vector.broadcast %cst_354 : f32 to vector<8x1152xf32>
    %369 = arith.mulf %365, %368 : vector<8x1152xf32>
    %370 = math.absf %369 : vector<8x1152xf32>
    %cst_355 = arith.constant 0.327591091 : f32
    %371 = vector.broadcast %cst_355 : f32 to vector<8x1152xf32>
    %372 = arith.mulf %371, %370 : vector<8x1152xf32>
    %cst_356 = arith.constant 1.000000e+00 : f32
    %373 = vector.broadcast %cst_356 : f32 to vector<8x1152xf32>
    %374 = arith.addf %373, %372 : vector<8x1152xf32>
    %cst_357 = arith.constant 1.000000e+00 : f32
    %375 = vector.broadcast %cst_357 : f32 to vector<8x1152xf32>
    %376 = arith.divf %375, %374 : vector<8x1152xf32>
    %cst_358 = arith.constant 1.06140542 : f32
    %377 = vector.broadcast %cst_358 : f32 to vector<8x1152xf32>
    %378 = arith.mulf %377, %376 : vector<8x1152xf32>
    %cst_359 = arith.constant -1.45315206 : f32
    %379 = vector.broadcast %cst_359 : f32 to vector<8x1152xf32>
    %380 = arith.addf %378, %379 : vector<8x1152xf32>
    %381 = arith.mulf %380, %376 : vector<8x1152xf32>
    %cst_360 = arith.constant 1.42141378 : f32
    %382 = vector.broadcast %cst_360 : f32 to vector<8x1152xf32>
    %383 = arith.addf %381, %382 : vector<8x1152xf32>
    %384 = arith.mulf %383, %376 : vector<8x1152xf32>
    %cst_361 = arith.constant -0.284496725 : f32
    %385 = vector.broadcast %cst_361 : f32 to vector<8x1152xf32>
    %386 = arith.addf %384, %385 : vector<8x1152xf32>
    %387 = arith.mulf %386, %376 : vector<8x1152xf32>
    %cst_362 = arith.constant 0.254829586 : f32
    %388 = vector.broadcast %cst_362 : f32 to vector<8x1152xf32>
    %389 = arith.addf %387, %388 : vector<8x1152xf32>
    %390 = arith.mulf %389, %376 : vector<8x1152xf32>
    %cst_363 = arith.constant 0.000000e+00 : f32
    %391 = vector.broadcast %cst_363 : f32 to vector<8x1152xf32>
    %392 = arith.subf %391, %370 : vector<8x1152xf32>
    %393 = arith.mulf %392, %370 : vector<8x1152xf32>
    %394 = math.exp %393 : vector<8x1152xf32>
    %395 = arith.mulf %390, %394 : vector<8x1152xf32>
    %cst_364 = arith.constant 1.000000e+00 : f32
    %396 = vector.broadcast %cst_364 : f32 to vector<8x1152xf32>
    %397 = arith.subf %396, %395 : vector<8x1152xf32>
    %cst_365 = arith.constant 0.000000e+00 : f32
    %398 = vector.broadcast %cst_365 : f32 to vector<8x1152xf32>
    %399 = arith.cmpf olt, %369, %398 : vector<8x1152xf32>
    %cst_366 = arith.constant 0.000000e+00 : f32
    %400 = vector.broadcast %cst_366 : f32 to vector<8x1152xf32>
    %401 = arith.subf %400, %397 : vector<8x1152xf32>
    %402 = arith.select %399, %401, %397 : vector<8x1152xi1>, vector<8x1152xf32>
    %cst_367 = arith.constant 1.000000e+00 : f32
    %403 = vector.broadcast %cst_367 : f32 to vector<8x1152xf32>
    %404 = arith.addf %403, %402 : vector<8x1152xf32>
    %405 = arith.mulf %367, %404 : vector<8x1152xf32>
    %c0_368 = arith.constant 0 : index
    %c0_369 = arith.constant 0 : index
    %c0_370 = arith.constant 0 : index
    %406 = vector.load %arg7[%c0_368, %c0_369, %c0_370] : memref<1x8x1152xf32, #tpu.memory_space<vmem>>, vector<1x8x1152xf32>
    %407 = vector.shape_cast %406 : vector<1x8x1152xf32> to vector<8x1152xf32>
    %408 = vector.shape_cast %405 : vector<8x1152xf32> to vector<1x8x1152xf32>
    tpu.vector_store %arg7[%c0_368, %c0_369, %c0_370], %408 {strides = array<i32>} : memref<1x8x1152xf32, #tpu.memory_space<vmem>>, vector<1x8x1152xf32>,
    return
  }
  func.func @transform_0(%arg0: i32) -> (i32, i32, i32, i32) {
    %c0_i32 = arith.constant 0 : i32
    %c0_i32_0 = arith.constant 0 : i32
    %c0_i32_1 = arith.constant 0 : i32
    %c0_i32_2 = arith.constant 0 : i32
    return %arg0, %c0_i32, %c0_i32_0, %c0_i32_1 : i32, i32, i32, i32
  }
  func.func @transform_1(%arg0: i32) -> (i32, i32) {
    %c0_i32 = arith.constant 0 : i32
    %c0_i32_0 = arith.constant 0 : i32
    %c0_i32_1 = arith.constant 0 : i32
    return %c0_i32, %c0_i32_0 : i32, i32
  }
  func.func @transform_2(%arg0: i32) -> (i32, i32) {
    %c0_i32 = arith.constant 0 : i32
    %c0_i32_0 = arith.constant 0 : i32
    %c0_i32_1 = arith.constant 0 : i32
    return %c0_i32, %c0_i32_0 : i32, i32
  }
  func.func @transform_3(%arg0: i32) -> (i32, i32) {
    %c0_i32 = arith.constant 0 : i32
    %c0_i32_0 = arith.constant 0 : i32
    %c0_i32_1 = arith.constant 0 : i32
    return %c0_i32, %c0_i32_0 : i32, i32
  }
  func.func @transform_4(%arg0: i32) -> (i32, i32) {
    %c0_i32 = arith.constant 0 : i32
    %c0_i32_0 = arith.constant 0 : i32
    %c0_i32_1 = arith.constant 0 : i32
    return %c0_i32, %c0_i32_0 : i32, i32
  }
  func.func @transform_5(%arg0: i32) -> (i32, i32) {
    %c0_i32 = arith.constant 0 : i32
    %c0_i32_0 = arith.constant 0 : i32
    %c0_i32_1 = arith.constant 0 : i32
    return %c0_i32, %c0_i32_0 : i32, i32
  }
  func.func @transform_6(%arg0: i32) -> (i32, i32, i32) {
    %c0_i32 = arith.constant 0 : i32
    %c0_i32_0 = arith.constant 0 : i32
    %c0_i32_1 = arith.constant 0 : i32
    return %arg0, %c0_i32, %c0_i32_0 : i32, i32, i32
  }
}

</mosaic_0001>

<bundles_post_ra>
// kernel: residual_block_up.1
= control target key start
LH: loop header
LB: loop body
LE: loop exit
PB: predicated region body
PF: predicated region fallthrough
CT: control target
= control target key end

     0   :  { %s7931_s21 = smov 0   ;;  %s11452_s0 = inlined_call_operand.vmem [shape: f32[2,4,32,32], index: 0, kind: input, shape index: {}]   ;;  %s11453_s1 = inlined_call_operand.vmem [shape: f32[1,1152], index: 1, kind: input, shape index: {}]   ;;  %s11454_s2 = inlined_call_operand.vmem [shape: bf16[8,100], index: 2, kind: input, shape index: {}]   ;;  %s11455_s3 = inlined_call_operand.vmem [shape: bf16[8,200], index: 3, kind: input, shape index: {}]   ;;  %s11456_s4 = inlined_call_operand.vmem [shape: f32[8,8], index: 4, kind: input, shape index: {}]   ;;  %s11457_s5 = inlined_call_operand.vmem [shape: bf16[8,4], index: 5, kind: input, shape index: {}]   ;;  %s11458_s6 = inlined_call_operand.vmem [shape: f32[2,8,1152], index: 6, kind: output, shape index: {}]  }
   0x1 LB: > { %s6899_s22 = sadd.s32 4294967295, %s7837_s21   ;;  %p6903_p0 = scmp.ge.s32.totalorder %s7837_s21, 1  ;;  %s7837_s21 = sphi %s7931_s21, %s16_s21  }
   0x2   : > { %p212_p1 = scmp.lt.s32.totalorder %s7837_s21, 3 }
   0x4   : > { %p213_p2 = pnand %p6903_p0, %p212_p1 }
   0x5   : > { %p242_p3 = scmp.lt.s32.totalorder (!%p213_p2), %s6899_s22, 1  ;;  %v11514_v0 = vmov (!%p213_p2), 0.0   ;;  %vm272_vm0 = vcmask (!%p213_p2), 1041409   ;;  %vm274_vm1 = vcmask (!%p213_p2), 1045509   ;;  %vm277_vm2 = vcmask (!%p213_p2), 1042434   ;;  %s11461_s27 = smov (!%p213_p2), 110  }
   0x6   : > { %216 = sbr.rel (%p213_p2) target bundleno = 2642 (0xa52), region = 44  ;;  %256 = vst [vmem:[#allocation2] sm:$0xff] (!%p213_p2), %v11514_v0  ;;  %257 = vst [vmem:[#allocation2 + $0x8] sm:$0xff] (!%p213_p2), %v11514_v0  ;;  %vm279_vm3 = vcmask (!%p213_p2), 1046534   ;;  %vm282_vm4 = vcmask (!%p213_p2), 1043459   ;;  %vm284_vm5 = vcmask (!%p213_p2), 1047559  }
   0x7   : > { %258 = vst [vmem:[#allocation2 + $0x10] sm:$0xff] (!%p213_p2), %v11514_v0  ;;  %259 = vst [vmem:[#allocation2 + $0x18] sm:$0xff] (!%p213_p2), %v11514_v0  ;;  %s7841_s28 = smov (!%p213_p2), 126   ;;  %s11476_s29 = smov (!%p213_p2), 18   ;;  %vm292_vm6 = vcmask (!%p213_p2), 1044336   ;;  %vm293_vm7 = vcmask (!%p213_p2), 113668  }
   0x8   : > { %260 = vst [vmem:[#allocation2 + $0x20] sm:$0xff] (!%p213_p2), %v11514_v0  ;;  %s11495_s30 = smov (!%p213_p2), 54   ;;  %s7844_s7 = smov (!%p213_p2), 90   ;;  %vm11470_vm8 = vcmask (!%p213_p2), 900096   ;;  %vm294_vm9 = vmor (!%p213_p2), %vm293_vm7, %vm292_vm6  ;;  %vm316_vm10 = vcmask (!%p213_p2), 404624   ;;  %vm338_vm11 = vcmask (!%p213_p2), 699824  }
   0x9   : > { %s7845_s8 = smov (!%p213_p2), 106   ;;  %s7846_s9 = smov (!%p213_p2), 34   ;;  %vm385_vm12 = vcmask (!%p213_p2), 1044464   ;;  %vm386_vm13 = vcmask (!%p213_p2), 244740   ;;  %vm261_vm14 = vcmask (!%p213_p2), 715776   ;;  %vm382_vm15 = vcmask (!%p213_p2), 1031168  }
   0xa   : > { %s7847_s10 = smov (!%p213_p2), 70   ;;  %s7848_s11 = smov (!%p213_p2), 14   ;;  %262 = vst.msk [vmem:[#allocation2 + $0x28] sm:$0xf] (!%p213_p2), %vm261_vm14, %v11514_v0  ;;  %vm431_vm6 = vcmask (!%p213_p2), 831024   ;;  %vm524_vm14 = vcmask (!%p213_p2), 962224  }
   0xb   : > { %s7849_s12 = smov (!%p213_p2), 122   ;;  %s7850_s13 = smov (!%p213_p2), 50  }
   0xc   : > { %s7851_s14 = smov (!%p213_p2), 86   ;;  %s7852_s15 = smov (!%p213_p2), 102  }
   0xd   : > { %s11812_s22 = smov (!%p242_p3, %s6899_s22), 1  ;;  %s7853_s16 = smov 30  }
   0xe   : > { %s6937_s23 = sshll.u32 %s11812_s22, 7  ;;  %s7854_s17 = smov 66  }
   0xf   : > { %s7950_s26 = scalar_lea.vmem %s11452_s0, %s6937_s23  ;;  %s7855_s18 = smov 10  }
  0x10   : > { %v263_v1 = vld [vmem:[%s7950_s26] sm:$0x1]  ;;  %v362_v7 = vld [vmem:[%s7950_s26 + $0x4] sm:$0x1]  ;;  %v296_v15 = vld [vmem:[%s7950_s26 + $0x1] sm:$0x1] }
  0x11   : > { %v264_v2 = vld [vmem:[%s7950_s26 + $0x20] sm:$0x1]  ;;  %v363_v9 = vld [vmem:[%s7950_s26 + $0x24] sm:$0x1]  ;;  %v297_v18 = vld [vmem:[%s7950_s26 + $0x21] sm:$0x1] }
  0x12   : > { %v265_v3 = vld [vmem:[%s7950_s26 + $0x40] sm:$0x1]  ;;  %v271_v5 = vrot.slane %v264_v2, 7  ;;  %v364_v10 = vld [vmem:[%s7950_s26 + $0x44] sm:$0x1]  ;;  %v370_v13 = vrot.slane %v363_v9, 7 }
  0x13   : > { %v266_v4 = vld [vmem:[%s7950_s26 + $0x60] sm:$0x1]  ;;  %v276_v6 = vrot.slane %v265_v3, 6  ;;  %v365_v12 = vld [vmem:[%s7950_s26 + $0x64] sm:$0x1]  ;;  %v373_v14 = vrot.slane %v364_v10, 6 }
  0x14   : > { %v281_v8 = vrot.slane %v266_v4, 5  ;;  %v273_v11 = vsel %vm272_vm0, %v271_v5, %v263_v1  ;;  %v376_v17 = vrot.slane %v365_v12, 5  ;;  %v298_v19 = vld [vmem:[%s7950_s26 + $0x41] sm:$0x1]  ;;  %v371_v21 = vsel %vm272_vm0, %v370_v13, %v362_v7  ;;  %v318_v25 = vld [vmem:[%s7950_s26 + $0x2] sm:$0x1] }
  0x15   : > { %v275_v16 = vsel %vm274_vm1, %v271_v5, %v273_v11  ;;  %v299_v22 = vld [vmem:[%s7950_s26 + $0x61] sm:$0x1]  ;;  %v304_v23 = vrot.slane %v297_v18, 7  ;;  %v307_v24 = vrot.slane %v298_v19, 6  ;;  %v372_v27 = vsel %vm274_vm1, %v370_v13, %v371_v21  ;;  %v319_v29 = vld [vmem:[%s7950_s26 + $0x22] sm:$0x1] }
  0x16   : > { %v278_v20 = vsel %vm277_vm2, %v276_v6, %v275_v16  ;;  %v310_v28 = vrot.slane %v299_v22, 5  ;;  %v320_v30 = vld [vmem:[%s7950_s26 + $0x42] sm:$0x1]  ;;  %v374_v32 = vsel %vm277_vm2, %v373_v14, %v372_v27  ;;  %v326_v35 = vrot.slane %v319_v29, 7  ;;  %v341_v40 = vld [vmem:[%s7950_s26 + $0x23] sm:$0x1] }
  0x17   : > { %v280_v26 = vsel %vm279_vm3, %v276_v6, %v278_v20  ;;  %v305_v33 = vsel %vm272_vm0, %v304_v23, %v296_v15  ;;  %v321_v34 = vld [vmem:[%s7950_s26 + $0x62] sm:$0x1]  ;;  %v375_v37 = vsel %vm279_vm3, %v373_v14, %v374_v32  ;;  %v329_v39 = vrot.slane %v320_v30, 6  ;;  %v342_v41 = vld [vmem:[%s7950_s26 + $0x43] sm:$0x1]  ;;  %s7856_s19 = smov 118  }
  0x18   : > { %v283_v31 = vsel %vm282_vm4, %v281_v8, %v280_v26  ;;  %v306_v38 = vsel %vm274_vm1, %v304_v23, %v305_v33  ;;  %v377_v42 = vsel %vm282_vm4, %v376_v17, %v375_v37  ;;  %v327_v44 = vsel %vm272_vm0, %v326_v35, %v318_v25  ;;  %v340_v46 = vld [vmem:[%s7950_s26 + $0x3] sm:$0x1]  ;;  %v434_v52 = vld [vmem:[%s7950_s26 + $0x27] sm:$0x1]  ;;  %v390_v1 = vld [vmem:[%s7950_s26 + $0x25] sm:$0x1] }
  0x19   : > { %v285_v36 = vsel %vm284_vm5, %v281_v8, %v283_v31  ;;  %v308_v43 = vsel %vm277_vm2, %v307_v24, %v306_v38  ;;  %v332_v45 = vrot.slane %v321_v34, 5  ;;  %v343_v47 = vld [vmem:[%s7950_s26 + $0x63] sm:$0x1]  ;;  %v378_v48 = vsel %vm284_vm5, %v376_v17, %v377_v42  ;;  %v435_v53 = vld [vmem:[%s7950_s26 + $0x47] sm:$0x1]  ;;  %s7857_s20 = smov 46  }
  0x1a   : > { %286 = vrot.lane.b32.xlu0 %v285_v36, %s11461_s27  ;;  %v309_v49 = vsel %vm279_vm3, %v307_v24, %v308_v43  ;;  %v328_v50 = vsel %vm274_vm1, %v326_v35, %v327_v44  ;;  %v348_v51 = vrot.slane %v341_v40, 7  ;;  %379 = vrot.lane.b32.xlu1 %v378_v48, %s7841_s28  ;;  %v351_v56 = vrot.slane %v342_v41, 6  ;;  %v433_v58 = vld [vmem:[%s7950_s26 + $0x7] sm:$0x1]  ;;  %v391_v2 = vld [vmem:[%s7950_s26 + $0x45] sm:$0x1] }
  0x1b   : > { %v311_v54 = vsel %vm282_vm4, %v310_v28, %v309_v49  ;;  %v330_v55 = vsel %vm277_vm2, %v329_v39, %v328_v50  ;;  %v354_v57 = vrot.slane %v343_v47, 5  ;;  %v436_v59 = vld [vmem:[%s7950_s26 + $0x67] sm:$0x1]  ;;  %v441_v63 = vrot.slane %v434_v52, 7  ;;  %v389_v7 = vld [vmem:[%s7950_s26 + $0x5] sm:$0x1] }
  0x1c   : > { %v312_v60 = vsel %vm284_vm5, %v310_v28, %v311_v54  ;;  %v331_v61 = vsel %vm279_vm3, %v329_v39, %v330_v55  ;;  %v349_v62 = vsel %vm272_vm0, %v348_v51, %v340_v46  ;;  %v444_v5 = vrot.slane %v435_v53, 6  ;;  %v392_v8 = vld [vmem:[%s7950_s26 + $0x65] sm:$0x1]  ;;  %v412_v13 = vld [vmem:[%s7950_s26 + $0x26] sm:$0x1]  ;;  %s7858_s23 = smov 82  }
  0x1d   : > { %v333_v3 = vsel %vm282_vm4, %v332_v45, %v331_v61  ;;  %v350_v4 = vsel %vm274_vm1, %v348_v51, %v349_v62  ;;  %v447_v6 = vrot.slane %v436_v59, 5  ;;  %v442_v11 = vsel %vm272_vm0, %v441_v63, %v433_v58  ;;  %v413_v14 = vld [vmem:[%s7950_s26 + $0x46] sm:$0x1]  ;;  %v461_v25 = vld [vmem:[%s7950_s26 + $0x28] sm:$0x1]  ;;  %s7859_s24 = smov 98  }
  0x1e   : > { %313 = vrot.lane.b32.xlu0 %v312_v60, %s11476_s29  ;;  %v334_v9 = vsel %vm284_vm5, %v332_v45, %v333_v3  ;;  %v352_v10 = vsel %vm277_vm2, %v351_v56, %v350_v4  ;;  %v397_v12 = vrot.slane %v390_v1, 7  ;;  %v443_v16 = vsel %vm274_vm1, %v441_v63, %v442_v11  ;;  %v411_v19 = vld [vmem:[%s7950_s26 + $0x6] sm:$0x1]  ;;  %v462_v30 = vld [vmem:[%s7950_s26 + $0x48] sm:$0x1]  ;;  %s7860_s25 = smov 26  }
  0x1f   : > { %335 = vrot.lane.b32.xlu1 %v334_v9, %s11495_s30  ;;  %v353_v15 = vsel %vm279_vm3, %v351_v56, %v352_v10  ;;  %v400_v17 = vrot.slane %v391_v2, 6  ;;  %v403_v18 = vrot.slane %v392_v8, 5  ;;  %v414_v20 = vld [vmem:[%s7950_s26 + $0x66] sm:$0x1]  ;;  %v445_v22 = vsel %vm277_vm2, %v444_v5, %v443_v16  ;;  %v463_v31 = vld [vmem:[%s7950_s26 + $0x68] sm:$0x1] }
  0x20   : > { %v355_v21 = vsel %vm282_vm4, %v354_v57, %v353_v15  ;;  %v398_v23 = vsel %vm272_vm0, %v397_v12, %v389_v7  ;;  %v419_v24 = vrot.slane %v412_v13, 7  ;;  %v446_v27 = vsel %vm279_vm3, %v444_v5, %v445_v22  ;;  %v460_v36 = vld [vmem:[%s7950_s26 + $0x8] sm:$0x1]  ;;  %v527_v37 = vld [vmem:[%s7950_s26 + $0x2b] sm:$0x1]  ;;  %s7861_s28 = smov 62  }
  0x21   : > { %v356_v26 = vsel %vm284_vm5, %v354_v57, %v355_v21  ;;  %v399_v28 = vsel %vm274_vm1, %v397_v12, %v398_v23  ;;  %v422_v29 = vrot.slane %v413_v14, 6  ;;  %v448_v32 = vsel %vm282_vm4, %v447_v6, %v446_v27  ;;  %v528_v42 = vld [vmem:[%s7950_s26 + $0x4b] sm:$0x1]  ;;  %v483_v49 = vld [vmem:[%s7950_s26 + $0x29] sm:$0x1] }
  0x22   : > { %357 = vrot.lane.b32.xlu0 %v356_v26, %s7844_s7  ;;  %v401_v33 = vsel %vm277_vm2, %v400_v17, %v399_v28  ;;  %v420_v34 = vsel %vm272_vm0, %v419_v24, %v411_v19  ;;  %v425_v35 = vrot.slane %v414_v20, 5  ;;  %v449_v38 = vsel %vm284_vm5, %v447_v6, %v448_v32  ;;  %v529_v43 = vld [vmem:[%s7950_s26 + $0x6b] sm:$0x1]  ;;  %v484_v54 = vld [vmem:[%s7950_s26 + $0x49] sm:$0x1] }
  0x23   : > { %v402_v39 = vsel %vm279_vm3, %v400_v17, %v401_v33  ;;  %v421_v40 = vsel %vm274_vm1, %v419_v24, %v420_v34  ;;  %v468_v41 = vrot.slane %v461_v25, 7  ;;  %450 = vrot.lane.b32.xlu1 %v449_v38, %s7845_s8  ;;  %v471_v46 = vrot.slane %v462_v30, 6  ;;  %v526_v48 = vld [vmem:[%s7950_s26 + $0xb] sm:$0x1]  ;;  %v485_v55 = vld [vmem:[%s7950_s26 + $0x69] sm:$0x1] }
  0x24   : > { %v404_v44 = vsel %vm282_vm4, %v403_v18, %v402_v39  ;;  %v423_v45 = vsel %vm277_vm2, %v422_v29, %v421_v40  ;;  %v474_v47 = vrot.slane %v463_v31, 5  ;;  %v534_v53 = vrot.slane %v527_v37, 7  ;;  %v482_v60 = vld [vmem:[%s7950_s26 + $0x9] sm:$0x1]  ;;  %v505_v61 = vld [vmem:[%s7950_s26 + $0x2a] sm:$0x1] }
  0x25   : > { %v405_v50 = vsel %vm284_vm5, %v403_v18, %v404_v44  ;;  %v424_v51 = vsel %vm279_vm3, %v422_v29, %v423_v45  ;;  %v469_v52 = vsel %vm272_vm0, %v468_v41, %v460_v36  ;;  %v537_v58 = vrot.slane %v528_v42, 6  ;;  %v506_v3 = vld [vmem:[%s7950_s26 + $0x4a] sm:$0x1]  ;;  %v598_v14 = vld [vmem:[%s7950_s26 + $0x2e] sm:$0x1]  ;;  %s7862_s8 = smov 6  }
  0x26   : > { %406 = vrot.lane.b32.xlu0 %v405_v50, %s7846_s9  ;;  %v426_v56 = vsel %vm282_vm4, %v425_v35, %v424_v51  ;;  %v470_v57 = vsel %vm274_vm1, %v468_v41, %v469_v52  ;;  %v540_v59 = vrot.slane %v529_v43, 5  ;;  %v535_v1 = vsel %vm272_vm0, %v534_v53, %v526_v48  ;;  %v504_v8 = vld [vmem:[%s7950_s26 + $0xa] sm:$0x1]  ;;  %v599_v19 = vld [vmem:[%s7950_s26 + $0x4e] sm:$0x1]  ;;  %s11474_s9 = smov 114  }
  0x27   : > { %v427_v62 = vsel %vm284_vm5, %v425_v35, %v426_v56  ;;  %v472_v63 = vsel %vm277_vm2, %v471_v46, %v470_v57  ;;  %v490_v2 = vrot.slane %v483_v49, 7  ;;  %v536_v5 = vsel %vm274_vm1, %v534_v53, %v535_v1  ;;  %v507_v9 = vld [vmem:[%s7950_s26 + $0x6a] sm:$0x1]  ;;  %v600_v20 = vld [vmem:[%s7950_s26 + $0x6e] sm:$0x1] }
  0x28   : > { %428 = vrot.lane.b32.xlu1 %v427_v62, %s7847_s10  ;;  %v473_v4 = vsel %vm279_vm3, %v471_v46, %v472_v63  ;;  %v493_v6 = vrot.slane %v484_v54, 6  ;;  %v496_v7 = vrot.slane %v485_v55, 5  ;;  %v538_v11 = vsel %vm277_vm2, %v537_v58, %v536_v5  ;;  %v597_v25 = vld [vmem:[%s7950_s26 + $0xe] sm:$0x1]  ;;  %v554_v26 = vld [vmem:[%s7950_s26 + $0x2c] sm:$0x1] }
  0x29   : > { %v475_v10 = vsel %vm282_vm4, %v474_v47, %v473_v4  ;;  %v491_v12 = vsel %vm272_vm0, %v490_v2, %v482_v60  ;;  %v512_v13 = vrot.slane %v505_v61, 7  ;;  %v539_v16 = vsel %vm279_vm3, %v537_v58, %v538_v11  ;;  %v555_v31 = vld [vmem:[%s7950_s26 + $0x4c] sm:$0x1]  ;;  %v576_v38 = vld [vmem:[%s7950_s26 + $0x2d] sm:$0x1]  ;;  %s7864_s10 = smov 42  }
  0x2a   : > { %v476_v15 = vsel %vm284_vm5, %v474_v47, %v475_v10  ;;  %v492_v17 = vsel %vm274_vm1, %v490_v2, %v491_v12  ;;  %v515_v18 = vrot.slane %v506_v3, 6  ;;  %v541_v21 = vsel %vm282_vm4, %v540_v59, %v539_v16  ;;  %v556_v32 = vld [vmem:[%s7950_s26 + $0x6c] sm:$0x1]  ;;  %v577_v43 = vld [vmem:[%s7950_s26 + $0x4d] sm:$0x1] }
  0x2b   : > { %477 = vrot.lane.b32.xlu0 %v476_v15, %s7848_s11  ;;  %v494_v22 = vsel %vm277_vm2, %v493_v6, %v492_v17  ;;  %v513_v23 = vsel %vm272_vm0, %v512_v13, %v504_v8  ;;  %v518_v24 = vrot.slane %v507_v9, 5  ;;  %v542_v27 = vsel %vm284_vm5, %v540_v59, %v541_v21  ;;  %v553_v37 = vld [vmem:[%s7950_s26 + $0xc] sm:$0x1]  ;;  %v578_v44 = vld [vmem:[%s7950_s26 + $0x6d] sm:$0x1]  ;;  %s7865_s11 = smov 78  }
  0x2c   : > { %v495_v28 = vsel %vm279_vm3, %v493_v6, %v494_v22  ;;  %v514_v29 = vsel %vm274_vm1, %v512_v13, %v513_v23  ;;  %v605_v30 = vrot.slane %v598_v14, 7  ;;  %543 = vrot.lane.b32.xlu1 %v542_v27, %s7849_s12  ;;  %v608_v35 = vrot.slane %v599_v19, 6  ;;  %v575_v49 = vld [vmem:[%s7950_s26 + $0xd] sm:$0x1]  ;;  %v625_v50 = vld [vmem:[%s7950_s26 + $0x2f] sm:$0x1] }
  0x2d   : > { %v497_v33 = vsel %vm282_vm4, %v496_v7, %v495_v28  ;;  %v516_v34 = vsel %vm277_vm2, %v515_v18, %v514_v29  ;;  %v611_v36 = vrot.slane %v600_v20, 5  ;;  %v561_v42 = vrot.slane %v554_v26, 7  ;;  %v626_v55 = vld [vmem:[%s7950_s26 + $0x4f] sm:$0x1]  ;;  %v691_v3 = vld [vmem:[%s7950_s26 + $0x32] sm:$0x1] }
  0x2e   : > { %v498_v39 = vsel %vm284_vm5, %v496_v7, %v497_v33  ;;  %v517_v40 = vsel %vm279_vm3, %v515_v18, %v516_v34  ;;  %v606_v41 = vsel %vm272_vm0, %v605_v30, %v597_v25  ;;  %v564_v47 = vrot.slane %v555_v31, 6  ;;  %v624_v60 = vld [vmem:[%s7950_s26 + $0xf] sm:$0x1]  ;;  %v692_v8 = vld [vmem:[%s7950_s26 + $0x52] sm:$0x1]  ;;  %s7866_s12 = smov 22  }
  0x2f   : > { %499 = vrot.lane.b32.xlu0 %v498_v39, %s7850_s13  ;;  %v519_v45 = vsel %vm282_vm4, %v518_v24, %v517_v40  ;;  %v607_v46 = vsel %vm274_vm1, %v605_v30, %v606_v41  ;;  %v567_v48 = vrot.slane %v556_v32, 5  ;;  %v562_v53 = vsel %vm272_vm0, %v561_v42, %v553_v37  ;;  %v627_v61 = vld [vmem:[%s7950_s26 + $0x6f] sm:$0x1]  ;;  %v693_v9 = vld [vmem:[%s7950_s26 + $0x72] sm:$0x1]  ;;  %s11493_s13 = smov 58  }
  0x30   : > { %v520_v51 = vsel %vm284_vm5, %v518_v24, %v519_v45  ;;  %v609_v52 = vsel %vm277_vm2, %v608_v35, %v607_v46  ;;  %v583_v54 = vrot.slane %v576_v38, 7  ;;  %v563_v57 = vsel %vm274_vm1, %v561_v42, %v562_v53  ;;  %v690_v14 = vld [vmem:[%s7950_s26 + $0x12] sm:$0x1]  ;;  %v647_v15 = vld [vmem:[%s7950_s26 + $0x30] sm:$0x1] }
  0x31   : > { %521 = vrot.lane.b32.xlu1 %v520_v51, %s7851_s14  ;;  %v610_v56 = vsel %vm279_vm3, %v608_v35, %v609_v52  ;;  %v586_v58 = vrot.slane %v577_v43, 6  ;;  %v589_v59 = vrot.slane %v578_v44, 5  ;;  %v565_v63 = vsel %vm277_vm2, %v564_v47, %v563_v57  ;;  %v648_v20 = vld [vmem:[%s7950_s26 + $0x50] sm:$0x1]  ;;  %v669_v27 = vld [vmem:[%s7950_s26 + $0x31] sm:$0x1] }
  0x32   : > { %v612_v62 = vsel %vm282_vm4, %v611_v36, %v610_v56  ;;  %v584_v1 = vsel %vm272_vm0, %v583_v54, %v575_v49  ;;  %v632_v2 = vrot.slane %v625_v50, 7  ;;  %v566_v5 = vsel %vm279_vm3, %v564_v47, %v565_v63  ;;  %v649_v21 = vld [vmem:[%s7950_s26 + $0x70] sm:$0x1]  ;;  %v670_v32 = vld [vmem:[%s7950_s26 + $0x51] sm:$0x1]  ;;  %s7868_s14 = smov 94  }
  0x33   : > { %v613_v4 = vsel %vm284_vm5, %v611_v36, %v612_v62  ;;  %v585_v6 = vsel %vm274_vm1, %v583_v54, %v584_v1  ;;  %v635_v7 = vrot.slane %v626_v55, 6  ;;  %v568_v10 = vsel %vm282_vm4, %v567_v48, %v566_v5  ;;  %v646_v26 = vld [vmem:[%s7950_s26 + $0x10] sm:$0x1]  ;;  %v671_v33 = vld [vmem:[%s7950_s26 + $0x71] sm:$0x1] }
  0x34   : > { %614 = vrot.lane.b32.xlu0 %v613_v4, %s7852_s15  ;;  %v587_v11 = vsel %vm277_vm2, %v586_v58, %v585_v6  ;;  %v633_v12 = vsel %vm272_vm0, %v632_v2, %v624_v60  ;;  %v638_v13 = vrot.slane %v627_v61, 5  ;;  %v569_v16 = vsel %vm284_vm5, %v567_v48, %v568_v10  ;;  %v668_v38 = vld [vmem:[%s7950_s26 + $0x11] sm:$0x1]  ;;  %v762_v39 = vld [vmem:[%s7950_s26 + $0x35] sm:$0x1]  ;;  %s7870_s15 = smov 38  }
  0x35   : > { %v588_v17 = vsel %vm279_vm3, %v586_v58, %v587_v11  ;;  %v634_v18 = vsel %vm274_vm1, %v632_v2, %v633_v12  ;;  %v698_v19 = vrot.slane %v691_v3, 7  ;;  %570 = vrot.lane.b32.xlu1 %v569_v16, %s7853_s16  ;;  %v701_v24 = vrot.slane %v692_v8, 6  ;;  %v763_v44 = vld [vmem:[%s7950_s26 + $0x55] sm:$0x1]  ;;  %v718_v55 = vld [vmem:[%s7950_s26 + $0x33] sm:$0x1] }
  0x36   : > { %v590_v22 = vsel %vm282_vm4, %v589_v59, %v588_v17  ;;  %v636_v23 = vsel %vm277_vm2, %v635_v7, %v634_v18  ;;  %v704_v25 = vrot.slane %v693_v9, 5  ;;  %v654_v31 = vrot.slane %v647_v15, 7  ;;  %v761_v49 = vld [vmem:[%s7950_s26 + $0x15] sm:$0x1]  ;;  %v719_v60 = vld [vmem:[%s7950_s26 + $0x53] sm:$0x1] }
  0x37   : > { %v591_v28 = vsel %vm284_vm5, %v589_v59, %v590_v22  ;;  %v637_v29 = vsel %vm279_vm3, %v635_v7, %v636_v23  ;;  %v699_v30 = vsel %vm272_vm0, %v698_v19, %v690_v14  ;;  %v657_v36 = vrot.slane %v648_v20, 6  ;;  %v764_v50 = vld [vmem:[%s7950_s26 + $0x75] sm:$0x1]  ;;  %v720_v61 = vld [vmem:[%s7950_s26 + $0x73] sm:$0x1]  ;;  %s7871_s16 = smov 74  }
  0x38   : > { %592 = vrot.lane.b32.xlu0 %v591_v28, %s7854_s17  ;;  %v639_v34 = vsel %vm282_vm4, %v638_v13, %v637_v29  ;;  %v700_v35 = vsel %vm274_vm1, %v698_v19, %v699_v30  ;;  %v660_v37 = vrot.slane %v649_v21, 5  ;;  %v655_v42 = vsel %vm272_vm0, %v654_v31, %v646_v26  ;;  %v717_v3 = vld [vmem:[%s7950_s26 + $0x13] sm:$0x1]  ;;  %v740_v4 = vld [vmem:[%s7950_s26 + $0x34] sm:$0x1]  ;;  %s7872_s17 = smov 93  }
  0x39   : > { %v640_v40 = vsel %vm284_vm5, %v638_v13, %v639_v34  ;;  %v702_v41 = vsel %vm277_vm2, %v701_v24, %v700_v35  ;;  %v676_v43 = vrot.slane %v669_v27, 7  ;;  %v656_v46 = vsel %vm274_vm1, %v654_v31, %v655_v42  ;;  %v741_v9 = vld [vmem:[%s7950_s26 + $0x54] sm:$0x1]  ;;  %v789_v16 = vld [vmem:[%s7950_s26 + $0x36] sm:$0x1] }
  0x3a   : > { %641 = vrot.lane.b32.xlu1 %v640_v40, %s7855_s18  ;;  %v703_v45 = vsel %vm279_vm3, %v701_v24, %v702_v41  ;;  %v679_v47 = vrot.slane %v670_v32, 6  ;;  %v682_v48 = vrot.slane %v671_v33, 5  ;;  %v658_v52 = vsel %vm277_vm2, %v657_v36, %v656_v46  ;;  %v742_v10 = vld [vmem:[%s7950_s26 + $0x74] sm:$0x1]  ;;  %v790_v21 = vld [vmem:[%s7950_s26 + $0x56] sm:$0x1] }
  0x3b   : > { %v705_v51 = vsel %vm282_vm4, %v704_v25, %v703_v45  ;;  %v677_v53 = vsel %vm272_vm0, %v676_v43, %v668_v38  ;;  %v769_v54 = vrot.slane %v762_v39, 7  ;;  %v659_v57 = vsel %vm279_vm3, %v657_v36, %v658_v52  ;;  %v739_v15 = vld [vmem:[%s7950_s26 + $0x14] sm:$0x1]  ;;  %v791_v22 = vld [vmem:[%s7950_s26 + $0x76] sm:$0x1]  ;;  %s7873_s18 = smov 91  }
  0x3c   : > { %v706_v56 = vsel %vm284_vm5, %v704_v25, %v705_v51  ;;  %v678_v58 = vsel %vm274_vm1, %v676_v43, %v677_v53  ;;  %v772_v59 = vrot.slane %v763_v44, 6  ;;  %v661_v62 = vsel %vm282_vm4, %v660_v37, %v659_v57  ;;  %v788_v27 = vld [vmem:[%s7950_s26 + $0x16] sm:$0x1]  ;;  %v855_v28 = vld [vmem:[%s7950_s26 + $0x39] sm:$0x1] }
  0x3d   : > { %707 = vrot.lane.b32.xlu0 %v706_v56, %s7856_s19  ;;  %v680_v63 = vsel %vm277_vm2, %v679_v47, %v678_v58  ;;  %v770_v1 = vsel %vm272_vm0, %v769_v54, %v761_v49  ;;  %v775_v2 = vrot.slane %v764_v50, 5  ;;  %v662_v5 = vsel %vm284_vm5, %v660_v37, %v661_v62  ;;  %v856_v33 = vld [vmem:[%s7950_s26 + $0x59] sm:$0x1]  ;;  %v811_v44 = vld [vmem:[%s7950_s26 + $0x37] sm:$0x1]  ;;  %s7874_s19 = smov 92  }
  0x3e   : > { %v681_v6 = vsel %vm279_vm3, %v679_v47, %v680_v63  ;;  %v771_v7 = vsel %vm274_vm1, %v769_v54, %v770_v1  ;;  %v725_v8 = vrot.slane %v718_v55, 7  ;;  %663 = vrot.lane.b32.xlu1 %v662_v5, %s7857_s20  ;;  %v728_v13 = vrot.slane %v719_v60, 6  ;;  %v854_v38 = vld [vmem:[%s7950_s26 + $0x19] sm:$0x1]  ;;  %v812_v49 = vld [vmem:[%s7950_s26 + $0x57] sm:$0x1] }
  0x3f   : > { %v683_v11 = vsel %vm282_vm4, %v682_v48, %v681_v6  ;;  %v773_v12 = vsel %vm277_vm2, %v772_v59, %v771_v7  ;;  %v731_v14 = vrot.slane %v720_v61, 5  ;;  %v747_v20 = vrot.slane %v740_v4, 7  ;;  %v857_v39 = vld [vmem:[%s7950_s26 + $0x79] sm:$0x1]  ;;  %v813_v50 = vld [vmem:[%s7950_s26 + $0x77] sm:$0x1] }
  0x40   : > { %v684_v17 = vsel %vm284_vm5, %v682_v48, %v683_v11  ;;  %v774_v18 = vsel %vm279_vm3, %v772_v59, %v773_v12  ;;  %v726_v19 = vsel %vm272_vm0, %v725_v8, %v717_v3  ;;  %v750_v25 = vrot.slane %v741_v9, 6  ;;  %v810_v55 = vld [vmem:[%s7950_s26 + $0x17] sm:$0x1]  ;;  %v833_v56 = vld [vmem:[%s7950_s26 + $0x38] sm:$0x1]  ;;  %s11489_s20 = smov 56  }
  0x41   : > { %685 = vrot.lane.b32.xlu0 %v684_v17, %s7858_s23  ;;  %v776_v23 = vsel %vm282_vm4, %v775_v2, %v774_v18  ;;  %v727_v24 = vsel %vm274_vm1, %v725_v8, %v726_v19  ;;  %v753_v26 = vrot.slane %v742_v10, 5  ;;  %v748_v31 = vsel %vm272_vm0, %v747_v20, %v739_v15  ;;  %v834_v61 = vld [vmem:[%s7950_s26 + $0x58] sm:$0x1]  ;;  %v882_v5 = vld [vmem:[%s7950_s26 + $0x3a] sm:$0x1]  ;;  %s11483_s23 = smov 21  }
  0x42   : > { %v777_v29 = vsel %vm284_vm5, %v775_v2, %v776_v23  ;;  %v729_v30 = vsel %vm277_vm2, %v728_v13, %v727_v24  ;;  %v796_v32 = vrot.slane %v789_v16, 7  ;;  %v749_v35 = vsel %vm274_vm1, %v747_v20, %v748_v31  ;;  %v835_v62 = vld [vmem:[%s7950_s26 + $0x78] sm:$0x1]  ;;  %v883_v10 = vld [vmem:[%s7950_s26 + $0x5a] sm:$0x1] }
  0x43   : > { %778 = vrot.lane.b32.xlu1 %v777_v29, %s7859_s24  ;;  %v730_v34 = vsel %vm279_vm3, %v728_v13, %v729_v30  ;;  %v799_v36 = vrot.slane %v790_v21, 6  ;;  %v802_v37 = vrot.slane %v791_v22, 5  ;;  %v751_v41 = vsel %vm277_vm2, %v750_v25, %v749_v35  ;;  %v832_v4 = vld [vmem:[%s7950_s26 + $0x18] sm:$0x1]  ;;  %v884_v11 = vld [vmem:[%s7950_s26 + $0x7a] sm:$0x1] }
  0x44   : > { %v732_v40 = vsel %vm282_vm4, %v731_v14, %v730_v34  ;;  %v797_v42 = vsel %vm272_vm0, %v796_v32, %v788_v27  ;;  %v862_v43 = vrot.slane %v855_v28, 7  ;;  %v752_v46 = vsel %vm279_vm3, %v750_v25, %v751_v41  ;;  %v881_v16 = vld [vmem:[%s7950_s26 + $0x1a] sm:$0x1]  ;;  %v904_v17 = vld [vmem:[%s7950_s26 + $0x3b] sm:$0x1]  ;;  %s11479_s24 = smov 19  }
  0x45   : > { %v733_v45 = vsel %vm284_vm5, %v731_v14, %v732_v40  ;;  %v798_v47 = vsel %vm274_vm1, %v796_v32, %v797_v42  ;;  %v865_v48 = vrot.slane %v856_v33, 6  ;;  %v754_v51 = vsel %vm282_vm4, %v753_v26, %v752_v46  ;;  %v905_v22 = vld [vmem:[%s7950_s26 + $0x5b] sm:$0x1]  ;;  %v926_v33 = vld [vmem:[%s7950_s26 + $0x3c] sm:$0x1] }
  0x46   : > { %734 = vrot.lane.b32.xlu0 %v733_v45, %s7860_s25  ;;  %v800_v52 = vsel %vm277_vm2, %v799_v36, %v798_v47  ;;  %v863_v53 = vsel %vm272_vm0, %v862_v43, %v854_v38  ;;  %v868_v54 = vrot.slane %v857_v39, 5  ;;  %v755_v57 = vsel %vm284_vm5, %v753_v26, %v754_v51  ;;  %v903_v27 = vld [vmem:[%s7950_s26 + $0x1b] sm:$0x1]  ;;  %v927_v38 = vld [vmem:[%s7950_s26 + $0x5c] sm:$0x1]  ;;  %s11491_s25 = smov 57  }
  0x47   : > { %v801_v58 = vsel %vm279_vm3, %v799_v36, %v800_v52  ;;  %v864_v59 = vsel %vm274_vm1, %v862_v43, %v863_v53  ;;  %v818_v60 = vrot.slane %v811_v44, 7  ;;  %756 = vrot.lane.b32.xlu1 %v755_v57, %s7861_s28  ;;  %v821_v2 = vrot.slane %v812_v49, 6  ;;  %v906_v28 = vld [vmem:[%s7950_s26 + $0x7b] sm:$0x1]  ;;  %v925_v43 = vld [vmem:[%s7950_s26 + $0x1c] sm:$0x1] }
  0x48   : > { %v803_v63 = vsel %vm282_vm4, %v802_v37, %v801_v58  ;;  %v866_v1 = vsel %vm277_vm2, %v865_v48, %v864_v59  ;;  %v824_v3 = vrot.slane %v813_v50, 5  ;;  %v840_v9 = vrot.slane %v833_v56, 7  ;;  %v928_v44 = vld [vmem:[%s7950_s26 + $0x7c] sm:$0x1]  ;;  %v948_v49 = vld [vmem:[%s7950_s26 + $0x3d] sm:$0x1] }
  0x49   : > { %v804_v6 = vsel %vm284_vm5, %v802_v37, %v803_v63  ;;  %v867_v7 = vsel %vm279_vm3, %v865_v48, %v866_v1  ;;  %v819_v8 = vsel %vm272_vm0, %v818_v60, %v810_v55  ;;  %v843_v14 = vrot.slane %v834_v61, 6  ;;  %v949_v53 = vld [vmem:[%s7950_s26 + $0x5d] sm:$0x1]  ;;  %s11497_s28 = smov 55  }
  0x4a   : > { %805 = vrot.lane.b32.xlu0 %v804_v6, %s7862_s8  ;;  %v869_v12 = vsel %vm282_vm4, %v868_v54, %v867_v7  ;;  %v820_v13 = vsel %vm274_vm1, %v818_v60, %v819_v8  ;;  %v846_v15 = vrot.slane %v835_v62, 5  ;;  %v841_v20 = vsel %vm272_vm0, %v840_v9, %v832_v4  ;;  %v947_v58 = vld [vmem:[%s7950_s26 + $0x1d] sm:$0x1]  ;;  %v971_v4 = vld [vmem:[%s7950_s26 + $0x5e] sm:$0x1]  ;;  %s11481_s8 = smov 20  }
  0x4b   : > { %v870_v18 = vsel %vm284_vm5, %v868_v54, %v869_v12  ;;  %v822_v19 = vsel %vm277_vm2, %v821_v2, %v820_v13  ;;  %v889_v21 = vrot.slane %v882_v5, 7  ;;  %v842_v24 = vsel %vm274_vm1, %v840_v9, %v841_v20  ;;  %v950_v59 = vld [vmem:[%s7950_s26 + $0x7d] sm:$0x1]  ;;  %v992_v8 = vld [vmem:[%s7950_s26 + $0x3f] sm:$0x1] }
  0x4c   : > { %871 = vrot.lane.b32.xlu1 %v870_v18, %s11474_s9  ;;  %v823_v23 = vsel %vm279_vm3, %v821_v2, %v822_v19  ;;  %v892_v25 = vrot.slane %v883_v10, 6  ;;  %v895_v26 = vrot.slane %v884_v11, 5  ;;  %v844_v30 = vsel %vm277_vm2, %v843_v14, %v842_v24  ;;  %v993_v9 = vld [vmem:[%s7950_s26 + $0x5f] sm:$0x1]  ;;  %v969_v12 = vld [vmem:[%s7950_s26 + $0x1e] sm:$0x1] }
  0x4d   : > { %v825_v29 = vsel %vm282_vm4, %v824_v3, %v823_v23  ;;  %v890_v31 = vsel %vm272_vm0, %v889_v21, %v881_v16  ;;  %v911_v32 = vrot.slane %v904_v17, 7  ;;  %v845_v35 = vsel %vm279_vm3, %v843_v14, %v844_v30  ;;  %v972_v13 = vld [vmem:[%s7950_s26 + $0x7e] sm:$0x1]  ;;  %v991_v18 = vld [vmem:[%s7950_s26 + $0x1f] sm:$0x1] }
  0x4e   : > { %v826_v34 = vsel %vm284_vm5, %v824_v3, %v825_v29  ;;  %v891_v36 = vsel %vm274_vm1, %v889_v21, %v890_v31  ;;  %v914_v37 = vrot.slane %v905_v22, 6  ;;  %v847_v39 = vsel %vm282_vm4, %v846_v15, %v845_v35  ;;  %v970_v3 = vld [vmem:[%s7950_s26 + $0x3e] sm:$0x1]  ;;  %v994_v19 = vld [vmem:[%s7950_s26 + $0x7f] sm:$0x1]  ;;  %s7869_s26 = smov 2  }
  0x4f   : > { %827 = vrot.lane.b32.xlu0 %v826_v34, %s7864_s10  ;;  %v893_v40 = vsel %vm277_vm2, %v892_v25, %v891_v36  ;;  %v912_v41 = vsel %vm272_vm0, %v911_v32, %v903_v27  ;;  %v917_v42 = vrot.slane %v906_v28, 5  ;;  %v848_v45 = vsel %vm284_vm5, %v846_v15, %v847_v39  ;;  %s7881_s10 = smov 113  }
  0x50   : > { %v894_v46 = vsel %vm279_vm3, %v892_v25, %v893_v40  ;;  %v913_v47 = vsel %vm274_vm1, %v911_v32, %v912_v41  ;;  %v933_v48 = vrot.slane %v926_v33, 7  ;;  %849 = vrot.lane.b32.xlu1 %v848_v45, %s7865_s11  ;;  %v936_v52 = vrot.slane %v927_v38, 6 }
  0x51   : > { %v896_v50 = vsel %vm282_vm4, %v895_v26, %v894_v46  ;;  %v915_v51 = vsel %vm277_vm2, %v914_v37, %v913_v47  ;;  %v939_v57 = vrot.slane %v928_v44, 5  ;;  %v955_v62 = vrot.slane %v948_v49, 7 }
  0x52   : > { %v897_v54 = vsel %vm284_vm5, %v895_v26, %v896_v50  ;;  %v916_v55 = vsel %vm279_vm3, %v914_v37, %v915_v51  ;;  %v934_v56 = vsel %vm272_vm0, %v933_v48, %v925_v43  ;;  %v958_v2 = vrot.slane %v949_v53, 6 }
  0x53   : > { %898 = vrot.lane.b32.xlu0 %v897_v54, %s7866_s12  ;;  %v918_v60 = vsel %vm282_vm4, %v917_v42, %v916_v55  ;;  %v935_v61 = vsel %vm274_vm1, %v933_v48, %v934_v56  ;;  %v956_v6 = vsel %vm272_vm0, %v955_v62, %v947_v58  ;;  %v961_v7 = vrot.slane %v950_v59, 5 }
  0x54   : > { %v919_v63 = vsel %vm284_vm5, %v917_v42, %v918_v60  ;;  %v937_v1 = vsel %vm277_vm2, %v936_v52, %v935_v61  ;;  %v957_v11 = vsel %vm274_vm1, %v955_v62, %v956_v6  ;;  %v977_v16 = vrot.slane %v970_v3, 7 }
  0x55   : > { %920 = vrot.lane.b32.xlu1 %v919_v63, %s11493_s13  ;;  %v938_v5 = vsel %vm279_vm3, %v936_v52, %v937_v1  ;;  %v959_v15 = vsel %vm277_vm2, %v958_v2, %v957_v11  ;;  %v980_v17 = vrot.slane %v971_v4, 6  ;;  %v999_v21 = vrot.slane %v992_v8, 7 }
  0x56   : > { %v940_v10 = vsel %vm282_vm4, %v939_v57, %v938_v5  ;;  %v960_v20 = vsel %vm279_vm3, %v958_v2, %v959_v15  ;;  %v1002_v22 = vrot.slane %v993_v9, 6  ;;  %v978_v24 = vsel %vm272_vm0, %v977_v16, %v969_v12 }
  0x57   : > { %v941_v14 = vsel %vm284_vm5, %v939_v57, %v940_v10  ;;  %v962_v23 = vsel %vm282_vm4, %v961_v7, %v960_v20  ;;  %v983_v25 = vrot.slane %v972_v13, 5  ;;  %v979_v27 = vsel %vm274_vm1, %v977_v16, %v978_v24 }
  0x58   : > { %942 = vrot.lane.b32.xlu0 %v941_v14, %s7868_s14  ;;  %v963_v26 = vsel %vm284_vm5, %v961_v7, %v962_v23  ;;  %v1000_v28 = vsel %vm272_vm0, %v999_v21, %v991_v18  ;;  %v1005_v29 = vrot.slane %v994_v19, 5  ;;  %v981_v30 = vsel %vm277_vm2, %v980_v17, %v979_v27 }
  0x59   : > { %964 = vrot.lane.b32.xlu1 %v963_v26, %s7869_s26  ;;  %v1001_v31 = vsel %vm274_vm1, %v999_v21, %v1000_v28  ;;  %v982_v32 = vsel %vm279_vm3, %v980_v17, %v981_v30  ;;  %vm360_vm0 = vcmask 995024   ;;  %vm387_vm1 = vmor %vm386_vm13, %vm385_vm12  ;;  %vm549_vm12 = vcmask 1044432   ;;  %s11463_s26 = smov 112  }
  0x5a   : > { %v1003_v33 = vsel %vm277_vm2, %v1002_v22, %v1001_v31  ;;  %v984_v34 = vsel %vm282_vm4, %v983_v25, %v982_v32  ;;  %vm453_vm2 = vcmask 867328   ;;  %vm550_vm13 = vcmask 211972  }
  0x5b   : > { %v1004_v35 = vsel %vm279_vm3, %v1002_v22, %v1003_v33  ;;  %v985_v36 = vsel %vm284_vm5, %v983_v25, %v984_v34  ;;  %vm409_vm3 = vcmask 535824  }
  0x5c   : > { %v1006_v37 = vsel %vm282_vm4, %v1005_v29, %v1004_v35  ;;  %986 = vrot.lane.b32.xlu0 %v985_v36, %s7870_s15  ;;  %vm456_vm4 = vcmask 1044304   ;;  %s11459_s15 = smov 111  }
  0x5d   : > { %v1007_v38 = vsel %vm284_vm5, %v1005_v29, %v1006_v37  ;;  %vm457_vm5 = vcmask 80900  }
  0x5e   : > { %1008 = vrot.lane.b32.xlu1 %v1007_v38, %s7871_s16  ;;  %vm458_vm7 = vmor %vm457_vm5, %vm456_vm4  ;;  %vm595_vm4 = vcmask 798224  }
  0x8c   : > { %v287_v39 = vpop.permute.xlu0 %286  ;;  %v380_v41 = vpop.permute.xlu1 %379 }
  0x8d   : > { %v288_v40 = vrot.slane %v287_v39, 4  ;;  %v381_v44 = vrot.slane %v380_v41, 4 }
  0x8f   : > { %v290_v42 = vsel %vm11470_vm8, %v288_v40, %v287_v39  ;;  %v383_v47 = vsel %vm382_vm15, %v381_v44, %v380_v41  ;;  %vm551_vm15 = vmor %vm550_vm13, %vm549_vm12  ;;  %vm688_vm12 = vcmask 929424  }
  0x90   : > { %295 = vst.msk [vmem:[#allocation2] sm:$0xff] %vm294_vm9, %v290_v42  ;;  %v314_v43 = vpop.permute.xlu0 %313  ;;  %vm480_vm9 = vcmask 371824  }
  0x91   : > { %317 = vst.msk [vmem:[#allocation2 + $0x4] sm:$0xf] %vm316_vm10, %v314_v43  ;;  %v336_v45 = vpop.permute.xlu1 %335  ;;  %vm546_vm10 = vcmask 998400  }
  0x92   : > { %339 = vst.msk [vmem:[#allocation2 + $0x4] sm:$0xf] %vm338_vm11, %v336_v45  ;;  %vm502_vm11 = vcmask 667024  }
  0x94   : > { %v358_v46 = vpop.permute.xlu0 %357 }
  0x95   : > { %361 = vst.msk [vmem:[#allocation2 + $0x4] sm:$0xf] %vm360_vm0, %v358_v46  ;;  %v451_v48 = vpop.permute.xlu1 %450  ;;  %vm617_vm0 = vcmask 834560  }
  0x96   : > { %388 = vst.msk [vmem:[#allocation2 + $0x4] sm:$0xff] %vm387_vm1, %v383_v47  ;;  %v452_v49 = vrot.slane %v451_v48, 4  ;;  %vm573_vm1 = vcmask 503024  }
  0x98   : > { %v407_v50 = vpop.permute.xlu0 %406  ;;  %v454_v51 = vsel %vm453_vm2, %v452_v49, %v451_v48  ;;  %vm620_vm2 = vcmask 1044272  }
  0x99   : > { %410 = vst.msk [vmem:[#allocation2 + $0x8] sm:$0xf] %vm409_vm3, %v407_v50  ;;  %vm621_vm3 = vcmask 48132  }
  0x9a   : > { %v429_v52 = vpop.permute.xlu1 %428  ;;  %vm622_vm5 = vmor %vm621_vm3, %vm620_vm2  ;;  %vm759_vm2 = vcmask 765424  }
  0x9b   : > { %432 = vst.msk [vmem:[#allocation2 + $0x8] sm:$0xf] %vm431_vm6, %v429_v52  ;;  %vm644_vm6 = vcmask 339024  }
  0x9c   : > { %459 = vst.msk [vmem:[#allocation2 + $0x8] sm:$0xff] %vm458_vm7, %v454_v51  ;;  %vm710_vm7 = vcmask 965632  }
  0x9d   : > { %v8284_v53 = vld [vmem:[#allocation2] sm:$0xff]  ;;  %v478_v54 = vpop.permute.xlu0 %477 }
  0x9e   : > { %1093 = vrot.lane.b32.xlu0 %v8284_v53, %s7872_s17  ;;  %v8290_v55 = vcombine.low %v8284_v53, %v8284_v53  ;;  %481 = vst.msk [vmem:[#allocation2 + $0xc] sm:$0xf] %vm480_vm9, %v478_v54  ;;  %v544_v56 = vpop.permute.xlu1 %543  ;;  %vm666_vm9 = vcmask 634224   ;;  %v1023_v27 = vcombine.high %v8284_v53, %v8284_v53 }
  0x9f   : > { %v545_v57 = vrot.slane %v544_v56, 4 }
  0xa0   : > { %1091 = vrot.lane.b32.xlu1 %v8290_v55, %s7872_s17 }
  0xa1   : > { %v500_v58 = vpop.permute.xlu0 %499  ;;  %v547_v59 = vsel %vm546_vm10, %v545_v57, %v544_v56  ;;  %vm713_vm10 = vcmask 1044400  }
  0xa2   : > { %1219 = vrot.lane.b32.xlu0 %v8284_v53, %s7873_s18  ;;  %503 = vst.msk [vmem:[#allocation2 + $0xc] sm:$0xf] %vm502_vm11, %v500_v58  ;;  %vm714_vm11 = vcmask 179204  }
  0xa3   : > { %v522_v60 = vpop.permute.xlu1 %521  ;;  %vm715_vm13 = vmor %vm714_vm11, %vm713_vm10  ;;  %v8316_v11 = vld [vmem:[#allocation2 + $0x4] sm:$0xff]  ;;  %vm852_vm10 = vcmask 896624  }
  0xa4   : > { %1217 = vrot.lane.b32.xlu1 %v8290_v55, %s7873_s18  ;;  %525 = vst.msk [vmem:[#allocation2 + $0xc] sm:$0xf] %vm524_vm14, %v522_v60  ;;  %vm781_vm14 = vcmask 801792   ;;  %v8324_v14 = vcombine.low %v8316_v11, %v8316_v11  ;;  %v8389_v33 = vcombine.high %v8316_v11, %v8316_v11 }
  0xa5   : > { %552 = vst.msk [vmem:[#allocation2 + $0xc] sm:$0xff] %vm551_vm15, %v547_v59  ;;  %vm737_vm15 = vcmask 470224  }
  0xa6   : > { %1028 = vrot.lane.b32.xlu0 %v8284_v53, %s7868_s14  ;;  %v615_v61 = vpop.permute.xlu0 %614 }
  0xa7   : > { %v616_v62 = vrot.slane %v615_v61, 4  ;;  %v571_v63 = vpop.permute.xlu1 %570 }
  0xa8   : > { %1343 = vrot.lane.b32.xlu1 %v8290_v55, %s11493_s13  ;;  %574 = vst.msk [vmem:[#allocation2 + $0x10] sm:$0xf] %vm573_vm1, %v571_v63  ;;  %vm785_vm1 = vcmask 15364  }
  0xa9   : > { %v618_v1 = vsel %vm617_vm0, %v616_v62, %v615_v61  ;;  %vm784_vm0 = vcmask 1044240  }
  0xaa   : > { %1154 = vrot.lane.b32.xlu0 %v8284_v53, %s7874_s19  ;;  %v593_v2 = vpop.permute.xlu0 %592  ;;  %vm786_vm3 = vmor %vm785_vm1, %vm784_vm0  ;;  %vm989_vm0 = vcmask 568624   ;;  %vm1011_vm1 = vcmask 863824  }
  0xab   : > { %596 = vst.msk [vmem:[#allocation2 + $0x10] sm:$0xf] %vm595_vm4, %v593_v2  ;;  %vm808_vm4 = vcmask 306224  }
  0xac   : > { %1469 = vrot.lane.b32.xlu1 %v8290_v55, %s11489_s20  ;;  %623 = vst.msk [vmem:[#allocation2 + $0x10] sm:$0xff] %vm622_vm5, %v618_v1  ;;  %v642_v3 = vpop.permute.xlu1 %641  ;;  %vm11467_vm5 = vcmask 932864   ;;  %v8330_v18 = vld [vmem:[#allocation2 + $0x8] sm:$0xff] }
  0xad   : > { %645 = vst.msk [vmem:[#allocation2 + $0x14] sm:$0xf] %vm644_vm6, %v642_v3  ;;  %vm830_vm6 = vcmask 601424   ;;  %v1087_v30 = vcombine.low %v8330_v18, %v8330_v18  ;;  %v8457_v52 = vcombine.high %v8330_v18, %v8330_v18 }
  0xae   : > { %1345 = vrot.lane.b32.xlu0 %v8284_v53, %s11493_s13 }
  0xaf   : > { %v708_v4 = vpop.permute.xlu0 %707 }
  0xb0   : > { %1595 = vrot.lane.b32.xlu1 %v8290_v55, %s11495_s30  ;;  %v709_v5 = vrot.slane %v708_v4, 4  ;;  %v664_v6 = vpop.permute.xlu1 %663 }
  0xb1   : > { %667 = vst.msk [vmem:[#allocation2 + $0x14] sm:$0xf] %vm666_vm9, %v664_v6  ;;  %vm878_vm9 = vcmask 146436  }
  0xb2   : > { %1471 = vrot.lane.b32.xlu0 %v8284_v53, %s11489_s20  ;;  %v711_v7 = vsel %vm710_vm7, %v709_v5, %v708_v4  ;;  %vm877_vm7 = vcmask 1044368  }
  0xb3   : > { %v686_v8 = vpop.permute.xlu0 %685  ;;  %vm879_vm11 = vmor %vm878_vm9, %vm877_vm7  ;;  %v8379_v31 = vld [vmem:[#allocation2 + $0xc] sm:$0xff]  ;;  %vm11506_vm7 = vcmask 441344   ;;  %vm11488_vm9 = vcmask 171008  }
  0xb4   : > { %1721 = vrot.lane.b32.xlu1 %v8290_v55, %s11483_s23  ;;  %689 = vst.msk [vmem:[#allocation2 + $0x14] sm:$0xf] %vm688_vm12, %v686_v8  ;;  %vm901_vm12 = vcmask 437424   ;;  %v1969_v32 = vcombine.low %v8379_v31, %v8379_v31 }
  0xb5   : > { %716 = vst.msk [vmem:[#allocation2 + $0x14] sm:$0xff] %vm715_vm13, %v711_v7  ;;  %v779_v9 = vpop.permute.xlu1 %778  ;;  %vm923_vm13 = vcmask 732624  }
  0xb6   : > { %1280 = vrot.lane.b32.xlu0 %v8284_v53, %s7844_s7  ;;  %v780_v10 = vrot.slane %v779_v9, 4 }
  0xb8   : > { %1847 = vrot.lane.b32.xlu1 %v8290_v55, %s11479_s24  ;;  %v735_v12 = vpop.permute.xlu0 %734  ;;  %v782_v13 = vsel %vm781_vm14, %v780_v10, %v779_v9  ;;  %vm945_vm14 = vcmask 1027824  }
  0xb9   : > { %738 = vst.msk [vmem:[#allocation2 + $0x18] sm:$0xf] %vm737_vm15, %v735_v12  ;;  %v757_v15 = vpop.permute.xlu1 %756  ;;  %vm967_vm15 = vcmask 273424  }
  0xba   : > { %1406 = vrot.lane.b32.xlu0 %v8284_v53, %s11491_s25  ;;  %760 = vst.msk [vmem:[#allocation2 + $0x18] sm:$0xf] %vm759_vm2, %v757_v15  ;;  %vm11485_vm2 = vcmask 760832  }
  0xbb   : > { %787 = vst.msk [vmem:[#allocation2 + $0x18] sm:$0xff] %vm786_vm3, %v782_v13  ;;  %vm1237_vm3 = vcmask 744448  }
  0xbc   : > { %1973 = vrot.lane.b32.xlu1 %v8324_v14, %s11474_s9  ;;  %v806_v16 = vpop.permute.xlu0 %805  ;;  %v8467_v55 = vld [vmem:[#allocation2 + $0x10] sm:$0xff] }
  0xbd   : > { %809 = vst.msk [vmem:[#allocation2 + $0x1c] sm:$0xf] %vm808_vm4, %v806_v16  ;;  %vm1363_vm4 = vcmask 474112   ;;  %v8481_v59 = vcombine.low %v8467_v55, %v8467_v55  ;;  %v8517_v6 = vcombine.high %v8467_v55, %v8467_v55 }
  0xbe   : > { %1597 = vrot.lane.b32.xlu0 %v8284_v53, %s11495_s30  ;;  %v872_v17 = vpop.permute.xlu1 %871 }
  0xbf   : > { %v873_v19 = vrot.slane %v872_v17, 4 }
  0xc0   : > { %1032 = vrot.lane.b32.xlu1 %v8330_v18, %s7868_s14 }
  0xc1   : > { %v828_v20 = vpop.permute.xlu0 %827  ;;  %v875_v21 = vsel %vm11467_vm5, %v873_v19, %v872_v17 }
  0xc2   : > { %1723 = vrot.lane.b32.xlu0 %v8284_v53, %s11483_s23  ;;  %831 = vst.msk [vmem:[#allocation2 + $0x1c] sm:$0xf] %vm830_vm6, %v828_v20  ;;  %v850_v22 = vpop.permute.xlu1 %849  ;;  %vm11486_vm6 = vcmask 457728  }
  0xc3   : > { %853 = vst.msk [vmem:[#allocation2 + $0x1c] sm:$0xf] %vm852_vm10, %v850_v22  ;;  %vm11466_vm10 = vcmask 154624  }
  0xc4   : > { %1158 = vrot.lane.b32.xlu1 %v8330_v18, %s7874_s19  ;;  %880 = vst.msk [vmem:[#allocation2 + $0x1c] sm:$0xff] %vm879_vm11, %v875_v21  ;;  %vm11478_vm11 = vcmask 769024  }
  0xc5   : > { %v899_v23 = vpop.permute.xlu0 %898 }
  0xc6   : > { %1532 = vrot.lane.b32.xlu0 %v8284_v53, %s11497_s28  ;;  %902 = vst.msk [vmem:[#allocation2 + $0x20] sm:$0xf] %vm901_vm12, %v899_v23  ;;  %vm1174_vm12 = vcmask 752640  }
  0xc7   : > { %v921_v24 = vpop.permute.xlu1 %920 }
  0xc8   : > { %1284 = vrot.lane.b32.xlu1 %v8330_v18, %s7844_s7  ;;  %924 = vst.msk [vmem:[#allocation2 + $0x20] sm:$0xf] %vm923_vm13, %v921_v24  ;;  %vm1300_vm13 = vcmask 736256  }
  0xca   : > { %1658 = vrot.lane.b32.xlu0 %v8284_v53, %s7866_s12  ;;  %v943_v25 = vpop.permute.xlu0 %942 }
  0xcb   : > { %946 = vst.msk [vmem:[#allocation2 + $0x20] sm:$0xf] %vm945_vm14, %v943_v25  ;;  %v965_v26 = vpop.permute.xlu1 %964  ;;  %vm11487_vm14 = vcmask 465920  }
  0xcc   : > { %1410 = vrot.lane.b32.xlu1 %v8330_v18, %s11491_s25  ;;  %968 = vst.msk [vmem:[#allocation2 + $0x24] sm:$0xf] %vm967_vm15, %v965_v26  ;;  %v11503_v26 = vmov 0   ;;  %vm1552_vm15 = vcmask 449536  }
  0xcd   : > { %2836 = vmatprep.mubr.bf16.mxu0 %v11503_v26  ;;  %2877 = vmatprep.mubr.bf16.mxu1 %v11503_v26 }
  0xce   : > { %1849 = vrot.lane.b32.xlu0 %v8284_v53, %s11479_s24  ;;  %v987_v28 = vpop.permute.xlu0 %986 }
  0xcf   : > { %990 = vst.msk [vmem:[#allocation2 + $0x24] sm:$0xf] %vm989_vm0, %v987_v28  ;;  %7087 = vset.pattern.permute.xlu0 %v11503_v26  ;;  %vm11465_vm0 = vcmask 179200  }
  0xd0   : > { %1536 = vrot.lane.b32.xlu1 %v8330_v18, %s11497_s28  ;;  %v1009_v29 = vpop.permute.xlu1 %1008 }
  0xd1   : > { %1012 = vst.msk [vmem:[#allocation2 + $0x24] sm:$0xf] %vm1011_vm1, %v1009_v29  ;;  %vm11502_vm1 = vcmask 162816  }
  0xd2   : > { %1030 = vrot.lane.b32.xlu0 %v1023_v27, %s7868_s14 }
  0xd4   : > { %1662 = vrot.lane.b32.xlu1 %v8330_v18, %s7866_s12 }
  0xd6   : > { %1156 = vrot.lane.b32.xlu0 %v1023_v27, %s7874_s19 }
  0xd8   : > { %1788 = vrot.lane.b32.xlu1 %v8330_v18, %s11481_s8 }
  0xda   : > { %1282 = vrot.lane.b32.xlu0 %v1023_v27, %s7844_s7 }
  0xdc   : > { %1914 = vrot.lane.b32.xlu1 %v8330_v18, %s11476_s29 }
  0xde   : > { %1408 = vrot.lane.b32.xlu0 %v1023_v27, %s11491_s25 }
  0xe0   : > { %1095 = vrot.lane.b32.xlu1 %v1087_v30, %s7872_s17 }
  0xe2   : > { %1534 = vrot.lane.b32.xlu0 %v1023_v27, %s11497_s28 }
  0xe4   : > { %1221 = vrot.lane.b32.xlu1 %v1087_v30, %s7873_s18 }
  0xe6   : > { %1660 = vrot.lane.b32.xlu0 %v1023_v27, %s7866_s12 }
  0xe8   : > { %1347 = vrot.lane.b32.xlu1 %v1087_v30, %s11493_s13 }
  0xea   : > { %1786 = vrot.lane.b32.xlu0 %v1023_v27, %s11481_s8 }
  0xec   : > { %1473 = vrot.lane.b32.xlu1 %v1087_v30, %s11489_s20 }
  0xee   : > { %1912 = vrot.lane.b32.xlu0 %v1023_v27, %s11476_s29 }
  0xf0   : > { %1599 = vrot.lane.b32.xlu1 %v1087_v30, %s11495_s30 }
  0xf2   : > { %1975 = vrot.lane.b32.xlu0 %v8316_v11, %s11474_s9 }
  0xf4   : > { %1725 = vrot.lane.b32.xlu1 %v1087_v30, %s11483_s23 }
  0xf6   : > { %1784 = vrot.lane.b32.xlu0 %v8284_v53, %s11481_s8 }
  0xf8   : > { %1851 = vrot.lane.b32.xlu1 %v1087_v30, %s11479_s24 }
  0xfa   : > { %1910 = vrot.lane.b32.xlu0 %v8284_v53, %s11476_s29 }
  0xfc   : > { %1977 = vrot.lane.b32.xlu1 %v1969_v32, %s11474_s9 }
  0xfe   : > { %2037 = vrot.lane.b32.xlu0 %v8389_v33, %s7881_s10 }
 0x100   : > { %2039 = vrot.lane.b32.xlu1 %v8379_v31, %s7881_s10 }
 0x102   : > { %2100 = vrot.lane.b32.xlu0 %v8316_v11, %s11463_s26 }
 0x104   : > { %2102 = vrot.lane.b32.xlu1 %v1969_v32, %s11463_s26 }
 0x106   : > { %2163 = vrot.lane.b32.xlu0 %v8389_v33, %s11459_s15 }
 0x108   : > { %2165 = vrot.lane.b32.xlu1 %v8379_v31, %s11459_s15 }
 0x10a   : > { %2226 = vrot.lane.b32.xlu0 %v8316_v11, %s11461_s27 }
 0x10c   : > { %2228 = vrot.lane.b32.xlu1 %v1969_v32, %s11461_s27 }
 0x10e   : > { %2035 = vrot.lane.b32.xlu0 %v8316_v11, %s7881_s10 }
 0x110   : > { %2098 = vrot.lane.b32.xlu1 %v8324_v14, %s11463_s26  ;;  %v8409_v34 = vpop.permute.xlu0 %1093  ;;  %s7886_s26 = smov 75  }
 0x112   : > { %v1092_v35 = vpop.permute.xlu1 %1091  ;;  %2161 = vrot.lane.b32.xlu0 %v8316_v11, %s11459_s15  ;;  %s7884_s15 = smov 77  }
 0x113   : > { %v1112_v36 = vsel %vm11485_vm2, %v1092_v35, %v8409_v34 }
 0x114   : > { %1130 = vst [vmem:[#allocation4] sm:$0xf0] %v1112_v36  ;;  %2224 = vrot.lane.b32.xlu1 %v8324_v14, %s11461_s27  ;;  %v8417_v37 = vpop.permute.xlu0 %1219  ;;  %s7885_s27 = smov 76  }
 0x116   : > { %v1218_v38 = vpop.permute.xlu1 %1217  ;;  %2288 = vrot.lane.b32.xlu0 %v8389_v33, %s7865_s11 }
 0x117   : > { %v1238_v39 = vsel %vm1237_vm3, %v1218_v38, %v8417_v37 }
 0x118   : > { %1256 = vst [vmem:[#allocation4 + $0x48] sm:$0xf0] %v1238_v39  ;;  %2290 = vrot.lane.b32.xlu1 %v8379_v31, %s7865_s11  ;;  %v8425_v40 = vpop.permute.xlu0 %1028 }
 0x11a   : > { %v1344_v41 = vpop.permute.xlu1 %1343  ;;  %2351 = vrot.lane.b32.xlu0 %v8316_v11, %s7884_s15 }
 0x11c   : > { %2353 = vrot.lane.b32.xlu1 %v1969_v32, %s7884_s15  ;;  %v8430_v42 = vpop.permute.xlu0 %1154 }
 0x11e   : > { %v1470_v43 = vpop.permute.xlu1 %1469  ;;  %2414 = vrot.lane.b32.xlu0 %v8389_v33, %s7885_s27 }
 0x120   : > { %2416 = vrot.lane.b32.xlu1 %v8379_v31, %s7885_s27  ;;  %v8436_v44 = vpop.permute.xlu0 %1345 }
 0x121   : > { %v1364_v45 = vsel %vm1363_vm4, %v1344_v41, %v8436_v44 }
 0x122   : > { %1382 = vst [vmem:[#allocation4 + $0x90] sm:$0xf0] %v1364_v45  ;;  %v1596_v46 = vpop.permute.xlu1 %1595  ;;  %2477 = vrot.lane.b32.xlu0 %v8316_v11, %s7886_s26 }
 0x124   : > { %2479 = vrot.lane.b32.xlu1 %v1969_v32, %s7886_s26  ;;  %v8443_v47 = vpop.permute.xlu0 %1471 }
 0x125   : > { %v1490_v48 = vsel %vm11486_vm6, %v1470_v43, %v8443_v47 }
 0x126   : > { %1508 = vst [vmem:[#allocation4 + $0xd8] sm:$0xf0] %v1490_v48  ;;  %v1722_v49 = vpop.permute.xlu1 %1721  ;;  %2286 = vrot.lane.b32.xlu0 %v8316_v11, %s7865_s11 }
 0x128   : > { %2349 = vrot.lane.b32.xlu1 %v8324_v14, %s7884_s15  ;;  %v8451_v50 = vpop.permute.xlu0 %1280 }
 0x12a   : > { %v1848_v51 = vpop.permute.xlu1 %1847  ;;  %2412 = vrot.lane.b32.xlu0 %v8316_v11, %s7885_s27 }
 0x12c   : > { %2475 = vrot.lane.b32.xlu1 %v8324_v14, %s7886_s26  ;;  %v8461_v53 = vpop.permute.xlu0 %1406 }
 0x12e   : > { %v8463_v54 = vpop.permute.xlu1 %1973  ;;  %1034 = vrot.lane.b32.xlu0 %v8457_v52, %s7868_s14 }
 0x130   : > { %1036 = vrot.lane.b32.xlu1 %v8467_v55, %s7868_s14  ;;  %v8471_v56 = vpop.permute.xlu0 %1597 }
 0x131   : > { %v1616_v57 = vsel %vm11506_vm7, %v1596_v46, %v8471_v56 }
 0x132   : > { %1634 = vst [vmem:[#allocation4 + $0x120] sm:$0xf0] %v1616_v57  ;;  %v8475_v58 = vpop.permute.xlu1 %1032  ;;  %1097 = vrot.lane.b32.xlu0 %v8330_v18, %s7872_s17 }
 0x134   : > { %1099 = vrot.lane.b32.xlu1 %v8481_v59, %s7872_s17  ;;  %v8485_v60 = vpop.permute.xlu0 %1723 }
 0x135   : > { %v1742_v61 = vsel %vm11488_vm9, %v1722_v49, %v8485_v60 }
 0x136   : > { %1760 = vst [vmem:[#allocation4 + $0x168] sm:$0xf0] %v1742_v61  ;;  %v8489_v62 = vpop.permute.xlu1 %1158  ;;  %1160 = vrot.lane.b32.xlu0 %v8457_v52, %s7874_s19 }
 0x138   : > { %1162 = vrot.lane.b32.xlu1 %v8467_v55, %s7874_s19  ;;  %v8495_v63 = vpop.permute.xlu0 %1532 }
 0x13a   : > { %v8497_v1 = vpop.permute.xlu1 %1284  ;;  %1223 = vrot.lane.b32.xlu0 %v8330_v18, %s7873_s18 }
 0x13c   : > { %1225 = vrot.lane.b32.xlu1 %v8481_v59, %s7873_s18  ;;  %v8503_v2 = vpop.permute.xlu0 %1658 }
 0x13e   : > { %v8505_v3 = vpop.permute.xlu1 %1410  ;;  %2538 = vrot.lane.b32.xlu0 %v8316_v11, %s7871_s16  ;;  %v8529_v11 = vld [vmem:[#allocation2 + $0x18] sm:$0xff] }
 0x13f   : > { %v8539_v14 = vcombine.low %v8529_v11, %v8529_v11 }
 0x140   : > { %2540 = vrot.lane.b32.xlu1 %v8389_v33, %s7871_s16  ;;  %v8511_v4 = vpop.permute.xlu0 %1849 }
 0x141   : > { %v1868_v5 = vsel %vm11466_vm10, %v1848_v51, %v8511_v4 }
 0x142   : > { %1886 = vst [vmem:[#allocation4 + $0x1b0] sm:$0xf0] %v1868_v5  ;;  %v8519_v7 = vpop.permute.xlu1 %1536  ;;  %2542 = vrot.lane.b32.xlu0 %v8379_v31, %s7871_s16 }
 0x144   : > { %1038 = vrot.lane.b32.xlu1 %v8517_v6, %s7868_s14  ;;  %v1031_v8 = vpop.permute.xlu0 %1030 }
 0x145   : > { %v1049_v9 = vsel %vm11478_vm11, %v8425_v40, %v1031_v8  ;;  %v1050_v10 = vsel %vm11478_vm11, %v1031_v8, %v8475_v58 }
 0x146   : > { %1067 = vst [vmem:[#allocation4] sm:$0xf] %v1049_v9  ;;  %1068 = vst [vmem:[#allocation4 + $0x8] sm:$0xf] %v1050_v10  ;;  %v8531_v12 = vpop.permute.xlu1 %1662  ;;  %1040 = vrot.lane.b32.xlu0 %v8529_v11, %s7868_s14 }
 0x148   : > { %1101 = vrot.lane.b32.xlu1 %v8467_v55, %s7872_s17  ;;  %v1157_v13 = vpop.permute.xlu0 %1156 }
 0x149   : > { %v1175_v15 = vsel %vm1174_vm12, %v8430_v42, %v1157_v13  ;;  %v1176_v16 = vsel %vm1174_vm12, %v1157_v13, %v8489_v62 }
 0x14a   : > { %1193 = vst [vmem:[#allocation4 + $0x48] sm:$0xf] %v1175_v15  ;;  %1194 = vst [vmem:[#allocation4 + $0x50] sm:$0xf] %v1176_v16  ;;  %v8545_v17 = vpop.permute.xlu1 %1788  ;;  %1103 = vrot.lane.b32.xlu0 %v8539_v14, %s7872_s17 }
 0x14c   : > { %1164 = vrot.lane.b32.xlu1 %v8517_v6, %s7874_s19  ;;  %v1283_v19 = vpop.permute.xlu0 %1282 }
 0x14d   : > { %v1301_v20 = vsel %vm1300_vm13, %v8451_v50, %v1283_v19  ;;  %v1302_v21 = vsel %vm1300_vm13, %v1283_v19, %v8497_v1  ;;  %v2587_v50 = vld [vmem:[#allocation4] sm:$0xff] }
 0x14e   : > { %1319 = vst [vmem:[#allocation4 + $0x90] sm:$0xf] %v1301_v20  ;;  %1320 = vst [vmem:[#allocation4 + $0x98] sm:$0xf] %v1302_v21  ;;  %v8555_v22 = vpop.permute.xlu1 %1914  ;;  %1166 = vrot.lane.b32.xlu0 %v8529_v11, %s7874_s19 }
 0x150   : > { %1227 = vrot.lane.b32.xlu1 %v8467_v55, %s7873_s18  ;;  %v1409_v23 = vpop.permute.xlu0 %1408 }
 0x151   : > { %v1427_v24 = vsel %vm11487_vm14, %v8461_v53, %v1409_v23  ;;  %v1428_v25 = vsel %vm11487_vm14, %v1409_v23, %v8505_v3  ;;  %v2596_v43 = vld [vmem:[#allocation4 + $0x48] sm:$0xff] }
 0x152   : > { %1445 = vst [vmem:[#allocation4 + $0xd8] sm:$0xf] %v1427_v24  ;;  %1446 = vst [vmem:[#allocation4 + $0xe0] sm:$0xf] %v1428_v25  ;;  %v8567_v27 = vpop.permute.xlu1 %1095  ;;  %1229 = vrot.lane.b32.xlu0 %v8539_v14, %s7873_s18  ;;  %v2704_v53 = vpack.c.bf16 %v2596_v43, %v2587_v50 }
 0x153   : > { %v1113_v28 = vsel %vm11485_vm2, %v8409_v34, %v8567_v27 }
 0x154   : > { %1131 = vst [vmem:[#allocation4 + $0x8] sm:$0xf0] %v1113_v28  ;;  %1286 = vrot.lane.b32.xlu1 %v8457_v52, %s7844_s7  ;;  %v1535_v29 = vpop.permute.xlu0 %1534 }
 0x155   : > { %v1553_v30 = vsel %vm1552_vm15, %v8495_v63, %v1535_v29  ;;  %v1554_v32 = vsel %vm1552_vm15, %v1535_v29, %v8519_v7 }
 0x156   : > { %1571 = vst [vmem:[#allocation4 + $0x120] sm:$0xf] %v1553_v30  ;;  %1572 = vst [vmem:[#allocation4 + $0x128] sm:$0xf] %v1554_v32  ;;  %v8581_v33 = vpop.permute.xlu1 %1221  ;;  %1288 = vrot.lane.b32.xlu0 %v8467_v55, %s7844_s7 }
 0x157   : > { %v1239_v34 = vsel %vm1237_vm3, %v8417_v37, %v8581_v33 }
 0x158   : > { %1257 = vst [vmem:[#allocation4 + $0x50] sm:$0xf0] %v1239_v34  ;;  %1349 = vrot.lane.b32.xlu1 %v8330_v18, %s11493_s13  ;;  %v1661_v35 = vpop.permute.xlu0 %1660 }
 0x159   : > { %v1679_v36 = vsel %vm11465_vm0, %v8503_v2, %v1661_v35  ;;  %v1680_v38 = vsel %vm11465_vm0, %v1661_v35, %v8531_v12  ;;  %vm11468_vm0 = vcmask 146432   ;;  %v2614_v5 = vld [vmem:[#allocation4 + $0xd8] sm:$0xff] }
 0x15a   : > { %1697 = vst [vmem:[#allocation4 + $0x168] sm:$0xf] %v1679_v36  ;;  %1698 = vst [vmem:[#allocation4 + $0x170] sm:$0xf] %v1680_v38  ;;  %v8594_v39 = vpop.permute.xlu1 %1347  ;;  %1351 = vrot.lane.b32.xlu0 %v8481_v59, %s11493_s13 }
 0x15b   : > { %v1365_v37 = vsel %vm1363_vm4, %v8436_v44, %v8594_v39  ;;  %v2588_v45 = vld [vmem:[#allocation4 + $0x8] sm:$0xff] }
 0x15c   : > { %1383 = vst [vmem:[#allocation4 + $0x98] sm:$0xf0] %v1365_v37  ;;  %1412 = vrot.lane.b32.xlu1 %v8457_v52, %s11491_s25  ;;  %v1787_v40 = vpop.permute.xlu0 %1786 }
 0x15d   : > { %v1806_v41 = vsel %vm11502_vm1, %v1787_v40, %v8545_v17  ;;  %v2623_v32 = vld [vmem:[#allocation4 + $0x120] sm:$0xff] }
 0x15e   : > { %1824 = vst [vmem:[#allocation4 + $0x1b8] sm:$0xf] %v1806_v41  ;;  %v8605_v42 = vpop.permute.xlu1 %1473  ;;  %1414 = vrot.lane.b32.xlu0 %v8467_v55, %s11491_s25 }
 0x15f   : > { %v1491_v44 = vsel %vm11486_vm6, %v8443_v47, %v8605_v42  ;;  %v2597_v46 = vld [vmem:[#allocation4 + $0x50] sm:$0xff] }
 0x160   : > { %1509 = vst [vmem:[#allocation4 + $0xe0] sm:$0xf0] %v1491_v44  ;;  %1475 = vrot.lane.b32.xlu1 %v8330_v18, %s11489_s20  ;;  %v1913_v48 = vpop.permute.xlu0 %1912  ;;  %v2705_v49 = vpack.c.bf16 %v2597_v46, %v2588_v45 }
 0x161   : > { %v1932_v51 = vsel %vm11468_vm0, %v1913_v48, %v8555_v22  ;;  %v2632_v24 = vld [vmem:[#allocation4 + $0x168] sm:$0xff] }
 0x162   : > { %1950 = vst [vmem:[#allocation4 + $0x200] sm:$0xf] %v1932_v51  ;;  %v8616_v57 = vpop.permute.xlu1 %1599  ;;  %1477 = vrot.lane.b32.xlu0 %v8481_v59, %s11489_s20  ;;  %2804 = vmatprep.subr.bf16.mxu0 %v2705_v49  ;;  %v2722_v34 = vpack.c.bf16 %v2632_v24, %v2623_v32 }
 0x163   : > { %v1617_v47 = vsel %vm11506_vm7, %v8471_v56, %v8616_v57  ;;  %2805 = vmatpush1.bf16.msra.mxu0 %v2704_v53  ;;  %v2606_v8 = vld [vmem:[#allocation4 + $0x98] sm:$0xff] }
 0x164   : > { %1635 = vst [vmem:[#allocation4 + $0x128] sm:$0xf0] %v1617_v47  ;;  %1290 = vrot.lane.b32.xlu1 %v8517_v6, %s7844_s7  ;;  %v1976_v61 = vpop.permute.xlu0 %1975 }
 0x165   : > { %v1993_v63 = vsel %vm11467_vm5, %v8463_v54, %v1976_v61  ;;  %v2605_v54 = vld [vmem:[#allocation4 + $0x90] sm:$0xff] }
 0x166   : > { %2011 = vst [vmem:[#allocation4 + $0x1f8] sm:$0xf0] %v1993_v63  ;;  %v8627_v2 = vpop.permute.xlu1 %1725  ;;  %1292 = vrot.lane.b32.xlu0 %v8529_v11, %s7844_s7  ;;  %v2713_v16 = vpack.c.bf16 %v2614_v5, %v2605_v54 }
 0x167   : > { %v1743_v56 = vsel %vm11488_vm9, %v8485_v60, %v8627_v2  ;;  %v2615_v9 = vld [vmem:[#allocation4 + $0xe0] sm:$0xff] }
 0x168   : > { %1761 = vst [vmem:[#allocation4 + $0x170] sm:$0xf0] %v1743_v56  ;;  %1353 = vrot.lane.b32.xlu1 %v8467_v55, %s11493_s13  ;;  %v1785_v10 = vpop.permute.xlu0 %1784  ;;  %v2714_v13 = vpack.c.bf16 %v2615_v9, %v2606_v8 }
 0x169   : > { %v1805_v15 = vsel %vm11502_vm1, %v1785_v10, %v1787_v40 }
 0x16a   : > { %1823 = vst [vmem:[#allocation4 + $0x1b0] sm:$0xf] %v1805_v15  ;;  %v8637_v19 = vpop.permute.xlu1 %1851  ;;  %1355 = vrot.lane.b32.xlu0 %v8539_v14, %s11493_s13  ;;  %2806 = vmatprep.subr.bf16.mxu0 %v2714_v13 }
 0x16b   : > { %v1869_v60 = vsel %vm11466_vm10, %v8511_v4, %v8637_v19  ;;  %2807 = vmatpush1.bf16.msra.mxu0 %v2713_v16  ;;  %v2624_v28 = vld [vmem:[#allocation4 + $0x128] sm:$0xff]  ;;  %vm11472_vm10 = vcmask 924672  }
 0x16c   : > { %1887 = vst [vmem:[#allocation4 + $0x1b8] sm:$0xf0] %v1869_v60  ;;  %1416 = vrot.lane.b32.xlu1 %v8517_v6, %s11491_s25  ;;  %v1911_v20 = vpop.permute.xlu0 %1910 }
 0x16d   : > { %v1931_v21 = vsel %vm11468_vm0, %v1911_v20, %v1913_v48  ;;  %vm11471_vm0 = vcmask 908288  }
 0x16e   : > { %1949 = vst [vmem:[#allocation4 + $0x1f8] sm:$0xf] %v1931_v21  ;;  %v8647_v23 = vpop.permute.xlu1 %1977  ;;  %1418 = vrot.lane.b32.xlu0 %v8529_v11, %s11491_s25 }
 0x16f   : > { %v1994_v25 = vsel %vm11467_vm5, %v1976_v61, %v8647_v23  ;;  %v2633_v4 = vld [vmem:[#allocation4 + $0x170] sm:$0xff]  ;;  %vm11469_vm5 = vcmask 916480  }
 0x170   : > { %2012 = vst [vmem:[#allocation4 + $0x200] sm:$0xf0] %v1994_v25  ;;  %1479 = vrot.lane.b32.xlu1 %v8467_v55, %s11489_s20  ;;  %v2038_v29 = vpop.permute.xlu0 %2037  ;;  %v2723_v30 = vpack.c.bf16 %v2633_v4, %v2624_v28 }
 0x171   : > { %v2641_v48 = vld [vmem:[#allocation4 + $0x1b0] sm:$0xff] }
 0x172   : > { %v8655_v35 = vpop.permute.xlu1 %2039  ;;  %1481 = vrot.lane.b32.xlu0 %v8539_v14, %s11489_s20  ;;  %2808 = vmatprep.subr.bf16.mxu0 %v2723_v30 }
 0x173   : > { %v2057_v36 = vsel %vm11472_vm10, %v2038_v29, %v8655_v35  ;;  %2809 = vmatpush1.bf16.msra.mxu0 %v2722_v34  ;;  %v2642_v43 = vld [vmem:[#allocation4 + $0x1b8] sm:$0xff] }
 0x174   : > { %2075 = vst [vmem:[#allocation4 + $0x248] sm:$0xf] %v2057_v36  ;;  %1538 = vrot.lane.b32.xlu1 %v8457_v52, %s11497_s28  ;;  %v2101_v38 = vpop.permute.xlu0 %2100 }
 0x175   : > { %v2650_v40 = vld [vmem:[#allocation4 + $0x1f8] sm:$0xff] }
 0x176   : > { %v8663_v37 = vpop.permute.xlu1 %2102  ;;  %1540 = vrot.lane.b32.xlu0 %v8467_v55, %s11497_s28  ;;  %v2731_v49 = vpack.c.bf16 %v2650_v40, %v2641_v48 }
 0x177   : > { %v2120_v41 = vsel %vm11469_vm5, %v2101_v38, %v8663_v37  ;;  %v2651_v44 = vld [vmem:[#allocation4 + $0x200] sm:$0xff] }
 0x178   : > { %2138 = vst [vmem:[#allocation4 + $0x248] sm:$0xf0] %v2120_v41  ;;  %1601 = vrot.lane.b32.xlu1 %v8330_v18, %s11495_s30  ;;  %v2164_v45 = vpop.permute.xlu0 %2163  ;;  %v2732_v46 = vpack.c.bf16 %v2651_v44, %v2642_v43 }
 0x17a   : > { %v8671_v50 = vpop.permute.xlu1 %2165  ;;  %1603 = vrot.lane.b32.xlu0 %v8481_v59, %s11495_s30  ;;  %2810 = vmatprep.subr.bf16.mxu0 %v2732_v46 }
 0x17b   : > { %v2183_v51 = vsel %vm11471_vm0, %v2164_v45, %v8671_v50  ;;  %2811 = vmatpush1.bf16.msra.mxu0 %v2731_v49 }
 0x17c   : > { %2201 = vst [vmem:[#allocation4 + $0x290] sm:$0xf] %v2183_v51  ;;  %1664 = vrot.lane.b32.xlu1 %v8457_v52, %s7866_s12  ;;  %v2227_v53 = vpop.permute.xlu0 %2226 }
 0x17e   : > { %v8679_v47 = vpop.permute.xlu1 %2228  ;;  %1666 = vrot.lane.b32.xlu0 %v8467_v55, %s7866_s12 }
 0x17f   : > { %v2245_v61 = vsel %vm11470_vm8, %v2227_v53, %v8679_v47  ;;  %v2660_v15 = vld [vmem:[#allocation4 + $0x248] sm:$0xff] }
 0x180   : > { %2263 = vst [vmem:[#allocation4 + $0x290] sm:$0xf0] %v2245_v61  ;;  %1727 = vrot.lane.b32.xlu1 %v8330_v18, %s11483_s23  ;;  %v2036_v63 = vpop.permute.xlu0 %2035 }
 0x181   : > { %v2056_v5 = vsel %vm11472_vm10, %v2036_v63, %v2038_v29  ;;  %vm11473_vm10 = vcmask 613376  }
 0x182   : > { %2074 = vst [vmem:[#allocation4 + $0x240] sm:$0xf] %v2056_v5  ;;  %v2099_v56 = vpop.permute.xlu1 %2098  ;;  %1729 = vrot.lane.b32.xlu0 %v8481_v59, %s11483_s23 }
 0x183   : > { %v2119_v8 = vsel %vm11469_vm5, %v2099_v56, %v2101_v38  ;;  %vm2306_vm5 = vcmask 637952  }
 0x184   : > { %2137 = vst [vmem:[#allocation4 + $0x240] sm:$0xf0] %v2119_v8  ;;  %1542 = vrot.lane.b32.xlu1 %v8517_v6, %s11497_s28  ;;  %v2162_v9 = vpop.permute.xlu0 %2161 }
 0x185   : > { %v2182_v10 = vsel %vm11471_vm0, %v2162_v9, %v2164_v45  ;;  %vm2432_vm0 = vcmask 621568  }
 0x186   : > { %2200 = vst [vmem:[#allocation4 + $0x288] sm:$0xf] %v2182_v10  ;;  %v2225_v13 = vpop.permute.xlu1 %2224  ;;  %1544 = vrot.lane.b32.xlu0 %v8529_v11, %s11497_s28 }
 0x187   : > { %v2244_v54 = vsel %vm11470_vm8, %v2225_v13, %v2227_v53  ;;  %v2669_v16 = vld [vmem:[#allocation4 + $0x290] sm:$0xff]  ;;  %vm2369_vm8 = vcmask 629760  }
 0x188   : > { %2262 = vst [vmem:[#allocation4 + $0x288] sm:$0xf0] %v2244_v54  ;;  %1605 = vrot.lane.b32.xlu1 %v8467_v55, %s11495_s30  ;;  %v2289_v60 = vpop.permute.xlu0 %2288  ;;  %v2741_v20 = vpack.c.bf16 %v2669_v16, %v2660_v15  ;;  %v8738_v53 = vld [vmem:[#allocation2 + $0x14] sm:$0xff] }
 0x18a   : > { %v8699_v21 = vpop.permute.xlu1 %2290  ;;  %1607 = vrot.lane.b32.xlu0 %v8539_v14, %s11495_s30  ;;  %2812 = vmatprep.subr.bf16.mxu0 %v2741_v20 }
 0x18b   : > { %v2308_v24 = vsel %vm2306_vm5, %v2289_v60, %v8699_v21  ;;  %v2659_v29 = vld [vmem:[#allocation4 + $0x240] sm:$0xff] }
 0x18c   : > { %2326 = vst [vmem:[#allocation4 + $0x2d8] sm:$0xf] %v2308_v24  ;;  %1668 = vrot.lane.b32.xlu1 %v8517_v6, %s7866_s12  ;;  %v2352_v25 = vpop.permute.xlu0 %2351 }
 0x18e   : > { %v8707_v28 = vpop.permute.xlu1 %2353  ;;  %1670 = vrot.lane.b32.xlu0 %v8529_v11, %s7866_s12 }
 0x18f   : > { %v2371_v4 = vsel %vm2369_vm8, %v2352_v25, %v8707_v28  ;;  %v2668_v30 = vld [vmem:[#allocation4 + $0x288] sm:$0xff] }
 0x190   : > { %2389 = vst [vmem:[#allocation4 + $0x2d8] sm:$0xf0] %v2371_v4  ;;  %1731 = vrot.lane.b32.xlu1 %v8467_v55, %s11483_s23  ;;  %v2415_v32 = vpop.permute.xlu0 %2414  ;;  %v2740_v34 = vpack.c.bf16 %v2668_v30, %v2659_v29  ;;  %v8772_v30 = vld [vmem:[#allocation2 + $0x1c] sm:$0xff] }
 0x192   : > { %v8715_v36 = vpop.permute.xlu1 %2416  ;;  %1733 = vrot.lane.b32.xlu0 %v8539_v14, %s11483_s23  ;;  %2813 = vmatpush1.bf16.msra.mxu0 %v2740_v34  ;;  %s11553_s23 = smov 21  }
 0x193   : > { %v2434_v38 = vsel %vm2432_vm0, %v2415_v32, %v8715_v36 }
 0x194   : > { %2452 = vst [vmem:[#allocation4 + $0x320] sm:$0xf] %v2434_v38  ;;  %1790 = vrot.lane.b32.xlu1 %v8457_v52, %s11481_s8  ;;  %v2478_v40 = vpop.permute.xlu0 %2477 }
 0x196   : > { %v8723_v41 = vpop.permute.xlu1 %2479  ;;  %1792 = vrot.lane.b32.xlu0 %v8467_v55, %s11481_s8 }
 0x197   : > { %v2497_v43 = vsel %vm11473_vm10, %v2478_v40, %v8723_v41  ;;  %v2678_v63 = vld [vmem:[#allocation4 + $0x2d8] sm:$0xff] }
 0x198   : > { %2515 = vst [vmem:[#allocation4 + $0x320] sm:$0xf0] %v2497_v43  ;;  %1853 = vrot.lane.b32.xlu1 %v8330_v18, %s11479_s24  ;;  %v2287_v44 = vpop.permute.xlu0 %2286 }
 0x199   : > { %v2307_v45 = vsel %vm2306_vm5, %v2287_v44, %v2289_v60 }
 0x19a   : > { %2325 = vst [vmem:[#allocation4 + $0x2d0] sm:$0xf] %v2307_v45  ;;  %v2350_v46 = vpop.permute.xlu1 %2349  ;;  %1855 = vrot.lane.b32.xlu0 %v8481_v59, %s11479_s24 }
 0x19b   : > { %v2370_v48 = vsel %vm2369_vm8, %v2350_v46, %v2352_v25 }
 0x19c   : > { %2388 = vst [vmem:[#allocation4 + $0x2d0] sm:$0xf0] %v2370_v48  ;;  %1916 = vrot.lane.b32.xlu1 %v8457_v52, %s11476_s29  ;;  %v2413_v49 = vpop.permute.xlu0 %2412  ;;  %v8747_v52 = vcombine.low %v8738_v53, %v8738_v53 }
 0x19d   : > { %v2433_v51 = vsel %vm2432_vm0, %v2413_v49, %v2415_v32  ;;  %v8788_v32 = vcombine.high %v8379_v31, %v8379_v31 }
 0x19e   : > { %2451 = vst [vmem:[#allocation4 + $0x318] sm:$0xf] %v2433_v51  ;;  %v2476_v18 = vpop.permute.xlu1 %2475  ;;  %1918 = vrot.lane.b32.xlu0 %v8467_v55, %s11476_s29 }
 0x19f   : > { %v2496_v61 = vsel %vm11473_vm10, %v2476_v18, %v2478_v40  ;;  %v2687_v59 = vld [vmem:[#allocation4 + $0x320] sm:$0xff]  ;;  %vm2558_vm10 = vcmask 605184  }
 0x1a0   : > { %2514 = vst [vmem:[#allocation4 + $0x318] sm:$0xf0] %v2496_v61  ;;  %1979 = vrot.lane.b32.xlu1 %v8379_v31, %s11474_s9  ;;  %v1035_v5 = vpop.permute.xlu0 %1034  ;;  %v2750_v56 = vpack.c.bf16 %v2687_v59, %v2678_v63 }
 0x1a1   : > { %v1051_v8 = vsel %vm11478_vm11, %v8475_v58, %v1035_v5 }
 0x1a2   : > { %1069 = vst [vmem:[#allocation4 + $0x10] sm:$0xf] %v1051_v8  ;;  %v1037_v9 = vpop.permute.xlu1 %1036  ;;  %1981 = vrot.lane.b32.xlu0 %v8747_v52, %s11474_s9  ;;  %2814 = vmatprep.subr.bf16.mxu0 %v2750_v56 }
 0x1a3   : > { %v1052_v10 = vsel %vm11478_vm11, %v1035_v5, %v1037_v9  ;;  %v2677_v16 = vld [vmem:[#allocation4 + $0x2d0] sm:$0xff] }
 0x1a4   : > { %1070 = vst [vmem:[#allocation4 + $0x18] sm:$0xf] %v1052_v10  ;;  %1794 = vrot.lane.b32.xlu1 %v8517_v6, %s11481_s8  ;;  %v1098_v13 = vpop.permute.xlu0 %1097 }
 0x1a5   : > { %v1114_v54 = vsel %vm11485_vm2, %v8567_v27, %v1098_v13 }
 0x1a6   : > { %1132 = vst [vmem:[#allocation4 + $0x10] sm:$0xf0] %v1114_v54  ;;  %v1100_v15 = vpop.permute.xlu1 %1099  ;;  %1796 = vrot.lane.b32.xlu0 %v8529_v11, %s11481_s8  ;;  %s11560_s8 = smov 20  }
 0x1a7   : > { %v1115_v58 = vsel %vm11485_vm2, %v1098_v13, %v1100_v15  ;;  %v2686_v60 = vld [vmem:[#allocation4 + $0x318] sm:$0xff] }
 0x1a8   : > { %1133 = vst [vmem:[#allocation4 + $0x18] sm:$0xf0] %v1115_v58  ;;  %1857 = vrot.lane.b32.xlu1 %v8467_v55, %s11479_s24  ;;  %v1161_v20 = vpop.permute.xlu0 %1160  ;;  %v2749_v24 = vpack.c.bf16 %v2686_v60, %v2677_v16 }
 0x1a9   : > { %v1177_v25 = vsel %vm1174_vm12, %v8489_v62, %v1161_v20 }
 0x1aa   : > { %1195 = vst [vmem:[#allocation4 + $0x58] sm:$0xf] %v1177_v25  ;;  %v1163_v27 = vpop.permute.xlu1 %1162  ;;  %1859 = vrot.lane.b32.xlu0 %v8539_v14, %s11479_s24  ;;  %2815 = vmatpush1.bf16.msra.mxu0 %v2749_v24  ;;  %s11532_s24 = smov 110   ;;  %v8831_v25 = vld [vmem:[%s11454_s2] sm:$0xf] }
 0x1ab   : > { %v1178_v4 = vsel %vm1174_vm12, %v1161_v20, %v1163_v27 }
 0x1ac   : > { %1196 = vst [vmem:[#allocation4 + $0x60] sm:$0xf] %v1178_v4  ;;  %1920 = vrot.lane.b32.xlu1 %v8517_v6, %s11476_s29  ;;  %v1224_v29 = vpop.permute.xlu0 %1223 }
 0x1ad   : > { %v1240_v55 = vsel %vm1237_vm3, %v8581_v33, %v1224_v29  ;;  %v8784_v33 = vcombine.low %v8772_v30, %v8772_v30  ;;  %v2589_v61 = vld [vmem:[#allocation4 + $0x10] sm:$0xff] }
 0x1ae   : > { %1258 = vst [vmem:[#allocation4 + $0x58] sm:$0xf0] %v1240_v55  ;;  %v8774_v62 = vpop.permute.xlu1 %1225  ;;  %1922 = vrot.lane.b32.xlu0 %v8529_v11, %s11476_s29  ;;  %s11531_s29 = smov 111  }
 0x1af   : > { %v1241_v14 = vsel %vm1237_vm3, %v1224_v29, %v8774_v62  ;;  %v2590_v48 = vld [vmem:[#allocation4 + $0x18] sm:$0xff] }
 0x1b0   : > { %1259 = vst [vmem:[#allocation4 + $0x60] sm:$0xf0] %v1241_v14  ;;  %1983 = vrot.lane.b32.xlu1 %v8738_v53, %s11474_s9  ;;  %v2539_v6 = vpop.permute.xlu0 %2538 }
 0x1b2   : > { %v2541_v34 = vpop.permute.xlu1 %2540  ;;  %1985 = vrot.lane.b32.xlu0 %v8784_v33, %s11474_s9  ;;  %s11530_s9 = smov 112  }
 0x1b3   : > { %v2559_v38 = vsel %vm2558_vm10, %v2539_v6, %v2541_v34 }
 0x1b4   : > { %2577 = vst [vmem:[#allocation4 + $0x360] sm:$0xf] %v2559_v38  ;;  %2041 = vrot.lane.b32.xlu1 %v8788_v32, %s7881_s10  ;;  %v8795_v40 = vpop.permute.xlu0 %2542 }
 0x1b5   : > { %v2560_v43 = vsel %vm2558_vm10, %v2541_v34, %v8795_v40  ;;  %v2598_v45 = vld [vmem:[#allocation4 + $0x58] sm:$0xff] }
 0x1b6   : > { %2578 = vst [vmem:[#allocation4 + $0x368] sm:$0xf] %v2560_v43  ;;  %v1039_v44 = vpop.permute.xlu1 %1038  ;;  %2043 = vrot.lane.b32.xlu0 %v8738_v53, %s7881_s10  ;;  %v2706_v59 = vpack.c.bf16 %v2598_v45, %v2589_v61 }
 0x1b7   : > { %v1053_v46 = vsel %vm11478_vm11, %v1037_v9, %v1039_v44  ;;  %v2599_v49 = vld [vmem:[#allocation4 + $0x60] sm:$0xff] }
 0x1b8   : > { %1071 = vst [vmem:[#allocation4 + $0x20] sm:$0xf] %v1053_v46  ;;  %2104 = vrot.lane.b32.xlu1 %v8379_v31, %s11530_s9  ;;  %v8804_v51 = vpop.permute.xlu0 %1040  ;;  %v2707_v18 = vpack.c.bf16 %v2599_v49, %v2590_v48 }
 0x1b9   : > { %v1054_v63 = vsel %vm11478_vm11, %v1039_v44, %v8804_v51  ;;  %vm11505_vm11 = vcmask 1041408  }
 0x1ba   : > { %1072 = vst [vmem:[#allocation4 + $0x28] sm:$0xf] %v1054_v63  ;;  %v1102_v5 = vpop.permute.xlu1 %1101  ;;  %2106 = vrot.lane.b32.xlu0 %v8747_v52, %s11530_s9  ;;  %2845 = vmatprep.subr.bf16.mxu1 %v2707_v18 }
 0x1bb   : > { %v1116_v56 = vsel %vm11485_vm2, %v1100_v15, %v1102_v5  ;;  %2846 = vmatpush1.bf16.msra.mxu1 %v2706_v59  ;;  %v2695_v8 = vld [vmem:[#allocation4 + $0x360] sm:$0xf] }
 0x1bc   : > { %1134 = vst [vmem:[#allocation4 + $0x20] sm:$0xf0] %v1116_v56  ;;  %2167 = vrot.lane.b32.xlu1 %v8788_v32, %s11531_s29  ;;  %v8813_v9 = vpop.permute.xlu0 %1103  ;;  %v2758_v10 = vpack.c.bf16 %v2695_v8, %v2695_v8 }
 0x1bd   : > { %v1117_v13 = vsel %vm11485_vm2, %v1102_v5, %v8813_v9  ;;  %v2696_v54 = vld [vmem:[#allocation4 + $0x368] sm:$0xf]  ;;  %vm11499_vm2 = vcmask 818176  }
 0x1be   : > { %1135 = vst [vmem:[#allocation4 + $0x28] sm:$0xf0] %v1117_v13  ;;  %v1165_v58 = vpop.permute.xlu1 %1164  ;;  %2169 = vrot.lane.b32.xlu0 %v8738_v53, %s11531_s29  ;;  %v2759_v15 = vpack.c.bf16 %v2696_v54, %v2696_v54  ;;  %v2778_v20 = vsel %vm11505_vm11, %v2758_v10, 0 }
 0x1bf   : > { %v1179_v16 = vsel %vm1174_vm12, %v1163_v27, %v1165_v58  ;;  %v8835_v27 = vcombine.high %v8738_v53, %v8738_v53 }
 0x1c0   : > { %1197 = vst [vmem:[#allocation4 + $0x68] sm:$0xf] %v1179_v16  ;;  %2230 = vrot.lane.b32.xlu1 %v8379_v31, %s11532_s24  ;;  %6907 = vmatprep.subr.msk.bf16.mxu0 %vm11505_vm11, %v2759_v15  ;;  %v8823_v60 = vpop.permute.xlu0 %1166 }
 0x1c1   : > { %v1180_v24 = vsel %vm1174_vm12, %v1165_v58, %v8823_v60  ;;  %2817 = vmatpush1.bf16.msra.mxu0 %v2778_v20 }
 0x1c2   : > { %1198 = vst [vmem:[#allocation4 + $0x70] sm:$0xf] %v1180_v24  ;;  %v1228_v4 = vpop.permute.xlu1 %1227  ;;  %2232 = vrot.lane.b32.xlu0 %v8747_v52, %s11532_s24 }
 0x1c3   : > { %v1242_v29 = vsel %vm1237_vm3, %v8774_v62, %v1228_v4  ;;  %v2591_v63 = vld [vmem:[#allocation4 + $0x20] sm:$0xff] }
 0x1c4   : > { %1260 = vst [vmem:[#allocation4 + $0x68] sm:$0xf0] %v1242_v29  ;;  %2045 = vrot.lane.b32.xlu1 %v8835_v27, %s7881_s10  ;;  %v8843_v55 = vpop.permute.xlu0 %1229  ;;  %6908 = vmatmul.mubr.msk.bf16.vlgmr.msra.gmra.mrb[0].mxu0 %vm11499_vm2, %v8831_v25 }
 0x1c5   : > { %v1243_v14 = vsel %vm1237_vm3, %v1228_v4, %v8843_v55  ;;  %2918 = vmatprep.mubr.bf16.mxu0 %v11503_v26  ;;  %v2592_v48 = vld [vmem:[#allocation4 + $0x28] sm:$0xff] }
 0x1c6   : > { %1261 = vst [vmem:[#allocation4 + $0x70] sm:$0xf0] %v1243_v14  ;;  %v1287_v6 = vpop.permute.xlu1 %1286  ;;  %2047 = vrot.lane.b32.xlu0 %v8772_v30, %s7881_s10 }
 0x1c7   : > { %v1303_v62 = vsel %vm1300_vm13, %v8497_v1, %v1287_v6 }
 0x1c8   : > { %1321 = vst [vmem:[#allocation4 + $0xa0] sm:$0xf] %v1303_v62  ;;  %2108 = vrot.lane.b32.xlu1 %v8738_v53, %s11530_s9  ;;  %v1289_v34 = vpop.permute.xlu0 %1288 }
 0x1c9   : > { %v1304_v38 = vsel %vm1300_vm13, %v1287_v6, %v1289_v34 }
 0x1ca   : > { %1322 = vst [vmem:[#allocation4 + $0xa8] sm:$0xf] %v1304_v38  ;;  %v1350_v43 = vpop.permute.xlu1 %1349  ;;  %2110 = vrot.lane.b32.xlu0 %v8784_v33, %s11530_s9 }
 0x1cb   : > { %v1366_v44 = vsel %vm1363_vm4, %v8594_v39, %v1350_v43  ;;  %v2600_v45 = vld [vmem:[#allocation4 + $0x68] sm:$0xff] }
 0x1cc   : > { %1384 = vst [vmem:[#allocation4 + $0xa0] sm:$0xf0] %v1366_v44  ;;  %2171 = vrot.lane.b32.xlu1 %v8835_v27, %s11531_s29  ;;  %v1352_v1 = vpop.permute.xlu0 %1351  ;;  %v2708_v59 = vpack.c.bf16 %v2600_v45, %v2591_v63 }
 0x1cd   : > { %v1367_v46 = vsel %vm1363_vm4, %v1350_v43, %v1352_v1  ;;  %v2601_v49 = vld [vmem:[#allocation4 + $0x70] sm:$0xff] }
 0x1ce   : > { %1385 = vst [vmem:[#allocation4 + $0xa8] sm:$0xf0] %v1367_v46  ;;  %v1413_v18 = vpop.permute.xlu1 %1412  ;;  %2173 = vrot.lane.b32.xlu0 %v8772_v30, %s11531_s29  ;;  %v2709_v61 = vpack.c.bf16 %v2601_v49, %v2592_v48 }
 0x1cf   : > { %v1429_v39 = vsel %vm11487_vm14, %v8505_v3, %v1413_v18 }
 0x1d0   : > { %1447 = vst [vmem:[#allocation4 + $0xe8] sm:$0xf] %v1429_v39  ;;  %2234 = vrot.lane.b32.xlu1 %v8738_v53, %s11532_s24  ;;  %2886 = vmatprep.subr.bf16.mxu0 %v2709_v61  ;;  %v1415_v5 = vpop.permute.xlu0 %1414 }
 0x1d1   : > { %v1430_v56 = vsel %vm11487_vm14, %v1413_v18, %v1415_v5  ;;  %2887 = vmatpush1.bf16.msra.mxu0 %v2708_v59 }
 0x1d2   : > { %1448 = vst [vmem:[#allocation4 + $0xf0] sm:$0xf] %v1430_v56  ;;  %v1476_v8 = vpop.permute.xlu1 %1475  ;;  %2236 = vrot.lane.b32.xlu0 %v8784_v33, %s11532_s24 }
 0x1d3   : > { %v1492_v10 = vsel %vm11486_vm6, %v8605_v42, %v1476_v8  ;;  %v2607_v38 = vld [vmem:[#allocation4 + $0xa0] sm:$0xff] }
 0x1d4   : > { %1510 = vst [vmem:[#allocation4 + $0xe8] sm:$0xf0] %v1492_v10  ;;  %2292 = vrot.lane.b32.xlu1 %v8788_v32, %s7865_s11  ;;  %v1478_v3 = vpop.permute.xlu0 %1477 }
 0x1d5   : > { %v1493_v13 = vsel %vm11486_vm6, %v1476_v8, %v1478_v3  ;;  %v2608_v14 = vld [vmem:[#allocation4 + $0xa8] sm:$0xff] }
 0x1d6   : > { %1511 = vst [vmem:[#allocation4 + $0xf0] sm:$0xf0] %v1493_v13  ;;  %v1291_v54 = vpop.permute.xlu1 %1290  ;;  %2294 = vrot.lane.b32.xlu0 %v8738_v53, %s7865_s11 }
 0x1d7   : > { %v1305_v58 = vsel %vm1300_vm13, %v1289_v34, %v1291_v54 }
 0x1d8   : > { %1323 = vst [vmem:[#allocation4 + $0xb0] sm:$0xf] %v1305_v58  ;;  %2355 = vrot.lane.b32.xlu1 %v8379_v31, %s7884_s15  ;;  %v8883_v15 = vpop.permute.xlu0 %1292 }
 0x1d9   : > { %v1306_v42 = vsel %vm1300_vm13, %v1291_v54, %v8883_v15 }
 0x1da   : > { %1324 = vst [vmem:[#allocation4 + $0xb8] sm:$0xf] %v1306_v42  ;;  %v1354_v16 = vpop.permute.xlu1 %1353  ;;  %2357 = vrot.lane.b32.xlu0 %v8747_v52, %s7884_s15 }
 0x1db   : > { %v1368_v20 = vsel %vm1363_vm4, %v1352_v1, %v1354_v16  ;;  %v2616_v4 = vld [vmem:[#allocation4 + $0xe8] sm:$0xff] }
 0x1dc   : > { %1386 = vst [vmem:[#allocation4 + $0xb0] sm:$0xf0] %v1368_v20  ;;  %2418 = vrot.lane.b32.xlu1 %v8788_v32, %s7885_s27  ;;  %v8892_v24 = vpop.permute.xlu0 %1355  ;;  %v2715_v44 = vpack.c.bf16 %v2616_v4, %v2607_v38 }
 0x1dd   : > { %v1369_v29 = vsel %vm1363_vm4, %v1354_v16, %v8892_v24  ;;  %v2617_v6 = vld [vmem:[#allocation4 + $0xf0] sm:$0xff] }
 0x1de   : > { %1387 = vst [vmem:[#allocation4 + $0xb8] sm:$0xf0] %v1369_v29  ;;  %v1417_v62 = vpop.permute.xlu1 %1416  ;;  %2420 = vrot.lane.b32.xlu0 %v8738_v53, %s7885_s27  ;;  %v2716_v34 = vpack.c.bf16 %v2617_v6, %v2608_v14  ;;  %v8944_v14 = vcombine.high %v8529_v11, %v8529_v11 }
 0x1df   : > { %v1431_v43 = vsel %vm11487_vm14, %v1415_v5, %v1417_v62 }
 0x1e0   : > { %1449 = vst [vmem:[#allocation4 + $0xf8] sm:$0xf] %v1431_v43  ;;  %2481 = vrot.lane.b32.xlu1 %v8379_v31, %s7886_s26  ;;  %2847 = vmatprep.subr.bf16.mxu1 %v2716_v34  ;;  %v8901_v1 = vpop.permute.xlu0 %1418 }
 0x1e1   : > { %v1432_v45 = vsel %vm11487_vm14, %v1417_v62, %v8901_v1  ;;  %2848 = vmatpush1.bf16.msra.mxu1 %v2715_v44  ;;  %v8955_v62 = vld [vmem:[#allocation2 + $0x20] sm:$0xff] }
 0x1e2   : > { %1450 = vst [vmem:[#allocation4 + $0x100] sm:$0xf] %v1432_v45  ;;  %v1480_v46 = vpop.permute.xlu1 %1479  ;;  %2483 = vrot.lane.b32.xlu0 %v8747_v52, %s7886_s26  ;;  %v8966_v43 = vcombine.low %v8955_v62, %v8955_v62 }
 0x1e3   : > { %v1494_v48 = vsel %vm11486_vm6, %v1478_v3, %v1480_v46  ;;  %v2609_v54 = vld [vmem:[#allocation4 + $0xb0] sm:$0xff] }
 0x1e4   : > { %1512 = vst [vmem:[#allocation4 + $0xf8] sm:$0xf0] %v1494_v48  ;;  %2296 = vrot.lane.b32.xlu1 %v8835_v27, %s7865_s11  ;;  %v8910_v49 = vpop.permute.xlu0 %1481 }
 0x1e5   : > { %v1495_v31 = vsel %vm11486_vm6, %v1480_v46, %v8910_v49  ;;  %v2610_v8 = vld [vmem:[#allocation4 + $0xb8] sm:$0xff]  ;;  %vm11533_vm6 = vcmask 179200  }
 0x1e6   : > { %1513 = vst [vmem:[#allocation4 + $0x100] sm:$0xf0] %v1495_v31  ;;  %v1539_v18 = vpop.permute.xlu1 %1538  ;;  %2298 = vrot.lane.b32.xlu0 %v8772_v30, %s7865_s11  ;;  %vm11534_vm14 = vmmov %vm11533_vm6 }
 0x1e7   : > { %v1555_v61 = vsel %vm1552_vm15, %v8519_v7, %v1539_v18 }
 0x1e8   : > { %1573 = vst [vmem:[#allocation4 + $0x130] sm:$0xf] %v1555_v61  ;;  %2359 = vrot.lane.b32.xlu1 %v8738_v53, %s7884_s15  ;;  %v1541_v52 = vpop.permute.xlu0 %1540 }
 0x1e9   : > { %v1556_v63 = vsel %vm1552_vm15, %v1539_v18, %v1541_v52 }
 0x1ea   : > { %1574 = vst [vmem:[#allocation4 + $0x138] sm:$0xf] %v1556_v63  ;;  %v1602_v39 = vpop.permute.xlu1 %1601  ;;  %2361 = vrot.lane.b32.xlu0 %v8784_v33, %s7884_s15 }
 0x1eb   : > { %v1618_v59 = vsel %vm11506_vm7, %v8616_v57, %v1602_v39  ;;  %v2618_v5 = vld [vmem:[#allocation4 + $0xf8] sm:$0xff] }
 0x1ec   : > { %1636 = vst [vmem:[#allocation4 + $0x130] sm:$0xf0] %v1618_v59  ;;  %2422 = vrot.lane.b32.xlu1 %v8835_v27, %s7885_s27  ;;  %v1604_v7 = vpop.permute.xlu0 %1603  ;;  %v2717_v58 = vpack.c.bf16 %v2618_v5, %v2609_v54 }
 0x1ed   : > { %v1619_v56 = vsel %vm11506_vm7, %v1602_v39, %v1604_v7  ;;  %v2619_v10 = vld [vmem:[#allocation4 + $0x100] sm:$0xff] }
 0x1ee   : > { %1637 = vst [vmem:[#allocation4 + $0x138] sm:$0xf0] %v1619_v56  ;;  %v1665_v3 = vpop.permute.xlu1 %1664  ;;  %2424 = vrot.lane.b32.xlu0 %v8772_v30, %s7885_s27  ;;  %v2718_v13 = vpack.c.bf16 %v2619_v10, %v2610_v8 }
 0x1ef   : > { %v1681_v57 = vsel %vm11533_vm6, %v8531_v12, %v1665_v3 }
 0x1f0   : > { %1699 = vst [vmem:[#allocation4 + $0x178] sm:$0xf] %v1681_v57  ;;  %2485 = vrot.lane.b32.xlu1 %v8738_v53, %s7886_s26  ;;  %2888 = vmatprep.subr.bf16.mxu0 %v2718_v13  ;;  %v1667_v42 = vpop.permute.xlu0 %1666 }
 0x1f1   : > { %v1682_v16 = vsel %vm11534_vm14, %v1665_v3, %v1667_v42  ;;  %2889 = vmatpush1.bf16.msra.mxu0 %v2717_v58  ;;  %vm11535_vm14 = vmmov %vm11533_vm6 }
 0x1f2   : > { %1700 = vst [vmem:[#allocation4 + $0x180] sm:$0xf] %v1682_v16  ;;  %v1728_v20 = vpop.permute.xlu1 %1727  ;;  %2487 = vrot.lane.b32.xlu0 %v8784_v33, %s7886_s26 }
 0x1f3   : > { %v1744_v4 = vsel %vm11488_vm9, %v8627_v2, %v1728_v20  ;;  %v2625_v61 = vld [vmem:[#allocation4 + $0x130] sm:$0xff] }
 0x1f4   : > { %1762 = vst [vmem:[#allocation4 + $0x178] sm:$0xf0] %v1744_v4  ;;  %2544 = vrot.lane.b32.xlu1 %v8788_v32, %s7871_s16  ;;  %v1730_v12 = vpop.permute.xlu0 %1729 }
 0x1f5   : > { %v1745_v29 = vsel %vm11488_vm9, %v1728_v20, %v1730_v12  ;;  %v2626_v46 = vld [vmem:[#allocation4 + $0x138] sm:$0xff] }
 0x1f6   : > { %1763 = vst [vmem:[#allocation4 + $0x180] sm:$0xf0] %v1745_v29  ;;  %v1543_v6 = vpop.permute.xlu1 %1542  ;;  %2546 = vrot.lane.b32.xlu0 %v8738_v53, %s7871_s16 }
 0x1f7   : > { %v1557_v33 = vsel %vm1552_vm15, %v1541_v52, %v1543_v6 }
 0x1f8   : > { %1575 = vst [vmem:[#allocation4 + $0x140] sm:$0xf] %v1557_v33  ;;  %1042 = vrot.lane.b32.xlu1 %v8944_v14, %s7868_s14  ;;  %v8951_v2 = vpop.permute.xlu0 %1544 }
 0x1f9   : > { %v1558_v32 = vsel %vm1552_vm15, %v1543_v6, %v8951_v2  ;;  %v9006_v6 = vld [vmem:[#allocation2 + $0x18] sm:$0xff] }
 0x1fa   : > { %1576 = vst [vmem:[#allocation4 + $0x148] sm:$0xf] %v1558_v32  ;;  %v1606_v34 = vpop.permute.xlu1 %1605  ;;  %1044 = vrot.lane.b32.xlu0 %v8955_v62, %s7868_s14 }
 0x1fb   : > { %v1620_v53 = vsel %vm11506_vm7, %v1604_v7, %v1606_v34  ;;  %v2634_v44 = vld [vmem:[#allocation4 + $0x178] sm:$0xff] }
 0x1fc   : > { %1638 = vst [vmem:[#allocation4 + $0x140] sm:$0xf0] %v1620_v53  ;;  %1105 = vrot.lane.b32.xlu1 %v8529_v11, %s7872_s17  ;;  %v8962_v38 = vpop.permute.xlu0 %1607  ;;  %v2724_v63 = vpack.c.bf16 %v2634_v44, %v2625_v61 }
 0x1fd   : > { %v1621_v45 = vsel %vm11506_vm7, %v1606_v34, %v8962_v38  ;;  %v2635_v48 = vld [vmem:[#allocation4 + $0x180] sm:$0xff] }
 0x1fe   : > { %1639 = vst [vmem:[#allocation4 + $0x148] sm:$0xf0] %v1621_v45  ;;  %v1669_v31 = vpop.permute.xlu1 %1668  ;;  %1107 = vrot.lane.b32.xlu0 %v8966_v43, %s7872_s17  ;;  %v2725_v18 = vpack.c.bf16 %v2635_v48, %v2626_v46 }
 0x1ff   : > { %v1683_v52 = vsel %vm11533_vm6, %v1667_v42, %v1669_v31  ;;  %vm11536_vm6 = vcmask 154624  }
 0x200   : > { %1701 = vst [vmem:[#allocation4 + $0x188] sm:$0xf] %v1683_v52  ;;  %1168 = vrot.lane.b32.xlu1 %v8944_v14, %s7874_s19  ;;  %2849 = vmatprep.subr.bf16.mxu1 %v2725_v18  ;;  %v8975_v39 = vpop.permute.xlu0 %1670 }
 0x201   : > { %v1684_v59 = vsel %vm11535_vm14, %v1669_v31, %v8975_v39  ;;  %2850 = vmatpush1.bf16.msra.mxu1 %v2724_v63  ;;  %vm11537_vm14 = vmmov %vm11536_vm6  ;;  %v9029_v31 = vcombine.high %v8955_v62, %v8955_v62 }
 0x202   : > { %1702 = vst [vmem:[#allocation4 + $0x190] sm:$0xf] %v1684_v59  ;;  %v1732_v7 = vpop.permute.xlu1 %1731  ;;  %1170 = vrot.lane.b32.xlu0 %v8955_v62, %s7874_s19 }
 0x203   : > { %v1746_v5 = vsel %vm11488_vm9, %v1730_v12, %v1732_v7  ;;  %v2627_v12 = vld [vmem:[#allocation4 + $0x140] sm:$0xff] }
 0x204   : > { %1764 = vst [vmem:[#allocation4 + $0x188] sm:$0xf0] %v1746_v5  ;;  %1231 = vrot.lane.b32.xlu1 %v8529_v11, %s7873_s18  ;;  %v8984_v56 = vpop.permute.xlu0 %1733 }
 0x205   : > { %v1747_v8 = vsel %vm11488_vm9, %v1732_v7, %v8984_v56  ;;  %vm11538_vm9 = vcmask 146432  }
 0x206   : > { %1765 = vst [vmem:[#allocation4 + $0x190] sm:$0xf0] %v1747_v8  ;;  %v1791_v10 = vpop.permute.xlu1 %1790  ;;  %1233 = vrot.lane.b32.xlu0 %v8966_v43, %s7873_s18 }
 0x207   : > { %v1807_v3 = vsel %vm11502_vm1, %v8545_v17, %v1791_v10 }
 0x208   : > { %1825 = vst [vmem:[#allocation4 + $0x1c0] sm:$0xf] %v1807_v3  ;;  %2548 = vrot.lane.b32.xlu1 %v8835_v27, %s7871_s16  ;;  %v1793_v13 = vpop.permute.xlu0 %1792  ;;  %v2628_v27 = vld [vmem:[#allocation4 + $0x148] sm:$0xff] }
 0x209   : > { %v1808_v11 = vsel %vm11502_vm1, %v1791_v10, %v1793_v13 }
 0x20a   : > { %1826 = vst [vmem:[#allocation4 + $0x1c8] sm:$0xf] %v1808_v11  ;;  %v1854_v54 = vpop.permute.xlu1 %1853  ;;  %2550 = vrot.lane.b32.xlu0 %v8772_v30, %s7871_s16 }
 0x20b   : > { %v1870_v57 = vsel %vm11536_vm6, %v8637_v19, %v1854_v54  ;;  %v2636_v58 = vld [vmem:[#allocation4 + $0x188] sm:$0xff]  ;;  %vm11539_vm6 = vmmov %vm11538_vm9 }
 0x20c   : > { %1888 = vst [vmem:[#allocation4 + $0x1c0] sm:$0xf0] %v1870_v57  ;;  %1294 = vrot.lane.b32.xlu1 %v8944_v14, %s7844_s7  ;;  %v1856_v17 = vpop.permute.xlu0 %1855  ;;  %v2726_v29 = vpack.c.bf16 %v2636_v58, %v2627_v12 }
 0x20d   : > { %v1871_v42 = vsel %vm11537_vm14, %v1854_v54, %v1856_v17  ;;  %v2637_v16 = vld [vmem:[#allocation4 + $0x190] sm:$0xff]  ;;  %vm11540_vm14 = vcmask 932864  }
 0x20e   : > { %1889 = vst [vmem:[#allocation4 + $0x1c8] sm:$0xf0] %v1871_v42  ;;  %v1917_v20 = vpop.permute.xlu1 %1916  ;;  %1296 = vrot.lane.b32.xlu0 %v8955_v62, %s7844_s7  ;;  %v2727_v4 = vpack.c.bf16 %v2637_v16, %v2628_v27 }
 0x20f   : > { %v1933_v19 = vsel %vm11538_vm9, %v8555_v22, %v1917_v20  ;;  %vm11541_vm9 = vmmov %vm11540_vm14 }
 0x210   : > { %1951 = vst [vmem:[#allocation4 + $0x208] sm:$0xf] %v1933_v19  ;;  %1357 = vrot.lane.b32.xlu1 %v9006_v6, %s11493_s13  ;;  %2890 = vmatprep.subr.bf16.mxu0 %v2727_v4  ;;  %v1919_v33 = vpop.permute.xlu0 %1918 }
 0x211   : > { %v1934_v32 = vsel %vm11539_vm6, %v1917_v20, %v1919_v33  ;;  %2891 = vmatpush1.bf16.msra.mxu0 %v2726_v29  ;;  %vm11542_vm6 = vcmask 154624  }
 0x212   : > { %1952 = vst [vmem:[#allocation4 + $0x210] sm:$0xf] %v1934_v32  ;;  %v1980_v34 = vpop.permute.xlu1 %1979  ;;  %1359 = vrot.lane.b32.xlu0 %v8966_v43, %s11493_s13 }
 0x213   : > { %v1995_v22 = vsel %vm11540_vm14, %v8647_v23, %v1980_v34  ;;  %vm11543_vm14 = vmmov %vm11542_vm6  ;;  %v2643_v3 = vld [vmem:[#allocation4 + $0x1c0] sm:$0xff] }
 0x214   : > { %2013 = vst [vmem:[#allocation4 + $0x208] sm:$0xf0] %v1995_v22  ;;  %1420 = vrot.lane.b32.xlu1 %v8944_v14, %s11491_s25  ;;  %v1982_v53 = vpop.permute.xlu0 %1981 }
 0x215   : > { %v1996_v44 = vsel %vm11541_vm9, %v1980_v34, %v1982_v53  ;;  %v2644_v7 = vld [vmem:[#allocation4 + $0x1c8] sm:$0xff]  ;;  %vm11544_vm9 = vcmask 146432  }
 0x216   : > { %2014 = vst [vmem:[#allocation4 + $0x210] sm:$0xf0] %v1996_v44  ;;  %v1795_v45 = vpop.permute.xlu1 %1794  ;;  %1422 = vrot.lane.b32.xlu0 %v8955_v62, %s11491_s25 }
 0x217   : > { %v1809_v46 = vsel %vm11502_vm1, %v1793_v13, %v1795_v45 }
 0x218   : > { %1827 = vst [vmem:[#allocation4 + $0x1d0] sm:$0xf] %v1809_v46  ;;  %1483 = vrot.lane.b32.xlu1 %v9006_v6, %s11489_s20  ;;  %v9023_v48 = vpop.permute.xlu0 %1796 }
 0x219   : > { %v1810_v23 = vsel %vm11502_vm1, %v1795_v45, %v9023_v48 }
 0x21a   : > { %1828 = vst [vmem:[#allocation4 + $0x1d8] sm:$0xf] %v1810_v23  ;;  %v1858_v18 = vpop.permute.xlu1 %1857  ;;  %1485 = vrot.lane.b32.xlu0 %v8966_v43, %s11489_s20 }
 0x21b   : > { %v1872_v61 = vsel %vm11542_vm6, %v1856_v17, %v1858_v18  ;;  %v2652_v63 = vld [vmem:[#allocation4 + $0x208] sm:$0xff]  ;;  %vm11545_vm6 = vmmov %vm11544_vm9 }
 0x21c   : > { %1890 = vst [vmem:[#allocation4 + $0x1d0] sm:$0xf0] %v1872_v61  ;;  %1046 = vrot.lane.b32.xlu1 %v9029_v31, %s7868_s14  ;;  %v9036_v52 = vpop.permute.xlu0 %1859  ;;  %v2733_v11 = vpack.c.bf16 %v2652_v63, %v2643_v3 }
 0x21d   : > { %v1873_v59 = vsel %vm11543_vm14, %v1858_v18, %v9036_v52  ;;  %v2653_v5 = vld [vmem:[#allocation4 + $0x210] sm:$0xff]  ;;  %vm11546_vm14 = vcmask 932864  }
 0x21e   : > { %1891 = vst [vmem:[#allocation4 + $0x1d8] sm:$0xf0] %v1873_v59  ;;  %v1921_v8 = vpop.permute.xlu1 %1920  ;;  %1109 = vrot.lane.b32.xlu0 %v8955_v62, %s7872_s17  ;;  %v2734_v10 = vpack.c.bf16 %v2653_v5, %v2644_v7 }
 0x21f   : > { %v1935_v13 = vsel %vm11544_vm9, %v1919_v33, %v1921_v8  ;;  %vm11547_vm9 = vmmov %vm11546_vm14 }
 0x220   : > { %1953 = vst [vmem:[#allocation4 + $0x218] sm:$0xf] %v1935_v13  ;;  %1172 = vrot.lane.b32.xlu1 %v9029_v31, %s7874_s19  ;;  %2851 = vmatprep.subr.bf16.mxu1 %v2734_v10  ;;  %v9045_v54 = vpop.permute.xlu0 %1922 }
 0x221   : > { %v1936_v57 = vsel %vm11545_vm6, %v1921_v8, %v9045_v54  ;;  %2852 = vmatpush1.bf16.msra.mxu1 %v2733_v11  ;;  %vm11548_vm6 = vcmask 924672  }
 0x222   : > { %1954 = vst [vmem:[#allocation4 + $0x220] sm:$0xf] %v1936_v57  ;;  %v1984_v17 = vpop.permute.xlu1 %1983  ;;  %1235 = vrot.lane.b32.xlu0 %v8955_v62, %s7873_s18 }
 0x223   : > { %v1997_v58 = vsel %vm11546_vm14, %v1982_v53, %v1984_v17  ;;  %vm11549_vm14 = vmmov %vm11548_vm6  ;;  %v2645_v45 = vld [vmem:[#allocation4 + $0x1d0] sm:$0xff] }
 0x224   : > { %2015 = vst [vmem:[#allocation4 + $0x218] sm:$0xf0] %v1997_v58  ;;  %1546 = vrot.lane.b32.xlu1 %v8944_v14, %s11497_s28  ;;  %v9054_v42 = vpop.permute.xlu0 %1985 }
 0x225   : > { %v1998_v27 = vsel %vm11547_vm9, %v1984_v17, %v9054_v42  ;;  %vm11550_vm9 = vcmask 916480   ;;  %v2646_v34 = vld [vmem:[#allocation4 + $0x1d8] sm:$0xff] }
 0x226   : > { %2016 = vst [vmem:[#allocation4 + $0x220] sm:$0xf0] %v1998_v27  ;;  %v2042_v16 = vpop.permute.xlu1 %2041  ;;  %1548 = vrot.lane.b32.xlu0 %v8955_v62, %s11497_s28 }
 0x227   : > { %v2058_v20 = vsel %vm11548_vm6, %v8655_v35, %v2042_v16  ;;  %vm11551_vm6 = vmmov %vm11550_vm9 }
 0x228   : > { %2076 = vst [vmem:[#allocation4 + $0x250] sm:$0xf] %v2058_v20  ;;  %1609 = vrot.lane.b32.xlu1 %v9006_v6, %s11495_s30  ;;  %v2044_v4 = vpop.permute.xlu0 %2043 }
 0x229   : > { %v2059_v12 = vsel %vm11549_vm14, %v2042_v16, %v2044_v4  ;;  %vm11552_vm14 = vcmask 908288  }
 0x22a   : > { %2077 = vst [vmem:[#allocation4 + $0x258] sm:$0xf] %v2059_v12  ;;  %v2105_v19 = vpop.permute.xlu1 %2104  ;;  %1611 = vrot.lane.b32.xlu0 %v8966_v43, %s11495_s30 }
 0x22b   : > { %v2121_v29 = vsel %vm11550_vm9, %v8663_v37, %v2105_v19  ;;  %v2654_v33 = vld [vmem:[#allocation4 + $0x218] sm:$0xff]  ;;  %vm11554_vm9 = vmmov %vm11552_vm14 }
 0x22c   : > { %2139 = vst [vmem:[#allocation4 + $0x250] sm:$0xf0] %v2121_v29  ;;  %1672 = vrot.lane.b32.xlu1 %v8944_v14, %s7866_s12  ;;  %v2107_v35 = vpop.permute.xlu0 %2106  ;;  %v2735_v46 = vpack.c.bf16 %v2654_v33, %v2645_v45 }
 0x22d   : > { %v2122_v32 = vsel %vm11551_vm6, %v2105_v19, %v2107_v35  ;;  %v2655_v22 = vld [vmem:[#allocation4 + $0x220] sm:$0xff]  ;;  %vm11555_vm6 = vcmask 900096  }
 0x22e   : > { %2140 = vst [vmem:[#allocation4 + $0x258] sm:$0xf0] %v2122_v32  ;;  %v2168_v53 = vpop.permute.xlu1 %2167  ;;  %1674 = vrot.lane.b32.xlu0 %v8955_v62, %s7866_s12  ;;  %v2736_v44 = vpack.c.bf16 %v2655_v22, %v2646_v34  ;;  %v9122_v34 = vld [vmem:[#allocation2 + $0x24] sm:$0xff] }
 0x22f   : > { %v2184_v37 = vsel %vm11552_vm14, %v8671_v50, %v2168_v53  ;;  %vm11556_vm14 = vmmov %vm11555_vm6 }
 0x230   : > { %2202 = vst [vmem:[#allocation4 + $0x298] sm:$0xf] %v2184_v37  ;;  %1735 = vrot.lane.b32.xlu1 %v9006_v6, %s11553_s23  ;;  %2892 = vmatprep.subr.bf16.mxu0 %v2736_v44  ;;  %v2170_v23 = vpop.permute.xlu0 %2169 }
 0x231   : > { %v2185_v18 = vsel %vm11554_vm9, %v2168_v53, %v2170_v23  ;;  %2893 = vmatpush1.bf16.msra.mxu0 %v2735_v46  ;;  %vm11557_vm9 = vcmask 924672   ;;  %v9132_v53 = vcombine.low %v9122_v34, %v9122_v34 }
 0x232   : > { %2203 = vst [vmem:[#allocation4 + $0x2a0] sm:$0xf] %v2185_v18  ;;  %v2231_v61 = vpop.permute.xlu1 %2230  ;;  %1737 = vrot.lane.b32.xlu0 %v8966_v43, %s11553_s23 }
 0x233   : > { %v2246_v63 = vsel %vm11555_vm6, %v8679_v47, %v2231_v61  ;;  %vm11558_vm6 = vmmov %vm11557_vm9  ;;  %v2661_v20 = vld [vmem:[#allocation4 + $0x250] sm:$0xff] }
 0x234   : > { %2264 = vst [vmem:[#allocation4 + $0x298] sm:$0xf0] %v2246_v63  ;;  %1298 = vrot.lane.b32.xlu1 %v9029_v31, %s7844_s7  ;;  %v2233_v50 = vpop.permute.xlu0 %2232 }
 0x235   : > { %v2247_v59 = vsel %vm11556_vm14, %v2231_v61, %v2233_v50  ;;  %vm11559_vm14 = vcmask 916480   ;;  %v2662_v17 = vld [vmem:[#allocation4 + $0x258] sm:$0xff] }
 0x236   : > { %2265 = vst [vmem:[#allocation4 + $0x2a0] sm:$0xf0] %v2247_v59  ;;  %v2046_v7 = vpop.permute.xlu1 %2045  ;;  %1361 = vrot.lane.b32.xlu0 %v8955_v62, %s11493_s13  ;;  %s11568_s13 = smov 114  }
 0x237   : > { %v2060_v5 = vsel %vm11557_vm9, %v2044_v4, %v2046_v7  ;;  %vm11561_vm9 = vmmov %vm11559_vm14 }
 0x238   : > { %2078 = vst [vmem:[#allocation4 + $0x260] sm:$0xf] %v2060_v5  ;;  %1424 = vrot.lane.b32.xlu1 %v9029_v31, %s11491_s25  ;;  %v9091_v8 = vpop.permute.xlu0 %2047  ;;  %s11566_s25 = smov 18  }
 0x239   : > { %v2061_v47 = vsel %vm11558_vm6, %v2046_v7, %v9091_v8  ;;  %vm11562_vm6 = vcmask 908288  }
 0x23a   : > { %2079 = vst [vmem:[#allocation4 + $0x268] sm:$0xf] %v2061_v47  ;;  %v2109_v10 = vpop.permute.xlu1 %2108  ;;  %1487 = vrot.lane.b32.xlu0 %v8955_v62, %s11489_s20  ;;  %s11563_s20 = smov 19  }
 0x23b   : > { %v2123_v3 = vsel %vm11559_vm14, %v2107_v35, %v2109_v10  ;;  %v2670_v11 = vld [vmem:[#allocation4 + $0x298] sm:$0xff]  ;;  %vm11564_vm14 = vmmov %vm11562_vm6 }
 0x23c   : > { %2141 = vst [vmem:[#allocation4 + $0x260] sm:$0xf0] %v2123_v3  ;;  %1798 = vrot.lane.b32.xlu1 %v8944_v14, %s11560_s8  ;;  %v9100_v13 = vpop.permute.xlu0 %2110  ;;  %v2742_v12 = vpack.c.bf16 %v2670_v11, %v2661_v20 }
 0x23d   : > { %v2124_v57 = vsel %vm11561_vm9, %v2109_v10, %v9100_v13  ;;  %v2671_v58 = vld [vmem:[#allocation4 + $0x2a0] sm:$0xff]  ;;  %vm11565_vm9 = vcmask 900096   ;;  %v9151_v10 = vcombine.high %v8772_v30, %v8772_v30 }
 0x23e   : > { %2142 = vst [vmem:[#allocation4 + $0x268] sm:$0xf0] %v2124_v57  ;;  %v2172_v27 = vpop.permute.xlu1 %2171  ;;  %1800 = vrot.lane.b32.xlu0 %v8955_v62, %s11560_s8  ;;  %v2743_v16 = vpack.c.bf16 %v2671_v58, %v2662_v17 }
 0x23f   : > { %v2186_v4 = vsel %vm11562_vm6, %v2170_v23, %v2172_v27  ;;  %vm11567_vm6 = vmmov %vm11565_vm9 }
 0x240   : > { %2204 = vst [vmem:[#allocation4 + $0x2a8] sm:$0xf] %v2186_v4  ;;  %1861 = vrot.lane.b32.xlu1 %v9006_v6, %s11563_s20  ;;  %2853 = vmatprep.subr.bf16.mxu1 %v2743_v16  ;;  %v9109_v19 = vpop.permute.xlu0 %2173 }
 0x241   : > { %v2187_v29 = vsel %vm11564_vm14, %v2172_v27, %v9109_v19  ;;  %2854 = vmatpush1.bf16.msra.mxu1 %v2742_v12  ;;  %vm11569_vm14 = vcmask 613376  }
 0x242   : > { %2205 = vst [vmem:[#allocation4 + $0x2b0] sm:$0xf] %v2187_v29  ;;  %v2235_v35 = vpop.permute.xlu1 %2234  ;;  %1863 = vrot.lane.b32.xlu0 %v8966_v43, %s11563_s20 }
 0x243   : > { %v2248_v33 = vsel %vm11565_vm9, %v2233_v50, %v2235_v35  ;;  %v2663_v59 = vld [vmem:[#allocation4 + $0x260] sm:$0xff]  ;;  %vm11570_vm9 = vmmov %vm11569_vm14 }
 0x244   : > { %2266 = vst [vmem:[#allocation4 + $0x2a8] sm:$0xf0] %v2248_v33  ;;  %1924 = vrot.lane.b32.xlu1 %v8944_v14, %s11566_s25  ;;  %v9118_v32 = vpop.permute.xlu0 %2236 }
 0x245   : > { %v2249_v6 = vsel %vm11567_vm6, %v2235_v35, %v9118_v32  ;;  %v2664_v18 = vld [vmem:[#allocation4 + $0x268] sm:$0xff]  ;;  %vm11571_vm6 = vmmov %vm11570_vm9 }
 0x246   : > { %2267 = vst [vmem:[#allocation4 + $0x2b0] sm:$0xf0] %v2249_v6  ;;  %v2293_v22 = vpop.permute.xlu1 %2292  ;;  %1926 = vrot.lane.b32.xlu0 %v8955_v62, %s11566_s25 }
 0x247   : > { %v2309_v43 = vsel %vm2306_vm5, %v8699_v21, %v2293_v22 }
 0x248   : > { %2327 = vst [vmem:[#allocation4 + $0x2e0] sm:$0xf] %v2309_v43  ;;  %1987 = vrot.lane.b32.xlu1 %v8772_v30, %s11568_s13  ;;  %v2295_v14 = vpop.permute.xlu0 %2294 }
 0x249   : > { %v2310_v44 = vsel %vm2306_vm5, %v2293_v22, %v2295_v14 }
 0x24a   : > { %2328 = vst [vmem:[#allocation4 + $0x2e8] sm:$0xf] %v2310_v44  ;;  %v2356_v45 = vpop.permute.xlu1 %2355  ;;  %1989 = vrot.lane.b32.xlu0 %v9132_v53, %s11568_s13 }
 0x24b   : > { %v2372_v37 = vsel %vm2369_vm8, %v8707_v28, %v2356_v45  ;;  %v2672_v46 = vld [vmem:[#allocation4 + $0x2a8] sm:$0xff] }
 0x24c   : > { %2390 = vst [vmem:[#allocation4 + $0x2e0] sm:$0xf0] %v2372_v37  ;;  %1550 = vrot.lane.b32.xlu1 %v9029_v31, %s11497_s28  ;;  %v2358_v21 = vpop.permute.xlu0 %2357  ;;  %v2744_v7 = vpack.c.bf16 %v2672_v46, %v2663_v59 }
 0x24d   : > { %v2373_v23 = vsel %vm2369_vm8, %v2356_v45, %v2358_v21  ;;  %v2673_v61 = vld [vmem:[#allocation4 + $0x2b0] sm:$0xff] }
 0x24e   : > { %2391 = vst [vmem:[#allocation4 + $0x2e8] sm:$0xf0] %v2373_v23  ;;  %v2419_v63 = vpop.permute.xlu1 %2418  ;;  %1613 = vrot.lane.b32.xlu0 %v8955_v62, %s11495_s30  ;;  %v2745_v50 = vpack.c.bf16 %v2673_v61, %v2664_v18  ;;  %s7891_s30 = smov 108  }
 0x24f   : > { %v2435_v28 = vsel %vm2432_vm0, %v8715_v36, %v2419_v63 }
 0x250   : > { %2453 = vst [vmem:[#allocation4 + $0x328] sm:$0xf] %v2435_v28  ;;  %1676 = vrot.lane.b32.xlu1 %v9029_v31, %s7866_s12  ;;  %2894 = vmatprep.subr.bf16.mxu0 %v2745_v50  ;;  %v2421_v5 = vpop.permute.xlu0 %2420 }
 0x251   : > { %v2436_v47 = vsel %vm2432_vm0, %v2419_v63, %v2421_v5  ;;  %2895 = vmatpush1.bf16.msra.mxu0 %v2744_v7 }
 0x252   : > { %2454 = vst [vmem:[#allocation4 + $0x330] sm:$0xf] %v2436_v47  ;;  %v2482_v3 = vpop.permute.xlu1 %2481  ;;  %1739 = vrot.lane.b32.xlu0 %v8955_v62, %s11553_s23 }
 0x253   : > { %v2498_v36 = vsel %vm11569_vm14, %v8723_v41, %v2482_v3  ;;  %v2679_v43 = vld [vmem:[#allocation4 + $0x2e0] sm:$0xff]  ;;  %vm11572_vm14 = vmmov %vm11571_vm6 }
 0x254   : > { %2516 = vst [vmem:[#allocation4 + $0x328] sm:$0xf0] %v2498_v36  ;;  %2049 = vrot.lane.b32.xlu1 %v9151_v10, %s7881_s10  ;;  %v2484_v11 = vpop.permute.xlu0 %2483 }
 0x255   : > { %v2499_v57 = vsel %vm11570_vm9, %v2482_v3, %v2484_v11  ;;  %v2680_v35 = vld [vmem:[#allocation4 + $0x2e8] sm:$0xff]  ;;  %vm11573_vm9 = vcmask 769024  }
 0x256   : > { %2517 = vst [vmem:[#allocation4 + $0x330] sm:$0xf0] %v2499_v57  ;;  %v2297_v17 = vpop.permute.xlu1 %2296  ;;  %2051 = vrot.lane.b32.xlu0 %v9122_v34, %s7881_s10 }
 0x257   : > { %v2311_v58 = vsel %vm2306_vm5, %v2295_v14, %v2297_v17 }
 0x258   : > { %2329 = vst [vmem:[#allocation4 + $0x2f0] sm:$0xf] %v2311_v58  ;;  %2112 = vrot.lane.b32.xlu1 %v8772_v30, %s11530_s9  ;;  %v9165_v27 = vpop.permute.xlu0 %2298 }
 0x259   : > { %v2312_v41 = vsel %vm2306_vm5, %v2297_v17, %v9165_v27 }
 0x25a   : > { %2330 = vst [vmem:[#allocation4 + $0x2f8] sm:$0xf] %v2312_v41  ;;  %v2360_v16 = vpop.permute.xlu1 %2359  ;;  %2114 = vrot.lane.b32.xlu0 %v9132_v53, %s11530_s9 }
 0x25b   : > { %v2374_v20 = vsel %vm2369_vm8, %v2358_v21, %v2360_v16  ;;  %v2688_v12 = vld [vmem:[#allocation4 + $0x328] sm:$0xff] }
 0x25c   : > { %2392 = vst [vmem:[#allocation4 + $0x2f0] sm:$0xf0] %v2374_v20  ;;  %2175 = vrot.lane.b32.xlu1 %v9151_v10, %s11531_s29  ;;  %v9174_v4 = vpop.permute.xlu0 %2361  ;;  %v2751_v44 = vpack.c.bf16 %v2688_v12, %v2679_v43 }
 0x25d   : > { %v2375_v29 = vsel %vm2369_vm8, %v2360_v16, %v9174_v4  ;;  %v2689_v33 = vld [vmem:[#allocation4 + $0x330] sm:$0xff] }
 0x25e   : > { %2393 = vst [vmem:[#allocation4 + $0x2f8] sm:$0xf0] %v2375_v29  ;;  %v2423_v6 = vpop.permute.xlu1 %2422  ;;  %2177 = vrot.lane.b32.xlu0 %v9122_v34, %s11531_s29  ;;  %v2752_v22 = vpack.c.bf16 %v2689_v33, %v2680_v35 }
 0x25f   : > { %v2437_v14 = vsel %vm2432_vm0, %v2421_v5, %v2423_v6 }
 0x260   : > { %2455 = vst [vmem:[#allocation4 + $0x338] sm:$0xf] %v2437_v14  ;;  %2238 = vrot.lane.b32.xlu1 %v8772_v30, %s11532_s24  ;;  %2855 = vmatprep.subr.bf16.mxu1 %v2752_v22  ;;  %v9183_v45 = vpop.permute.xlu0 %2424  ;;  %v7826_v22 = vld [vmem:[#allocation2 + $0x1c] sm:$0xff] }
 0x261   : > { %v2438_v37 = vsel %vm2432_vm0, %v2423_v6, %v9183_v45  ;;  %2856 = vmatpush1.bf16.msra.mxu1 %v2751_v44  ;;  %v9249_v44 = vcombine.high %v9122_v34, %v9122_v34 }
 0x262   : > { %2456 = vst [vmem:[#allocation4 + $0x340] sm:$0xf] %v2438_v37  ;;  %v2486_v21 = vpop.permute.xlu1 %2485  ;;  %2240 = vrot.lane.b32.xlu0 %v9132_v53, %s11532_s24 }
 0x263   : > { %v2500_v46 = vsel %vm11571_vm6, %v2484_v11, %v2486_v21  ;;  %vm11574_vm6 = vmmov %vm11573_vm9  ;;  %v2681_v11 = vld [vmem:[#allocation4 + $0x2f0] sm:$0xff] }
 0x264   : > { %2518 = vst [vmem:[#allocation4 + $0x338] sm:$0xf0] %v2500_v46  ;;  %1802 = vrot.lane.b32.xlu1 %v9029_v31, %s11560_s8  ;;  %v9192_v23 = vpop.permute.xlu0 %2487 }
 0x265   : > { %v2501_v18 = vsel %vm11572_vm14, %v2486_v21, %v9192_v23  ;;  %v2682_v5 = vld [vmem:[#allocation4 + $0x2f8] sm:$0xff]  ;;  %vm11575_vm14 = vcmask 760832  }
 0x266   : > { %2519 = vst [vmem:[#allocation4 + $0x340] sm:$0xf0] %v2501_v18  ;;  %v2545_v61 = vpop.permute.xlu1 %2544  ;;  %1865 = vrot.lane.b32.xlu0 %v8955_v62, %s11563_s20 }
 0x267   : > { %v2561_v63 = vsel %vm2558_vm10, %v8795_v40, %v2545_v61 }
 0x268   : > { %2579 = vst [vmem:[#allocation4 + $0x370] sm:$0xf] %v2561_v63  ;;  %1928 = vrot.lane.b32.xlu1 %v9029_v31, %s11566_s25  ;;  %v2547_v50 = vpop.permute.xlu0 %2546 }
 0x269   : > { %v2562_v59 = vsel %vm2558_vm10, %v2545_v61, %v2547_v50 }
 0x26a   : > { %2580 = vst [vmem:[#allocation4 + $0x378] sm:$0xf] %v2562_v59  ;;  %v1043_v28 = vpop.permute.xlu1 %1042  ;;  %1991 = vrot.lane.b32.xlu0 %v9122_v34, %s11568_s13 }
 0x26b   : > { %v1055_v7 = vsel %vm11573_vm9, %v8804_v51, %v1043_v28  ;;  %v2690_v62 = vld [vmem:[#allocation4 + $0x338] sm:$0xff]  ;;  %vm11576_vm9 = vmmov %vm11575_vm14 }
 0x26c   : > { %1073 = vst [vmem:[#allocation4 + $0x30] sm:$0xf] %v1055_v7  ;;  %2300 = vrot.lane.b32.xlu1 %v9151_v10, %s7865_s11  ;;  %v9209_v40 = vpop.permute.xlu0 %1044  ;;  %v2753_v57 = vpack.c.bf16 %v2690_v62, %v2681_v11 }
 0x26d   : > { %v1056_v31 = vsel %vm11574_vm6, %v1043_v28, %v9209_v40  ;;  %v2691_v47 = vld [vmem:[#allocation4 + $0x340] sm:$0xff]  ;;  %vm11577_vm6 = vcmask 465920  }
 0x26e   : > { %1074 = vst [vmem:[#allocation4 + $0x38] sm:$0xf] %v1056_v31  ;;  %v1106_v3 = vpop.permute.xlu1 %1105  ;;  %2302 = vrot.lane.b32.xlu0 %v9122_v34, %s7865_s11  ;;  %v2754_v36 = vpack.c.bf16 %v2691_v47, %v2682_v5 }
 0x26f   : > { %v1118_v51 = vsel %vm11575_vm14, %v8813_v9, %v1106_v3  ;;  %v2697_v17 = vld [vmem:[#allocation4 + $0x370] sm:$0xf]  ;;  %vm11578_vm14 = vmmov %vm11577_vm6 }
 0x270   : > { %1136 = vst [vmem:[#allocation4 + $0x30] sm:$0xf0] %v1118_v51  ;;  %2363 = vrot.lane.b32.xlu1 %v8772_v30, %s7884_s15  ;;  %2896 = vmatprep.subr.bf16.mxu0 %v2754_v36  ;;  %v9219_v58 = vpop.permute.xlu0 %1107  ;;  %v2760_v41 = vpack.c.bf16 %v2697_v17, %v2697_v17 }
 0x271   : > { %v1119_v16 = vsel %vm11576_vm9, %v1106_v3, %v9219_v58  ;;  %2897 = vmatpush1.bf16.msra.mxu0 %v2753_v57  ;;  %v2698_v20 = vld [vmem:[#allocation4 + $0x378] sm:$0xf]  ;;  %vm11579_vm9 = vcmask 457728  }
 0x272   : > { %1137 = vst [vmem:[#allocation4 + $0x38] sm:$0xf0] %v1119_v16  ;;  %v1169_v12 = vpop.permute.xlu1 %1168  ;;  %2365 = vrot.lane.b32.xlu0 %v9132_v53, %s7884_s15  ;;  %v2761_v9 = vpack.c.bf16 %v2698_v20, %v2698_v20  ;;  %v2784_v35 = vsel %vm11505_vm11, %v2760_v41, 0 }
 0x273   : > { %v1181_v29 = vsel %vm1174_vm12, %v8823_v60, %v1169_v12 }
 0x274   : > { %1199 = vst [vmem:[#allocation4 + $0x78] sm:$0xf] %v1181_v29  ;;  %2426 = vrot.lane.b32.xlu1 %v9151_v10, %s7885_s27  ;;  %6909 = vmatprep.subr.msk.bf16.mxu1 %vm11505_vm11, %v2761_v9  ;;  %v9230_v30 = vpop.permute.xlu0 %1170 }
 0x275   : > { %v1182_v33 = vsel %vm1174_vm12, %v1169_v12, %v9230_v30  ;;  %2858 = vmatpush1.bf16.msra.mxu1 %v2784_v35  ;;  %v9304_v12 = vld [vmem:[%s11454_s2] sm:$0xf] }
 0x276   : > { %1200 = vst [vmem:[#allocation4 + $0x80] sm:$0xf] %v1182_v33  ;;  %v1232_v6 = vpop.permute.xlu1 %1231  ;;  %2428 = vrot.lane.b32.xlu0 %v9122_v34, %s7885_s27 }
 0x277   : > { %v1244_v60 = vsel %vm1237_vm3, %v8843_v55, %v1232_v6  ;;  %v2593_v62 = vld [vmem:[#allocation4 + $0x30] sm:$0xff] }
 0x278   : > { %1262 = vst [vmem:[#allocation4 + $0x78] sm:$0xf0] %v1244_v60  ;;  %2489 = vrot.lane.b32.xlu1 %v7826_v22, %s7886_s26  ;;  %v9240_v43 = vpop.permute.xlu0 %1233  ;;  %6910 = vmatmul.mubr.msk.bf16.vlgmr.msra.gmra.mrb[0].mxu1 %vm11499_vm2, %v8831_v25 }
 0x279   : > { %v1245_v14 = vsel %vm1237_vm3, %v1232_v6, %v9240_v43  ;;  %2959 = vmatprep.mubr.bf16.mxu1 %v11503_v26 }
 0x27a   : > { %1263 = vst [vmem:[#allocation4 + $0x80] sm:$0xf0] %v1245_v14  ;;  %v2549_v55 = vpop.permute.xlu1 %2548  ;;  %2491 = vrot.lane.b32.xlu0 %v9132_v53, %s7886_s26 }
 0x27b   : > { %v2563_v37 = vsel %vm2558_vm10, %v2547_v50, %v2549_v55  ;;  %v2594_v50 = vld [vmem:[#allocation4 + $0x38] sm:$0xff] }
 0x27c   : > { %2581 = vst [vmem:[#allocation4 + $0x380] sm:$0xf] %v2563_v37  ;;  %2053 = vrot.lane.b32.xlu1 %v9249_v44, %s7881_s10  ;;  %v9256_v25 = vpop.permute.xlu0 %2550 }
 0x27d   : > { %v2564_v21 = vsel %vm2558_vm10, %v2549_v55, %v9256_v25 }
 0x27e   : > { %2582 = vst [vmem:[#allocation4 + $0x388] sm:$0xf] %v2564_v21  ;;  %v1295_v46 = vpop.permute.xlu1 %1294  ;;  %2116 = vrot.lane.b32.xlu0 %v9122_v34, %s11530_s9 }
 0x27f   : > { %v1307_v18 = vsel %vm1300_vm13, %v8883_v15, %v1295_v46  ;;  %v2602_v61 = vld [vmem:[#allocation4 + $0x78] sm:$0xff] }
 0x280   : > { %1325 = vst [vmem:[#allocation4 + $0xc0] sm:$0xf] %v1307_v18  ;;  %2179 = vrot.lane.b32.xlu1 %v9249_v44, %s11531_s29  ;;  %v9266_v53 = vpop.permute.xlu0 %1296  ;;  %v2710_v31 = vpack.c.bf16 %v2602_v61, %v2593_v62 }
 0x281   : > { %v1308_v63 = vsel %vm1300_vm13, %v1295_v46, %v9266_v53  ;;  %v2603_v59 = vld [vmem:[#allocation4 + $0x80] sm:$0xff] }
 0x282   : > { %1326 = vst [vmem:[#allocation4 + $0xc8] sm:$0xf] %v1308_v63  ;;  %v1358_v28 = vpop.permute.xlu1 %1357  ;;  %2242 = vrot.lane.b32.xlu0 %v9122_v34, %s11532_s24  ;;  %v2711_v7 = vpack.c.bf16 %v2603_v59, %v2594_v50 }
 0x283   : > { %v1370_v15 = vsel %vm1363_vm4, %v8892_v24, %v1358_v28  ;;  %v2699_v5 = vld [vmem:[#allocation4 + $0x380] sm:$0xf] }
 0x284   : > { %1388 = vst [vmem:[#allocation4 + $0xc0] sm:$0xf0] %v1370_v15  ;;  %2552 = vrot.lane.b32.xlu1 %v9151_v10, %s7871_s16  ;;  %2927 = vmatprep.subr.bf16.mxu1 %v2711_v7  ;;  %v9276_v47 = vpop.permute.xlu0 %1359  ;;  %v2762_v3 = vpack.c.bf16 %v2699_v5, %v2699_v5 }
 0x285   : > { %v1371_v36 = vsel %vm1363_vm4, %v1358_v28, %v9276_v47  ;;  %2928 = vmatpush1.bf16.msra.mxu1 %v2710_v31  ;;  %v2700_v11 = vld [vmem:[#allocation4 + $0x388] sm:$0xf] }
 0x286   : > { %1389 = vst [vmem:[#allocation4 + $0xc8] sm:$0xf0] %v1371_v36  ;;  %v1421_v51 = vpop.permute.xlu1 %1420  ;;  %2554 = vrot.lane.b32.xlu0 %v9122_v34, %s7871_s16  ;;  %v2763_v24 = vpack.c.bf16 %v2700_v11, %v2700_v11  ;;  %v2790_v17 = vsel %vm11505_vm11, %v2762_v3, 0 }
 0x287   : > { %v1433_v57 = vsel %vm11577_vm6, %v8901_v1, %v1421_v51  ;;  %vm11580_vm6 = vmmov %vm11579_vm9 }
 0x288   : > { %1451 = vst [vmem:[#allocation4 + $0x108] sm:$0xf] %v1433_v57  ;;  %2304 = vrot.lane.b32.xlu1 %v9249_v44, %s7865_s11  ;;  %6911 = vmatprep.subr.msk.bf16.mxu0 %vm11505_vm11, %v2763_v24  ;;  %v9287_v10 = vpop.permute.xlu0 %1422 }
 0x289   : > { %v1434_v41 = vsel %vm11578_vm14, %v1421_v51, %v9287_v10  ;;  %2899 = vmatpush1.bf16.msra.mxu0 %v2790_v17  ;;  %vm11581_vm14 = vcmask 769024  }
 0x28a   : > { %1452 = vst [vmem:[#allocation4 + $0x110] sm:$0xf] %v1434_v41  ;;  %v1484_v16 = vpop.permute.xlu1 %1483  ;;  %2367 = vrot.lane.b32.xlu0 %v9122_v34, %s7884_s15  ;;  %6963 = vmatprep.subr.bf16.mxu0 %v11514_v0 }
 0x28b   : > { %v1496_v1 = vsel %vm11579_vm9, %v8910_v49, %v1484_v16  ;;  %vm11582_vm9 = vcmask 760832   ;;  %v2611_v21 = vld [vmem:[#allocation4 + $0xc0] sm:$0xff] }
 0x28c   : > { %1514 = vst [vmem:[#allocation4 + $0x108] sm:$0xf0] %v1496_v1  ;;  %2430 = vrot.lane.b32.xlu1 %v9249_v44, %s7885_s27  ;;  %v9299_v20 = vpop.permute.xlu0 %1485  ;;  %6912 = vmatmul.mubr.msk.bf16.vlgmr.msra.gmra.mrb[4].mxu0 %vm11499_vm2, %v9304_v12  ;;  %vm11500_vm2 = vmmov 0  }
 0x28d   : > { %v1497_v9 = vsel %vm11580_vm6, %v1484_v16, %v9299_v20  ;;  %6977 = vmatprep.mubr.msk.bf16.mxu0 %vm11500_vm2, %v11514_v0  ;;  %v2612_v14 = vld [vmem:[#allocation4 + $0xc8] sm:$0xff]  ;;  %vm11583_vm6 = vcmask 179200  }
 0x28e   : > { %1515 = vst [vmem:[#allocation4 + $0x110] sm:$0xf0] %v1497_v9  ;;  %v1047_v29 = vpop.permute.xlu1 %1046  ;;  %2493 = vrot.lane.b32.xlu0 %v9122_v34, %s7886_s26 }
 0x28f   : > { %v1057_v49 = vsel %vm11581_vm14, %v9209_v40, %v1047_v29  ;;  %v9325_v40 = vld [vmem:[%s11456_s4] sm:$0xff]  ;;  %vm11584_vm14 = vmmov %vm11583_vm6 }
 0x290   : > { %1075 = vst [vmem:[#allocation4 + $0x40] sm:$0xf] %v1057_v49  ;;  %2556 = vrot.lane.b32.xlu1 %v9249_v44, %s7871_s16  ;;  %v1110_v35 = vpop.permute.xlu0 %1109 }
 0x291   : > { %v1120_v33 = vsel %vm11582_vm9, %v9219_v58, %v1110_v35  ;;  %vm11585_vm9 = vcmask 171008  }
 0x292   : > { %1138 = vst [vmem:[#allocation4 + $0x40] sm:$0xf0] %v1120_v33  ;;  %v1173_v6 = vpop.permute.xlu1 %1172  ;;  %2769 = vperm.xlu0 %7087, %v9325_v40   ;;  %vm11586_vm2 = vmmov %vm11585_vm9 }
 0x293   : > { %v1183_v34 = vsel %vm1174_vm12, %v9230_v30, %v1173_v6  ;;  %v2620_v22 = vld [vmem:[#allocation4 + $0x108] sm:$0xff] }
 0x294   : > { %1201 = vst [vmem:[#allocation4 + $0x88] sm:$0xf] %v1183_v34  ;;  %v1236_v60 = vpop.permute.xlu0 %1235  ;;  %v2719_v46 = vpack.c.bf16 %v2620_v22, %v2611_v21 }
 0x295   : > { %v1246_v58 = vsel %vm1237_vm3, %v9240_v43, %v1236_v60  ;;  %v2621_v44 = vld [vmem:[#allocation4 + $0x110] sm:$0xff] }
 0x296   : > { %1264 = vst [vmem:[#allocation4 + $0x88] sm:$0xf0] %v1246_v58  ;;  %v1547_v55 = vpop.permute.xlu1 %1546  ;;  %v2720_v37 = vpack.c.bf16 %v2621_v44, %v2612_v14 }
 0x297   : > { %v1559_v30 = vsel %vm1552_vm15, %v8951_v2, %v1547_v55  ;;  %v9332_v18 = vpop.f32.mrb[0].mxu0 }
 0x298   : > { %1577 = vst [vmem:[#allocation4 + $0x150] sm:$0xf] %v1559_v30  ;;  %2929 = vmatprep.subr.bf16.mxu1 %v2720_v37  ;;  %v9334_v61 = vpop.permute.xlu0 %1548  ;;  %v9336_v63 = vpop.f32.mrb[1].mxu0 }
 0x299   : > { %v1560_v43 = vsel %vm1552_vm15, %v1547_v55, %v9334_v61  ;;  %2930 = vmatpush1.bf16.msra.mxu1 %v2719_v46  ;;  %v2842_v50 = vpop.f32.mrb[2].mxu0  ;;  %v2595_v15 = vld [vmem:[#allocation4 + $0x40] sm:$0xff] }
 0x29a   : > { %1578 = vst [vmem:[#allocation4 + $0x158] sm:$0xf] %v1560_v43  ;;  %v1610_v59 = vpop.permute.xlu1 %1609  ;;  %v2843_v28 = vpop.f32.mrb[3].mxu0 }
 0x29b   : > { %v1622_v2 = vsel %vm11506_vm7, %v8962_v38, %v1610_v59 }
 0x29c   : > { %1640 = vst [vmem:[#allocation4 + $0x150] sm:$0xf0] %v1622_v2  ;;  %v9342_v7 = vpop.permute.xlu0 %1611 }
 0x29d   : > { %v1623_v62 = vsel %vm11506_vm7, %v1610_v59, %v9342_v7  ;;  %v2604_v31 = vld [vmem:[#allocation4 + $0x88] sm:$0xff] }
 0x29e   : > { %1641 = vst [vmem:[#allocation4 + $0x158] sm:$0xf0] %v1623_v62  ;;  %v1673_v5 = vpop.permute.xlu1 %1672  ;;  %v2712_v3 = vpack.c.bf16 %v2604_v31, %v2595_v15 }
 0x29f   : > { %v1685_v36 = vsel %vm11583_vm6, %v8975_v39, %v1673_v5  ;;  %vm11587_vm6 = vcmask 465920  }
 0x2a0   : > { %1703 = vst [vmem:[#allocation4 + $0x198] sm:$0xf] %v1685_v36  ;;  %6964 = vmatpush3.bf16.msra.mxu0 %v2712_v3  ;;  %v9348_v11 = vpop.permute.xlu0 %1674 }
 0x2a1   : > { %v1686_v38 = vsel %vm11584_vm14, %v1673_v5, %v9348_v11  ;;  %6965 = vmatprep.subr.bf16.mxu0 %v11514_v0  ;;  %vm11589_vm14 = vcmask 154624  }
 0x2a2   : > { %1704 = vst [vmem:[#allocation4 + $0x1a0] sm:$0xf] %v1686_v38  ;;  %v1736_v51 = vpop.permute.xlu1 %1735 }
 0x2a3   : > { %v1748_v24 = vsel %vm11585_vm9, %v8984_v56, %v1736_v51  ;;  %v2629_v60 = vld [vmem:[#allocation4 + $0x150] sm:$0xff]  ;;  %vm11590_vm9 = vmmov %vm11589_vm14 }
 0x2a4   : > { %1766 = vst [vmem:[#allocation4 + $0x198] sm:$0xf0] %v1748_v24  ;;  %v9355_v57 = vpop.permute.xlu0 %1737 }
 0x2a5   : > { %v1749_v39 = vsel %vm11586_vm2, %v1736_v51, %v9355_v57  ;;  %vm11588_vm2 = vcmask 457728   ;;  %v2630_v33 = vld [vmem:[#allocation4 + $0x158] sm:$0xff] }
 0x2a6   : > { %1767 = vst [vmem:[#allocation4 + $0x1a0] sm:$0xf0] %v1749_v39  ;;  %v1299_v17 = vpop.permute.xlu1 %1298 }
 0x2a7   : > { %v1309_v41 = vsel %vm1300_vm13, %v9266_v53, %v1299_v17 }
 0x2a8   : > { %1327 = vst [vmem:[#allocation4 + $0xd0] sm:$0xf] %v1309_v41  ;;  %v1362_v16 = vpop.permute.xlu0 %1361 }
 0x2a9   : > { %v1372_v1 = vsel %vm1363_vm4, %v9276_v47, %v1362_v16 }
 0x2aa   : > { %1390 = vst [vmem:[#allocation4 + $0xd0] sm:$0xf0] %v1372_v1  ;;  %v1425_v9 = vpop.permute.xlu1 %1424 }
 0x2ab   : > { %v1435_v56 = vsel %vm11587_vm6, %v9287_v10, %v1425_v9  ;;  %v2638_v49 = vld [vmem:[#allocation4 + $0x198] sm:$0xff]  ;;  %vm11591_vm6 = vcmask 146432  }
 0x2ac   : > { %1453 = vst [vmem:[#allocation4 + $0x118] sm:$0xf] %v1435_v56  ;;  %v1488_v29 = vpop.permute.xlu0 %1487  ;;  %v2728_v22 = vpack.c.bf16 %v2638_v49, %v2629_v60 }
 0x2ad   : > { %v1498_v35 = vsel %vm11588_vm2, %v9299_v20, %v1488_v29  ;;  %v2639_v6 = vld [vmem:[#allocation4 + $0x1a0] sm:$0xff]  ;;  %vm11592_vm2 = vmmov %vm11591_vm6 }
 0x2ae   : > { %1516 = vst [vmem:[#allocation4 + $0x118] sm:$0xf0] %v1498_v35  ;;  %v1799_v53 = vpop.permute.xlu1 %1798  ;;  %v2729_v34 = vpack.c.bf16 %v2639_v6, %v2630_v33 }
 0x2af   : > { %v1811_v47 = vsel %vm11502_vm1, %v9023_v48, %v1799_v53 }
 0x2b0   : > { %1829 = vst [vmem:[#allocation4 + $0x1e0] sm:$0xf] %v1811_v47  ;;  %2931 = vmatprep.subr.bf16.mxu1 %v2729_v34  ;;  %v9369_v58 = vpop.permute.xlu0 %1800 }
 0x2b1   : > { %v1812_v10 = vsel %vm11502_vm1, %v1799_v53, %v9369_v58  ;;  %2932 = vmatpush1.bf16.msra.mxu1 %v2728_v22  ;;  %v2613_v55 = vld [vmem:[#allocation4 + $0xd0] sm:$0xff] }
 0x2b2   : > { %1830 = vst [vmem:[#allocation4 + $0x1e8] sm:$0xf] %v1812_v10  ;;  %v1862_v20 = vpop.permute.xlu1 %1861 }
 0x2b3   : > { %v1874_v14 = vsel %vm11589_vm14, %v9036_v52, %v1862_v20  ;;  %vm11593_vm14 = vcmask 932864  }
 0x2b4   : > { %1892 = vst [vmem:[#allocation4 + $0x1e0] sm:$0xf0] %v1874_v14  ;;  %v9375_v44 = vpop.permute.xlu0 %1863 }
 0x2b5   : > { %v1875_v48 = vsel %vm11590_vm9, %v1862_v20, %v9375_v44  ;;  %v2622_v37 = vld [vmem:[#allocation4 + $0x118] sm:$0xff]  ;;  %vm11594_vm9 = vmmov %vm11593_vm14 }
 0x2b6   : > { %1893 = vst [vmem:[#allocation4 + $0x1e8] sm:$0xf0] %v1875_v48  ;;  %v1925_v21 = vpop.permute.xlu1 %1924  ;;  %v2721_v30 = vpack.c.bf16 %v2622_v37, %v2613_v55 }
 0x2b7   : > { %v1937_v46 = vsel %vm11591_vm6, %v9045_v54, %v1925_v21  ;;  %vm11595_vm6 = vcmask 179200  }
 0x2b8   : > { %1955 = vst [vmem:[#allocation4 + $0x228] sm:$0xf] %v1937_v46  ;;  %6966 = vmatpush3.bf16.msra.mxu0 %v2721_v30  ;;  %v9381_v43 = vpop.permute.xlu0 %1926 }
 0x2b9   : > { %v1938_v52 = vsel %vm11592_vm2, %v1925_v21, %v9381_v43  ;;  %6967 = vmatprep.subr.bf16.mxu0 %v11514_v0  ;;  %vm11596_vm2 = vcmask 171008  }
 0x2ba   : > { %1956 = vst [vmem:[#allocation4 + $0x230] sm:$0xf] %v1938_v52  ;;  %v1988_v50 = vpop.permute.xlu1 %1987 }
 0x2bb   : > { %v1999_v59 = vsel %vm11593_vm14, %v9054_v42, %v1988_v50  ;;  %v2647_v17 = vld [vmem:[#allocation4 + $0x1e0] sm:$0xff]  ;;  %vm11597_vm14 = vcmask 924672  }
 0x2bc   : > { %2017 = vst [vmem:[#allocation4 + $0x228] sm:$0xf0] %v1999_v59  ;;  %v9388_v28 = vpop.permute.xlu0 %1989 }
 0x2bd   : > { %v2000_v54 = vsel %vm11594_vm9, %v1988_v50, %v9388_v28  ;;  %v2648_v51 = vld [vmem:[#allocation4 + $0x1e8] sm:$0xff]  ;;  %vm11598_vm9 = vmmov %vm11597_vm14 }
 0x2be   : > { %2018 = vst [vmem:[#allocation4 + $0x230] sm:$0xf0] %v2000_v54  ;;  %v1551_v2 = vpop.permute.xlu1 %1550 }
 0x2bf   : > { %v1561_v62 = vsel %vm1552_vm15, %v9334_v61, %v1551_v2 }
 0x2c0   : > { %1579 = vst [vmem:[#allocation4 + $0x160] sm:$0xf] %v1561_v62  ;;  %v1614_v15 = vpop.permute.xlu0 %1613 }
 0x2c1   : > { %v1624_v31 = vsel %vm11506_vm7, %v9342_v7, %v1614_v15 }
 0x2c2   : > { %1642 = vst [vmem:[#allocation4 + $0x160] sm:$0xf0] %v1624_v31  ;;  %v1677_v5 = vpop.permute.xlu1 %1676 }
 0x2c3   : > { %v1687_v42 = vsel %vm11595_vm6, %v9348_v11, %v1677_v5  ;;  %v2656_v36 = vld [vmem:[#allocation4 + $0x228] sm:$0xff]  ;;  %vm11599_vm6 = vcmask 916480  }
 0x2c4   : > { %1705 = vst [vmem:[#allocation4 + $0x1a8] sm:$0xf] %v1687_v42  ;;  %v1740_v3 = vpop.permute.xlu0 %1739  ;;  %v2737_v41 = vpack.c.bf16 %v2656_v36, %v2647_v17 }
 0x2c5   : > { %v1750_v38 = vsel %vm11596_vm2, %v9355_v57, %v1740_v3  ;;  %v2657_v24 = vld [vmem:[#allocation4 + $0x230] sm:$0xff]  ;;  %vm11600_vm2 = vmmov %vm11599_vm6 }
 0x2c6   : > { %1768 = vst [vmem:[#allocation4 + $0x1a8] sm:$0xf0] %v1750_v38  ;;  %v2050_v61 = vpop.permute.xlu1 %2049  ;;  %v2738_v39 = vpack.c.bf16 %v2657_v24, %v2648_v51 }
 0x2c7   : > { %v2062_v7 = vsel %vm11597_vm14, %v9091_v8, %v2050_v61  ;;  %vm11601_vm14 = vcmask 908288  }
 0x2c8   : > { %2080 = vst [vmem:[#allocation4 + $0x270] sm:$0xf] %v2062_v7  ;;  %2933 = vmatprep.subr.bf16.mxu1 %v2738_v39  ;;  %v9402_v16 = vpop.permute.xlu0 %2051 }
 0x2c9   : > { %v2063_v11 = vsel %vm11598_vm9, %v2050_v61, %v9402_v16  ;;  %2934 = vmatpush1.bf16.msra.mxu1 %v2737_v41  ;;  %v2631_v56 = vld [vmem:[#allocation4 + $0x160] sm:$0xff]  ;;  %vm11602_vm9 = vmmov %vm11601_vm14 }
 0x2ca   : > { %2081 = vst [vmem:[#allocation4 + $0x278] sm:$0xf] %v2063_v11  ;;  %v2113_v57 = vpop.permute.xlu1 %2112 }
 0x2cb   : > { %v2125_v1 = vsel %vm11599_vm6, %v9100_v13, %v2113_v57  ;;  %vm11603_vm6 = vcmask 900096  }
 0x2cc   : > { %2143 = vst [vmem:[#allocation4 + $0x270] sm:$0xf0] %v2125_v1  ;;  %v9408_v9 = vpop.permute.xlu0 %2114 }
 0x2cd   : > { %v2126_v8 = vsel %vm11600_vm2, %v2113_v57, %v9408_v9  ;;  %v2640_v29 = vld [vmem:[#allocation4 + $0x1a8] sm:$0xff]  ;;  %vm11604_vm2 = vmmov %vm11603_vm6 }
 0x2ce   : > { %2144 = vst [vmem:[#allocation4 + $0x278] sm:$0xf0] %v2126_v8  ;;  %v2176_v49 = vpop.permute.xlu1 %2175  ;;  %v2730_v35 = vpack.c.bf16 %v2640_v29, %v2631_v56 }
 0x2cf   : > { %v2188_v33 = vsel %vm11601_vm14, %v9109_v19, %v2176_v49  ;;  %vm11605_vm14 = vcmask 154624  }
 0x2d0   : > { %2206 = vst [vmem:[#allocation4 + $0x2b8] sm:$0xf] %v2188_v33  ;;  %6968 = vmatpush3.bf16.msra.mxu0 %v2730_v35  ;;  %v9414_v6 = vpop.permute.xlu0 %2177 }
 0x2d1   : > { %v2189_v13 = vsel %vm11602_vm9, %v2176_v49, %v9414_v6  ;;  %6969 = vmatprep.subr.bf16.mxu0 %v11514_v0  ;;  %vm11606_vm9 = vcmask 146432  }
 0x2d2   : > { %2207 = vst [vmem:[#allocation4 + $0x2c0] sm:$0xf] %v2189_v13  ;;  %v2239_v53 = vpop.permute.xlu1 %2238 }
 0x2d3   : > { %v2250_v34 = vsel %vm11603_vm6, %v9118_v32, %v2239_v53  ;;  %vm11607_vm6 = vcmask 932864   ;;  %v2665_v52 = vld [vmem:[#allocation4 + $0x270] sm:$0xff] }
 0x2d4   : > { %2268 = vst [vmem:[#allocation4 + $0x2b8] sm:$0xf0] %v2250_v34  ;;  %v9421_v60 = vpop.permute.xlu0 %2240 }
 0x2d5   : > { %v2251_v19 = vsel %vm11604_vm2, %v2239_v53, %v9421_v60  ;;  %v2666_v21 = vld [vmem:[#allocation4 + $0x278] sm:$0xff]  ;;  %vm11608_vm2 = vcmask 613376  }
 0x2d6   : > { %2269 = vst [vmem:[#allocation4 + $0x2c0] sm:$0xf0] %v2251_v19  ;;  %v1803_v47 = vpop.permute.xlu1 %1802 }
 0x2d7   : > { %v1813_v22 = vsel %vm11502_vm1, %v9369_v58, %v1803_v47  ;;  %vm11612_vm1 = vcmask 908288  }
 0x2d8   : > { %1831 = vst [vmem:[#allocation4 + $0x1f0] sm:$0xf] %v1813_v22  ;;  %v1866_v10 = vpop.permute.xlu0 %1865 }
 0x2d9   : > { %v1876_v20 = vsel %vm11605_vm14, %v9375_v44, %v1866_v10  ;;  %vm11609_vm14 = vmmov %vm11608_vm2 }
 0x2da   : > { %1894 = vst [vmem:[#allocation4 + $0x1f0] sm:$0xf0] %v1876_v20  ;;  %v1929_v14 = vpop.permute.xlu1 %1928 }
 0x2db   : > { %v1939_v32 = vsel %vm11606_vm9, %v9381_v43, %v1929_v14  ;;  %v2674_v55 = vld [vmem:[#allocation4 + $0x2b8] sm:$0xff]  ;;  %vm11610_vm9 = vcmask 924672  }
 0x2dc   : > { %1957 = vst [vmem:[#allocation4 + $0x238] sm:$0xf] %v1939_v32  ;;  %v1992_v48 = vpop.permute.xlu0 %1991  ;;  %v2746_v50 = vpack.c.bf16 %v2674_v55, %v2665_v52 }
 0x2dd   : > { %v2001_v37 = vsel %vm11607_vm6, %v9388_v28, %v1992_v48  ;;  %v2675_v30 = vld [vmem:[#allocation4 + $0x2c0] sm:$0xff]  ;;  %vm11611_vm6 = vcmask 916480  }
 0x2de   : > { %2019 = vst [vmem:[#allocation4 + $0x238] sm:$0xf0] %v2001_v37  ;;  %v2301_v58 = vpop.permute.xlu1 %2300  ;;  %v2747_v46 = vpack.c.bf16 %v2675_v30, %v2666_v21 }
 0x2df   : > { %v2313_v44 = vsel %vm2306_vm5, %v9165_v27, %v2301_v58 }
 0x2e0   : > { %2331 = vst [vmem:[#allocation4 + $0x300] sm:$0xf] %v2313_v44  ;;  %2935 = vmatprep.subr.bf16.mxu1 %v2747_v46  ;;  %v2303_v59 = vpop.permute.xlu0 %2302 }
 0x2e1   : > { %v2314_v43 = vsel %vm2306_vm5, %v2301_v58, %v2303_v59  ;;  %2936 = vmatpush1.bf16.msra.mxu1 %v2746_v50  ;;  %v2649_v15 = vld [vmem:[#allocation4 + $0x1f0] sm:$0xff] }
 0x2e2   : > { %2332 = vst [vmem:[#allocation4 + $0x308] sm:$0xf] %v2314_v43  ;;  %v2364_v54 = vpop.permute.xlu1 %2363 }
 0x2e3   : > { %v2376_v28 = vsel %vm2369_vm8, %v9174_v4, %v2364_v54 }
 0x2e4   : > { %2394 = vst [vmem:[#allocation4 + $0x300] sm:$0xf0] %v2376_v28  ;;  %v2366_v2 = vpop.permute.xlu0 %2365 }
 0x2e5   : > { %v2377_v62 = vsel %vm2369_vm8, %v2364_v54, %v2366_v2  ;;  %v2658_v31 = vld [vmem:[#allocation4 + $0x238] sm:$0xff] }
 0x2e6   : > { %2395 = vst [vmem:[#allocation4 + $0x308] sm:$0xf0] %v2377_v62  ;;  %v2427_v27 = vpop.permute.xlu1 %2426  ;;  %v2739_v5 = vpack.c.bf16 %v2658_v31, %v2649_v15 }
 0x2e7   : > { %v2439_v42 = vsel %vm2432_vm0, %v9183_v45, %v2427_v27 }
 0x2e8   : > { %2457 = vst [vmem:[#allocation4 + $0x348] sm:$0xf] %v2439_v42  ;;  %6970 = vmatpush3.bf16.msra.mxu0 %v2739_v5  ;;  %v2429_v3 = vpop.permute.xlu0 %2428  ;;  %v3010_v5 = vlaneseq }
 0x2e9   : > { %v2440_v36 = vsel %vm2432_vm0, %v2427_v27, %v2429_v3  ;;  %6971 = vmatprep.subr.bf16.mxu0 %v11514_v0 }
 0x2ea   : > { %2458 = vst [vmem:[#allocation4 + $0x350] sm:$0xf] %v2440_v36  ;;  %v2490_v4 = vpop.permute.xlu1 %2489  ;;  %v3011_v42 = vshrl.u32 %v3010_v5, 7 }
 0x2eb   : > { %v2502_v38 = vsel %vm11608_vm2, %v9192_v23, %v2490_v4  ;;  %vm11613_vm2 = vcmask 900096   ;;  %v2683_v29 = vld [vmem:[#allocation4 + $0x300] sm:$0xff] }
 0x2ec   : > { %2520 = vst [vmem:[#allocation4 + $0x348] sm:$0xf0] %v2502_v38  ;;  %v2492_v51 = vpop.permute.xlu0 %2491  ;;  %v3016_v36 = vsub.s32 1, %v3011_v42  ;;  %v253_v38 = vld [vmem:[%s11453_s1] sm:$0xff] }
 0x2ed   : > { %v2503_v24 = vsel %vm11609_vm14, %v2490_v4, %v2492_v51  ;;  %v2684_v1 = vld [vmem:[#allocation4 + $0x308] sm:$0xff] }
 0x2ee   : > { %2521 = vst [vmem:[#allocation4 + $0x350] sm:$0xf0] %v2503_v24  ;;  %v2054_v61 = vpop.permute.xlu1 %2053 }
 0x2ef   : > { %v2064_v45 = vsel %vm11610_vm9, %v9402_v16, %v2054_v61 }
 0x2f0   : > { %2082 = vst [vmem:[#allocation4 + $0x280] sm:$0xf] %v2064_v45  ;;  %v2117_v39 = vpop.permute.xlu0 %2116  ;;  %v9480_v45 = vrot.slane %v253_v38, %v3016_v36 }
 0x2f1   : > { %v2127_v17 = vsel %vm11611_vm6, %v9408_v9, %v2117_v39  ;;  %v3024_v39 = vsub.s32 3, %v3011_v42 }
 0x2f2   : > { %2145 = vst [vmem:[#allocation4 + $0x280] sm:$0xf0] %v2127_v17  ;;  %v2180_v7 = vpop.permute.xlu1 %2179 }
 0x2f3   : > { %v2190_v41 = vsel %vm11612_vm1, %v9414_v6, %v2180_v7  ;;  %v2692_v11 = vld [vmem:[#allocation4 + $0x348] sm:$0xff]  ;;  %vm11614_vm1 = vmmov %vm11609_vm14  ;;  %vm11615_vm14 = vcmask 818176  }
 0x2f4   : > { %2208 = vst [vmem:[#allocation4 + $0x2c8] sm:$0xf] %v2190_v41  ;;  %v2243_v23 = vpop.permute.xlu0 %2242  ;;  %v2755_v49 = vpack.c.bf16 %v2692_v11, %v2683_v29  ;;  %vm11616_vm9 = vmmov %vm11615_vm14  ;;  %v3028_v11 = vsub.s32 4, %v3011_v42 }
 0x2f5   : > { %v2252_v57 = vsel %vm11613_vm2, %v9421_v60, %v2243_v23  ;;  %v2693_v8 = vld [vmem:[#allocation4 + $0x350] sm:$0xff] }
 0x2f6   : > { %2270 = vst [vmem:[#allocation4 + $0x2c8] sm:$0xf0] %v2252_v57  ;;  %v2553_v16 = vpop.permute.xlu1 %2552  ;;  %v2756_v56 = vpack.c.bf16 %v2693_v8, %v2684_v1 }
 0x2f7   : > { %v2565_v9 = vsel %vm2558_vm10, %v9256_v25, %v2553_v16 }
 0x2f8   : > { %2583 = vst [vmem:[#allocation4 + $0x390] sm:$0xf] %v2565_v9  ;;  %2937 = vmatprep.subr.bf16.mxu1 %v2756_v56  ;;  %v2555_v35 = vpop.permute.xlu0 %2554  ;;  %v3032_v9 = vsub.s32 5, %v3011_v42 }
 0x2f9   : > { %v2566_v33 = vsel %vm2558_vm10, %v2553_v16, %v2555_v35  ;;  %2938 = vmatpush1.bf16.msra.mxu1 %v2755_v49  ;;  %v2667_v60 = vld [vmem:[#allocation4 + $0x280] sm:$0xff]  ;;  %v3036_v49 = vsub.s32 6, %v3011_v42 }
 0x2fa   : > { %2584 = vst [vmem:[#allocation4 + $0x398] sm:$0xf] %v2566_v33  ;;  %v2305_v6 = vpop.permute.xlu1 %2304 }
 0x2fb   : > { %v2315_v13 = vsel %vm2306_vm5, %v2303_v59, %v2305_v6 }
 0x2fc   : > { %2333 = vst [vmem:[#allocation4 + $0x310] sm:$0xf] %v2315_v13  ;;  %v2368_v53 = vpop.permute.xlu0 %2367  ;;  %v9493_v13 = vrot.slane %v253_v38, %v3032_v9 }
 0x2fd   : > { %v2378_v34 = vsel %vm2369_vm8, %v2366_v2, %v2368_v53  ;;  %v2676_v19 = vld [vmem:[#allocation4 + $0x2c8] sm:$0xff] }
 0x2fe   : > { %2396 = vst [vmem:[#allocation4 + $0x310] sm:$0xf0] %v2378_v34  ;;  %v2431_v47 = vpop.permute.xlu1 %2430  ;;  %v2748_v25 = vpack.c.bf16 %v2676_v19, %v2667_v60  ;;  %v9495_v19 = vrot.slane %v253_v38, %v3036_v49 }
 0x2ff   : > { %v2441_v22 = vsel %vm2432_vm0, %v2429_v3, %v2431_v47  ;;  %v2701_v10 = vld [vmem:[#allocation4 + $0x390] sm:$0xf]  ;;  %v3012_v3 = vsub.s32 0, %v3011_v42  ;;  %v3040_v47 = vsub.s32 7, %v3011_v42 }
 0x300   : > { %2459 = vst [vmem:[#allocation4 + $0x358] sm:$0xf] %v2441_v22  ;;  %6972 = vmatpush3.bf16.msra.mxu0 %v2748_v25  ;;  %v2494_v20 = vpop.permute.xlu0 %2493  ;;  %v2764_v14 = vpack.c.bf16 %v2701_v10, %v2701_v10 }
 0x301   : > { %v2504_v32 = vsel %vm11614_vm1, %v2492_v51, %v2494_v20  ;;  %v2702_v48 = vld [vmem:[#allocation4 + $0x398] sm:$0xf]  ;;  %6973 = vmatprep.subr.bf16.mxu0 %v11514_v0  ;;  %v9478_v61 = vrot.slane %v253_v38, %v3012_v3 }
 0x302   : > { %2522 = vst [vmem:[#allocation4 + $0x358] sm:$0xf0] %v2504_v32  ;;  %v2557_v55 = vpop.permute.xlu1 %2556  ;;  %v2765_v37 = vpack.c.bf16 %v2702_v48, %v2702_v48  ;;  %v2796_v30 = vsel %vm11505_vm11, %v2764_v14, 0  ;;  %v9499_v48 = vrot.slane %v253_v38, %v3040_v47 }
 0x303   : > { %v2567_v21 = vsel %vm2558_vm10, %v2555_v35, %v2557_v55 }
 0x304   : > { %2585 = vst [vmem:[#allocation4 + $0x3a0] sm:$0xf] %v2567_v21  ;;  %6913 = vmatprep.subr.msk.bf16.mxu1 %vm11505_vm11, %v2765_v37 }
 0x305   : > { %2940 = vmatpush1.bf16.msra.mxu1 %v2796_v30  ;;  %v2685_v58 = vld [vmem:[#allocation4 + $0x310] sm:$0xff]  ;;  %v9505_v30 = vld [vmem:[%s11453_s1 + $0x8] ss:$0 sm:$0xff] }
 0x308   : > { %6914 = vmatmul.mubr.msk.bf16.vlgmr.msra.gmra.mrb[4].mxu1 %vm11615_vm14, %v9304_v12 }
 0x309   : > { %v2694_v46 = vld [vmem:[#allocation4 + $0x358] sm:$0xff]  ;;  %5546 = vmatprep.mubr.bf16.mxu1 %v11503_v26 }
 0x30a   : > { %v2757_v52 = vpack.c.bf16 %v2694_v46, %v2685_v58 }
 0x30b   : > { %v2703_v44 = vld [vmem:[#allocation4 + $0x3a0] sm:$0xf] }
 0x30c   : > { %6974 = vmatpush3.bf16.msra.mxu0 %v2757_v52  ;;  %v2766_v50 = vpack.c.bf16 %v2703_v44, %v2703_v44 }
 0x30d   : > { %6975 = vmatprep.subr.bf16.mxu0 %v11514_v0 }
 0x30e   : > { %v2802_v59 = vsel %vm11505_vm11, %v2766_v50, 0 }
 0x310   : > { %6976 = vmatpush3.bf16.msra.mxu0 %v2802_v59 }
 0x311   : > { %v2770_v4 = vpop.permute.xlu0 %2769 }
 0x312   : > { %v2839_v51 = vadd.f32 %v9332_v18, %v2770_v4  ;;  %v2841_v24 = vadd.f32 %v9336_v63, %v2770_v4  ;;  %v9487_v18 = vrot.slane %v253_v38, %v3024_v39  ;;  %v9489_v63 = vrot.slane %v253_v38, %v3028_v11 }
 0x313   : > { %6978 = vmatmul.mubr.msk.bf16.vlgmr.msra.gmra.mrb[8].mxu0 %vm11616_vm9, %v9304_v12  ;;  %v3020_v12 = vsub.s32 2, %v3011_v42  ;;  %vm3393_vm9 = vcmask 883712  }
 0x314   : > { %5628 = vmatprep.mubr.bf16.mxu0 %v11503_v26  ;;  %v3055_v41 = vmul.f32 %v9478_v61, %v2839_v51  ;;  %v3056_v23 = vmul.f32 %v9480_v45, %v2841_v24  ;;  %3394 = vst.msk [vmem:[#allocation3] sm:$0xff] %vm3393_vm9, %v11514_v0 }
 0x315   : > { %v9482_v7 = vrot.slane %v253_v38, %v3020_v12 }
 0x316   : > { %v3064_v1 = vadd.f32 %v3056_v23, %v3055_v41 }
 0x34b   : > { %v2879_v43 = vpop.f32.mrb[0].mxu1 }
 0x34c   : > { %v2881_v54 = vpop.f32.mrb[1].mxu1  ;;  %v2880_v17 = vadd.f32 %v2879_v43, %v2770_v4 }
 0x34d   : > { %v2883_v28 = vpop.f32.mrb[2].mxu1  ;;  %v2882_v8 = vadd.f32 %v2881_v54, %v2770_v4 }
 0x34e   : > { %v2884_v2 = vpop.f32.mrb[3].mxu1  ;;  %v3057_v57 = vmul.f32 %v9482_v7, %v2880_v17  ;;  %v7889_v28 = vmov 1  }
 0x34f   : > { %v3058_v56 = vmul.f32 %v9487_v18, %v2882_v8  ;;  %7088 = vset.pattern.permute.xlu1 %v7889_v28  ;;  %v7890_v2 = vmov 2  }
 0x350   : > { %v3065_v16 = vadd.f32 %v3064_v1, %v3057_v57  ;;  %7089 = vset.pattern.permute.xlu0 %v7890_v2 }
 0x352   : > { %v3066_v35 = vadd.f32 %v3065_v16, %v3058_v56 }
 0x35f   : > { %v2920_v62 = vpop.f32.mrb[4].mxu0 }
 0x360   : > { %v2922_v15 = vpop.f32.mrb[5].mxu0  ;;  %v2921_v29 = vadd.f32 %v2920_v62, %v2770_v4 }
 0x361   : > { %v2924_v31 = vpop.f32.mrb[6].mxu0  ;;  %v2923_v6 = vadd.f32 %v2922_v15, %v2770_v4 }
 0x362   : > { %v2925_v27 = vpop.f32.mrb[7].mxu0  ;;  %v3059_v33 = vmul.f32 %v9489_v63, %v2921_v29 }
 0x363   : > { %v3060_v20 = vmul.f32 %v9493_v13, %v2923_v6 }
 0x364   : > { %v3067_v10 = vadd.f32 %v3066_v35, %v3059_v33 }
 0x366   : > { %v3068_v55 = vadd.f32 %v3067_v10, %v3060_v20 }
 0x3db   : > { %v2961_v53 = vpop.f32.mrb[4].mxu1 }
 0x3dc   : > { %v2963_v34 = vpop.f32.mrb[5].mxu1  ;;  %v2962_v60 = vadd.f32 %v2961_v53, %v2770_v4 }
 0x3dd   : > { %v2965_v25 = vpop.f32.mrb[6].mxu1  ;;  %v2964_v32 = vadd.f32 %v2963_v34, %v2770_v4 }
 0x3de   : > { %v2966_v22 = vpop.f32.mrb[7].mxu1  ;;  %v3061_v14 = vmul.f32 %v9495_v19, %v2962_v60 }
 0x3df   : > { %v3062_v21 = vmul.f32 %v9499_v48, %v2964_v32 }
 0x3e0   : > { %v3069_v37 = vadd.f32 %v3068_v55, %v3061_v14 }
 0x3e2   : > { %v3070_v50 = vadd.f32 %v3069_v37, %v3062_v21 }
 0x3e6   : > { %v3002_v58 = vpop.f32.mrb[8].mxu0 }
 0x3e7   : > { %v3003_v46 = vadd.f32 %v3002_v58, %v2770_v4  ;;  %v6979_v52 = vpop.f32.mrb[9].mxu0 }
 0x3e8   : > { %v3005_v44 = vpop.f32.mrb[10].mxu0 }
 0x3e9   : > { %v3063_v59 = vmul.f32 %v9505_v30, %v3003_v46  ;;  %v6980_v43 = vpop.f32.mrb[11].mxu0 }
 0x3eb   : > { %v3071_v54 = vadd.f32 %v3070_v50, %v3063_v59 }
 0x3ed   : > { %3072 = vadd.xlane.f32.xlu1 %v3071_v54 }
 0x3fe   : > { %3125 = vperm.xlu1 %7088, %v9325_v40  }
 0x47a   : > { %v3073_v62 = vpop.xlane.xlu1 %3072 }
 0x47b   : > { %v3074_v15 = vmul.f32 0.0009765625, %v3073_v62 }
 0x47d   : > { %v3075_v31 = vsub.f32 %v2839_v51, %v3074_v15  ;;  %v3076_v27 = vsub.f32 %v2841_v24, %v3074_v15  ;;  %v3077_v5 = vsub.f32 %v2880_v17, %v3074_v15  ;;  %v3078_v42 = vsub.f32 %v2882_v8, %v3074_v15 }
 0x47e   : > { %v3079_v3 = vsub.f32 %v2921_v29, %v3074_v15  ;;  %v3080_v12 = vsub.f32 %v2923_v6, %v3074_v15  ;;  %v3081_v11 = vsub.f32 %v2962_v60, %v3074_v15  ;;  %v3082_v56 = vsub.f32 %v2964_v32, %v3074_v15  ;;  %v9525_v21 = vpop.permute.xlu1 %3125 }
 0x47f   : > { %v3084_v36 = vmul.f32 %v3075_v31, %v3075_v31  ;;  %v3085_v4 = vmul.f32 %v3076_v27, %v3076_v27  ;;  %v3086_v38 = vmul.f32 %v3077_v5, %v3077_v5  ;;  %v3087_v39 = vmul.f32 %v3078_v42, %v3078_v42 }
 0x480   : > { %v3088_v57 = vmul.f32 %v3079_v3, %v3079_v3  ;;  %v3089_v51 = vmul.f32 %v3080_v12, %v3080_v12  ;;  %v9513_v8 = vsub.f32 %v3003_v46, %v3074_v15  ;;  %v3090_v29 = vmul.f32 %v3081_v11, %v3081_v11 }
 0x481   : > { %v3093_v41 = vmul.f32 %v3084_v36, %v9478_v61  ;;  %v3094_v23 = vmul.f32 %v3085_v4, %v9480_v45  ;;  %v3095_v1 = vmul.f32 %v3086_v38, %v9482_v7  ;;  %v3096_v24 = vmul.f32 %v3087_v39, %v9487_v18 }
 0x482   : > { %v3097_v9 = vmul.f32 %v3088_v57, %v9489_v63  ;;  %v3091_v35 = vmul.f32 %v3082_v56, %v3082_v56  ;;  %v3098_v33 = vmul.f32 %v3089_v51, %v9493_v13  ;;  %v3092_v53 = vmul.f32 %v9513_v8, %v9513_v8 }
 0x483   : > { %v3102_v16 = vadd.f32 %v3094_v23, %v3093_v41  ;;  %v3099_v34 = vmul.f32 %v3090_v29, %v9495_v19 }
 0x484   : > { %v3100_v47 = vmul.f32 %v3091_v35, %v9499_v48  ;;  %v3101_v22 = vmul.f32 %v9505_v30, %v3092_v53 }
 0x485   : > { %v3103_v17 = vadd.f32 %v3102_v16, %v3095_v1 }
 0x487   : > { %v3104_v49 = vadd.f32 %v3103_v17, %v3096_v24 }
 0x489   : > { %v3105_v6 = vadd.f32 %v3104_v49, %v3097_v9 }
 0x48b   : > { %v3106_v60 = vadd.f32 %v3105_v6, %v3098_v33 }
 0x48d   : > { %v3107_v25 = vadd.f32 %v3106_v60, %v3099_v34 }
 0x48f   : > { %v3108_v10 = vadd.f32 %v3107_v25, %v3100_v47 }
 0x491   : > { %v3109_v20 = vadd.f32 %v3108_v10, %v3101_v22 }
 0x493   : > { %3110 = vadd.xlane.f32.xlu0 %v3109_v20 }
 0x4a9   : > { %3138 = vperm.xlu0 %7089, %v9325_v40  }
 0x520   : > { %v3111_v14 = vpop.xlane.xlu0 %3110 }
 0x521   : > { %v3112_v32 = vmul.f32 0.0009765625, %v3111_v14 }
 0x523   : > { %v3113_v55 = vadd.f32 1e-05, %v3112_v32 }
 0x525   : > { %7713 = vrsqrt.f32 %v3113_v55 }
 0x528   : > { %v9531_v50 = vpop.permute.xlu0 %3138 }
 0x52f   : > { %v9523_v37 = vpop.eup %7713 }
 0x530   : > { %v3121_v58 = vmul.f32 %v9523_v37, %v3081_v11  ;;  %v3116_v46 = vmul.f32 %v9523_v37, %v3076_v27  ;;  %v3117_v52 = vmul.f32 %v9523_v37, %v3077_v5  ;;  %v3118_v44 = vmul.f32 %v9523_v37, %v3078_v42 }
 0x531   : > { %v3115_v28 = vmul.f32 %v9523_v37, %v3075_v31  ;;  %v3119_v2 = vmul.f32 %v9523_v37, %v3079_v3  ;;  %v3120_v42 = vmul.f32 %v9523_v37, %v3080_v12  ;;  %v3122_v38 = vmul.f32 %v9523_v37, %v3082_v56 }
 0x532   : > { %v3134_v40 = vmul.f32 %v9525_v21, %v3121_v58  ;;  %v3129_v59 = vmul.f32 %v9525_v21, %v3116_v46  ;;  %v3130_v43 = vmul.f32 %v9525_v21, %v3117_v52  ;;  %v3131_v54 = vmul.f32 %v9525_v21, %v3118_v44 }
 0x533   : > { %v3128_v39 = vmul.f32 %v9525_v21, %v3115_v28  ;;  %v3132_v41 = vmul.f32 %v9525_v21, %v3119_v2  ;;  %v3133_v1 = vmul.f32 %v9525_v21, %v3120_v42  ;;  %v3135_v9 = vmul.f32 %v9525_v21, %v3122_v38 }
 0x534   : > { %v3147_v62 = vadd.f32 %v9531_v50, %v3134_v40  ;;  %v3142_v15 = vadd.f32 %v9531_v50, %v3129_v59  ;;  %v3143_v27 = vadd.f32 %v9531_v50, %v3130_v43  ;;  %v9543_v5 = vadd.f32 %v9531_v50, %v3131_v54 }
 0x535   : > { %v9564_v17 = vadd.f32 %v9531_v50, %v3128_v39  ;;  %v9567_v29 = vadd.f32 %v9531_v50, %v3132_v41  ;;  %v9571_v60 = vadd.f32 %v9531_v50, %v3133_v1  ;;  %v9580_v32 = vadd.f32 %v9531_v50, %v3135_v9 }
 0x536   : > { %v9546_v36 = vmul.f32 0.70710677, %v3147_v62  ;;  %v9548_v4 = vmul.f32 0.70710677, %v3142_v15  ;;  %v9551_v31 = vmul.f32 0.70710677, %v3143_v27 }
 0x537   : > { %v9554_v3 = vmul.f32 0.70710677, %v9543_v5  ;;  %v9574_v22 = vmul.f32 0.70710677, %v9564_v17  ;;  %v9577_v14 = vmul.f32 0.70710677, %v9567_v29 }
 0x538   : > { %v3174_v23 = vand.u32 2147483647, %v9546_v36  ;;  %v3169_v11 = vand.u32 2147483647, %v9548_v4  ;;  %v3170_v12 = vand.u32 2147483647, %v9551_v31 }
 0x539   : > { %v3171_v57 = vand.u32 2147483647, %v9554_v3  ;;  %v3168_v46 = vand.u32 2147483647, %v9574_v22  ;;  %v9584_v52 = vmul.f32 0.70710677, %v9571_v60 }
 0x53a   : > { %v3183_v16 = vmul.f32 0.3275911, %v3174_v23  ;;  %v3300_v56 = vsub.f32 0.0, %v3174_v23  ;;  %v3178_v51 = vmul.f32 0.3275911, %v3169_v11  ;;  %v3295_v33 = vsub.f32 0.0, %v3169_v11 }
 0x53b   : > { %v3179_v24 = vmul.f32 0.3275911, %v3170_v12  ;;  %v3180_v6 = vmul.f32 0.3275911, %v3171_v57  ;;  %v3296_v34 = vsub.f32 0.0, %v3170_v12  ;;  %v3297_v25 = vsub.f32 0.0, %v3171_v57 }
 0x53c   : > { %v3192_v49 = vadd.f32 1.0, %v3183_v16  ;;  %v3187_v35 = vadd.f32 1.0, %v3178_v51  ;;  %v3309_v53 = vmul.f32 %v3300_v56, %v3174_v23  ;;  %v3304_v10 = vmul.f32 %v3295_v33, %v3169_v11 }
 0x53d   : > { %v3188_v47 = vadd.f32 1.0, %v3179_v24  ;;  %v3189_v20 = vadd.f32 1.0, %v3180_v6  ;;  %v3305_v58 = vmul.f32 %v3296_v34, %v3170_v12  ;;  %v9586_v44 = vmul.f32 0.5, %v3147_v62 }
 0x53e   : > { %7715 = vrcp.f32 %v3192_v49  ;;  %v3324_v55 = vmul.f32 1.442695, %v3309_v53  ;;  %v9588_v40 = vmul.f32 0.5, %v3142_v15  ;;  %v3172_v59 = vand.u32 2147483647, %v9577_v14 }
 0x53f   : > { %7717 = vrcp.f32 %v3187_v35  ;;  %v3306_v43 = vmul.f32 %v3297_v25, %v3171_v57  ;;  %v3177_v54 = vmul.f32 0.3275911, %v3168_v46  ;;  %v3294_v28 = vsub.f32 0.0, %v3168_v46 }
 0x540   : > { %7719 = vrcp.f32 %v3188_v47  ;;  %v3173_v2 = vand.u32 2147483647, %v9584_v52  ;;  %v3314_v42 = vmul.f32 1.442695, %v3304_v10  ;;  %v3181_v38 = vmul.f32 0.3275911, %v3172_v59 }
 0x541   : > { %7721 = vrcp.f32 %v3189_v20  ;;  %v3298_v39 = vsub.f32 0.0, %v3172_v59  ;;  %v3316_v41 = vmul.f32 1.442695, %v3305_v58  ;;  %v3186_v23 = vadd.f32 1.0, %v3177_v54 }
 0x542   : > { %7723 = vpow2.f32 %v3324_v55  ;;  %v3182_v11 = vmul.f32 0.3275911, %v3173_v2  ;;  %v3303_v62 = vmul.f32 %v3294_v28, %v3168_v46  ;;  %v3190_v12 = vadd.f32 1.0, %v3181_v38 }
 0x543   : > { %v3299_v15 = vsub.f32 0.0, %v3173_v2  ;;  %v9593_v1 = vmul.f32 0.70710677, %v9580_v32  ;;  %v9595_v16 = vmul.f32 0.5, %v3143_v27  ;;  %7725 = vrcp.f32 %v3186_v23 }
 0x544   : > { %v3191_v57 = vadd.f32 1.0, %v3182_v11  ;;  %v3123_v56 = vmul.f32 %v9523_v37, %v9513_v8  ;;  %v3318_v24 = vmul.f32 1.442695, %v3306_v43  ;;  %7727 = vrcp.f32 %v3190_v12 }
 0x545   : > { %v3307_v9 = vmul.f32 %v3298_v39, %v3172_v59  ;;  %v3175_v49 = vand.u32 2147483647, %v9593_v1  ;;  %7729 = vpow2.f32 %v3314_v42  ;;  %v3308_v6 = vmul.f32 %v3299_v15, %v3173_v2 }
 0x546   : > { %v3136_v27 = vmul.f32 %v9525_v21, %v3123_v56  ;;  %7731 = vpow2.f32 %v3316_v41  ;;  %v3312_v34 = vmul.f32 1.442695, %v3303_v62  ;;  %v9618_v2 = vmul.f32 0.5, %v9543_v5 }
 0x547   : > { %v3184_v8 = vmul.f32 0.3275911, %v3175_v49  ;;  %7733 = vrcp.f32 %v3191_v57  ;;  %v3301_v47 = vsub.f32 0.0, %v3175_v49  ;;  %v3320_v55 = vmul.f32 1.442695, %v3307_v9 }
 0x548   : > { %v9599_v51 = vpop.eup %7715  ;;  %v9608_v25 = vadd.f32 %v9531_v50, %v3136_v27  ;;  %7735 = vpow2.f32 %v3318_v24  ;;  %v3322_v59 = vmul.f32 1.442695, %v3308_v6  ;;  %vm3354_vm6 = vcmp.lt.f32.partialorder %v9546_v36, 0.0 }
 0x549   : > { %v9602_v35 = vpop.eup %7717  ;;  %v3219_v33 = vmul.f32 1.0614054, %v9599_v51  ;;  %v3193_v58 = vadd.f32 1.0, %v3184_v8  ;;  %v3310_v43 = vmul.f32 %v3301_v47, %v3175_v49  ;;  %vm3349_vm2 = vcmp.lt.f32.partialorder %v9548_v4, 0.0 }
 0x54a   : > { %v3214_v53 = vmul.f32 1.0614054, %v9602_v35  ;;  %v9610_v10 = vpop.eup %7719  ;;  %v9621_v50 = vmul.f32 0.70710677, %v9608_v25  ;;  %vm3350_vm1 = vcmp.lt.f32.partialorder %v9551_v31, 0.0  ;;  %vm3351_vm14 = vcmp.lt.f32.partialorder %v9554_v3, 0.0 }
 0x54b   : > { %v3228_v37 = vadd.f32 -1.4531521, %v3219_v33  ;;  %v3215_v21 = vmul.f32 1.0614054, %v9610_v10  ;;  %v9614_v54 = vpop.eup %7721  ;;  %7737 = vrcp.f32 %v3193_v58  ;;  %v3326_v11 = vmul.f32 1.442695, %v3310_v43 }
 0x54c   : > { %v3223_v20 = vadd.f32 -1.4531521, %v3214_v53  ;;  %v7724_v42 = vpop.eup %7723  ;;  %v3216_v41 = vmul.f32 1.0614054, %v9614_v54  ;;  %7739 = vpow2.f32 %v3312_v34  ;;  %v3176_v62 = vand.u32 2147483647, %v9621_v50 }
 0x54d   : > { %v3237_v46 = vmul.f32 %v9599_v51, %v3228_v37  ;;  %v3224_v39 = vadd.f32 -1.4531521, %v3215_v21  ;;  %7741 = vpow2.f32 %v3320_v55  ;;  %v9625_v12 = vpop.eup %7725  ;;  %vm3348_vm11 = vcmp.lt.f32.partialorder %v9574_v22, 0.0 }
 0x54e   : > { %v3232_v28 = vmul.f32 %v9602_v35, %v3223_v20  ;;  %v3225_v57 = vadd.f32 -1.4531521, %v3216_v41  ;;  %7743 = vpow2.f32 %v3322_v59  ;;  %v9629_v56 = vpop.eup %7727  ;;  %v3213_v9 = vmul.f32 1.0614054, %v9625_v12 }
 0x54f   : > { %v3246_v38 = vadd.f32 1.4214138, %v3237_v46  ;;  %v3233_v15 = vmul.f32 %v9610_v10, %v3224_v39  ;;  %7745 = vpow2.f32 %v3326_v11  ;;  %v3185_v49 = vmul.f32 0.3275911, %v3176_v62  ;;  %v7730_v33 = vpop.eup %7729 }
 0x550   : > { %v3241_v23 = vadd.f32 1.4214138, %v3232_v28  ;;  %v3234_v53 = vmul.f32 %v9614_v54, %v3225_v57  ;;  %v3217_v34 = vmul.f32 1.0614054, %v9629_v56  ;;  %v7732_v8 = vpop.eup %7731  ;;  %v3222_v47 = vadd.f32 -1.4531521, %v3213_v9 }
 0x551   : > { %v3255_v5 = vmul.f32 %v9599_v51, %v3246_v38  ;;  %v3242_v27 = vadd.f32 1.4214138, %v3233_v15  ;;  %v3194_v20 = vadd.f32 1.0, %v3185_v49  ;;  %v3302_v55 = vsub.f32 0.0, %v3176_v62  ;;  %v9635_v58 = vpop.eup %7733 }
 0x552   : > { %v3250_v24 = vmul.f32 %v9602_v35, %v3241_v23  ;;  %v3243_v59 = vadd.f32 1.4214138, %v3234_v53  ;;  %v3226_v43 = vadd.f32 -1.4531521, %v3217_v34  ;;  %v7736_v28 = vpop.eup %7735  ;;  %v3231_v39 = vmul.f32 %v9625_v12, %v3222_v47 }
 0x553   : > { %v3264_v6 = vadd.f32 -0.28449672, %v3255_v5  ;;  %v3251_v21 = vmul.f32 %v9610_v10, %v3242_v27  ;;  %v3218_v41 = vmul.f32 1.0614054, %v9635_v58  ;;  %7747 = vrcp.f32 %v3194_v20 }
 0x554   : > { %v3259_v37 = vadd.f32 -0.28449672, %v3250_v24  ;;  %v3252_v5 = vmul.f32 %v9614_v54, %v3243_v59  ;;  %v3235_v15 = vmul.f32 %v9629_v56, %v3226_v43  ;;  %v3240_v9 = vadd.f32 1.4214138, %v3231_v39 }
 0x555   : > { %v3273_v46 = vmul.f32 %v9599_v51, %v3264_v6  ;;  %v3260_v11 = vadd.f32 -0.28449672, %v3251_v21  ;;  %v9644_v57 = vpop.eup %7737  ;;  %v3227_v49 = vadd.f32 -1.4531521, %v3218_v41  ;;  %v9647_v6 = vmul.f32 %v3302_v55, %v3176_v62 }
 0x556   : > { %v3268_v38 = vmul.f32 %v9602_v35, %v3259_v37  ;;  %v7740_v27 = vpop.eup %7739  ;;  %v3261_v37 = vadd.f32 -0.28449672, %v3252_v5  ;;  %v3244_v47 = vadd.f32 1.4214138, %v3235_v15  ;;  %v3249_v21 = vmul.f32 %v9625_v12, %v3240_v9 }
 0x557   : > { %v3282_v23 = vadd.f32 0.2548296, %v3273_v46  ;;  %v3269_v34 = vmul.f32 %v9610_v10, %v3260_v11  ;;  %v7742_v20 = vpop.eup %7741  ;;  %v3236_v59 = vmul.f32 %v9635_v58, %v3227_v49  ;;  %v3220_v43 = vmul.f32 1.0614054, %v9644_v57 }
 0x558   : > { %v3277_v24 = vadd.f32 0.2548296, %v3268_v38  ;;  %v9656_v62 = vpop.eup %7743  ;;  %v3253_v39 = vmul.f32 %v9629_v56, %v3244_v47  ;;  %vm3352_vm7 = vcmp.lt.f32.partialorder %v9577_v14, 0.0 }
 0x559   : > { %v3291_v53 = vmul.f32 %v9599_v51, %v3282_v23  ;;  %v3278_v38 = vadd.f32 0.2548296, %v3269_v34  ;;  %v3270_v51 = vmul.f32 %v9614_v54, %v3261_v37  ;;  %v9660_v41 = vpop.eup %7745  ;;  %v3245_v11 = vadd.f32 1.4214138, %v3236_v59 }
 0x55a   : > { %v3286_v46 = vmul.f32 %v9602_v35, %v3277_v24  ;;  %v3258_v35 = vadd.f32 -0.28449672, %v3249_v21  ;;  %v3229_v5 = vadd.f32 -1.4531521, %v3220_v43  ;;  %v3262_v49 = vadd.f32 -0.28449672, %v3253_v39 }
 0x55b   : > { %v3336_v55 = vmul.f32 %v7724_v42, %v3291_v53  ;;  %v3287_v24 = vmul.f32 %v9610_v10, %v3278_v38  ;;  %v3279_v9 = vadd.f32 0.2548296, %v3270_v51  ;;  %v3254_v53 = vmul.f32 %v9635_v58, %v3245_v11 }
 0x55c   : > { %v3331_v23 = vmul.f32 %v7730_v33, %v3286_v46  ;;  %v3267_v42 = vmul.f32 %v9625_v12, %v3258_v35  ;;  %v3238_v34 = vmul.f32 %v9644_v57, %v3229_v5  ;;  %v3271_v46 = vmul.f32 %v9629_v56, %v3262_v49 }
 0x55d   : > { %v3345_v15 = vsub.f32 1.0, %v3336_v55  ;;  %v3332_v37 = vmul.f32 %v7732_v8, %v3287_v24  ;;  %v3288_v47 = vmul.f32 %v9614_v54, %v3279_v9  ;;  %v9670_v21 = vpop.eup %7747  ;;  %v3263_v43 = vadd.f32 -0.28449672, %v3254_v53 }
 0x55e   : > { %v3340_v26 = vsub.f32 1.0, %v3331_v23  ;;  %v3276_v59 = vadd.f32 0.2548296, %v3267_v42  ;;  %v3280_v39 = vadd.f32 0.2548296, %v3271_v46 }
 0x55f   : > { %v3363_v33 = vsub.f32 0.0, %v3345_v15  ;;  %v3341_v38 = vsub.f32 1.0, %v3332_v37  ;;  %v3333_v51 = vmul.f32 %v7736_v28, %v3288_v47  ;;  %v3272_v35 = vmul.f32 %v9635_v58, %v3263_v43 }
 0x560   : > { %v3358_v10 = vsub.f32 0.0, %v3340_v26  ;;  %v3285_v23 = vmul.f32 %v9625_v12, %v3276_v59  ;;  %v3289_v28 = vmul.f32 %v9629_v56, %v3280_v39  ;;  %v3247_v49 = vadd.f32 1.4214138, %v3238_v34 }
 0x561   : > { %v3372_v55 = vsel %vm3354_vm6, %v3363_v33, %v3345_v15  ;;  %v3359_v11 = vsub.f32 0.0, %v3341_v38  ;;  %v3342_v5 = vsub.f32 1.0, %v3333_v51  ;;  %v3281_v9 = vadd.f32 0.2548296, %v3272_v35 }
 0x562   : > { %v3381_v54 = vadd.f32 1.0, %v3372_v55  ;;  %v3367_v8 = vsel %vm3349_vm2, %v3358_v10, %v3340_v26  ;;  %v3330_v24 = vmul.f32 %v7740_v27, %v3285_v23  ;;  %v3334_v12 = vmul.f32 %v7742_v20, %v3289_v28 }
 0x563   : > { %v3376_v36 = vadd.f32 1.0, %v3367_v8  ;;  %v3368_v26 = vsel %vm3350_vm1, %v3359_v11, %v3341_v38  ;;  %v3360_v4 = vsub.f32 0.0, %v3342_v5  ;;  %v3290_v47 = vmul.f32 %v9635_v58, %v3281_v9 }
 0x564   : > { %v3390_v15 = vmul.f32 %v3381_v54, %v9586_v44  ;;  %v3377_v33 = vadd.f32 1.0, %v3368_v26  ;;  %v3339_v37 = vsub.f32 1.0, %v3330_v24  ;;  %v3343_v27 = vsub.f32 1.0, %v3334_v12 }
 0x565   : > { %v3385_v42 = vmul.f32 %v3376_v36, %v9588_v40  ;;  %v3369_v44 = vsel %vm3351_vm14, %v3360_v4, %v3342_v5  ;;  %v3256_v34 = vmul.f32 %v9644_v57, %v3247_v49  ;;  %v3335_v46 = vmul.f32 %v9656_v62, %v3290_v47 }
 0x566   : > { %v3405_v53 = vmul.f32 %v3390_v15, %v9495_v19  ;;  %v3386_v31 = vmul.f32 %v3377_v33, %v9595_v16  ;;  %v3378_v40 = vadd.f32 1.0, %v3369_v44  ;;  %v3357_v20 = vsub.f32 0.0, %v3339_v37 }
 0x567   : > { %v3400_v56 = vmul.f32 %v3385_v42, %v9480_v45  ;;  %v3361_v58 = vsub.f32 0.0, %v3343_v27  ;;  %v3265_v10 = vadd.f32 -0.28449672, %v3256_v34  ;;  %v3221_v59 = vmul.f32 1.0614054, %v9670_v21 }
 0x568   : > { %3429 = vrot.lane.b32.xlu0 %v3405_v53, %s7891_s30  ;;  %vm3395_vm6 = vcmask 1048416   ;;  %v3401_v3 = vmul.f32 %v3386_v31, %v9482_v7  ;;  %v3387_v43 = vmul.f32 %v3378_v40, %v9618_v2  ;;  %v3366_v55 = vsel %vm3348_vm11, %v3357_v20, %v3339_v37 }
 0x569   : > { %3419 = vrot.lane.b32.xlu1 %v3400_v56, %s7891_s30  ;;  %v3344_v38 = vsub.f32 1.0, %v3335_v46  ;;  %3396 = vst.msk [vmem:[#allocation3 + $0x48] sm:$0xff] %vm3395_vm6, %v11514_v0  ;;  %v3375_v16 = vadd.f32 1.0, %v3366_v55  ;;  %v3370_v62 = vsel %vm3352_vm7, %v3361_v58, %v3343_v27  ;;  %v3274_v51 = vmul.f32 %v9644_v57, %v3265_v10 }
 0x56a   : > { %v3230_v39 = vadd.f32 -1.4531521, %v3221_v59  ;;  %v3328_v8 = vmul.f32 1.442695, %v9647_v6  ;;  %v3150_v2 = vmul.f32 0.5, %v9564_v17  ;;  %v3379_v35 = vadd.f32 1.0, %v3370_v62 }
 0x56b   : > { %v3362_v54 = vsub.f32 0.0, %v3344_v38  ;;  %v3283_v22 = vadd.f32 0.2548296, %v3274_v51  ;;  %vm3353_vm11 = vcmp.lt.f32.partialorder %v9584_v52, 0.0  ;;  %v3402_v36 = vmul.f32 %v3387_v43, %v9487_v18 }
 0x56c   : > { %v3239_v23 = vmul.f32 %v9670_v21, %v3230_v39  ;;  %v3384_v14 = vmul.f32 %v3375_v16, %v3150_v2  ;;  %v3154_v28 = vmul.f32 0.5, %v9567_v29  ;;  %7749 = vpow2.f32 %v3328_v8 }
 0x56d   : > { %3421 = vrot.lane.b32.xlu1 %v3401_v3, %s7891_s30  ;;  %v3292_v11 = vmul.f32 %v9644_v57, %v3283_v22  ;;  %v3371_v15 = vsel %vm3353_vm11, %v3362_v54, %v3344_v38  ;;  %v3155_v57 = vmul.f32 0.5, %v9571_v60  ;;  %vm3355_vm7 = vcmp.lt.f32.partialorder %v9593_v1, 0.0 }
 0x56e   : > { %v3248_v5 = vadd.f32 1.4214138, %v3239_v23  ;;  %v3388_v24 = vmul.f32 %v3379_v35, %v3154_v28  ;;  %v3399_v9 = vmul.f32 %v3384_v14, %v9478_v61  ;;  %v3380_v52 = vadd.f32 1.0, %v3371_v15 }
 0x56f   : > { %v3337_v17 = vmul.f32 %v9660_v41, %v3292_v11  ;;  %v3157_v37 = vmul.f32 0.5, %v9580_v32  ;;  %vm3356_vm2 = vcmp.lt.f32.partialorder %v9621_v50, 0.0  ;;  %v3158_v32 = vmul.f32 0.5, %v9608_v25 }
 0x570   : > { %v3257_v6 = vmul.f32 %v9670_v21, %v3248_v5  ;;  %v3403_v4 = vmul.f32 %v3388_v24, %v9489_v63  ;;  %v3389_v41 = vmul.f32 %v3380_v52, %v3155_v57  ;;  %vm3397_vm1 = vcmask 719872  }
 0x571   : > { %3423 = vrot.lane.b32.xlu1 %v3402_v36, %s7891_s30  ;;  %v3346_v49 = vsub.f32 1.0, %v3337_v17  ;;  %3398 = vst.msk [vmem:[#allocation3 + $0x50] sm:$0xff] %vm3397_vm1, %v11514_v0  ;;  %vm11620_vm14 = vcmask 924672  }
 0x572   : > { %v3266_v42 = vadd.f32 -0.28449672, %v3257_v6  ;;  %v3404_v60 = vmul.f32 %v3389_v41, %v9493_v13 }
 0x573   : > { %v3364_v26 = vsub.f32 0.0, %v3346_v49 }
 0x574   : > { %v3275_v29 = vmul.f32 %v9670_v21, %v3266_v42 }
 0x575   : > { %3417 = vrot.lane.b32.xlu1 %v3399_v9, %s7891_s30  ;;  %v3373_v12 = vsel %vm3355_vm7, %v3364_v26, %v3346_v49  ;;  %vm11626_vm7 = vcmask 908288  }
 0x576   : > { %v3284_v53 = vadd.f32 0.2548296, %v3275_v29  ;;  %v3382_v33 = vadd.f32 1.0, %v3373_v12  ;;  %v7750_v56 = vpop.eup %7749  ;;  %vm11628_vm1 = vmmov %vm11626_vm7 }
 0x578   : > { %v3293_v47 = vmul.f32 %v9670_v21, %v3284_v53  ;;  %v3391_v44 = vmul.f32 %v3382_v33, %v3157_v37  ;;  %v4544_v24 = vld [vmem:[#allocation3 + $0x50] sm:$0xff] }
 0x579   : > { %3425 = vrot.lane.b32.xlu1 %v3403_v4, %s7891_s30 }
 0x57a   : > { %v3338_v27 = vmul.f32 %v7750_v56, %v3293_v47  ;;  %v3406_v34 = vmul.f32 %v3391_v44, %v9499_v48 }
 0x57c   : > { %v3347_v1 = vsub.f32 1.0, %v3338_v27 }
 0x57d   : > { %3427 = vrot.lane.b32.xlu1 %v3404_v60, %s7891_s30 }
 0x57e   : > { %v3365_v31 = vsub.f32 0.0, %v3347_v1 }
 0x580   : > { %v3374_v40 = vsel %vm3356_vm2, %v3365_v31, %v3347_v1  ;;  %vm11627_vm2 = vcmask 900096  }
 0x581   : > { %3431 = vrot.lane.b32.xlu1 %v3406_v34, %s7891_s30  ;;  %v3383_v20 = vadd.f32 1.0, %v3374_v40 }
 0x583   : > { %v3392_v21 = vmul.f32 %v3383_v20, %v3158_v32 }
 0x585   : > { %v3407_v46 = vmul.f32 %v9505_v30, %v3392_v21 }
 0x587   : > { %3433 = vrot.lane.b32.xlu1 %v3407_v46, %s7891_s30 }
 0x5da   : > { %v3430_v38 = vpop.permute.xlu0 %3429 }
 0x5db   : > { %v3420_v58 = vpop.permute.xlu1 %3419 }
 0x5df   : > { %v3422_v10 = vpop.permute.xlu1 %3421 }
 0x5e0   : > { %v3436_v59 = vsel %vm3393_vm9, %v3420_v58, %v3422_v10 }
 0x5e3   : > { %v3424_v3 = vpop.permute.xlu1 %3423 }
 0x5e4   : > { %v9738_v50 = vsel %vm3393_vm9, %v3422_v10, %v3424_v3 }
 0x5e5   : > { %v9755_v11 = vpack.i.bf16 %v9738_v50, %v3436_v59 }
 0x5e7   : > { %v3418_v43 = vpop.permute.xlu1 %3417 }
 0x5e8   : > { %v3435_v25 = vsel %vm3393_vm9, %v3418_v43, %v3420_v58  ;;  %3453 = vst.msk [vmem:[#allocation3] sm:$0xff] %vm3395_vm6, %v3418_v43  ;;  %vm11623_vm6 = vmmov %vm11620_vm14 }
 0x5e9   : > { %v9791_v28 = vpack.i.bf16 %v3436_v59, %v3435_v25 }
 0x5eb   : > { %v3426_v55 = vpop.permute.xlu1 %3425 }
 0x5ec   : > { %v3438_v30 = vsel %vm3393_vm9, %v3424_v3, %v3426_v55 }
 0x5ed   : > { %3457 = vst [vmem:[#allocation3 + $0x20] sm:$0xff] %v3438_v30  ;;  %v9761_v5 = vpack.i.bf16 %v3438_v30, %v3435_v25  ;;  %v7175_v15 = vpack.i.bf16 %v3438_v30, %v9738_v50 }
 0x5ef   : > { %v3428_v16 = vpop.permute.xlu1 %3427  ;;  %v3530_v52 = vld [vmem:[#allocation3] sm:$0xff] }
 0x5f0   : > { %v3439_v62 = vsel %vm3393_vm9, %v3426_v55, %v3428_v16  ;;  %v3440_v51 = vsel %vm3393_vm9, %v3428_v16, %v3430_v38  ;;  %v9828_v49 = vpack.i.bf16 %v9738_v50, %v3530_v52 }
 0x5f1   : > { %3458 = vst [vmem:[#allocation3 + $0x28] sm:$0xff] %v3439_v62  ;;  %3459 = vst [vmem:[#allocation3 + $0x30] sm:$0xff] %v3440_v51  ;;  %v9745_v39 = vpack.i.bf16 %v3439_v62, %v3438_v30  ;;  %v7245_v9 = vpack.i.bf16 %v4544_v24, %v3440_v51 }
 0x5f3   : > { %v3432_v54 = vpop.permute.xlu1 %3431 }
 0x5f4   : > { %v3441_v8 = vsel %vm3393_vm9, %v3430_v38, %v3432_v54 }
 0x5f5   : > { %3460 = vst [vmem:[#allocation3 + $0x38] sm:$0xff] %v3441_v8  ;;  %v7220_v2 = vpack.i.bf16 %v3441_v8, %v3439_v62  ;;  %v9748_v22 = vpack.i.bf16 %v3441_v8, %v3440_v51 }
 0x5f9   : > { %v3434_v23 = vpop.permute.xlu1 %3433 }
 0x5fa   : > { %v3442_v35 = vsel %vm3393_vm9, %v3432_v54, %v3434_v23  ;;  %3462 = vst.msk [vmem:[#allocation3 + $0x48] sm:$0xff] %vm3393_vm9, %v3434_v23  ;;  %vm11621_vm9 = vcmask 916480  }
 0x5fb   : > { %3461 = vst [vmem:[#allocation3 + $0x40] sm:$0xff] %v3442_v35  ;;  %v7185_v17 = vpack.i.bf16 %v3442_v35, %v3439_v62  ;;  %vm11624_vm11 = vmmov %vm11621_vm9 }
 0x601   : > { %v4209_v36 = vld [vmem:[#allocation3 + $0x48] sm:$0xff] }
 0x602   : > { %4238 = vrot.lane.b32.xlu1 %v4209_v36, %s11553_s23  ;;  %4171 = vrot.lane.b32.xlu0 %v4209_v36, %s7866_s12  ;;  %v7295_v14 = vpack.i.bf16 %v4209_v36, %v3442_v35  ;;  %v7225_v6 = vpack.i.bf16 %v3441_v8, %v4209_v36  ;;  %v7892_v35 = vmov 3  }
 0x603   : > { %7685 = vset.pattern.permute.xlu0 %v7892_v35 }
 0x606   : > { %7091 = vrot.lane.b32.xlu1 %v9755_v11, %s7881_s10  ;;  %7096 = vrot.lane.b32.xlu0 %v9755_v11, %s11530_s9 }
 0x60a   : > { %7101 = vrot.lane.b32.xlu1 %v9761_v5, %s7881_s10  ;;  %7106 = vrot.lane.b32.xlu0 %v9761_v5, %s11530_s9 }
 0x60e   : > { %7111 = vrot.lane.b32.xlu1 %v9755_v11, %s11531_s29  ;;  %7116 = vrot.lane.b32.xlu0 %v9755_v11, %s11532_s24 }
 0x612   : > { %7121 = vrot.lane.b32.xlu1 %v9761_v5, %s11531_s29  ;;  %7126 = vrot.lane.b32.xlu0 %v9761_v5, %s11532_s24 }
 0x616   : > { %7131 = vrot.lane.b32.xlu1 %v9755_v11, %s7865_s11  ;;  %7136 = vrot.lane.b32.xlu0 %v9755_v11, %s7884_s15 }
 0x61a   : > { %7141 = vrot.lane.b32.xlu1 %v9761_v5, %s7865_s11  ;;  %7146 = vrot.lane.b32.xlu0 %v9761_v5, %s7884_s15 }
 0x61e   : > { %7151 = vrot.lane.b32.xlu1 %v9755_v11, %s7885_s27  ;;  %7156 = vrot.lane.b32.xlu0 %v9755_v11, %s7886_s26 }
 0x622   : > { %7161 = vrot.lane.b32.xlu1 %v9761_v5, %s7885_s27  ;;  %7166 = vrot.lane.b32.xlu0 %v9761_v5, %s7886_s26 }
 0x626   : > { %7171 = vrot.lane.b32.xlu1 %v9791_v28, %s7871_s16  ;;  %7176 = vrot.lane.b32.xlu0 %v7175_v15, %s7871_s16 }
 0x62a   : > { %7186 = vrot.lane.b32.xlu0 %v7185_v17, %s11530_s9  ;;  %7181 = vrot.lane.b32.xlu1 %v7185_v17, %s7881_s10 }
 0x62e   : > { %7196 = vrot.lane.b32.xlu0 %v7185_v17, %s11532_s24  ;;  %7191 = vrot.lane.b32.xlu1 %v7185_v17, %s11531_s29 }
 0x632   : > { %7206 = vrot.lane.b32.xlu0 %v7185_v17, %s7884_s15  ;;  %7201 = vrot.lane.b32.xlu1 %v7185_v17, %s7865_s11 }
 0x636   : > { %7216 = vrot.lane.b32.xlu0 %v7185_v17, %s7886_s26  ;;  %7211 = vrot.lane.b32.xlu1 %v7185_v17, %s7885_s27 }
 0x63a   : > { %7226 = vrot.lane.b32.xlu0 %v7225_v6, %s7881_s10  ;;  %7221 = vrot.lane.b32.xlu1 %v7220_v2, %s7871_s16 }
 0x63e   : > { %7236 = vrot.lane.b32.xlu0 %v7225_v6, %s11531_s29  ;;  %7231 = vrot.lane.b32.xlu1 %v7225_v6, %s11530_s9 }
 0x642   : > { %7246 = vrot.lane.b32.xlu0 %v7245_v9, %s7881_s10  ;;  %7241 = vrot.lane.b32.xlu1 %v7225_v6, %s11532_s24 }
 0x646   : > { %7256 = vrot.lane.b32.xlu0 %v7225_v6, %s7865_s11  ;;  %7251 = vrot.lane.b32.xlu1 %v7245_v9, %s11530_s9  ;;  %s11619_s9 = smov 56  }
 0x64a   : > { %7266 = vrot.lane.b32.xlu0 %v7245_v9, %s11531_s29  ;;  %7261 = vrot.lane.b32.xlu1 %v7225_v6, %s7884_s15  ;;  %s11618_s29 = smov 57  }
 0x64e   : > { %7276 = vrot.lane.b32.xlu0 %v7225_v6, %s7885_s27  ;;  %7271 = vrot.lane.b32.xlu1 %v7245_v9, %s11532_s24 }
 0x652   : > { %7286 = vrot.lane.b32.xlu0 %v7245_v9, %s7865_s11  ;;  %7281 = vrot.lane.b32.xlu1 %v7225_v6, %s7886_s26  ;;  %s11622_s11 = smov 55  }
 0x656   : > { %7296 = vrot.lane.b32.xlu0 %v7295_v14, %s7871_s16  ;;  %7291 = vrot.lane.b32.xlu1 %v7245_v9, %s7884_s15  ;;  %s7021_s15 = smul.u32 72, %s11812_s22 }
 0x65a   : > { %7306 = vrot.lane.b32.xlu0 %v9791_v28, %s7872_s17  ;;  %7301 = vrot.lane.b32.xlu1 %v9791_v28, %s7868_s14 }
 0x65e   : > { %7316 = vrot.lane.b32.xlu0 %v7245_v9, %s7886_s26  ;;  %7311 = vrot.lane.b32.xlu1 %v7245_v9, %s7885_s27  ;;  %s11617_s27 = smov 58  }
 0x662   : > { %7326 = vrot.lane.b32.xlu0 %v9828_v49, %s7872_s17  ;;  %7321 = vrot.lane.b32.xlu1 %v9828_v49, %s7868_s14 }
 0x666   : > { %7336 = vrot.lane.b32.xlu0 %v9791_v28, %s7873_s18  ;;  %7331 = vrot.lane.b32.xlu1 %v9791_v28, %s7874_s19 }
 0x66a   : > { %7346 = vrot.lane.b32.xlu0 %v9828_v49, %s7874_s19  ;;  %7341 = vrot.lane.b32.xlu1 %v7245_v9, %s7871_s16  ;;  %s11625_s16 = smov 54  }
 0x66e   : > { %7356 = vrot.lane.b32.xlu0 %v9791_v28, %s7844_s7  ;;  %7351 = vrot.lane.b32.xlu1 %v9828_v49, %s7873_s18 }
 0x672   : > { %7366 = vrot.lane.b32.xlu0 %v9828_v49, %s7844_s7  ;;  %7361 = vrot.lane.b32.xlu1 %v9791_v28, %s11617_s27 }
 0x674   : > { %v9849_v42 = vpop.permute.xlu1 %4238  ;;  %v9851_v57 = vpop.permute.xlu0 %4171 }
 0x676   : > { %7376 = vrot.lane.b32.xlu0 %v9791_v28, %s11618_s29  ;;  %7371 = vrot.lane.b32.xlu1 %v9828_v49, %s11617_s27 }
 0x678   : > { %v9857_v26 = vpop.permute.xlu1 %7091  ;;  %v9859_v29 = vpop.permute.xlu0 %7096 }
 0x679   : > { %v7094_v4 = vunpack.i.h.bf16 %v9857_v26  ;;  %v7093_v41 = vunpack.i.l.bf16 %v9857_v26  ;;  %v7099_v12 = vunpack.i.h.bf16 %v9859_v29  ;;  %v7098_v53 = vunpack.i.l.bf16 %v9859_v29 }
 0x67a   : > { %7386 = vrot.lane.b32.xlu0 %v9828_v49, %s11618_s29  ;;  %7381 = vrot.lane.b32.xlu1 %v9791_v28, %s11619_s9 }
 0x67b   : > { %v4576_v33 = vsel %vm11620_vm14, %v7093_v41, %v7094_v4  ;;  %v4643_v37 = vsel %vm11621_vm9, %v7098_v53, %v7099_v12  ;;  %vm11629_vm14 = vmmov %vm11627_vm2  ;;  %vm11630_vm9 = vcmask 613376  }
 0x67c   : > { %v9875_v47 = vpop.permute.xlu1 %7101  ;;  %v9877_v56 = vpop.permute.xlu0 %7106  ;;  %v5438_v60 = vpack.c.bf16 %v4643_v37, %v4576_v33 }
 0x67d   : > { %v7103_v44 = vunpack.i.l.bf16 %v9875_v47  ;;  %v7108_v27 = vunpack.i.l.bf16 %v9877_v56 }
 0x67e   : > { %5514 = vmatprep.subr.bf16.mxu1 %v5438_v60  ;;  %7396 = vrot.lane.b32.xlu0 %v9791_v28, %s11622_s11 }
 0x67f   : > { %v4575_v1 = vsel %vm11623_vm6, %v7103_v44, %v7093_v41  ;;  %v4642_v34 = vsel %vm11624_vm11, %v7108_v27, %v7098_v53  ;;  %7391 = vrot.lane.b32.xlu1 %v9828_v49, %s11619_s9  ;;  %vm11631_vm6 = vmmov %vm11630_vm9  ;;  %vm5486_vm11 = vcmask 1043456  }
 0x680   : > { %v9887_v31 = vpop.permute.xlu1 %7111  ;;  %v9889_v40 = vpop.permute.xlu0 %7116  ;;  %v5437_v32 = vpack.c.bf16 %v4642_v34, %v4575_v1 }
 0x681   : > { %v7114_v20 = vunpack.i.h.bf16 %v9887_v31  ;;  %v7113_v21 = vunpack.i.l.bf16 %v9887_v31  ;;  %v7119_v46 = vunpack.i.h.bf16 %v9889_v40  ;;  %v7118_v58 = vunpack.i.l.bf16 %v9889_v40 }
 0x682   : > { %5515 = vmatpush1.bf16.msra.mxu1 %v5437_v32  ;;  %7406 = vrot.lane.b32.xlu0 %v9828_v49, %s11622_s11 }
 0x683   : > { %7401 = vrot.lane.b32.xlu1 %v9791_v28, %s11625_s16  ;;  %v4710_v10 = vsel %vm11626_vm7, %v7113_v21, %v7114_v20  ;;  %v4777_v59 = vsel %vm11627_vm2, %v7118_v58, %v7119_v46  ;;  %vm11632_vm7 = vcmask 924672   ;;  %vm11633_vm2 = vcmask 916480  }
 0x684   : > { %v9905_v3 = vpop.permute.xlu1 %7121  ;;  %v9907_v50 = vpop.permute.xlu0 %7126  ;;  %v5447_v43 = vpack.c.bf16 %v4777_v59, %v4710_v10 }
 0x685   : > { %v7123_v25 = vunpack.i.l.bf16 %v9905_v3  ;;  %v7128_v55 = vunpack.i.l.bf16 %v9907_v50 }
 0x686   : > { %5516 = vmatprep.subr.bf16.mxu1 %v5447_v43  ;;  %7416 = vrot.lane.b32.xlu0 %v9791_v28, %s7866_s12 }
 0x687   : > { %v4709_v30 = vsel %vm11628_vm1, %v7123_v25, %v7113_v21  ;;  %v4776_v38 = vsel %vm11629_vm14, %v7128_v55, %v7118_v58  ;;  %7411 = vrot.lane.b32.xlu1 %v9828_v49, %s11625_s16  ;;  %vm11634_vm1 = vmmov %vm11632_vm7 }
 0x688   : > { %v9917_v16 = vpop.permute.xlu1 %7131  ;;  %v9919_v62 = vpop.permute.xlu0 %7136  ;;  %v5446_v51 = vpack.c.bf16 %v4776_v38, %v4709_v30  ;;  %vm11635_vm14 = vmmov %vm11633_vm2 }
 0x689   : > { %v7134_v54 = vunpack.i.h.bf16 %v9917_v16  ;;  %v7133_v8 = vunpack.i.l.bf16 %v9917_v16  ;;  %v7139_v2 = vunpack.i.h.bf16 %v9919_v62  ;;  %v7138_v23 = vunpack.i.l.bf16 %v9919_v62 }
 0x68a   : > { %5517 = vmatpush1.bf16.msra.mxu1 %v5446_v51  ;;  %7426 = vrot.lane.b32.xlu0 %v9828_v49, %s7866_s12 }
 0x68b   : > { %7421 = vrot.lane.b32.xlu1 %v9791_v28, %s11553_s23  ;;  %v4844_v36 = vsel %vm2306_vm5, %v7133_v8, %v7134_v54  ;;  %v4911_v14 = vsel %vm2369_vm8, %v7138_v23, %v7139_v2 }
 0x68c   : > { %v9935_v15 = vpop.permute.xlu1 %7141  ;;  %v9937_v17 = vpop.permute.xlu0 %7146  ;;  %v5456_v6 = vpack.c.bf16 %v4911_v14, %v4844_v36  ;;  %v7104_v36 = vunpack.i.h.bf16 %v9875_v47  ;;  %v7109_v14 = vunpack.i.h.bf16 %v9877_v56 }
 0x68d   : > { %v7143_v24 = vunpack.i.l.bf16 %v9935_v15  ;;  %v7148_v9 = vunpack.i.l.bf16 %v9937_v17 }
 0x68e   : > { %5518 = vmatprep.subr.bf16.mxu1 %v5456_v6  ;;  %7436 = vrot.lane.b32.xlu0 %v9791_v28, %s11560_s8 }
 0x68f   : > { %v4843_v52 = vsel %vm2306_vm5, %v7143_v24, %v7133_v8  ;;  %v4910_v41 = vsel %vm2369_vm8, %v7148_v9, %v7138_v23  ;;  %7431 = vrot.lane.b32.xlu1 %v9828_v49, %s11553_s23 }
 0x690   : > { %v9947_v53 = vpop.permute.xlu1 %7151  ;;  %v9949_v33 = vpop.permute.xlu0 %7156  ;;  %v5455_v37 = vpack.c.bf16 %v4910_v41, %v4843_v52 }
 0x691   : > { %v7154_v60 = vunpack.i.h.bf16 %v9947_v53  ;;  %v7153_v44 = vunpack.i.l.bf16 %v9947_v53  ;;  %v7159_v27 = vunpack.i.h.bf16 %v9949_v33  ;;  %v7158_v1 = vunpack.i.l.bf16 %v9949_v33 }
 0x692   : > { %5519 = vmatpush1.bf16.msra.mxu1 %v5455_v37  ;;  %7446 = vrot.lane.b32.xlu0 %v9828_v49, %s11560_s8  ;;  %v4577_v37 = vsel %vm11632_vm7, %v7094_v4, %v7104_v36  ;;  %vm11637_vm7 = vcmask 900096  }
 0x693   : > { %7441 = vrot.lane.b32.xlu1 %v9791_v28, %s11563_s20  ;;  %v4978_v34 = vsel %vm2432_vm0, %v7153_v44, %v7154_v60  ;;  %v5045_v32 = vsel %vm11630_vm9, %v7158_v1, %v7159_v27  ;;  %vm5482_vm9 = vcmask 588800  }
 0x694   : > { %v9965_v21 = vpop.permute.xlu1 %7161  ;;  %v9967_v58 = vpop.permute.xlu0 %7166  ;;  %v5465_v10 = vpack.c.bf16 %v5045_v32, %v4978_v34  ;;  %v4644_v34 = vsel %vm11633_vm2, %v7099_v12, %v7109_v14  ;;  %v7129_v32 = vunpack.i.h.bf16 %v9907_v50  ;;  %v10023_v12 = vld [vmem:[%s11455_s3 + $0x4] sm:$0xf] }
 0x695   : > { %v7163_v59 = vunpack.i.l.bf16 %v9965_v21  ;;  %v7168_v43 = vunpack.i.l.bf16 %v9967_v58 }
 0x696   : > { %5520 = vmatprep.subr.bf16.mxu1 %v5465_v10  ;;  %7456 = vrot.lane.b32.xlu0 %v9745_v39, %s7868_s14 }
 0x697   : > { %v4977_v25 = vsel %vm2432_vm0, %v7163_v59, %v7153_v44  ;;  %v5044_v55 = vsel %vm11631_vm6, %v7168_v43, %v7158_v1  ;;  %7451 = vrot.lane.b32.xlu1 %v9828_v49, %s11563_s20  ;;  %v7124_v44 = vunpack.i.h.bf16 %v9905_v3  ;;  %vm11636_vm6 = vcmask 908288  }
 0x698   : > { %v7172_v30 = vpop.permute.xlu1 %7171  ;;  %v9977_v38 = vpop.permute.xlu0 %7176  ;;  %v5464_v51 = vpack.c.bf16 %v5044_v55, %v4977_v25  ;;  %v7144_v59 = vunpack.i.h.bf16 %v9935_v15  ;;  %v7149_v43 = vunpack.i.h.bf16 %v9937_v17  ;;  %v5439_v25 = vpack.c.bf16 %v4644_v34, %v4577_v37  ;;  %vm11638_vm2 = vmmov %vm11636_vm6 }
 0x699   : > { %v7174_v8 = vunpack.i.h.bf16 %v7172_v30  ;;  %v7173_v23 = vunpack.i.l.bf16 %v7172_v30  ;;  %v7178_v35 = vunpack.i.l.bf16 %v9977_v38  ;;  %v4711_v10 = vsel %vm11636_vm6, %v7114_v20, %v7124_v44 }
 0x69a   : > { %5521 = vmatpush1.bf16.msra.mxu1 %v5464_v51  ;;  %7466 = vrot.lane.b32.xlu0 %v9791_v28, %s11566_s25  ;;  %v4778_v55 = vsel %vm11637_vm7, %v7119_v46, %v7129_v32  ;;  %v11640_v17 = vmov 0   ;;  %v4845_v51 = vsel %vm2306_vm5, %v7134_v54, %v7144_v59 }
 0x69b   : > { %7461 = vrot.lane.b32.xlu1 %v9745_v39, %s7872_s17  ;;  %v5112_v6 = vsel %vm2558_vm10, %v7174_v8, %v7178_v35  ;;  %v5111_v24 = vsel %vm2558_vm10, %v7173_v23, %v7174_v8  ;;  %v4912_v8 = vsel %vm2369_vm8, %v7139_v2, %v7149_v43  ;;  %v7164_v23 = vunpack.i.h.bf16 %v9965_v21 }
 0x69c   : > { %v9990_v9 = vpop.permute.xlu0 %7186  ;;  %v9992_v52 = vpop.permute.xlu1 %7181  ;;  %v5474_v47 = vpack.c.bf16 %v5112_v6, %v5112_v6  ;;  %v5473_v41 = vpack.c.bf16 %v5111_v24, %v5111_v24  ;;  %v7179_v6 = vunpack.i.h.bf16 %v9977_v38 }
 0x69d   : > { %v7188_v28 = vunpack.i.l.bf16 %v9990_v9  ;;  %v7183_v56 = vunpack.i.l.bf16 %v9992_v52 }
 0x69e   : > { %6917 = vmatprep.subr.msk.bf16.mxu1 %vm5486_vm11, %v5474_v47  ;;  %7476 = vrot.lane.b32.xlu0 %v9828_v49, %s11566_s25  ;;  %v5488_v1 = vsel %vm5486_vm11, %v5473_v41, 0  ;;  %v4979_v47 = vsel %vm2432_vm0, %v7154_v60, %v7164_v23  ;;  %v5457_v41 = vpack.c.bf16 %v4912_v8, %v4845_v51  ;;  %v5113_v60 = vsel %vm2558_vm10, %v7178_v35, %v7179_v6 }
 0x69f   : > { %7471 = vrot.lane.b32.xlu1 %v9755_v11, %s11568_s13  ;;  %5523 = vmatpush1.bf16.msra.mxu1 %v5488_v1  ;;  %v4578_v26 = vsel %vm11634_vm1, %v7104_v36, %v7183_v56  ;;  %v4645_v49 = vsel %vm11635_vm14, %v7109_v14, %v7188_v28  ;;  %vm11639_vm1 = vmmov %vm11637_vm7  ;;  %v5448_v36 = vpack.c.bf16 %v4778_v55, %v4711_v10  ;;  %v7169_v14 = vunpack.i.h.bf16 %v9967_v58  ;;  %v10113_v10 = vld [vmem:[#allocation3 + $0x30] sm:$0xff] }
 0x6a0   : > { %v10016_v4 = vpop.permute.xlu0 %7196  ;;  %v10018_v3 = vpop.permute.xlu1 %7191  ;;  %v5440_v29 = vpack.c.bf16 %v4645_v49, %v4578_v26  ;;  %vm11641_vm14 = vcmask 613376   ;;  %v10105_v26 = vld [vmem:[#allocation3 + $0x28] sm:$0xff]  ;;  %v5475_v38 = vpack.c.bf16 %v5113_v60, %v5113_v60  ;;  %vm11643_vm7 = vcmask 924672  }
 0x6a1   : > { %v7198_v11 = vunpack.i.l.bf16 %v10016_v4  ;;  %v7193_v50 = vunpack.i.l.bf16 %v10018_v3  ;;  %v5046_v37 = vsel %vm11641_vm14, %v7159_v27, %v7169_v14  ;;  %vm11642_vm6 = vmmov %vm11641_vm14 }
 0x6a2   : > { %7486 = vrot.lane.b32.xlu0 %v9748_v22, %s7868_s14  ;;  %5555 = vmatprep.subr.bf16.mxu1 %v5440_v29  ;;  %v5466_v49 = vpack.c.bf16 %v5046_v37, %v4979_v47 }
 0x6a3   : > { %7481 = vrot.lane.b32.xlu1 %v9761_v5, %s11568_s13  ;;  %6918 = vmatmul.mubr.msk.bf16.vlgmr.msra.gmra.mrb[8].mxu1 %vm5482_vm9, %v10023_v12  ;;  %v4712_v31 = vsel %vm11638_vm2, %v7124_v44, %v7193_v50  ;;  %v4779_v20 = vsel %vm11639_vm1, %v7129_v32, %v7198_v11  ;;  %v10103_v32 = vld [vmem:[#allocation3 + $0x38] sm:$0xff]  ;;  %vm11644_vm2 = vcmask 916480   ;;  %vm11645_vm1 = vmmov %vm11643_vm7 }
 0x6a4   : > { %5556 = vmatpush1.bf16.msra.mxu1 %v5439_v25  ;;  %v10047_v15 = vpop.permute.xlu0 %7206  ;;  %v10049_v40 = vpop.permute.xlu1 %7201  ;;  %v5449_v46 = vpack.c.bf16 %v4779_v20, %v4712_v31  ;;  %5587 = vmatprep.mubr.bf16.mxu1 %v11640_v17  ;;  %v10124_v55 = vpack.i.bf16 %v10103_v32, %v10113_v10  ;;  %v7189_v20 = vunpack.i.h.bf16 %v9990_v9  ;;  %vm11646_vm14 = vmmov %vm11644_vm2 }
 0x6a5   : > { %v7208_v5 = vunpack.i.l.bf16 %v10047_v15  ;;  %v7203_v30 = vunpack.i.l.bf16 %v10049_v40  ;;  %v7209_v9 = vunpack.i.h.bf16 %v10047_v15 }
 0x6a6   : > { %7496 = vrot.lane.b32.xlu0 %v9745_v39, %s7874_s19  ;;  %5557 = vmatprep.subr.bf16.mxu1 %v5449_v46  ;;  %v7184_v46 = vunpack.i.h.bf16 %v9992_v52 }
 0x6a7   : > { %7491 = vrot.lane.b32.xlu1 %v9748_v22, %s7872_s17  ;;  %v4846_v16 = vsel %vm2306_vm5, %v7144_v59, %v7203_v30  ;;  %v4913_v62 = vsel %vm2369_vm8, %v7149_v43, %v7208_v5  ;;  %v3802_v59 = vld [vmem:[#allocation3 + $0x20] sm:$0xff] }
 0x6a8   : > { %5558 = vmatpush1.bf16.msra.mxu1 %v5448_v36  ;;  %v10073_v54 = vpop.permute.xlu0 %7216  ;;  %v10075_v2 = vpop.permute.xlu1 %7211  ;;  %v5458_v21 = vpack.c.bf16 %v4913_v62, %v4846_v16  ;;  %v10127_v31 = vpack.i.bf16 %v10105_v26, %v3802_v59 }
 0x6a9   : > { %v7218_v58 = vunpack.i.l.bf16 %v10073_v54  ;;  %v7213_v24 = vunpack.i.l.bf16 %v10075_v2 }
 0x6aa   : > { %7506 = vrot.lane.b32.xlu0 %v9748_v22, %s7874_s19  ;;  %5559 = vmatprep.subr.bf16.mxu1 %v5458_v21 }
 0x6ab   : > { %7501 = vrot.lane.b32.xlu1 %v9745_v39, %s7873_s18  ;;  %v4980_v44 = vsel %vm2432_vm0, %v7164_v23, %v7213_v24  ;;  %v5047_v53 = vsel %vm11642_vm6, %v7169_v14, %v7218_v58  ;;  %v5494_v23 = vsel %vm5486_vm11, %v5475_v38, 0  ;;  %vm11647_vm6 = vcmask 900096  }
 0x6ac   : > { %5560 = vmatpush1.bf16.msra.mxu1 %v5457_v41  ;;  %v10098_v1 = vpop.permute.xlu0 %7226  ;;  %v10100_v33 = vpop.permute.xlu1 %7221  ;;  %v5467_v27 = vpack.c.bf16 %v5047_v53, %v4980_v44  ;;  %v7199_v44 = vunpack.i.h.bf16 %v10016_v4 }
 0x6ad   : > { %v7223_v34 = vunpack.i.l.bf16 %v10100_v33  ;;  %v7229_v35 = vunpack.i.h.bf16 %v10098_v1  ;;  %v7228_v29 = vunpack.i.l.bf16 %v10098_v1 }
 0x6ae   : > { %7516 = vrot.lane.b32.xlu0 %v9745_v39, %s7844_s7  ;;  %5561 = vmatprep.subr.bf16.mxu1 %v5467_v27 }
 0x6af   : > { %7511 = vrot.lane.b32.xlu1 %v9748_v22, %s7873_s18  ;;  %v5114_v43 = vsel %vm2558_vm10, %v7179_v6, %v7223_v34  ;;  %v4581_v36 = vsel %vm11643_vm7, %v7229_v35, %v7184_v46  ;;  %v4582_v6 = vsel %vm11645_vm1, %v7184_v46, %v7228_v29  ;;  %vm11648_vm7 = vcmask 908288  }
 0x6b0   : > { %5562 = vmatpush1.bf16.msra.mxu1 %v5466_v49  ;;  %v10118_v25 = vpop.permute.xlu0 %7236  ;;  %v10120_v39 = vpop.permute.xlu1 %7231  ;;  %v5476_v22 = vpack.c.bf16 %v5114_v43, %v5114_v43  ;;  %v7194_v49 = vunpack.i.h.bf16 %v10018_v3  ;;  %vm11650_vm1 = vmmov %vm11648_vm7 }
 0x6b1   : > { %v7234_v51 = vunpack.i.h.bf16 %v10120_v39  ;;  %v7233_v8 = vunpack.i.l.bf16 %v10120_v39  ;;  %v7239_v62 = vunpack.i.h.bf16 %v10118_v25  ;;  %v11507_v53 = vunpack.i.l.bf16 %v10118_v25 }
 0x6b2   : > { %7526 = vrot.lane.b32.xlu0 %v10124_v55, %s7844_s7  ;;  %6919 = vmatprep.subr.msk.bf16.mxu1 %vm5486_vm11, %v5476_v22 }
 0x6b3   : > { %v4648_v14 = vsel %vm11644_vm2, %v7234_v51, %v7189_v20  ;;  %7521 = vrot.lane.b32.xlu1 %v10127_v31, %s11617_s27  ;;  %v4649_v16 = vsel %vm11646_vm14, %v7189_v20, %v7233_v8  ;;  %v4715_v43 = vsel %vm11648_vm7, %v7239_v62, %v7194_v49  ;;  %vm11649_vm2 = vmmov %vm11647_vm6  ;;  %vm11651_vm14 = vcmask 924672  }
 0x6b4   : > { %5564 = vmatpush1.bf16.msra.mxu1 %v5494_v23  ;;  %v10148_v21 = vpop.permute.xlu0 %7246  ;;  %v10150_v47 = vpop.permute.xlu1 %7241  ;;  %v5444_v41 = vpack.c.bf16 %v4649_v16, %v4582_v6  ;;  %v5443_v37 = vpack.c.bf16 %v4648_v14, %v4581_v36  ;;  %v4716_v36 = vsel %vm11650_vm1, %v7194_v49, %v11507_v53  ;;  %vm11653_vm7 = vmmov %vm11651_vm14 }
 0x6b5   : > { %v7244_v60 = vunpack.i.h.bf16 %v10150_v47  ;;  %v11512_v27 = vunpack.i.l.bf16 %v10150_v47  ;;  %v7248_v38 = vunpack.i.l.bf16 %v10148_v21 }
 0x6b6   : > { %7536 = vrot.lane.b32.xlu0 %v10127_v31, %s11618_s29  ;;  %5637 = vmatprep.subr.bf16.mxu1 %v5444_v41 }
 0x6b7   : > { %v4782_v59 = vsel %vm11647_vm6, %v7244_v60, %v7199_v44  ;;  %7531 = vrot.lane.b32.xlu1 %v10124_v55, %s11617_s27  ;;  %6920 = vmatmul.mubr.msk.bf16.vlgmr.msra.gmra.mrb[12].mxu1 %vm5482_vm9, %v10023_v12  ;;  %v4783_v46 = vsel %vm11649_vm2, %v7199_v44, %v11512_v27  ;;  %v4579_v16 = vsel %vm11651_vm14, %v7183_v56, %v7248_v38  ;;  %vm11652_vm6 = vcmask 916480  }
 0x6b8   : > { %5638 = vmatpush1.bf16.msra.mxu1 %v5443_v37  ;;  %v10168_v22 = vpop.permute.xlu0 %7256  ;;  %v10170_v20 = vpop.permute.xlu1 %7251  ;;  %5669 = vmatprep.mubr.bf16.mxu1 %v11640_v17  ;;  %v5452_v14 = vpack.c.bf16 %v4782_v59, %v4715_v43  ;;  %v5453_v6 = vpack.c.bf16 %v4783_v46, %v4716_v36  ;;  %v4580_v37 = vsel %vm11653_vm7, %v7248_v38, %v7229_v35  ;;  %vm11654_vm2 = vmmov %vm11652_vm6  ;;  %vm11655_vm14 = vcmask 900096  }
 0x6b9   : > { %v7253_v23 = vunpack.i.l.bf16 %v10170_v20  ;;  %v7259_v49 = vunpack.i.h.bf16 %v10168_v22  ;;  %vm11657_vm7 = vmmov %vm11655_vm14 }
 0x6ba   : > { %7546 = vrot.lane.b32.xlu0 %v10124_v55, %s11618_s29  ;;  %5639 = vmatprep.subr.bf16.mxu1 %v5453_v6 }
 0x6bb   : > { %v4646_v41 = vsel %vm11652_vm6, %v7188_v28, %v7253_v23  ;;  %7541 = vrot.lane.b32.xlu1 %v10127_v31, %s11619_s9  ;;  %v4647_v44 = vsel %vm11654_vm2, %v7253_v23, %v7234_v51  ;;  %v11508_v28 = vunpack.i.l.bf16 %v10168_v22  ;;  %v7204_v51 = vunpack.i.h.bf16 %v10049_v40  ;;  %vm11656_vm6 = vmmov %vm11650_vm1 }
 0x6bc   : > { %v10193_v59 = vpop.permute.xlu0 %7266  ;;  %v10195_v43 = vpop.permute.xlu1 %7261  ;;  %v5442_v52 = vpack.c.bf16 %v4647_v44, %v4580_v37  ;;  %v5441_v56 = vpack.c.bf16 %v4646_v41, %v4579_v16  ;;  %5640 = vmatpush1.bf16.msra.mxu1 %v5452_v14  ;;  %vm11658_vm2 = vcmask 613376  }
 0x6bd   : > { %v7264_v46 = vunpack.i.h.bf16 %v10195_v43  ;;  %v11509_v35 = vunpack.i.l.bf16 %v10195_v43  ;;  %v7268_v38 = vunpack.i.l.bf16 %v10193_v59  ;;  %v4849_v36 = vsel %vm2306_vm5, %v7259_v49, %v7204_v51 }
 0x6be   : > { %7556 = vrot.lane.b32.xlu0 %v10127_v31, %s11622_s11  ;;  %5596 = vmatprep.subr.bf16.mxu0 %v5442_v52  ;;  %v4850_v37 = vsel %vm2306_vm5, %v7204_v51, %v11508_v28  ;;  %v7224_v28 = vunpack.i.h.bf16 %v10100_v33  ;;  %v7269_v33 = vunpack.i.h.bf16 %v10193_v59 }
 0x6bf   : > { %v4916_v23 = vsel %vm2369_vm8, %v7264_v46, %v7209_v9  ;;  %7551 = vrot.lane.b32.xlu1 %v10124_v55, %s11619_s9  ;;  %5597 = vmatpush1.bf16.msra.mxu0 %v5441_v56  ;;  %v4917_v16 = vsel %vm2369_vm8, %v7209_v9, %v11509_v35  ;;  %v4713_v56 = vsel %vm11650_vm1, %v7193_v50, %v7268_v38  ;;  %vm11659_vm1 = vmmov %vm11658_vm2 }
 0x6c0   : > { %v10211_v14 = vpop.permute.xlu0 %7276  ;;  %v10213_v6 = vpop.permute.xlu1 %7271  ;;  %v5461_v44 = vpack.c.bf16 %v4916_v23, %v4849_v36  ;;  %v5462_v52 = vpack.c.bf16 %v4917_v16, %v4850_v37  ;;  %v4714_v9 = vsel %vm11656_vm6, %v7268_v38, %v7239_v62  ;;  %v7219_v16 = vunpack.i.h.bf16 %v10073_v54 }
 0x6c1   : > { %v7273_v41 = vunpack.i.l.bf16 %v10213_v6  ;;  %v7279_v23 = vunpack.i.h.bf16 %v10211_v14  ;;  %v11510_v36 = vunpack.i.l.bf16 %v10211_v14  ;;  %vm11661_vm6 = vcmask 760832  }
 0x6c2   : > { %7566 = vrot.lane.b32.xlu0 %v10124_v55, %s11622_s11  ;;  %5641 = vmatprep.subr.bf16.mxu1 %v5462_v52 }
 0x6c3   : > { %v4780_v53 = vsel %vm11655_vm14, %v7198_v11, %v7273_v41  ;;  %7561 = vrot.lane.b32.xlu1 %v10127_v31, %s11625_s16  ;;  %v4781_v51 = vsel %vm11657_vm7, %v7273_v41, %v7244_v60  ;;  %5642 = vmatpush1.bf16.msra.mxu1 %v5461_v44  ;;  %v7214_v60 = vunpack.i.h.bf16 %v10075_v2  ;;  %vm11660_vm14 = vcmask 769024   ;;  %vm11662_vm7 = vmmov %vm11659_vm1 }
 0x6c4   : > { %v10238_v3 = vpop.permute.xlu0 %7286  ;;  %v10240_v50 = vpop.permute.xlu1 %7281  ;;  %v5451_v4 = vpack.c.bf16 %v4781_v51, %v4714_v9  ;;  %v5450_v11 = vpack.c.bf16 %v4780_v53, %v4713_v56 }
 0x6c5   : > { %v7284_v37 = vunpack.i.h.bf16 %v10240_v50  ;;  %v11511_v62 = vunpack.i.l.bf16 %v10240_v50  ;;  %v7288_v38 = vunpack.i.l.bf16 %v10238_v3  ;;  %v4983_v53 = vsel %vm2432_vm0, %v7279_v23, %v7214_v60 }
 0x6c6   : > { %7576 = vrot.lane.b32.xlu0 %v10127_v31, %s7866_s12  ;;  %5598 = vmatprep.subr.bf16.mxu0 %v5451_v4  ;;  %v4984_v56 = vsel %vm2432_vm0, %v7214_v60, %v11510_v36 }
 0x6c7   : > { %v5050_v41 = vsel %vm11658_vm2, %v7284_v37, %v7219_v16  ;;  %7571 = vrot.lane.b32.xlu1 %v10124_v55, %s11625_s16  ;;  %5599 = vmatpush1.bf16.msra.mxu0 %v5450_v11  ;;  %v5051_v9 = vsel %vm11659_vm1, %v7219_v16, %v11511_v62  ;;  %v4847_v35 = vsel %vm2306_vm5, %v7203_v30, %v7288_v38  ;;  %vm11663_vm2 = vmmov %vm11659_vm1 }
 0x6c8   : > { %v10257_v44 = vpop.permute.xlu0 %7296  ;;  %v10259_v52 = vpop.permute.xlu1 %7291  ;;  %v5470_v11 = vpack.c.bf16 %v5050_v41, %v4983_v53  ;;  %v5471_v60 = vpack.c.bf16 %v5051_v9, %v4984_v56  ;;  %v4848_v41 = vsel %vm2306_vm5, %v7288_v38, %v7259_v49  ;;  %vm11664_vm1 = vmmov %vm11661_vm6 }
 0x6c9   : > { %v7299_v51 = vunpack.i.h.bf16 %v10257_v44  ;;  %v7298_v55 = vunpack.i.l.bf16 %v10257_v44  ;;  %v7293_v4 = vunpack.i.l.bf16 %v10259_v52 }
 0x6ca   : > { %4165 = vrot.lane.b32.xlu0 %v10113_v10, %s7866_s12  ;;  %5643 = vmatprep.subr.bf16.mxu1 %v5471_v60 }
 0x6cb   : > { %v4914_v16 = vsel %vm2369_vm8, %v7208_v5, %v7293_v4  ;;  %7581 = vrot.lane.b32.xlu1 %v10127_v31, %s11553_s23  ;;  %v4915_v53 = vsel %vm2369_vm8, %v7293_v4, %v7264_v46  ;;  %v5118_v40 = vsel %vm2558_vm10, %v7298_v55, %v7299_v51  ;;  %v5117_v5 = vsel %vm2558_vm10, %v7224_v28, %v7298_v55 }
 0x6cc   : > { %v7307_v30 = vpop.permute.xlu0 %7306  ;;  %v7302_v56 = vpop.permute.xlu1 %7301  ;;  %v5460_v9 = vpack.c.bf16 %v4915_v53, %v4848_v41  ;;  %v5480_v15 = vpack.c.bf16 %v5118_v40, %v5118_v40  ;;  %v5459_v36 = vpack.c.bf16 %v4914_v16, %v4847_v35  ;;  %5644 = vmatpush1.bf16.msra.mxu1 %v5470_v11  ;;  %v5479_v46 = vpack.c.bf16 %v5117_v5, %v5117_v5 }
 0x6cd   : > { %v7309_v62 = vunpack.i.h.bf16 %v7307_v30  ;;  %v7308_v27 = vunpack.i.l.bf16 %v7307_v30  ;;  %v7304_v49 = vunpack.i.h.bf16 %v7302_v56  ;;  %v7303_v38 = vunpack.i.l.bf16 %v7302_v56 }
 0x6ce   : > { %7586 = vrot.lane.b32.xlu0 %v10127_v31, %s11560_s8  ;;  %5600 = vmatprep.subr.bf16.mxu0 %v5460_v9  ;;  %v5506_v55 = vsel %vm5486_vm11, %v5479_v46, 0  ;;  %v10331_v46 = vld [vmem:[#allocation3 + $0x40] sm:$0xff] }
 0x6cf   : > { %4232 = vrot.lane.b32.xlu1 %v10113_v10, %s11553_s23  ;;  %6923 = vmatprep.subr.msk.bf16.mxu1 %vm5486_vm11, %v5480_v15  ;;  %v3504_v35 = vsel %vm11660_vm14, %v7303_v38, %v7304_v49  ;;  %v3571_v4 = vsel %vm11661_vm6, %v7308_v27, %v7309_v62  ;;  %vm11665_vm14 = vmmov %vm11664_vm1  ;;  %vm11666_vm6 = vcmask 769024  }
 0x6d0   : > { %5601 = vmatpush1.bf16.msra.mxu0 %v5459_v36  ;;  %v10299_v11 = vpop.permute.xlu0 %7316  ;;  %v10301_v60 = vpop.permute.xlu1 %7311  ;;  %v5284_v16 = vpack.c.bf16 %v3571_v4, %v3504_v35  ;;  %5646 = vmatpush1.bf16.msra.mxu1 %v5506_v55  ;;  %v10333_v35 = vld [vmem:[#allocation3 + $0x48] sm:$0xff] }
 0x6d1   : > { %v7318_v41 = vunpack.i.l.bf16 %v10299_v11  ;;  %v7313_v53 = vunpack.i.l.bf16 %v10301_v60 }
 0x6d2   : > { %4299 = vrot.lane.b32.xlu0 %v10113_v10, %s11560_s8  ;;  %5718 = vmatprep.subr.bf16.mxu1 %v5284_v16 }
 0x6d3   : > { %v5048_v36 = vsel %vm11662_vm7, %v7218_v58, %v7318_v41  ;;  %v4981_v40 = vsel %vm2432_vm0, %v7213_v24, %v7313_v53  ;;  %7591 = vrot.lane.b32.xlu1 %v10127_v31, %s11563_s20  ;;  %v4982_v9 = vsel %vm2432_vm0, %v7313_v53, %v7279_v23  ;;  %v5049_v54 = vsel %vm11663_vm2, %v7318_v41, %v7284_v37  ;;  %vm11667_vm7 = vmmov %vm11666_vm6 }
 0x6d4   : > { %v10315_v30 = vpop.permute.xlu0 %7326  ;;  %v10317_v56 = vpop.permute.xlu1 %7321  ;;  %v5468_v58 = vpack.c.bf16 %v5048_v36, %v4981_v40  ;;  %6924 = vmatmul.mubr.msk.bf16.vlgmr.msra.gmra.mrb[16].mxu1 %vm5482_vm9, %v10023_v12  ;;  %v5469_v23 = vpack.c.bf16 %v5049_v54, %v4982_v9  ;;  %vm11668_vm2 = vcmask 916480  }
 0x6d5   : > { %v11513_v2 = vunpack.i.h.bf16 %v10315_v30  ;;  %v7328_v24 = vunpack.i.l.bf16 %v10315_v30  ;;  %v7324_v15 = vunpack.i.h.bf16 %v10317_v56  ;;  %v7323_v5 = vunpack.i.l.bf16 %v10317_v56  ;;  %5750 = vmatprep.mubr.bf16.mxu1 %v11640_v17 }
 0x6d6   : > { %7596 = vrot.lane.b32.xlu0 %v10127_v31, %s11566_s25  ;;  %5602 = vmatprep.subr.bf16.mxu0 %v5469_v23 }
 0x6d7   : > { %v3570_v37 = vsel %vm11664_vm1, %v7328_v24, %v7308_v27  ;;  %v10342_v4 = vsel %vm11665_vm14, %v7309_v62, %v11513_v2  ;;  %v3503_v55 = vsel %vm11666_vm6, %v7323_v5, %v7303_v38  ;;  %v10348_v16 = vsel %vm11667_vm7, %v7304_v49, %v7324_v15  ;;  %4366 = vrot.lane.b32.xlu1 %v10113_v10, %s11563_s20 }
 0x6d8   : > { %v7337_v31 = vpop.permute.xlu0 %7336  ;;  %v7332_v41 = vpop.permute.xlu1 %7331  ;;  %v7600_v27 = vpack.i.bf16 %v10113_v10, %v10105_v26  ;;  %v5283_v53 = vpack.c.bf16 %v3570_v37, %v3503_v55  ;;  %v10356_v62 = vpack.i.bf16 %v10333_v35, %v10331_v46  ;;  %5603 = vmatpush1.bf16.msra.mxu0 %v5468_v58  ;;  %v7254_v58 = vunpack.i.h.bf16 %v10170_v20 }
 0x6d9   : > { %v7339_v49 = vunpack.i.h.bf16 %v7337_v31  ;;  %v7338_v36 = vunpack.i.l.bf16 %v7337_v31  ;;  %v7334_v40 = vunpack.i.h.bf16 %v7332_v41  ;;  %v7333_v9 = vunpack.i.l.bf16 %v7332_v41 }
 0x6da   : > { %5719 = vmatpush1.bf16.msra.mxu1 %v5283_v53  ;;  %7606 = vrot.lane.b32.xlu0 %v10356_v62, %s7868_s14  ;;  %vm11669_vm1 = vcmask 924672   ;;  %vm11671_vm14 = vcmask 900096   ;;  %vm11673_vm6 = vcmask 908288   ;;  %vm11674_vm7 = vmmov 0  }
 0x6db   : > { %7601 = vrot.lane.b32.xlu1 %v7600_v27, %s11568_s13  ;;  %v3638_v26 = vsel %vm1174_vm12, %v7333_v9, %v7334_v40  ;;  %v3705_v54 = vsel %vm1237_vm3, %v7338_v36, %v7339_v49  ;;  %v7249_v27 = vunpack.i.h.bf16 %v10148_v21 }
 0x6dc   : > { %v10365_v24 = vpop.permute.xlu0 %7346  ;;  %v10367_v5 = vpop.permute.xlu1 %7341  ;;  %v5293_v23 = vpack.c.bf16 %v3705_v54, %v3638_v26 }
 0x6dd   : > { %v7343_v37 = vunpack.i.l.bf16 %v10367_v5  ;;  %v7349_v55 = vunpack.i.h.bf16 %v10365_v24  ;;  %v7348_v31 = vunpack.i.l.bf16 %v10365_v24 }
 0x6de   : > { %5720 = vmatprep.subr.bf16.mxu1 %v5293_v23  ;;  %4433 = vrot.lane.b32.xlu0 %v10113_v10, %s11566_s25  ;;  %v4650_v10 = vsel %vm11668_vm2, %v7233_v8, %v7254_v58  ;;  %vm11681_vm2 = vcmask 457728  }
 0x6df   : > { %v5116_v41 = vsel %vm2558_vm10, %v7343_v37, %v7224_v28  ;;  %7611 = vrot.lane.b32.xlu1 %v10356_v62, %s7872_s17  ;;  %v5115_v20 = vsel %vm2558_vm10, %v7223_v34, %v7343_v37  ;;  %v7274_v28 = vunpack.i.h.bf16 %v10213_v6  ;;  %v3637_v34 = vsel %vm1174_vm12, %v7348_v31, %v7333_v9 }
 0x6e0   : > { %v5478_v53 = vpack.c.bf16 %v5116_v41, %v5116_v41  ;;  %v7357_v26 = vpop.permute.xlu0 %7356  ;;  %v10384_v54 = vpop.permute.xlu1 %7351  ;;  %v5477_v23 = vpack.c.bf16 %v5115_v20, %v5115_v20  ;;  %v10397_v21 = vsel %vm1174_vm12, %v7334_v40, %v7349_v55  ;;  %v4583_v40 = vsel %vm11669_vm1, %v7228_v29, %v7249_v27 }
 0x6e1   : > { %v11528_v38 = vunpack.i.h.bf16 %v10384_v54  ;;  %v7353_v2 = vunpack.i.l.bf16 %v10384_v54  ;;  %v7359_v8 = vunpack.i.h.bf16 %v7357_v26  ;;  %v7358_v6 = vunpack.i.l.bf16 %v7357_v26 }
 0x6e2   : > { %6921 = vmatprep.subr.msk.bf16.mxu0 %vm5486_vm11, %v5478_v53  ;;  %7616 = vrot.lane.b32.xlu0 %v10356_v62, %s7874_s19  ;;  %v5500_v39 = vsel %vm5486_vm11, %v5477_v23, 0  ;;  %v5445_v27 = vpack.c.bf16 %v4650_v10, %v4583_v40  ;;  %v11672_v26 = vunpack.i.l.bf16 %v10118_v25  ;;  %v7289_v25 = vunpack.i.h.bf16 %v10238_v3 }
 0x6e3   : > { %v10406_v59 = vsel %vm1237_vm3, %v7339_v49, %v11528_v38  ;;  %v3704_v9 = vsel %vm1237_vm3, %v7353_v2, %v7338_v36  ;;  %4500 = vrot.lane.b32.xlu1 %v10103_v32, %s11568_s13  ;;  %5605 = vmatpush1.bf16.msra.mxu0 %v5500_v39  ;;  %v11670_v49 = vunpack.i.l.bf16 %v10150_v47  ;;  %v7294_v36 = vunpack.i.h.bf16 %v10259_v52 }
 0x6e4   : > { %v5292_v58 = vpack.c.bf16 %v3704_v9, %v3637_v34  ;;  %v10416_v31 = vpop.permute.xlu0 %7366  ;;  %v7362_v41 = vpop.permute.xlu1 %7361  ;;  %6981 = vmatprep.subr.bf16.mxu0 %v11514_v0  ;;  %v4717_v23 = vsel %vm11673_vm6, %v11672_v26, %v7269_v33  ;;  %v3772_v47 = vsel %vm1300_vm13, %v7358_v6, %v7359_v8  ;;  %v11675_v33 = vunpack.i.l.bf16 %v10195_v43 }
 0x6e5   : > { %v4784_v2 = vsel %vm11671_vm14, %v11670_v49, %v7274_v28  ;;  %v7364_v20 = vunpack.i.h.bf16 %v7362_v41  ;;  %v7363_v53 = vunpack.i.l.bf16 %v7362_v41  ;;  %v11525_v1 = vunpack.i.h.bf16 %v10416_v31  ;;  %vm11685_vm14 = vmmov %vm11681_vm2 }
 0x6e6   : > { %v7368_v29 = vunpack.i.l.bf16 %v10416_v31  ;;  %5721 = vmatpush1.bf16.msra.mxu1 %v5292_v58  ;;  %7626 = vrot.lane.b32.xlu0 %v10356_v62, %s7844_s7  ;;  %v5454_v10 = vpack.c.bf16 %v4784_v2, %v4717_v23  ;;  %v4918_v9 = vsel %vm2369_vm8, %v11675_v33, %v7294_v36  ;;  %v7319_v41 = vunpack.i.h.bf16 %v10299_v11 }
 0x6e7   : > { %7621 = vrot.lane.b32.xlu1 %v10356_v62, %s7873_s18  ;;  %6922 = vmatmul.mubr.msk.bf16.vlgmr.msra.gmra.mrb[12].mxu0 %vm5482_vm9, %v10023_v12  ;;  %v3839_v52 = vsel %vm1363_vm4, %v7363_v53, %v7364_v20  ;;  %v7314_v49 = vunpack.i.h.bf16 %v10301_v60  ;;  %v10453_v3 = vsel %vm1300_vm13, %v7359_v8, %v11525_v1  ;;  %v7344_v60 = vunpack.i.h.bf16 %v10367_v5 }
 0x6e8   : > { %6982 = vmatpush3.bf16.msra.mxu0 %v5445_v27  ;;  %v7377_v28 = vpop.permute.xlu0 %7376  ;;  %v10436_v34 = vpop.permute.xlu1 %7371  ;;  %v5302_v39 = vpack.c.bf16 %v3839_v52, %v3772_v47  ;;  %6991 = vmatprep.mubr.msk.bf16.mxu0 %vm11674_vm7, %v11514_v0  ;;  %v3771_v2 = vsel %vm1300_vm13, %v7368_v29, %v7358_v6  ;;  %v11677_v52 = vunpack.i.l.bf16 %v10240_v50  ;;  %vm11678_vm8 = vcmask 613376  }
 0x6e9   : > { %v11522_v40 = vunpack.i.h.bf16 %v10436_v34  ;;  %v7373_v58 = vunpack.i.l.bf16 %v10436_v34  ;;  %6983 = vmatprep.subr.bf16.mxu0 %v11514_v0  ;;  %v7379_v43 = vunpack.i.h.bf16 %v7377_v28  ;;  %v7378_v36 = vunpack.i.l.bf16 %v7377_v28 }
 0x6ea   : > { %5722 = vmatprep.subr.bf16.mxu1 %v5302_v39  ;;  %7636 = vrot.lane.b32.xlu0 %v10356_v62, %s11618_s29  ;;  %v5052_v5 = vsel %vm11678_vm8, %v11677_v52, %v7319_v41  ;;  %v11679_v28 = vunpack.i.l.bf16 %v10211_v14  ;;  %v7655_v41 = vpack.i.bf16 %v10331_v46, %v10103_v32  ;;  %vm11686_vm6 = vcmask 441344  }
 0x6eb   : > { %v3838_v27 = vsel %vm1363_vm4, %v7373_v58, %v7363_v53  ;;  %v10461_v11 = vsel %vm1363_vm4, %v7364_v20, %v11522_v40  ;;  %7631 = vrot.lane.b32.xlu1 %v10356_v62, %s11617_s27  ;;  %v11676_v53 = vunpack.i.l.bf16 %v10168_v22  ;;  %vm11688_vm8 = vmmov %vm11686_vm6  ;;  %v11714_v24 = vpack.c.bf16 %v10406_v59, %v10397_v21 }
 0x6ec   : > { %v5301_v8 = vpack.c.bf16 %v3838_v27, %v3771_v2  ;;  %6984 = vmatpush3.bf16.msra.mxu0 %v5454_v10  ;;  %v10468_v29 = vpop.permute.xlu0 %7386  ;;  %v7382_v26 = vpop.permute.xlu1 %7381  ;;  %v4985_v39 = vsel %vm2432_vm0, %v11679_v28, %v7314_v49 }
 0x6ed   : > { %v4851_v23 = vsel %vm2306_vm5, %v11676_v53, %v7289_v25  ;;  %v7384_v47 = vunpack.i.h.bf16 %v7382_v26  ;;  %v7383_v20 = vunpack.i.l.bf16 %v7382_v26  ;;  %6985 = vmatprep.subr.bf16.mxu0 %v11514_v0  ;;  %v11521_v22 = vunpack.i.h.bf16 %v10468_v29 }
 0x6ee   : > { %5723 = vmatpush1.bf16.msra.mxu1 %v5301_v8  ;;  %7646 = vrot.lane.b32.xlu0 %v10356_v62, %s11622_s11  ;;  %v5463_v10 = vpack.c.bf16 %v4918_v9, %v4851_v23  ;;  %v7388_v25 = vunpack.i.l.bf16 %v10468_v29  ;;  %vm11680_vm5 = vcmask 465920   ;;  %v5119_v9 = vsel %vm2558_vm10, %v7299_v51, %v7344_v60  ;;  %vm11684_vm10 = vmmov %vm11681_vm2 }
 0x6ef   : > { %7641 = vrot.lane.b32.xlu1 %v10356_v62, %s11619_s9  ;;  %v3906_v50 = vsel %vm11680_vm5, %v7378_v36, %v7379_v43  ;;  %v3973_v33 = vsel %vm11681_vm2, %v7383_v20, %v7384_v47  ;;  %v5472_v8 = vpack.c.bf16 %v5052_v5, %v4985_v39  ;;  %vm11682_vm0 = vmmov %vm11680_vm5  ;;  %v5481_v44 = vpack.c.bf16 %v5119_v9, %v5119_v9 }
 0x6f0   : > { %6986 = vmatpush3.bf16.msra.mxu0 %v5463_v10  ;;  %v7397_v14 = vpop.permute.xlu0 %7396  ;;  %v5311_v58 = vpack.c.bf16 %v3973_v33, %v3906_v50  ;;  %v3905_v26 = vsel %vm11682_vm0, %v7388_v25, %v7378_v36  ;;  %vm11683_vm1 = vmmov %vm11682_vm0  ;;  %vm11690_vm5 = vcmask 171008  }
 0x6f1   : > { %v10493_v49 = vpop.permute.xlu1 %7391  ;;  %6987 = vmatprep.subr.bf16.mxu0 %v11514_v0  ;;  %v10503_v32 = vsel %vm11683_vm1, %v7379_v43, %v11521_v22  ;;  %v7399_v51 = vunpack.i.h.bf16 %v7397_v14  ;;  %v7398_v46 = vunpack.i.l.bf16 %v7397_v14  ;;  %vm11693_vm1 = vmmov %vm11690_vm5 }
 0x6f2   : > { %v11520_v2 = vunpack.i.h.bf16 %v10493_v49  ;;  %v7393_v27 = vunpack.i.l.bf16 %v10493_v49  ;;  %5724 = vmatprep.subr.bf16.mxu1 %v5311_v58  ;;  %7656 = vrot.lane.b32.xlu0 %v7655_v41, %s7866_s12 }
 0x6f3   : > { %7651 = vrot.lane.b32.xlu1 %v10356_v62, %s11625_s16  ;;  %v4040_v25 = vsel %vm1552_vm15, %v7398_v46, %v7399_v51 }
 0x6f4   : > { %v3972_v60 = vsel %vm11684_vm10, %v7393_v27, %v7383_v20  ;;  %v10511_v53 = vsel %vm11685_vm14, %v7384_v47, %v11520_v2  ;;  %6988 = vmatpush3.bf16.msra.mxu0 %v5472_v8  ;;  %v10513_v36 = vpop.permute.xlu0 %7406  ;;  %v5512_v47 = vsel %vm5486_vm11, %v5481_v44, 0  ;;  %vm11687_vm11 = vmmov %vm11686_vm6  ;;  %vm11695_vm14 = vcmask 162816  }
 0x6f5   : > { %v5310_v23 = vpack.c.bf16 %v3972_v60, %v3905_v26  ;;  %v7402_v52 = vpop.permute.xlu1 %7401  ;;  %6989 = vmatprep.subr.bf16.mxu0 %v11514_v0  ;;  %v11519_v20 = vunpack.i.h.bf16 %v10513_v36  ;;  %v7408_v39 = vunpack.i.l.bf16 %v10513_v36  ;;  %vm11694_vm10 = vmmov %vm11693_vm1 }
 0x6f6   : > { %v7404_v5 = vunpack.i.h.bf16 %v7402_v52  ;;  %v7403_v28 = vunpack.i.l.bf16 %v7402_v52  ;;  %7666 = vrot.lane.b32.xlu0 %v7655_v41, %s11560_s8 }
 0x6f7   : > { %5725 = vmatpush1.bf16.msra.mxu1 %v5310_v23  ;;  %7661 = vrot.lane.b32.xlu1 %v7655_v41, %s11553_s23  ;;  %v4039_v27 = vsel %vm1552_vm15, %v7408_v39, %v7398_v46  ;;  %v10534_v8 = vsel %vm1552_vm15, %v7399_v51, %v11519_v20 }
 0x6f8   : > { %6990 = vmatpush3.bf16.msra.mxu0 %v5512_v47  ;;  %v7417_v10 = vpop.permute.xlu0 %7416  ;;  %v4107_v50 = vsel %vm11686_vm6, %v7403_v28, %v7404_v5  ;;  %vm11696_vm6 = vcmask 154624  }
 0x6f9   : > { %v10525_v33 = vpop.permute.xlu1 %7411  ;;  %v5320_v14 = vpack.c.bf16 %v4107_v50, %v4040_v25  ;;  %v7419_v26 = vunpack.i.h.bf16 %v7417_v10  ;;  %v7418_v44 = vunpack.i.l.bf16 %v7417_v10 }
 0x6fa   : > { %v11518_v58 = vunpack.i.h.bf16 %v10525_v33  ;;  %v7413_v9 = vunpack.i.l.bf16 %v10525_v33  ;;  %7676 = vrot.lane.b32.xlu0 %v7655_v41, %s11566_s25 }
 0x6fb   : > { %5726 = vmatprep.subr.bf16.mxu1 %v5320_v14  ;;  %7671 = vrot.lane.b32.xlu1 %v7655_v41, %s11563_s20 }
 0x6fc   : > { %v4106_v60 = vsel %vm11687_vm11, %v7413_v9, %v7403_v28  ;;  %v10541_v23 = vsel %vm11688_vm8, %v7404_v5, %v11518_v58  ;;  %v10543_v52 = vpop.permute.xlu0 %7426  ;;  %6992 = vmatmul.mubr.msk.bf16.vlgmr.msra.gmra.mrb[16].mxu0 %vm5482_vm9, %v10023_v12  ;;  %vm11689_vm9 = vcmask 179200   ;;  %vm11697_vm11 = vmmov %vm11695_vm14 }
 0x6fd   : > { %v5319_v46 = vpack.c.bf16 %v4106_v60, %v4039_v27  ;;  %v7422_v39 = vpop.permute.xlu1 %7421  ;;  %5791 = vmatprep.mubr.bf16.mxu0 %v11640_v17  ;;  %v11516_v5 = vunpack.i.h.bf16 %v10543_v52  ;;  %v7428_v28 = vunpack.i.l.bf16 %v10543_v52  ;;  %v4174_v10 = vsel %vm11689_vm9, %v7418_v44, %v7419_v26  ;;  %vm11691_vm2 = vmmov %vm11689_vm9 }
 0x6fe   : > { %v7424_v41 = vunpack.i.h.bf16 %v7422_v39  ;;  %v7423_v47 = vunpack.i.l.bf16 %v7422_v39  ;;  %4305 = vrot.lane.b32.xlu0 %v10333_v35, %s11560_s8  ;;  %vm11692_vm0 = vmmov %vm11691_vm2 }
 0x6ff   : > { %5727 = vmatpush1.bf16.msra.mxu1 %v5319_v46  ;;  %7681 = vrot.lane.b32.xlu1 %v10356_v62, %s11568_s13  ;;  %v4173_v60 = vsel %vm11691_vm2, %v7428_v28, %v7418_v44  ;;  %v10568_v62 = vsel %vm11692_vm0, %v7419_v26, %v11516_v5  ;;  %v4477_v44 = vld [vmem:[#allocation3 + $0x50] sm:$0xff]  ;;  %v6274_v5 = vld [vmem:[#allocation2 + $0x8] sm:$0xff]  ;;  %vm11698_vm8 = vmmov %vm11697_vm11  ;;  %vm11701_vm2 = vcmask 769024   ;;  %vm11703_vm0 = vcmask 760832  }
 0x700   : > { %v7437_v12 = vpop.permute.xlu0 %7436  ;;  %v4241_v25 = vsel %vm11690_vm5, %v7423_v47, %v7424_v41  ;;  %vm11699_vm9 = vmmov %vm11696_vm6 }
 0x701   : > { %v10558_v50 = vpop.permute.xlu1 %7431  ;;  %v5329_v14 = vpack.c.bf16 %v4241_v25, %v4174_v10  ;;  %v7439_v46 = vunpack.i.h.bf16 %v7437_v12  ;;  %v7438_v39 = vunpack.i.l.bf16 %v7437_v12  ;;  %v6273_v12 = vld [vmem:[#allocation2] sm:$0xff]  ;;  %vm11700_vm5 = vmmov %vm11696_vm6 }
 0x702   : > { %v11517_v9 = vunpack.i.h.bf16 %v10558_v50  ;;  %v7433_v27 = vunpack.i.l.bf16 %v10558_v50  ;;  %4439 = vrot.lane.b32.xlu0 %v10333_v35, %s11566_s25  ;;  %v6284_v43 = vcombine.high %v6273_v12, %v6273_v12 }
 0x703   : > { %5728 = vmatprep.subr.bf16.mxu1 %v5329_v14  ;;  %4372 = vrot.lane.b32.xlu1 %v10333_v35, %s11563_s20 }
 0x704   : > { %v4240_v10 = vsel %vm11693_vm1, %v7433_v27, %v7423_v47  ;;  %v10576_v25 = vsel %vm11694_vm10, %v7424_v41, %v11517_v9  ;;  %v10578_v0 = vpop.permute.xlu0 %7446  ;;  %v7828_v47 = vld [vmem:[%s11456_s4] sm:$0xff]  ;;  %v6275_v9 = vld [vmem:[#allocation2 + $0x10] sm:$0xff]  ;;  %v6295_v40 = vpack.c.bf16 %v6284_v43, %v6284_v43  ;;  %vm11705_vm1 = vcmask 146432  }
 0x705   : > { %v5328_v28 = vpack.c.bf16 %v4240_v10, %v4173_v60  ;;  %v7442_v14 = vpop.permute.xlu1 %7441  ;;  %v7448_v41 = vunpack.i.l.bf16 %v10578_v0  ;;  %v11523_v27 = vunpack.i.h.bf16 %v10578_v0  ;;  %v4308_v10 = vsel %vm11695_vm14, %v7438_v39, %v7439_v46  ;;  %vm11707_vm14 = vmmov %vm11705_vm1 }
 0x706   : > { %v7444_v51 = vunpack.i.h.bf16 %v7442_v14  ;;  %v7443_v35 = vunpack.i.l.bf16 %v7442_v14  ;;  %5923 = vperm.xlu0 %7685, %v7828_v47   ;;  %v6296_v14 = vpack.c.bf16 %v6274_v5, %v6274_v5  ;;  %v6294_v47 = vpack.c.bf16 %v6273_v12, %v6273_v12 }
 0x707   : > { %5729 = vmatpush1.bf16.msra.mxu1 %v5328_v28  ;;  %4506 = vrot.lane.b32.xlu1 %v4477_v44, %s11568_s13  ;;  %v4307_v44 = vsel %vm11697_vm11, %v7448_v41, %v7438_v39  ;;  %v6298_v22 = vpack.c.bf16 %v6275_v9, %v6275_v9  ;;  %v10602_v6 = vsel %vm11698_vm8, %v7439_v46, %v11523_v27  ;;  %v6277_v41 = vld [vmem:[#allocation2 + $0x20] sm:$0xff]  ;;  %vm11706_vm10 = vcmask 932864   ;;  %vm11709_vm11 = vmmov %vm11703_vm0 }
 0x708   : > { %v10588_v60 = vpop.permute.xlu0 %7456  ;;  %v4375_v26 = vsel %vm11696_vm6, %v7443_v35, %v7444_v51  ;;  %v6285_v46 = vcombine.high %v6274_v5, %v6274_v5  ;;  %v11702_v5 = vunpack.i.h.bf16 %v10315_v30  ;;  %v11704_v30 = vpack.c.bf16 %v10342_v4, %v10348_v16  ;;  %vm11708_vm6 = vmmov %vm11706_vm10 }
 0x709   : > { %v10592_v58 = vpop.permute.xlu1 %7451  ;;  %v5338_v20 = vpack.c.bf16 %v4375_v26, %v4308_v10  ;;  %v7458_v26 = vunpack.i.l.bf16 %v10588_v60  ;;  %v7459_v38 = vunpack.i.h.bf16 %v10588_v60  ;;  %vm11710_vm8 = vmmov %vm11701_vm2 }
 0x70a   : > { %v11524_v2 = vunpack.i.h.bf16 %v10592_v58  ;;  %v7453_v28 = vunpack.i.l.bf16 %v10592_v58  ;;  %6322 = vrot.lane.b32.xlu0 %v6296_v14, %s11560_s8 }
 0x70b   : > { %5730 = vmatprep.subr.bf16.mxu1 %v5338_v20  ;;  %6318 = vrot.lane.b32.xlu1 %v6294_v47, %s11560_s8  ;;  %v6276_v20 = vld [vmem:[#allocation2 + $0x18] sm:$0xff]  ;;  %v3506_v43 = vsel %vm11701_vm2, %v7324_v15, %v7458_v26 }
 0x70c   : > { %v4374_v12 = vsel %vm11699_vm9, %v7453_v28, %v7443_v35  ;;  %v10609_v10 = vsel %vm11700_vm5, %v7444_v51, %v11524_v2  ;;  %v10611_v14 = vpop.permute.xlu0 %7466  ;;  %v6300_v35 = vpack.c.bf16 %v6276_v20, %v6276_v20  ;;  %vm11711_vm9 = vmmov %vm11703_vm0 }
 0x70d   : > { %v5337_v39 = vpack.c.bf16 %v4374_v12, %v4307_v44  ;;  %v7462_v47 = vpop.permute.xlu1 %7461  ;;  %v11526_v51 = vunpack.i.h.bf16 %v10611_v14  ;;  %v7468_v28 = vunpack.i.l.bf16 %v10611_v14  ;;  %v6297_v12 = vpack.c.bf16 %v6285_v46, %v6285_v46  ;;  %vm11712_vm5 = vmmov %vm11701_vm2 }
 0x70e   : > { %v7463_v27 = vunpack.i.l.bf16 %v7462_v47  ;;  %6326 = vrot.lane.b32.xlu0 %v6298_v22, %s11560_s8  ;;  %v7464_v4 = vunpack.i.h.bf16 %v7462_v47  ;;  %vm11719_vm2 = vcmask 465920  }
 0x70f   : > { %5731 = vmatpush1.bf16.msra.mxu1 %v5337_v39  ;;  %6320 = vrot.lane.b32.xlu1 %v6295_v40, %s11560_s8  ;;  %v6286_v39 = vcombine.high %v6275_v9, %v6275_v9  ;;  %v4442_v9 = vsel %vm11705_vm1, %v7468_v28, %v11526_v51 }
 0x710   : > { %v10619_v2 = vpop.permute.xlu0 %7476  ;;  %v3573_v22 = vsel %vm11703_vm0, %v11702_v5, %v7463_v27  ;;  %v3574_v47 = vsel %vm11709_vm11, %v7463_v27, %v7464_v4  ;;  %v3507_v27 = vsel %vm11712_vm5, %v7458_v26, %v7459_v38  ;;  %vm11721_vm0 = vcmask 457728  }
 0x711   : > { %v10629_v44 = vpop.permute.xlu1 %7471  ;;  %v5286_v40 = vpack.c.bf16 %v3573_v22, %v3506_v43  ;;  %v7478_v56 = vunpack.i.l.bf16 %v10619_v2  ;;  %v6299_v22 = vpack.c.bf16 %v6286_v39, %v6286_v39  ;;  %vm11722_vm1 = vmmov %vm11721_vm0  ;;  %vm11729_vm11 = vcmask 441344  }
 0x712   : > { %v11527_v1 = vunpack.i.h.bf16 %v10629_v44  ;;  %v7473_v37 = vunpack.i.l.bf16 %v10629_v44  ;;  %6330 = vrot.lane.b32.xlu0 %v6300_v35, %s11560_s8  ;;  %v6302_v35 = vpack.c.bf16 %v6277_v41, %v6277_v41  ;;  %vm11734_vm5 = vcmask 179200  }
 0x713   : > { %5759 = vmatprep.subr.bf16.mxu0 %v5286_v40  ;;  %6324 = vrot.lane.b32.xlu1 %v6297_v12, %s11560_s8  ;;  %v6287_v40 = vcombine.high %v6276_v20, %v6276_v20  ;;  %v4441_v16 = vsel %vm11707_vm14, %v7478_v56, %v7468_v28  ;;  %v10664_v28 = vld [vmem:[%s11455_s3] sm:$0xf]  ;;  %vm11725_vm14 = vmmov %vm11721_vm0 }
 0x714   : > { %5760 = vmatpush1.bf16.msra.mxu0 %v11704_v30  ;;  %v10639_v15 = vpop.permute.xlu0 %7486  ;;  %v4509_v46 = vsel %vm11706_vm10, %v7473_v37, %v11527_v1  ;;  %vm11724_vm10 = vmmov %vm11719_vm2 }
 0x715   : > { %v10647_v43 = vpop.permute.xlu1 %7481  ;;  %v5347_v5 = vpack.c.bf16 %v4509_v46, %v4442_v9  ;;  %v11529_v30 = vunpack.i.l.bf16 %v10639_v15  ;;  %v6301_v20 = vpack.c.bf16 %v6287_v40, %v6287_v40  ;;  %v6288_v46 = vcombine.high %v6277_v41, %v6277_v41 }
 0x716   : > { %v7483_v12 = vunpack.i.l.bf16 %v10647_v43  ;;  %6334 = vrot.lane.b32.xlu0 %v6302_v35, %s11560_s8 }
 0x717   : > { %5732 = vmatprep.subr.bf16.mxu1 %v5347_v5  ;;  %6328 = vrot.lane.b32.xlu1 %v6299_v22, %s11560_s8  ;;  %v6303_v40 = vpack.c.bf16 %v6288_v46, %v6288_v46 }
 0x718   : > { %v4508_v51 = vsel %vm11708_vm6, %v7483_v12, %v7473_v37  ;;  %v7497_v1 = vpop.permute.xlu0 %7496  ;;  %v5287_v12 = vpack.c.bf16 %v3574_v47, %v3507_v27  ;;  %vm11726_vm6 = vmmov %vm11719_vm2 }
 0x719   : > { %v5346_v9 = vpack.c.bf16 %v4508_v51, %v4441_v16  ;;  %v10656_v39 = vpop.permute.xlu1 %7491  ;;  %v7498_v37 = vunpack.i.l.bf16 %v7497_v1  ;;  %v3508_v51 = vsel %vm11710_vm8, %v7459_v38, %v11529_v30  ;;  %v11713_v38 = vunpack.i.h.bf16 %v10384_v54  ;;  %vm11730_vm8 = vmmov %vm11729_vm11 }
 0x71a   : > { %v7493_v35 = vunpack.i.l.bf16 %v10656_v39 }
 0x71b   : > { %5733 = vmatpush1.bf16.msra.mxu1 %v5346_v9  ;;  %6332 = vrot.lane.b32.xlu1 %v6301_v20, %s11560_s8  ;;  %v3640_v60 = vsel %vm1174_vm12, %v7349_v55, %v7498_v37 }
 0x71c   : > { %v10666_v56 = vpop.permute.xlu0 %7506  ;;  %v3575_v41 = vsel %vm11711_vm9, %v7464_v4, %v7493_v35  ;;  %v7499_v4 = vunpack.i.h.bf16 %v7497_v1  ;;  %vm11732_vm9 = vmmov %vm11730_vm8 }
 0x71d   : > { %v7502_v5 = vpop.permute.xlu1 %7501  ;;  %v5288_v22 = vpack.c.bf16 %v3575_v41, %v3508_v51  ;;  %v7508_v20 = vunpack.i.l.bf16 %v10666_v56 }
 0x71e   : > { %v7503_v16 = vunpack.i.l.bf16 %v7502_v5  ;;  %5751 = vmatmul.mubr.bf16.vlgmr.msra.gmra.mrb[20].mxu1 %v10664_v28  ;;  %v7504_v9 = vunpack.i.h.bf16 %v7502_v5  ;;  %v3641_v5 = vsel %vm1174_vm12, %v7498_v37, %v7499_v4 }
 0x71f   : > { %5800 = vmatprep.subr.bf16.mxu1 %v5288_v22  ;;  %6336 = vrot.lane.b32.xlu1 %v6303_v40, %s11560_s8  ;;  %v3642_v54 = vsel %vm1174_vm12, %v7499_v4, %v7508_v20  ;;  %s11402_s8 = scalar_lea.vmem %s11458_s6, %s7021_s15 }
 0x720   : > { %5801 = vmatpush1.bf16.msra.mxu1 %v5287_v12  ;;  %v7517_v30 = vpop.permute.xlu0 %7516  ;;  %v3707_v26 = vsel %vm1237_vm3, %v11713_v38, %v7503_v16  ;;  %5832 = vmatprep.mubr.bf16.mxu1 %v11640_v17  ;;  %v3708_v41 = vsel %vm1237_vm3, %v7503_v16, %v7504_v9  ;;  %v11715_v38 = vunpack.i.h.bf16 %v10416_v31 }
 0x721   : > { %v10687_v46 = vpop.permute.xlu1 %7511  ;;  %v5295_v47 = vpack.c.bf16 %v3707_v26, %v3640_v60  ;;  %v7518_v27 = vunpack.i.l.bf16 %v7517_v30  ;;  %v5296_v12 = vpack.c.bf16 %v3708_v41, %v3641_v5  ;;  %v11717_v5 = vpack.c.bf16 %v10461_v11, %v10453_v3 }
 0x722   : > { %v7513_v51 = vunpack.i.l.bf16 %v10687_v46 }
 0x723   : > { %5761 = vmatprep.subr.bf16.mxu0 %v5295_v47  ;;  %v3774_v26 = vsel %vm1300_vm13, %v11715_v38, %v7518_v27  ;;  %v11716_v47 = vunpack.i.h.bf16 %v10436_v34 }
 0x724   : > { %5762 = vmatpush1.bf16.msra.mxu0 %v11714_v24  ;;  %v10694_v55 = vpop.permute.xlu0 %7526  ;;  %v3709_v1 = vsel %vm1237_vm3, %v7504_v9, %v7513_v51  ;;  %v7519_v24 = vunpack.i.h.bf16 %v7517_v30 }
 0x725   : > { %v7522_v22 = vpop.permute.xlu1 %7521  ;;  %v5297_v40 = vpack.c.bf16 %v3709_v1, %v3642_v54  ;;  %v7528_v21 = vunpack.i.l.bf16 %v10694_v55 }
 0x726   : > { %v7523_v16 = vunpack.i.l.bf16 %v7522_v22  ;;  %v7524_v60 = vunpack.i.h.bf16 %v7522_v22  ;;  %v3775_v22 = vsel %vm1300_vm13, %v7518_v27, %v7519_v24 }
 0x727   : > { %5802 = vmatprep.subr.bf16.mxu1 %v5297_v40  ;;  %v3776_v34 = vsel %vm1300_vm13, %v7519_v24, %v7528_v21 }
 0x728   : > { %5803 = vmatpush1.bf16.msra.mxu1 %v5296_v12  ;;  %v7537_v59 = vpop.permute.xlu0 %7536  ;;  %v3841_v9 = vsel %vm1363_vm4, %v11716_v47, %v7523_v16  ;;  %v3842_v54 = vsel %vm1363_vm4, %v7523_v16, %v7524_v60  ;;  %v11718_v47 = vunpack.i.h.bf16 %v10468_v29 }
 0x729   : > { %v10710_v37 = vpop.permute.xlu1 %7531  ;;  %v5304_v4 = vpack.c.bf16 %v3841_v9, %v3774_v26  ;;  %v7538_v1 = vunpack.i.l.bf16 %v7537_v59  ;;  %v5305_v16 = vpack.c.bf16 %v3842_v54, %v3775_v22  ;;  %v11723_v22 = vpack.c.bf16 %v10511_v53, %v10503_v32 }
 0x72a   : > { %v7533_v41 = vunpack.i.l.bf16 %v10710_v37 }
 0x72b   : > { %5763 = vmatprep.subr.bf16.mxu0 %v5304_v4  ;;  %v3908_v9 = vsel %vm11719_vm2, %v11718_v47, %v7538_v1  ;;  %v11720_v4 = vunpack.i.h.bf16 %v10493_v49  ;;  %vm11736_vm2 = vcmask 171008  }
 0x72c   : > { %5764 = vmatpush1.bf16.msra.mxu0 %v11717_v5  ;;  %v10717_v31 = vpop.permute.xlu0 %7546  ;;  %v3843_v30 = vsel %vm1363_vm4, %v7524_v60, %v7533_v41  ;;  %v7539_v5 = vunpack.i.h.bf16 %v7537_v59 }
 0x72d   : > { %v7542_v40 = vpop.permute.xlu1 %7541  ;;  %v5306_v12 = vpack.c.bf16 %v3843_v30, %v3776_v34  ;;  %v7548_v3 = vunpack.i.l.bf16 %v10717_v31 }
 0x72e   : > { %v7543_v38 = vunpack.i.l.bf16 %v7542_v40  ;;  %v7544_v26 = vunpack.i.h.bf16 %v7542_v40  ;;  %v3909_v40 = vsel %vm11726_vm6, %v7538_v1, %v7539_v5  ;;  %vm11743_vm6 = vcmask 162816  }
 0x72f   : > { %5804 = vmatprep.subr.bf16.mxu1 %v5306_v12  ;;  %v3910_v49 = vsel %vm11724_vm10, %v7539_v5, %v7548_v3 }
 0x730   : > { %5805 = vmatpush1.bf16.msra.mxu1 %v5305_v16  ;;  %v7557_v11 = vpop.permute.xlu0 %7556  ;;  %v3975_v60 = vsel %vm11721_vm0, %v11720_v4, %v7543_v38  ;;  %v3976_v34 = vsel %vm11722_vm1, %v7543_v38, %v7544_v26  ;;  %v11727_v4 = vunpack.i.h.bf16 %v10513_v36  ;;  %vm11737_vm0 = vmmov %vm11736_vm2 }
 0x731   : > { %v10733_v27 = vpop.permute.xlu1 %7551  ;;  %v5313_v24 = vpack.c.bf16 %v3975_v60, %v3908_v9  ;;  %v7558_v30 = vunpack.i.l.bf16 %v7557_v11  ;;  %v5314_v38 = vpack.c.bf16 %v3976_v34, %v3909_v40  ;;  %v11731_v40 = vpack.c.bf16 %v10541_v23, %v10534_v8  ;;  %vm11738_vm1 = vmmov %vm11734_vm5 }
 0x732   : > { %v7553_v54 = vunpack.i.l.bf16 %v10733_v27  ;;  %v11733_v23 = vunpack.i.h.bf16 %v10543_v52  ;;  %vm11739_vm10 = vmmov %vm11737_vm0 }
 0x733   : > { %5765 = vmatprep.subr.bf16.mxu0 %v5313_v24  ;;  %v4042_v60 = vsel %vm1552_vm15, %v11727_v4, %v7558_v30  ;;  %v11728_v24 = vunpack.i.h.bf16 %v10525_v33 }
 0x734   : > { %5766 = vmatpush1.bf16.msra.mxu0 %v11723_v22  ;;  %v10740_v29 = vpop.permute.xlu0 %7566  ;;  %v3977_v59 = vsel %vm11725_vm14, %v7544_v26, %v7553_v54  ;;  %v7559_v22 = vunpack.i.h.bf16 %v7557_v11  ;;  %vm11740_vm14 = vmmov %vm11738_vm1 }
 0x735   : > { %v7562_v12 = vpop.permute.xlu1 %7561  ;;  %v5315_v16 = vpack.c.bf16 %v3977_v59, %v3910_v49  ;;  %v7568_v32 = vunpack.i.l.bf16 %v10740_v29 }
 0x736   : > { %v7563_v47 = vunpack.i.l.bf16 %v7562_v12  ;;  %v7564_v9 = vunpack.i.h.bf16 %v7562_v12  ;;  %v4043_v12 = vsel %vm1552_vm15, %v7558_v30, %v7559_v22 }
 0x737   : > { %5806 = vmatprep.subr.bf16.mxu1 %v5315_v16  ;;  %v4044_v33 = vsel %vm1552_vm15, %v7559_v22, %v7568_v32 }
 0x738   : > { %5807 = vmatpush1.bf16.msra.mxu1 %v5314_v38  ;;  %v7577_v53 = vpop.permute.xlu0 %7576  ;;  %v4109_v26 = vsel %vm11729_vm11, %v11728_v24, %v7563_v47  ;;  %v4110_v49 = vsel %vm11730_vm8, %v7563_v47, %v7564_v9  ;;  %vm11745_vm11 = vcmask 154624  }
 0x739   : > { %v10756_v1 = vpop.permute.xlu1 %7571  ;;  %v5322_v5 = vpack.c.bf16 %v4109_v26, %v4042_v60  ;;  %v7578_v59 = vunpack.i.l.bf16 %v7577_v53  ;;  %v5323_v47 = vpack.c.bf16 %v4110_v49, %v4043_v12  ;;  %v7579_v24 = vunpack.i.h.bf16 %v7577_v53  ;;  %vm11746_vm8 = vmmov %vm11745_vm11 }
 0x73a   : > { %v7573_v34 = vunpack.i.l.bf16 %v10756_v1 }
 0x73b   : > { %5767 = vmatprep.subr.bf16.mxu0 %v5322_v5  ;;  %v4176_v26 = vsel %vm11734_vm5, %v11733_v23, %v7578_v59  ;;  %v11735_v5 = vunpack.i.h.bf16 %v10558_v50  ;;  %v11741_v50 = vpack.c.bf16 %v10576_v25, %v10568_v62  ;;  %vm11748_vm5 = vmmov %vm11746_vm8 }
 0x73c   : > { %5768 = vmatpush1.bf16.msra.mxu0 %v11731_v40  ;;  %v10763_v36 = vpop.permute.xlu0 %4165  ;;  %v4111_v11 = vsel %vm11732_vm9, %v7564_v9, %v7573_v34  ;;  %vm11747_vm9 = vmmov %vm11743_vm6 }
 0x73d   : > { %v7582_v16 = vpop.permute.xlu1 %7581  ;;  %v5324_v38 = vpack.c.bf16 %v4111_v11, %v4044_v33  ;;  %v4178_v49 = vsel %vm11738_vm1, %v7579_v24, %v10763_v36  ;;  %v4177_v33 = vsel %vm11740_vm14, %v7578_v59, %v7579_v24  ;;  %v11744_v24 = vunpack.i.h.bf16 %v10592_v58 }
 0x73e   : > { %v7584_v4 = vunpack.i.h.bf16 %v7582_v16  ;;  %v7583_v60 = vunpack.i.l.bf16 %v7582_v16  ;;  %vm11753_vm1 = vcmask 146432  }
 0x73f   : > { %5808 = vmatprep.subr.bf16.mxu1 %v5324_v38  ;;  %vm11756_vm14 = vmmov %vm11753_vm1 }
 0x740   : > { %5809 = vmatpush1.bf16.msra.mxu1 %v5323_v47  ;;  %v7587_v8 = vpop.permute.xlu0 %7586  ;;  %v4243_v40 = vsel %vm11736_vm2, %v11735_v5, %v7583_v60  ;;  %v4244_v9 = vsel %vm11737_vm0, %v7583_v60, %v7584_v4  ;;  %vm11749_vm2 = vmmov %vm11743_vm6  ;;  %vm11752_vm0 = vcmask 932864  }
 0x741   : > { %v10779_v30 = vpop.permute.xlu1 %4232  ;;  %v5331_v22 = vpack.c.bf16 %v4243_v40, %v4176_v26  ;;  %v5332_v11 = vpack.c.bf16 %v4244_v9, %v4177_v33  ;;  %v7588_v12 = vunpack.i.l.bf16 %v7587_v8  ;;  %v7589_v23 = vunpack.i.h.bf16 %v7587_v8 }
 0x742   : > { %v4245_v53 = vsel %vm11739_vm10, %v7584_v4, %v10779_v30  ;;  %v11742_v4 = vunpack.i.h.bf16 %v10578_v0  ;;  %v11750_v33 = vpack.c.bf16 %v10609_v10, %v10602_v6  ;;  %vm11754_vm10 = vmmov %vm11752_vm0  ;;  %v11755_v10 = vunpack.i.h.bf16 %v10611_v14 }
 0x743   : > { %v5333_v52 = vpack.c.bf16 %v4245_v53, %v4178_v49  ;;  %5769 = vmatprep.subr.bf16.mxu0 %v5331_v22  ;;  %v7484_v22 = vunpack.i.h.bf16 %v10647_v43  ;;  %v4311_v0 = vsel %vm11749_vm2, %v7588_v12, %v7589_v23  ;;  %vm11763_vm2 = vmmov %vm11753_vm1 }
 0x744   : > { %5770 = vmatpush1.bf16.msra.mxu0 %v11741_v50  ;;  %v10789_v16 = vpop.permute.xlu0 %4299  ;;  %v4310_v59 = vsel %vm11743_vm6, %v11742_v4, %v7588_v12  ;;  %v7494_v12 = vunpack.i.h.bf16 %v10656_v39  ;;  %vm11757_vm6 = vcmask 760832  }
 0x745   : > { %v7592_v38 = vpop.permute.xlu1 %7591  ;;  %5810 = vmatprep.subr.bf16.mxu1 %v5333_v52  ;;  %v4312_v9 = vsel %vm11747_vm9, %v7589_v23, %v10789_v16 }
 0x746   : > { %v7594_v47 = vunpack.i.h.bf16 %v7592_v38  ;;  %v7593_v60 = vunpack.i.l.bf16 %v7592_v38  ;;  %5811 = vmatpush1.bf16.msra.mxu1 %v5332_v11  ;;  %v7479_v11 = vunpack.i.h.bf16 %v10619_v2 }
 0x748   : > { %v7597_v26 = vpop.permute.xlu0 %7596  ;;  %v4377_v5 = vsel %vm11745_vm11, %v11744_v24, %v7593_v60  ;;  %v4378_v62 = vsel %vm11746_vm8, %v7593_v60, %v7594_v47  ;;  %v4443_v2 = vsel %vm11756_vm14, %v11755_v10, %v7479_v11  ;;  %vm11758_vm11 = vcmask 769024   ;;  %vm11759_vm8 = vmmov %vm11757_vm6 }
 0x749   : > { %v10798_v25 = vpop.permute.xlu1 %4366  ;;  %v5340_v40 = vpack.c.bf16 %v4377_v5, %v4310_v59  ;;  %v5341_v58 = vpack.c.bf16 %v4378_v62, %v4311_v0  ;;  %v7598_v53 = vunpack.i.l.bf16 %v7597_v26  ;;  %v7489_v59 = vunpack.i.h.bf16 %v10639_v15  ;;  %vm11761_vm9 = vmmov %vm11758_vm11 }
 0x74a   : > { %v4379_v8 = vsel %vm11748_vm5, %v7594_v47, %v10798_v25  ;;  %v11751_v47 = vunpack.i.h.bf16 %v10629_v44  ;;  %vm11762_vm5 = vmmov %vm11752_vm0 }
 0x74b   : > { %v5342_v49 = vpack.c.bf16 %v4379_v8, %v4312_v9  ;;  %5771 = vmatprep.subr.bf16.mxu0 %v5340_v40  ;;  %v4444_v4 = vsel %vm11753_vm1, %v7479_v11, %v7598_v53  ;;  %v3576_v9 = vsel %vm11757_vm6, %v7493_v35, %v7494_v12  ;;  %v7599_v8 = vunpack.i.h.bf16 %v7597_v26  ;;  %vm11765_vm14 = vmmov %vm11761_vm9 }
 0x74c   : > { %5772 = vmatpush1.bf16.msra.mxu0 %v11750_v33  ;;  %v7607_v52 = vpop.permute.xlu0 %7606  ;;  %v4510_v43 = vsel %vm11752_vm0, %v11751_v47, %v7484_v22 }
 0x74d   : > { %v7602_v50 = vpop.permute.xlu1 %7601  ;;  %5812 = vmatprep.subr.bf16.mxu1 %v5342_v49  ;;  %v7608_v60 = vunpack.i.l.bf16 %v7607_v52  ;;  %v5348_v62 = vpack.c.bf16 %v4510_v43, %v4443_v2  ;;  %v11760_v49 = vunpack.i.l.bf16 %v10639_v15  ;;  %v7514_v43 = vunpack.i.h.bf16 %v10687_v46 }
 0x74e   : > { %v7603_v38 = vunpack.i.l.bf16 %v7602_v50  ;;  %5813 = vmatpush1.bf16.msra.mxu1 %v5341_v58  ;;  %v7604_v24 = vunpack.i.h.bf16 %v7602_v50  ;;  %v7609_v15 = vunpack.i.h.bf16 %v7607_v52  ;;  %v7509_v2 = vunpack.i.h.bf16 %v10666_v56 }
 0x74f   : > { %v3509_v58 = vsel %vm11761_vm9, %v11760_v49, %v7489_v59  ;;  %v7534_v52 = vunpack.i.h.bf16 %v10710_v37 }
 0x750   : > { %v10814_v23 = vpop.permute.xlu0 %4433  ;;  %v4511_v6 = vsel %vm11754_vm10, %v7484_v22, %v7603_v38  ;;  %v3510_v22 = vsel %vm11758_vm11, %v7489_v59, %v7608_v60  ;;  %v4512_v33 = vsel %vm11762_vm5, %v7603_v38, %v7604_v24  ;;  %v5289_v47 = vpack.c.bf16 %v3576_v9, %v3509_v58  ;;  %vm11764_vm10 = vmmov %vm11757_vm6 }
 0x751   : > { %v7612_v5 = vpop.permute.xlu1 %7611  ;;  %v5349_v44 = vpack.c.bf16 %v4511_v6, %v4444_v4  ;;  %v4446_v35 = vsel %vm11763_vm2, %v7599_v8, %v10814_v23  ;;  %v3643_v46 = vsel %vm1174_vm12, %v7508_v20, %v7509_v2  ;;  %v3844_v56 = vsel %vm1363_vm4, %v7533_v41, %v7534_v52 }
 0x752   : > { %v7613_v40 = vunpack.i.l.bf16 %v7612_v5  ;;  %v7614_v11 = vunpack.i.h.bf16 %v7612_v5  ;;  %v7554_v20 = vunpack.i.h.bf16 %v10733_v27  ;;  %v7549_v41 = vunpack.i.h.bf16 %v10717_v31 }
 0x753   : > { %5773 = vmatprep.subr.bf16.mxu0 %v5349_v44  ;;  %vm11776_vm2 = vcmask 179200  }
 0x754   : > { %5774 = vmatpush1.bf16.msra.mxu0 %v5348_v62  ;;  %v7617_v0 = vpop.permute.xlu0 %7616  ;;  %v3577_v14 = vsel %vm11759_vm8, %v7494_v12, %v7613_v40  ;;  %v4445_v12 = vsel %vm11753_vm1, %v7598_v53, %v7599_v8  ;;  %v3578_v59 = vsel %vm11764_vm10, %v7613_v40, %v7614_v11  ;;  %v3710_v53 = vsel %vm1237_vm3, %v7513_v51, %v7514_v43 }
 0x755   : > { %v10831_v50 = vpop.permute.xlu1 %4500  ;;  %v5290_v39 = vpack.c.bf16 %v3577_v14, %v3510_v22  ;;  %v5350_v38 = vpack.c.bf16 %v4512_v33, %v4445_v12  ;;  %v7618_v6 = vunpack.i.l.bf16 %v7617_v0  ;;  %v3511_v62 = vsel %vm11765_vm14, %v7608_v60, %v7609_v15  ;;  %vm11781_vm14 = vmmov %vm11776_vm2 }
 0x756   : > { %v4513_v26 = vsel %vm11752_vm0, %v7604_v24, %v10831_v50  ;;  %v7619_v9 = vunpack.i.h.bf16 %v7617_v0  ;;  %v11766_v8 = vmov 0.0   ;;  %v5291_v22 = vpack.c.bf16 %v3578_v59, %v3511_v62 }
 0x757   : > { %v5351_v4 = vpack.c.bf16 %v4513_v26, %v4446_v35  ;;  %5792 = vmatmul.mubr.bf16.vlgmr.msra.gmra.mrb[20].mxu0 %v10664_v28  ;;  %5841 = vmatprep.subr.bf16.mxu0 %v5290_v39  ;;  %v3644_v40 = vsel %vm1174_vm12, %v7509_v2, %v7618_v6  ;;  %v7529_v51 = vunpack.i.h.bf16 %v10694_v55  ;;  %v5298_v0 = vpack.c.bf16 %v3710_v53, %v3643_v46 }
 0x758   : > { %5842 = vmatpush1.bf16.msra.mxu0 %v5289_v47  ;;  %v7627_v10 = vpop.permute.xlu0 %7626  ;;  %5873 = vmatprep.mubr.bf16.mxu0 %v11640_v17  ;;  %v3645_v35 = vsel %vm1174_vm12, %v7618_v6, %v7619_v9  ;;  %v7574_v53 = vunpack.i.h.bf16 %v10756_v1  ;;  %vm11777_vm0 = vcmask 171008  }
 0x759   : > { %v7622_v24 = vpop.permute.xlu1 %7621  ;;  %5814 = vmatprep.subr.bf16.mxu1 %v5351_v4  ;;  %v7628_v14 = vunpack.i.l.bf16 %v7627_v10  ;;  %v7629_v26 = vunpack.i.h.bf16 %v7627_v10  ;;  %v3777_v37 = vsel %vm1300_vm13, %v7528_v21, %v7529_v51  ;;  %vm11778_vm1 = vmmov %vm11777_vm0 }
 0x75a   : > { %v7624_v5 = vunpack.i.h.bf16 %v7622_v24  ;;  %v7623_v44 = vunpack.i.l.bf16 %v7622_v24  ;;  %5815 = vmatpush1.bf16.msra.mxu1 %v5350_v38  ;;  %v5307_v59 = vpack.c.bf16 %v3844_v56, %v3777_v37  ;;  %vm11779_vm10 = vmmov %vm11777_vm0 }
 0x75b   : > { %6995 = vmatprep.subr.bf16.mxu1 %v11766_v8  ;;  %v3778_v4 = vsel %vm1300_vm13, %v7529_v51, %v7628_v14  ;;  %v3779_v55 = vsel %vm1300_vm13, %v7628_v14, %v7629_v26  ;;  %vm11772_vm13 = vcmask 441344  }
 0x75c   : > { %v7637_v49 = vpop.permute.xlu0 %7636  ;;  %v3711_v58 = vsel %vm1237_vm3, %v7514_v43, %v7623_v44  ;;  %v3712_v33 = vsel %vm1237_vm3, %v7623_v44, %v7624_v5  ;;  %vm11767_vm3 = vcmask 457728   ;;  %vm11774_vm9 = vmmov %vm11772_vm13 }
 0x75d   : > { %v7632_v11 = vpop.permute.xlu1 %7631  ;;  %5833 = vmatmul.mubr.bf16.vlgmr.msra.gmra.mrb[24].mxu1 %v10664_v28  ;;  %v5299_v60 = vpack.c.bf16 %v3711_v58, %v3644_v40  ;;  %v5300_v43 = vpack.c.bf16 %v3712_v33, %v3645_v35  ;;  %v7638_v12 = vunpack.i.l.bf16 %v7637_v49  ;;  %v3978_v44 = vsel %vm11767_vm3, %v7553_v54, %v7554_v20  ;;  %vm11769_vm12 = vmmov %vm11767_vm3 }
 0x75e   : > { %v7634_v39 = vunpack.i.h.bf16 %v7632_v11  ;;  %v7633_v47 = vunpack.i.l.bf16 %v7632_v11  ;;  %6996 = vmatpush3.bf16.msra.mxu1 %v5291_v22  ;;  %7011 = vmatprep.mubr.msk.bf16.mxu1 %vm11674_vm7, %v11766_v8  ;;  %v7569_v54 = vunpack.i.h.bf16 %v10740_v29  ;;  %vm11771_vm11 = vmmov %vm11767_vm3  ;;  %v4112_v11 = vsel %vm11772_vm13, %v7573_v34, %v7574_v53 }
 0x75f   : > { %5843 = vmatprep.subr.bf16.mxu0 %v5299_v60  ;;  %6997 = vmatprep.subr.bf16.mxu1 %v11766_v8  ;;  %vm11775_vm5 = vmmov %vm11774_vm9  ;;  %vm11782_vm3 = vcmask 162816   ;;  %vm11787_vm13 = vcmask 932864  }
 0x760   : > { %5844 = vmatpush1.bf16.msra.mxu0 %v5298_v0  ;;  %v7647_v15 = vpop.permute.xlu0 %7646  ;;  %v3845_v38 = vsel %vm1363_vm4, %v7534_v52, %v7633_v47  ;;  %v3846_v6 = vsel %vm1363_vm4, %v7633_v47, %v7634_v39  ;;  %v7639_v52 = vunpack.i.h.bf16 %v7637_v49  ;;  %vm11768_vm4 = vcmask 465920  }
 0x761   : > { %v7642_v10 = vpop.permute.xlu1 %7641  ;;  %v5308_v2 = vpack.c.bf16 %v3845_v38, %v3778_v4  ;;  %v5309_v21 = vpack.c.bf16 %v3846_v6, %v3779_v55  ;;  %v7648_v62 = vunpack.i.l.bf16 %v7647_v15  ;;  %v3912_v22 = vsel %vm11768_vm4, %v7549_v41, %v7638_v12  ;;  %vm11770_vm6 = vmmov %vm11768_vm4 }
 0x762   : > { %v7644_v24 = vunpack.i.h.bf16 %v7642_v10  ;;  %v7643_v5 = vunpack.i.l.bf16 %v7642_v10  ;;  %6998 = vmatpush3.bf16.msra.mxu1 %v5300_v43  ;;  %v3911_v27 = vsel %vm11770_vm6, %v7548_v3, %v7549_v41  ;;  %vm11773_vm8 = vmmov %vm11768_vm4  ;;  %v7649_v0 = vunpack.i.h.bf16 %v7647_v15 }
 0x763   : > { %5845 = vmatprep.subr.bf16.mxu0 %v5308_v2  ;;  %6999 = vmatprep.subr.bf16.mxu1 %v11766_v8  ;;  %v5316_v46 = vpack.c.bf16 %v3978_v44, %v3911_v27  ;;  %v3913_v60 = vsel %vm11773_vm8, %v7638_v12, %v7639_v52  ;;  %v4046_v47 = vsel %vm1552_vm15, %v7569_v54, %v7648_v62  ;;  %vm11783_vm4 = vmmov %vm11782_vm3 }
 0x764   : > { %5846 = vmatpush1.bf16.msra.mxu0 %v5307_v59  ;;  %v7657_v9 = vpop.permute.xlu0 %7656  ;;  %v3979_v40 = vsel %vm11769_vm12, %v7554_v20, %v7643_v5  ;;  %v3980_v14 = vsel %vm11771_vm11, %v7643_v5, %v7644_v24  ;;  %v4045_v1 = vsel %vm1552_vm15, %v7568_v32, %v7569_v54  ;;  %v4047_v4 = vsel %vm1552_vm15, %v7648_v62, %v7649_v0  ;;  %vm11780_vm15 = vmmov %vm11776_vm2 }
 0x765   : > { %v7652_v49 = vpop.permute.xlu1 %7651  ;;  %v5317_v58 = vpack.c.bf16 %v3979_v40, %v3912_v22  ;;  %v7658_v31 = vunpack.i.l.bf16 %v7657_v9  ;;  %v5318_v3 = vpack.c.bf16 %v3980_v14, %v3913_v60  ;;  %v7659_v20 = vunpack.i.h.bf16 %v7657_v9 }
 0x766   : > { %v7654_v51 = vunpack.i.h.bf16 %v7652_v49  ;;  %v7653_v33 = vunpack.i.l.bf16 %v7652_v49  ;;  %7000 = vmatpush3.bf16.msra.mxu1 %v5309_v21  ;;  %v5325_v43 = vpack.c.bf16 %v4112_v11, %v4045_v1  ;;  %vm11784_vm12 = vcmask 154624  }
 0x767   : > { %5847 = vmatprep.subr.bf16.mxu0 %v5317_v58  ;;  %7001 = vmatprep.subr.bf16.mxu1 %v11766_v8  ;;  %v4179_v38 = vsel %vm11776_vm2, %v10763_v36, %v7658_v31  ;;  %v4180_v36 = vsel %vm11780_vm15, %v7658_v31, %v7659_v20  ;;  %v4181_v5 = vsel %vm11781_vm14, %v7659_v20, %v9851_v57  ;;  %vm11785_vm6 = vmmov %vm11784_vm12  ;;  %vm11786_vm11 = vcmask 146432  }
 0x768   : > { %5848 = vmatpush1.bf16.msra.mxu0 %v5316_v46  ;;  %v7667_v39 = vpop.permute.xlu0 %7666  ;;  %v4113_v56 = vsel %vm11774_vm9, %v7574_v53, %v7653_v33  ;;  %v4114_v34 = vsel %vm11775_vm5, %v7653_v33, %v7654_v51  ;;  %vm11788_vm8 = vmmov %vm11786_vm11  ;;  %vm11796_vm14 = vcmask 1041408  }
 0x769   : > { %v7662_v35 = vpop.permute.xlu1 %7661  ;;  %v5326_v26 = vpack.c.bf16 %v4113_v56, %v4046_v47  ;;  %v7669_v37 = vunpack.i.h.bf16 %v7667_v39  ;;  %v7668_v41 = vunpack.i.l.bf16 %v7667_v39  ;;  %v5327_v29 = vpack.c.bf16 %v4114_v34, %v4047_v4  ;;  %vm11789_vm9 = vmmov %vm11787_vm13 }
 0x76a   : > { %v7664_v12 = vunpack.i.h.bf16 %v7662_v35  ;;  %v7663_v15 = vunpack.i.l.bf16 %v7662_v35  ;;  %7002 = vmatpush3.bf16.msra.mxu1 %v5318_v3  ;;  %vm11790_vm5 = vmmov %vm11782_vm3 }
 0x76b   : > { %5849 = vmatprep.subr.bf16.mxu0 %v5326_v26  ;;  %7003 = vmatprep.subr.bf16.mxu1 %v11766_v8  ;;  %vm11791_vm2 = vmmov %vm11785_vm6 }
 0x76c   : > { %v4248_v32 = vsel %vm11777_vm0, %v7664_v12, %v9849_v42  ;;  %v4246_v6 = vsel %vm11778_vm1, %v10779_v30, %v7663_v15  ;;  %5850 = vmatpush1.bf16.msra.mxu0 %v5325_v43  ;;  %v7677_v10 = vpop.permute.xlu0 %7676  ;;  %v4247_v2 = vsel %vm11779_vm10, %v7663_v15, %v7664_v12  ;;  %v4313_v42 = vsel %vm11782_vm3, %v10789_v16, %v7668_v41  ;;  %vm11792_vm0 = vmmov %vm11788_vm8 }
 0x76d   : > { %v5334_v59 = vpack.c.bf16 %v4246_v6, %v4179_v38  ;;  %v7672_v24 = vpop.permute.xlu1 %7671  ;;  %v5335_v55 = vpack.c.bf16 %v4247_v2, %v4180_v36  ;;  %v5336_v52 = vpack.c.bf16 %v4248_v32, %v4181_v5  ;;  %v4314_v30 = vsel %vm11783_vm4, %v7668_v41, %v7669_v37  ;;  %vm11793_vm1 = vmmov %vm11789_vm9 }
 0x76e   : > { %v7674_v44 = vunpack.i.h.bf16 %v7672_v24  ;;  %v7673_v53 = vunpack.i.l.bf16 %v7672_v24  ;;  %7004 = vmatpush3.bf16.msra.mxu1 %v5327_v29  ;;  %v7679_v62 = vunpack.i.h.bf16 %v7677_v10  ;;  %v7678_v9 = vunpack.i.l.bf16 %v7677_v10  ;;  %vm11794_vm10 = vmmov %vm11782_vm3 }
 0x76f   : > { %7005 = vmatprep.subr.bf16.mxu1 %v11766_v8  ;;  %5851 = vmatprep.subr.bf16.mxu0 %v5335_v55  ;;  %vm11795_vm15 = vmmov %vm11782_vm3 }
 0x770   : > { %v4380_v21 = vsel %vm11784_vm12, %v10798_v25, %v7673_v53  ;;  %v4381_v57 = vsel %vm11785_vm6, %v7673_v53, %v7674_v44  ;;  %5852 = vmatpush1.bf16.msra.mxu0 %v5334_v59  ;;  %v4306_v27 = vpop.permute.xlu0 %4305  ;;  %v4447_v16 = vsel %vm11786_vm11, %v10814_v23, %v7678_v9  ;;  %v4448_v58 = vsel %vm11788_vm8, %v7678_v9, %v7679_v62  ;;  %vm11797_vm3 = vmmov %vm11796_vm14 }
 0x771   : > { %v5343_v22 = vpack.c.bf16 %v4380_v21, %v4313_v42  ;;  %v7682_v40 = vpop.permute.xlu1 %7681  ;;  %v5344_v54 = vpack.c.bf16 %v4381_v57, %v4314_v30  ;;  %v4315_v60 = vsel %vm11790_vm5, %v7669_v37, %v4306_v27  ;;  %vm11798_vm12 = vmmov %vm11783_vm4 }
 0x772   : > { %v7684_v14 = vunpack.i.h.bf16 %v7682_v40  ;;  %v7683_v49 = vunpack.i.l.bf16 %v7682_v40  ;;  %7006 = vmatpush3.bf16.msra.mxu1 %v5336_v52  ;;  %vm11799_vm6 = vmmov %vm11797_vm3 }
 0x773   : > { %5853 = vmatprep.subr.bf16.mxu0 %v5344_v54  ;;  %7007 = vmatprep.subr.bf16.mxu1 %v11766_v8  ;;  %vm11800_vm11 = vmmov %vm11797_vm3 }
 0x774   : > { %v4514_v25 = vsel %vm11787_vm13, %v10831_v50, %v7683_v49  ;;  %v4515_v46 = vsel %vm11789_vm9, %v7683_v49, %v7684_v14  ;;  %5854 = vmatpush1.bf16.msra.mxu0 %v5343_v22  ;;  %v4440_v39 = vpop.permute.xlu0 %4439  ;;  %vm11801_vm13 = vmmov %vm11783_vm4 }
 0x775   : > { %v5352_v51 = vpack.c.bf16 %v4514_v25, %v4447_v16  ;;  %v4373_v33 = vpop.permute.xlu1 %4372  ;;  %v5353_v11 = vpack.c.bf16 %v4515_v46, %v4448_v58  ;;  %v4449_v1 = vsel %vm11792_vm0, %v7679_v62, %v4440_v39  ;;  %vm11802_vm8 = vmmov %vm11797_vm3 }
 0x776   : > { %v4382_v0 = vsel %vm11791_vm2, %v7674_v44, %v4373_v33  ;;  %v10924_v31 = vpop.f32.mrb[8].mxu1  ;;  %vm11803_vm9 = vmmov %vm11783_vm4 }
 0x777   : > { %v5345_v3 = vpack.c.bf16 %v4382_v0, %v4315_v60  ;;  %5855 = vmatprep.subr.bf16.mxu0 %v5353_v11  ;;  %v10926_v23 = vpop.f32.mrb[9].mxu1  ;;  %vm11804_vm5 = vmmov %vm11783_vm4 }
 0x778   : > { %v5552_v50 = vpop.f32.mrb[10].mxu1  ;;  %5856 = vmatpush1.bf16.msra.mxu0 %v5352_v51  ;;  %vm11805_vm2 = vmmov %vm11783_vm4 }
 0x779   : > { %v4507_v47 = vpop.permute.xlu1 %4506  ;;  %7008 = vmatpush3.bf16.msra.mxu1 %v5345_v3  ;;  %v5553_v56 = vpop.f32.mrb[11].mxu1  ;;  %vm11806_vm0 = vmmov %vm11797_vm3 }
 0x77a   : > { %v4516_v34 = vsel %vm11793_vm1, %v7684_v14, %v4507_v47  ;;  %7009 = vmatprep.subr.bf16.mxu1 %v11766_v8  ;;  %vm11807_vm1 = vmmov %vm11806_vm0 }
 0x77b   : > { %v5354_v20 = vpack.c.bf16 %v4516_v34, %v4449_v1  ;;  %5874 = vmatmul.mubr.bf16.vlgmr.msra.gmra.mrb[24].mxu0 %v10664_v28 }
 0x77c   : > { %6411 = vmatprep.mubr.bf16.mxu0 %v11640_v17 }
 0x77d   : > { %v6319_v35 = vpop.permute.xlu1 %6318  ;;  %7010 = vmatpush3.bf16.msra.mxu1 %v5354_v20 }
 0x77e   : > { %7015 = vmatprep.subr.bf16.mxu1 %v11766_v8 }
 0x780   : > { %7012 = vmatmul.mubr.bf16.vlgmr.msra.gmra.mrb[28].mxu1 %v10664_v28 }
 0x781   : > { %v6321_v26 = vpop.permute.xlu1 %6320  ;;  %7017 = vmatprep.mubr.msk.bf16.mxu1 %vm11674_vm7, %v11766_v8  ;;  %v6278_v8 = vld [vmem:[%s11457_s5] sm:$0xf]  ;;  %vm6348_vm7 = vcmask 31744  }
 0x782   : > { %v6339_v15 = vsel %vm11794_vm10, %v6319_v35, %v6321_v26  ;;  %vm11808_vm10 = vmmov %vm11806_vm0 }
 0x783   : > { %v6353_v29 = vsel %vm11796_vm14, %v6339_v15, 0  ;;  %vm11810_vm14 = vmmov %vm11806_vm0 }
 0x785   : > { %v6325_v43 = vpop.permute.xlu1 %6324  ;;  %v10937_v12 = vpop.permute.xlu0 %5923 }
 0x789   : > { %v6329_v4 = vpop.permute.xlu1 %6328  ;;  %v6323_v38 = vpop.permute.xlu0 %6322 }
 0x78a   : > { %v6340_v37 = vsel %vm11795_vm15, %v6321_v26, %v6323_v38  ;;  %v5589_v41 = vpop.f32.mrb[12].mxu1  ;;  %v6341_v28 = vsel %vm11783_vm4, %v6323_v38, %v6325_v43  ;;  %vm11809_vm15 = vmmov %vm11805_vm2 }
 0x78b   : > { %6926 = vmatprep.subr.msk.bf16.mxu0 %vm11797_vm3, %v6340_v37  ;;  %v5591_v32 = vpop.f32.mrb[13].mxu1  ;;  %v6359_v24 = vsel %vm11799_vm6, %v6341_v28, 0 }
 0x78c   : > { %6380 = vmatpush1.bf16.msra.mxu0 %v6353_v29  ;;  %v5593_v6 = vpop.f32.mrb[14].mxu1 }
 0x78d   : > { %v6327_v10 = vpop.permute.xlu0 %6326  ;;  %v5594_v59 = vpop.f32.mrb[15].mxu1 }
 0x78e   : > { %v6342_v2 = vsel %vm11798_vm12, %v6325_v43, %v6327_v10  ;;  %v6333_v36 = vpop.permute.xlu1 %6332  ;;  %v6343_v53 = vsel %vm11803_vm9, %v6327_v10, %v6329_v4 }
 0x78f   : > { %6927 = vmatmul.mubr.msk.bf16.vlgmr.msra.gmra.mrb[28].mxu0 %vm6348_vm7, %v6278_v8  ;;  %6928 = vmatprep.subr.msk.bf16.mxu0 %vm11800_vm11, %v6342_v2  ;;  %v6365_v21 = vsel %vm11806_vm0, %v6343_v53, 0 }
 0x790   : > { %6421 = vmatpush1.bf16.msra.mxu0 %v6359_v24  ;;  %6452 = vmatprep.mubr.bf16.mxu0 %v11640_v17 }
 0x791   : > { %v6331_v5 = vpop.permute.xlu0 %6330 }
 0x792   : > { %v6344_v44 = vsel %vm11801_vm13, %v6329_v4, %v6331_v5  ;;  %v6337_v55 = vpop.permute.xlu1 %6336  ;;  %v6345_v9 = vsel %vm11809_vm15, %v6331_v5, %v6333_v36 }
 0x793   : > { %6930 = vmatprep.subr.msk.bf16.mxu0 %vm11802_vm8, %v6344_v44  ;;  %v6371_v57 = vsel %vm11810_vm14, %v6345_v9, 0 }
 0x795   : > { %v6335_v52 = vpop.permute.xlu0 %6334 }
 0x796   : > { %v6346_v42 = vsel %vm11804_vm5, %v6333_v36, %v6335_v52  ;;  %v6347_v30 = vsel %vm11805_vm2, %v6335_v52, %v6337_v55 }
 0x797   : > { %v6377_v62 = vsel %vm11807_vm1, %v6347_v30, 0  ;;  %6929 = vmatmul.mubr.msk.bf16.vlgmr.msra.gmra.mrb[32].mxu0 %vm6348_vm7, %v6278_v8 }
 0x798   : > { %6462 = vmatpush1.bf16.msra.mxu0 %v6365_v21  ;;  %7016 = vmatpush3.bf16.msra.mxu1 %v6377_v62 }
 0x799   : > { %6932 = vmatprep.subr.msk.bf16.mxu0 %vm11808_vm10, %v6346_v42  ;;  %6493 = vmatprep.mubr.bf16.mxu0 %v11640_v17 }
 0x79b   : > { %7018 = vmatmul.mubr.msk.bf16.vlgmr.msra.gmra.mrb[32].mxu1 %vm6348_vm7, %v6278_v8 }
 0x79f   : > { %6931 = vmatmul.mubr.msk.bf16.vlgmr.msra.gmra.mrb[36].mxu0 %vm6348_vm7, %v6278_v8 }
 0x7a0   : > { %6503 = vmatpush1.bf16.msra.mxu0 %v6371_v57  ;;  %6534 = vmatprep.mubr.bf16.mxu0 %v11640_v17 }
 0x7a7   : > { %v5671_v22 = vpop.f32.mrb[16].mxu1  ;;  %6933 = vmatmul.mubr.msk.bf16.vlgmr.msra.gmra.mrb[40].mxu0 %vm6348_vm7, %v6278_v8 }
 0x7a8   : > { %v5673_v40 = vpop.f32.mrb[17].mxu1 }
 0x7a9   : > { %v5675_v27 = vpop.f32.mrb[18].mxu1 }
 0x7aa   : > { %v5676_v54 = vpop.f32.mrb[19].mxu1 }
 0x7ba   : > { %v5630_v14 = vpop.f32.mrb[12].mxu0 }
 0x7bb   : > { %v5632_v49 = vpop.f32.mrb[13].mxu0 }
 0x7bc   : > { %v5634_v16 = vpop.f32.mrb[14].mxu0 }
 0x7bd   : > { %v5635_v25 = vpop.f32.mrb[15].mxu0 }
 0x7cf   : > { %v5712_v58 = vpop.f32.mrb[16].mxu0 }
 0x7d0   : > { %v6993_v46 = vpop.f32.mrb[17].mxu0 }
 0x7d1   : > { %v5715_v51 = vpop.f32.mrb[18].mxu0 }
 0x7d2   : > { %v6994_v33 = vpop.f32.mrb[19].mxu0 }
 0x7f1   : > { %v5752_v11 = vpop.f32.mrb[20].mxu1 }
 0x7f2   : > { %v5753_v60 = vadd.f32 %v5752_v11, %v10924_v31  ;;  %v5754_v0 = vpop.f32.mrb[21].mxu1 }
 0x7f3   : > { %v5755_v17 = vadd.f32 %v5754_v0, %v10926_v23  ;;  %v5756_v3 = vpop.f32.mrb[22].mxu1  ;;  %v7893_v0 = vmov 4  }
 0x7f4   : > { %v5757_v39 = vpop.f32.mrb[23].mxu1  ;;  %v5926_v37 = vadd.f32 %v10937_v12, %v5753_v60  ;;  %7686 = vset.pattern.permute.xlu0 %v7893_v0  ;;  %v7895_v3 = vmov 6  }
 0x7f5   : > { %v5927_v31 = vadd.f32 %v10937_v12, %v5755_v17  ;;  %v7894_v17 = vmov 5  }
 0x7f6   : > { %v5935_v29 = vmul.f32 %v5926_v37, %v9478_v61  ;;  %7687 = vset.pattern.permute.xlu1 %v7894_v17 }
 0x82a   : > { %v5793_v50 = vpop.f32.mrb[20].mxu0 }
 0x82b   : > { %v5794_v47 = vadd.f32 %v5793_v50, %v5589_v41  ;;  %v5795_v56 = vpop.f32.mrb[21].mxu0  ;;  %v5936_v41 = vmul.f32 %v5927_v31, %v9480_v45 }
 0x82c   : > { %v5796_v1 = vadd.f32 %v5795_v56, %v5591_v32  ;;  %v5797_v34 = vpop.f32.mrb[22].mxu0 }
 0x82d   : > { %v5798_v20 = vpop.f32.mrb[23].mxu0  ;;  %v5928_v23 = vadd.f32 %v10937_v12, %v5794_v47  ;;  %v5944_v8 = vadd.f32 %v5936_v41, %v5935_v29 }
 0x82e   : > { %v5929_v28 = vadd.f32 %v10937_v12, %v5796_v1 }
 0x82f   : > { %v5937_v32 = vmul.f32 %v5928_v23, %v9482_v7 }
 0x830   : > { %v5834_v35 = vpop.f32.mrb[24].mxu1  ;;  %v5938_v2 = vmul.f32 %v5929_v28, %v9487_v18 }
 0x831   : > { %v5835_v26 = vadd.f32 %v5834_v35, %v5630_v14  ;;  %v5836_v43 = vpop.f32.mrb[25].mxu1  ;;  %v5945_v10 = vadd.f32 %v5944_v8, %v5937_v32 }
 0x832   : > { %v5837_v15 = vadd.f32 %v5836_v43, %v5632_v49  ;;  %v5838_v4 = vpop.f32.mrb[26].mxu1 }
 0x833   : > { %v5839_v38 = vpop.f32.mrb[27].mxu1  ;;  %v5930_v6 = vadd.f32 %v10937_v12, %v5835_v26  ;;  %v5946_v36 = vadd.f32 %v5945_v10, %v5938_v2 }
 0x834   : > { %v5931_v24 = vadd.f32 %v10937_v12, %v5837_v15 }
 0x835   : > { %v5939_v59 = vmul.f32 %v5930_v6, %v9489_v63 }
 0x836   : > { %v5940_v53 = vmul.f32 %v5931_v24, %v9493_v13 }
 0x837   : > { %v5947_v44 = vadd.f32 %v5946_v36, %v5939_v59 }
 0x839   : > { %v5948_v27 = vadd.f32 %v5947_v44, %v5940_v53 }
 0x84e   : > { %v5875_v5 = vpop.f32.mrb[24].mxu0 }
 0x84f   : > { %v5876_v55 = vadd.f32 %v5875_v5, %v5671_v22  ;;  %v5877_v52 = vpop.f32.mrb[25].mxu0 }
 0x850   : > { %v5878_v42 = vadd.f32 %v5877_v52, %v5673_v40  ;;  %v5879_v30 = vpop.f32.mrb[26].mxu0  ;;  %v7829_v40 = vld [vmem:[%s11453_s1 + $0x8] ss:$0 sm:$0xff] }
 0x851   : > { %v5932_v21 = vadd.f32 %v10937_v12, %v5876_v55  ;;  %v5880_v62 = vpop.f32.mrb[27].mxu0 }
 0x852   : > { %v5933_v9 = vadd.f32 %v10937_v12, %v5878_v42 }
 0x853   : > { %v5916_v57 = vpop.f32.mrb[28].mxu1  ;;  %v5941_v54 = vmul.f32 %v5932_v21, %v9495_v19 }
 0x854   : > { %v5917_v14 = vadd.f32 %v5916_v57, %v5712_v58  ;;  %v7013_v49 = vpop.f32.mrb[29].mxu1  ;;  %v5942_v16 = vmul.f32 %v5933_v9, %v9499_v48  ;;  %v7830_v58 = vld [vmem:[%s11456_s4] sm:$0xff] }
 0x855   : > { %v5919_v25 = vpop.f32.mrb[30].mxu1  ;;  %v5949_v46 = vadd.f32 %v5948_v27, %v5941_v54 }
 0x856   : > { %v5934_v22 = vadd.f32 %v10937_v12, %v5917_v14  ;;  %v7014_v51 = vpop.f32.mrb[31].mxu1 }
 0x857   : > { %v5950_v11 = vadd.f32 %v5949_v46, %v5942_v16 }
 0x858   : > { %v5943_v33 = vmul.f32 %v7829_v40, %v5934_v22 }
 0x85a   : > { %v5951_v60 = vadd.f32 %v5950_v11, %v5943_v33 }
 0x85c   : > { %5952 = vadd.xlane.f32.xlu0 %v5951_v60 }
 0x872   : > { %6005 = vperm.xlu0 %7686, %v7830_v58  }
 0x876   : > { %7689 = vset.pattern.permute.xlu0 %v7895_v3 }
 0x8e9   : > { %v5953_v12 = vpop.xlane.xlu0 %5952 }
 0x8ea   : > { %v5954_v39 = vmul.f32 0.0009765625, %v5953_v12 }
 0x8ec   : > { %v5955_v50 = vsub.f32 %v5926_v37, %v5954_v39  ;;  %v5956_v47 = vsub.f32 %v5927_v31, %v5954_v39  ;;  %v5957_v56 = vsub.f32 %v5928_v23, %v5954_v39  ;;  %v5958_v1 = vsub.f32 %v5929_v28, %v5954_v39 }
 0x8ed   : > { %v10993_v34 = vsub.f32 %v5930_v6, %v5954_v39  ;;  %v10995_v43 = vsub.f32 %v5931_v24, %v5954_v39  ;;  %v10999_v29 = vsub.f32 %v5932_v21, %v5954_v39  ;;  %v11004_v41 = vsub.f32 %v5933_v9, %v5954_v39 }
 0x8ee   : > { %v5964_v20 = vmul.f32 %v5955_v50, %v5955_v50  ;;  %v5965_v35 = vmul.f32 %v5956_v47, %v5956_v47  ;;  %v5966_v26 = vmul.f32 %v5957_v56, %v5957_v56  ;;  %v5967_v15 = vmul.f32 %v5958_v1, %v5958_v1 }
 0x8ef   : > { %v5968_v37 = vmul.f32 %v10993_v34, %v10993_v34  ;;  %v5969_v32 = vmul.f32 %v10995_v43, %v10995_v43  ;;  %v11009_v6 = vsub.f32 %v5934_v22, %v5954_v39 }
 0x8f0   : > { %v5973_v4 = vmul.f32 %v5964_v20, %v9478_v61  ;;  %v5974_v38 = vmul.f32 %v5965_v35, %v9480_v45  ;;  %v5975_v31 = vmul.f32 %v5966_v26, %v9482_v7  ;;  %v5976_v28 = vmul.f32 %v5967_v15, %v9487_v18 }
 0x8f1   : > { %v5970_v61 = vmul.f32 %v10999_v29, %v10999_v29  ;;  %v5977_v45 = vmul.f32 %v5968_v37, %v9489_v63  ;;  %v5971_v7 = vmul.f32 %v11004_v41, %v11004_v41  ;;  %v5978_v2 = vmul.f32 %v5969_v32, %v9493_v13  ;;  %v11021_v63 = vpop.f32.mrb[28].mxu0  ;;  %v11039_v33 = vpop.permute.xlu0 %6005 }
 0x8f2   : > { %v5982_v23 = vadd.f32 %v5974_v38, %v5973_v4  ;;  %v5972_v24 = vmul.f32 %v11009_v6, %v11009_v6  ;;  %v11023_v13 = vpop.f32.mrb[29].mxu0 }
 0x8f3   : > { %v5979_v18 = vmul.f32 %v5970_v61, %v9495_v19  ;;  %v5980_v5 = vmul.f32 %v5971_v7, %v9499_v48  ;;  %v6417_v42 = vpop.f32.mrb[30].mxu0 }
 0x8f4   : > { %v5983_v8 = vadd.f32 %v5982_v23, %v5975_v31  ;;  %v5981_v53 = vmul.f32 %v7829_v40, %v5972_v24  ;;  %v6418_v30 = vpop.f32.mrb[31].mxu0 }
 0x8f5   : > { %v11025_v21 = vpop.f32.mrb[32].mxu0 }
 0x8f6   : > { %v5984_v10 = vadd.f32 %v5983_v8, %v5976_v28  ;;  %v11027_v19 = vpop.f32.mrb[33].mxu0 }
 0x8f7   : > { %v6458_v62 = vpop.f32.mrb[34].mxu0 }
 0x8f8   : > { %v5985_v59 = vadd.f32 %v5984_v10, %v5977_v45  ;;  %v6459_v48 = vpop.f32.mrb[35].mxu0 }
 0x8f9   : > { %v11029_v9 = vpop.f32.mrb[36].mxu0 }
 0x8fa   : > { %v5986_v36 = vadd.f32 %v5985_v59, %v5978_v2  ;;  %v11031_v57 = vpop.f32.mrb[37].mxu0 }
 0x8fb   : > { %v6499_v27 = vpop.f32.mrb[38].mxu0 }
 0x8fc   : > { %v5987_v44 = vadd.f32 %v5986_v36, %v5979_v18  ;;  %v6500_v54 = vpop.f32.mrb[39].mxu0 }
 0x8fd   : > { %v11033_v14 = vpop.f32.mrb[40].mxu0 }
 0x8fe   : > { %v5988_v55 = vadd.f32 %v5987_v44, %v5980_v5  ;;  %v11035_v49 = vpop.f32.mrb[41].mxu0  ;;  %v11092_v44 = vpop.f32.mrb[32].mxu1 }
 0x8ff   : > { %v6540_v16 = vpop.f32.mrb[42].mxu0 }
 0x900   : > { %v5989_v52 = vadd.f32 %v5988_v55, %v5981_v53  ;;  %v6541_v25 = vpop.f32.mrb[43].mxu0  ;;  %v7019_v55 = vpop.f32.mrb[33].mxu1 }
 0x901   : > { %v6580_v30 = vpop.f32.mrb[34].mxu1 }
 0x902   : > { %5990 = vadd.xlane.f32.xlu1 %v5989_v52 }
 0x913   : > { %6018 = vperm.xlu1 %7687, %v7830_v58  }
 0x917   : > { %7688 = vset.pattern.permute.xlu1 %v7895_v3 }
 0x918   : > { %6305 = vperm.xlu1 %7688, %v7830_v58  }
 0x98f   : > { %v5991_v46 = vpop.xlane.xlu1 %5990 }
 0x990   : > { %v5992_v22 = vmul.f32 0.0009765625, %v5991_v46 }
 0x992   : > { %v5993_v51 = vadd.f32 1e-05, %v5992_v22 }
 0x993   : > { %v11045_v58 = vpop.permute.xlu1 %6018 }
 0x994   : > { %7751 = vrsqrt.f32 %v5993_v51 }
 0x997   : > { %v11084_v7 = vpop.permute.xlu1 %6305 }
 0x998   : > { %v11104_v62 = vadd.f32 %v11023_v13, %v11084_v7  ;;  %v11108_v48 = vadd.f32 %v11025_v21, %v11084_v7  ;;  %v11119_v16 = vadd.f32 %v11029_v9, %v11084_v7  ;;  %v7020_v13 = vpop.f32.mrb[35].mxu1 }
 0x99e   : > { %v11037_v40 = vpop.eup %7751 }
 0x99f   : > { %v5995_v11 = vmul.f32 %v11037_v40, %v5955_v50  ;;  %v5996_v60 = vmul.f32 %v11037_v40, %v5956_v47  ;;  %v5997_v0 = vmul.f32 %v11037_v40, %v5957_v56  ;;  %v5998_v17 = vmul.f32 %v11037_v40, %v5958_v1 }
 0x9a0   : > { %v5999_v35 = vmul.f32 %v11037_v40, %v10993_v34  ;;  %v6000_v50 = vmul.f32 %v11037_v40, %v10995_v43  ;;  %v6001_v15 = vmul.f32 %v11037_v40, %v10999_v29  ;;  %v6002_v10 = vmul.f32 %v11037_v40, %v11004_v41 }
 0x9a1   : > { %v6008_v3 = vmul.f32 %v11039_v33, %v5995_v11  ;;  %v6009_v12 = vmul.f32 %v11039_v33, %v5996_v60  ;;  %v6010_v39 = vmul.f32 %v11039_v33, %v5997_v0  ;;  %v6011_v20 = vmul.f32 %v11039_v33, %v5998_v17 }
 0x9a2   : > { %v6012_v37 = vmul.f32 %v11039_v33, %v5999_v35  ;;  %v6013_v32 = vmul.f32 %v11039_v33, %v6000_v50  ;;  %v6014_v8 = vmul.f32 %v11039_v33, %v6001_v15  ;;  %v11099_v41 = vadd.f32 %v11021_v63, %v11084_v7 }
 0x9a3   : > { %v6021_v47 = vadd.f32 %v11045_v58, %v6008_v3  ;;  %v6022_v56 = vadd.f32 %v11045_v58, %v6009_v12  ;;  %v11058_v1 = vadd.f32 %v11045_v58, %v6010_v39  ;;  %v11061_v26 = vadd.f32 %v11045_v58, %v6011_v20 }
 0x9a4   : > { %v11087_v59 = vadd.f32 %v11045_v58, %v6012_v37  ;;  %v11090_v5 = vadd.f32 %v11045_v58, %v6013_v32  ;;  %v11095_v53 = vadd.f32 %v11045_v58, %v6014_v8  ;;  %v6015_v42 = vmul.f32 %v11039_v33, %v6002_v10 }
 0x9a5   : > { %v11065_v4 = vmul.f32 0.70710677, %v6021_v47  ;;  %v11067_v38 = vmul.f32 0.70710677, %v6022_v56  ;;  %v11070_v34 = vmul.f32 0.70710677, %v11058_v1  ;;  %v11115_v63 = vadd.f32 %v11027_v19, %v11084_v7 }
 0x9a6   : > { %v11073_v43 = vmul.f32 0.70710677, %v11061_v26  ;;  %v11111_v27 = vmul.f32 0.70710677, %v11087_v59  ;;  %v11122_v25 = vmul.f32 0.70710677, %v11090_v5  ;;  %v11131_v19 = vadd.f32 %v11031_v57, %v11084_v7 }
 0x9a7   : > { %v6048_v31 = vand.u32 2147483647, %v11065_v4  ;;  %v6049_v23 = vand.u32 2147483647, %v11067_v38  ;;  %v6050_v29 = vand.u32 2147483647, %v11070_v34  ;;  %v11134_v9 = vadd.f32 %v11045_v58, %v6015_v42 }
 0x9a8   : > { %v6051_v28 = vand.u32 2147483647, %v11073_v43  ;;  %v6052_v21 = vand.u32 2147483647, %v11111_v27  ;;  %v11126_v51 = vmul.f32 0.70710677, %v11095_v53  ;;  %v11141_v17 = vadd.f32 %v11033_v14, %v11084_v7 }
 0x9a9   : > { %v6057_v61 = vmul.f32 0.3275911, %v6048_v31  ;;  %v6058_v45 = vmul.f32 0.3275911, %v6049_v23  ;;  %v6059_v2 = vmul.f32 0.3275911, %v6050_v29  ;;  %v11145_v3 = vadd.f32 %v11035_v49, %v11084_v7 }
 0x9aa   : > { %v6060_v36 = vmul.f32 0.3275911, %v6051_v28  ;;  %v6174_v46 = vsub.f32 0.0, %v6048_v31  ;;  %v6175_v22 = vsub.f32 0.0, %v6049_v23  ;;  %v6053_v11 = vand.u32 2147483647, %v11122_v25 }
 0x9ab   : > { %v6066_v24 = vadd.f32 1.0, %v6057_v61  ;;  %v6067_v18 = vadd.f32 1.0, %v6058_v45  ;;  %v6068_v52 = vadd.f32 1.0, %v6059_v2  ;;  %v6061_v60 = vmul.f32 0.3275911, %v6052_v21 }
 0x9ac   : > { %v6069_v54 = vadd.f32 1.0, %v6060_v36  ;;  %v11137_v0 = vand.u32 2147483647, %v11126_v51  ;;  %v6176_v12 = vsub.f32 0.0, %v6050_v29  ;;  %v6177_v39 = vsub.f32 0.0, %v6051_v28 }
 0x9ad   : > { %7753 = vrcp.f32 %v6066_v24  ;;  %v6062_v57 = vmul.f32 0.3275911, %v6053_v11  ;;  %v6183_v20 = vmul.f32 %v6174_v46, %v6048_v31  ;;  %v6184_v35 = vmul.f32 %v6175_v22, %v6049_v23 }
 0x9ae   : > { %7755 = vrcp.f32 %v6067_v18  ;;  %v6070_v50 = vadd.f32 1.0, %v6061_v60  ;;  %v6063_v15 = vmul.f32 0.3275911, %v11137_v0  ;;  %v11148_v37 = vmul.f32 0.5, %v6021_v47 }
 0x9af   : > { %7757 = vrcp.f32 %v6068_v52  ;;  %v11150_v32 = vmul.f32 0.5, %v6022_v56  ;;  %v6071_v8 = vadd.f32 1.0, %v6062_v57  ;;  %v11153_v14 = vmul.f32 0.70710677, %v11134_v9 }
 0x9b0   : > { %7759 = vrcp.f32 %v6069_v54  ;;  %v11156_v49 = vmul.f32 0.5, %v11058_v1  ;;  %v6072_v61 = vadd.f32 1.0, %v6063_v15  ;;  %v6003_v31 = vmul.f32 %v11037_v40, %v11009_v6 }
 0x9b1   : > { %7761 = vrcp.f32 %v6070_v50  ;;  %v6185_v45 = vmul.f32 %v6176_v12, %v6050_v29  ;;  %v6186_v10 = vmul.f32 %v6177_v39, %v6051_v28  ;;  %v11163_v47 = vand.u32 2147483647, %v11153_v14 }
 0x9b2   : > { %7763 = vrcp.f32 %v6071_v8  ;;  %v6192_v2 = vmul.f32 1.442695, %v6183_v20  ;;  %v6194_v24 = vmul.f32 1.442695, %v6184_v35  ;;  %v6016_v18 = vmul.f32 %v11039_v33, %v6003_v31 }
 0x9b3   : > { %v11171_v6 = vmul.f32 0.5, %v11061_v26  ;;  %v6178_v40 = vsub.f32 0.0, %v6052_v21  ;;  %v6064_v29 = vmul.f32 0.3275911, %v11163_v47  ;;  %v11175_v55 = vmul.f32 0.5, %v11087_v59 }
 0x9b4   : > { %7765 = vrcp.f32 %v6072_v61  ;;  %v11178_v52 = vadd.f32 %v11045_v58, %v6016_v18  ;;  %v6196_v33 = vmul.f32 1.442695, %v6185_v45  ;;  %v6179_v54 = vsub.f32 0.0, %v6053_v11 }
 0x9b5   : > { %v11184_v26 = vadd.f32 %v11092_v44, %v11084_v7  ;;  %7767 = vpow2.f32 %v6192_v2  ;;  %v6198_v59 = vmul.f32 1.442695, %v6186_v10  ;;  %v6187_v60 = vmul.f32 %v6178_v40, %v6052_v21 }
 0x9b6   : > { %v11192_v12 = vmul.f32 0.5, %v11090_v5  ;;  %v6073_v39 = vadd.f32 1.0, %v6064_v29  ;;  %7769 = vpow2.f32 %v6194_v24  ;;  %v6188_v35 = vmul.f32 %v6179_v54, %v6053_v11 }
 0x9b7   : > { %v11160_v23 = vpop.eup %7753  ;;  %7771 = vpow2.f32 %v6196_v33  ;;  %v6180_v50 = vsub.f32 0.0, %v11137_v0  ;;  %v6200_v10 = vmul.f32 1.442695, %v6187_v60  ;;  %vm6228_vm3 = vcmp.lt.f32.partialorder %v11065_v4, 0.0 }
 0x9b8   : > { %v11165_v56 = vpop.eup %7755  ;;  %v6093_v1 = vmul.f32 1.0614054, %v11160_v23  ;;  %7773 = vpow2.f32 %v6198_v59  ;;  %v6202_v40 = vmul.f32 1.442695, %v6188_v35  ;;  %vm6229_vm4 = vcmp.lt.f32.partialorder %v11067_v38, 0.0 }
 0x9b9   : > { %v6094_v36 = vmul.f32 1.0614054, %v11165_v56  ;;  %v11180_v42 = vpop.eup %7757  ;;  %7775 = vrcp.f32 %v6073_v39  ;;  %v6189_v29 = vmul.f32 %v6180_v50, %v11137_v0  ;;  %vm6230_vm7 = vcmp.lt.f32.partialorder %v11070_v34, 0.0 }
 0x9ba   : > { %v6102_v28 = vadd.f32 -1.4531521, %v6093_v1  ;;  %v6095_v46 = vmul.f32 1.0614054, %v11180_v42  ;;  %v11188_v22 = vpop.eup %7759  ;;  %7777 = vpow2.f32 %v6200_v10  ;;  %vm6231_vm12 = vcmp.lt.f32.partialorder %v11073_v43, 0.0 }
 0x9bb   : > { %v6103_v30 = vadd.f32 -1.4531521, %v6094_v36  ;;  %v6096_v7 = vmul.f32 1.0614054, %v11188_v22  ;;  %v11196_v15 = vpop.eup %7761  ;;  %7779 = vpow2.f32 %v6202_v40  ;;  %vm6232_vm6 = vcmp.lt.f32.partialorder %v11111_v27, 0.0 }
 0x9bc   : > { %v6111_v13 = vmul.f32 %v11160_v23, %v6102_v28  ;;  %v6104_v20 = vadd.f32 -1.4531521, %v6095_v46  ;;  %v11200_v5 = vpop.eup %7763  ;;  %v6097_v45 = vmul.f32 1.0614054, %v11196_v15  ;;  %vm6233_vm11 = vcmp.lt.f32.partialorder %v11122_v25, 0.0 }
 0x9bd   : > { %v6112_v58 = vmul.f32 %v11165_v56, %v6103_v30  ;;  %v6105_v61 = vadd.f32 -1.4531521, %v6096_v7  ;;  %v6098_v1 = vmul.f32 1.0614054, %v11200_v5  ;;  %vm6234_vm13 = vcmp.lt.f32.partialorder %v11126_v51, 0.0 }
 0x9be   : > { %v6120_v57 = vadd.f32 1.4214138, %v6111_v13  ;;  %v6113_v21 = vmul.f32 %v11180_v42, %v6104_v20  ;;  %v6106_v36 = vadd.f32 -1.4531521, %v6097_v45  ;;  %v11207_v28 = vpop.eup %7765  ;;  %vm6235_vm8 = vcmp.lt.f32.partialorder %v11153_v14, 0.0 }
 0x9bf   : > { %v6121_v44 = vadd.f32 1.4214138, %v6112_v58  ;;  %v6114_v24 = vmul.f32 %v11188_v22, %v6105_v61  ;;  %v6107_v13 = vadd.f32 -1.4531521, %v6098_v1  ;;  %v6099_v58 = vmul.f32 1.0614054, %v11207_v28  ;;  %v7768_v60 = vpop.eup %7767 }
 0x9c0   : > { %v6129_v8 = vmul.f32 %v11160_v23, %v6120_v57  ;;  %v6122_v11 = vadd.f32 1.4214138, %v6113_v21  ;;  %v6115_v59 = vmul.f32 %v11196_v15, %v6106_v36  ;;  %v7770_v50 = vpop.eup %7769 }
 0x9c1   : > { %v6130_v31 = vmul.f32 %v11165_v56, %v6121_v44  ;;  %v6123_v54 = vadd.f32 1.4214138, %v6114_v24  ;;  %v6116_v20 = vmul.f32 %v11200_v5, %v6107_v13  ;;  %v6108_v35 = vadd.f32 -1.4531521, %v6099_v58  ;;  %v7772_v45 = vpop.eup %7771 }
 0x9c2   : > { %v6138_v2 = vadd.f32 -0.28449672, %v6129_v8  ;;  %v6131_v33 = vmul.f32 %v11180_v42, %v6122_v11  ;;  %v6124_v44 = vadd.f32 1.4214138, %v6115_v59  ;;  %v11224_v24 = vmul.f32 0.70710677, %v11178_v52  ;;  %v7774_v1 = vpop.eup %7773 }
 0x9c3   : > { %v6139_v18 = vadd.f32 -0.28449672, %v6130_v31  ;;  %v6132_v0 = vmul.f32 %v11188_v22, %v6123_v54  ;;  %v6125_v31 = vadd.f32 1.4214138, %v6116_v20  ;;  %v6117_v11 = vmul.f32 %v11207_v28, %v6108_v35 }
 0x9c4   : > { %v6147_v30 = vmul.f32 %v11160_v23, %v6138_v2  ;;  %v6140_v57 = vadd.f32 -0.28449672, %v6131_v33  ;;  %v6133_v2 = vmul.f32 %v11196_v15, %v6124_v44  ;;  %v6204_v13 = vmul.f32 1.442695, %v6189_v29 }
 0x9c5   : > { %v6148_v46 = vmul.f32 %v11165_v56, %v6139_v18  ;;  %v6141_v61 = vadd.f32 -0.28449672, %v6132_v0  ;;  %v6134_v40 = vmul.f32 %v11200_v5, %v6125_v31  ;;  %v6126_v54 = vadd.f32 1.4214138, %v6117_v11 }
 0x9c6   : > { %v6156_v39 = vadd.f32 0.2548296, %v6147_v30  ;;  %v6149_v21 = vmul.f32 %v11180_v42, %v6140_v57  ;;  %v11228_v30 = vpop.eup %7775  ;;  %v11236_v20 = vand.u32 2147483647, %v11224_v24  ;;  %7781 = vpow2.f32 %v6204_v13 }
 0x9c7   : > { %v6157_v7 = vadd.f32 0.2548296, %v6148_v46  ;;  %v6135_v0 = vmul.f32 %v11207_v28, %v6126_v54  ;;  %vm6236_vm15 = vcmp.lt.f32.partialorder %v11224_v24, 0.0 }
 0x9c8   : > { %v6165_v8 = vmul.f32 %v11160_v23, %v6156_v39  ;;  %v6158_v36 = vadd.f32 0.2548296, %v6149_v21  ;;  %v6150_v23 = vmul.f32 %v11188_v22, %v6141_v61  ;;  %v6143_v39 = vadd.f32 -0.28449672, %v6134_v40 }
 0x9c9   : > { %v6166_v10 = vmul.f32 %v11165_v56, %v6157_v7  ;;  %v6142_v56 = vadd.f32 -0.28449672, %v6133_v2  ;;  %v11241_v21 = vmul.f32 0.5, %v11095_v53  ;;  %v6100_v61 = vmul.f32 1.0614054, %v11228_v30 }
 0x9ca   : > { %v6210_v18 = vmul.f32 %v7768_v60, %v6165_v8  ;;  %v6167_v59 = vmul.f32 %v11180_v42, %v6158_v36  ;;  %v6159_v58 = vadd.f32 0.2548296, %v6150_v23  ;;  %v6152_v29 = vmul.f32 %v11200_v5, %v6143_v39 }
 0x9cb   : > { %v6211_v33 = vmul.f32 %v7770_v50, %v6166_v10  ;;  %v6151_v60 = vmul.f32 %v11196_v15, %v6142_v56  ;;  %v7778_v50 = vpop.eup %7777  ;;  %v6144_v23 = vadd.f32 -0.28449672, %v6135_v0 }
 0x9cc   : > { %v6219_v46 = vsub.f32 1.0, %v6210_v18  ;;  %v6212_v44 = vmul.f32 %v7772_v45, %v6167_v59  ;;  %v6168_v35 = vmul.f32 %v11188_v22, %v6159_v58  ;;  %v6161_v11 = vadd.f32 0.2548296, %v6152_v29  ;;  %v7780_v18 = vpop.eup %7779 }
 0x9cd   : > { %v6220_v57 = vsub.f32 1.0, %v6211_v33  ;;  %v6160_v8 = vadd.f32 0.2548296, %v6151_v60  ;;  %v6153_v0 = vmul.f32 %v11207_v28, %v6144_v23 }
 0x9ce   : > { %v6237_v7 = vsub.f32 0.0, %v6219_v46  ;;  %v6221_v10 = vsub.f32 1.0, %v6212_v44  ;;  %v6213_v2 = vmul.f32 %v7774_v1, %v6168_v35  ;;  %v6170_v56 = vmul.f32 %v11200_v5, %v6161_v11 }
 0x9cf   : > { %v6238_v42 = vsub.f32 0.0, %v6220_v57  ;;  %v6169_v36 = vmul.f32 %v11196_v15, %v6160_v8  ;;  %v6181_v1 = vsub.f32 0.0, %v11163_v47 }
 0x9d0   : > { %v6246_v31 = vsel %vm6228_vm3, %v6237_v7, %v6219_v46  ;;  %v6239_v33 = vsub.f32 0.0, %v6221_v10  ;;  %v6222_v53 = vsub.f32 1.0, %v6213_v2  ;;  %v6109_v46 = vadd.f32 -1.4531521, %v6100_v61 }
 0x9d1   : > { %v6247_v22 = vsel %vm6229_vm4, %v6238_v42, %v6220_v57  ;;  %v6255_v45 = vadd.f32 1.0, %v6246_v31  ;;  %v6214_v4 = vmul.f32 %v7778_v50, %v6169_v36  ;;  %v6215_v39 = vmul.f32 %v7780_v18, %v6170_v56 }
 0x9d2   : > { %v6256_v40 = vadd.f32 1.0, %v6247_v22  ;;  %v6248_v38 = vsel %vm6230_vm7, %v6239_v33, %v6221_v10  ;;  %v6240_v58 = vsub.f32 0.0, %v6222_v53  ;;  %v6190_v29 = vmul.f32 %v6181_v1, %v11163_v47 }
 0x9d3   : > { %v6264_v54 = vmul.f32 %v6255_v45, %v11148_v37  ;;  %v6257_v57 = vadd.f32 1.0, %v6248_v38  ;;  %v6223_v60 = vsub.f32 1.0, %v6214_v4  ;;  %v6224_v35 = vsub.f32 1.0, %v6215_v39 }
 0x9d4   : > { %v6265_v59 = vmul.f32 %v6256_v40, %v11150_v32  ;;  %v6249_v37 = vsel %vm6231_vm12, %v6240_v58, %v6222_v53  ;;  %v6065_v32 = vmul.f32 0.3275911, %v11236_v20  ;;  %v6162_v61 = vadd.f32 0.2548296, %v6153_v0  ;;  %v7782_v53 = vpop.eup %7781 }
 0x9d5   : > { %v6583_v15 = vadd.f32 %v11099_v41, %v6264_v54  ;;  %v6266_v34 = vmul.f32 %v6257_v57, %v11156_v49  ;;  %v6258_v44 = vadd.f32 1.0, %v6249_v37  ;;  %v6241_v13 = vsub.f32 0.0, %v6223_v60 }
 0x9d6   : > { %v11257_v5 = vadd.f32 %v11104_v62, %v6265_v59  ;;  %v6118_v62 = vmul.f32 %v11228_v30, %v6109_v46  ;;  %v6074_v31 = vadd.f32 1.0, %v6065_v32  ;;  %v6242_v11 = vsub.f32 0.0, %v6224_v35 }
 0x9d7   : > { %v11263_v7 = vmul.f32 0.70710677, %v6583_v15  ;;  %v6585_v50 = vadd.f32 %v11108_v48, %v6266_v34  ;;  %v6267_v42 = vmul.f32 %v6258_v44, %v11171_v6  ;;  %v6250_v8 = vsel %vm6232_vm6, %v6241_v13, %v6223_v60 }
 0x9d8   : > { %v11267_v41 = vmul.f32 0.70710677, %v11257_v5  ;;  %v6127_v48 = vadd.f32 1.4214138, %v6118_v62  ;;  %v6206_v22 = vmul.f32 1.442695, %v6190_v29  ;;  %7783 = vrcp.f32 %v6074_v31 }
 0x9d9   : > { %v6610_v43 = vand.u32 2147483647, %v11263_v7  ;;  %v11276_v2 = vmul.f32 0.70710677, %v6585_v50  ;;  %v11280_v18 = vadd.f32 %v11115_v63, %v6267_v42  ;;  %v6259_v36 = vadd.f32 1.0, %v6250_v8 }
 0x9da   : > { %v6611_v49 = vand.u32 2147483647, %v11267_v41  ;;  %v11287_v33 = vmul.f32 0.5, %v11134_v9  ;;  %v6251_v63 = vsel %vm6233_vm11, %v6242_v11, %v6224_v35  ;;  %v6171_v54 = vmul.f32 %v11207_v28, %v6162_v61 }
 0x9db   : > { %v6619_v10 = vmul.f32 0.3275911, %v6610_v43  ;;  %v6736_v45 = vsub.f32 0.0, %v6610_v43  ;;  %v6612_v27 = vand.u32 2147483647, %v11276_v2  ;;  %v6136_v1 = vmul.f32 %v11228_v30, %v6127_v48 }
 0x9dc   : > { %v6620_v47 = vmul.f32 0.3275911, %v6611_v49  ;;  %v11284_v40 = vmul.f32 0.70710677, %v11280_v18  ;;  %v6737_v4 = vsub.f32 0.0, %v6611_v49  ;;  %v6268_v38 = vmul.f32 %v6259_v36, %v11175_v55 }
 0x9dd   : > { %v6628_v6 = vadd.f32 1.0, %v6619_v10  ;;  %v6621_v56 = vmul.f32 0.3275911, %v6612_v27  ;;  %v6745_v59 = vmul.f32 %v6736_v45, %v6610_v43  ;;  %v11296_v58 = vmul.f32 0.5, %v6583_v15 }
 0x9de   : > { %v6629_v23 = vadd.f32 1.0, %v6620_v47  ;;  %v6613_v46 = vand.u32 2147483647, %v11284_v40  ;;  %v6260_v25 = vadd.f32 1.0, %v6251_v63  ;;  %v6182_v57 = vsub.f32 0.0, %v11236_v20 }
 0x9df   : > { %7785 = vrcp.f32 %v6628_v6  ;;  %v6630_v9 = vadd.f32 1.0, %v6621_v56  ;;  %v6738_v28 = vsub.f32 0.0, %v6612_v27  ;;  %v11300_v60 = vadd.f32 %v11119_v16, %v6268_v38 }
 0x9e0   : > { %7787 = vrcp.f32 %v6629_v23  ;;  %v6622_v39 = vmul.f32 0.3275911, %v6613_v46  ;;  %v6216_v37 = vmul.f32 %v7782_v53, %v6171_v54  ;;  %v6746_v0 = vmul.f32 %v6737_v4, %v6611_v49 }
 0x9e1   : > { %7789 = vpow2.f32 %v6206_v22  ;;  %v6269_v34 = vmul.f32 %v6260_v25, %v11192_v12  ;;  %v6145_v44 = vadd.f32 -0.28449672, %v6136_v1  ;;  %v6754_v35 = vmul.f32 1.442695, %v6745_v59 }
 0x9e2   : > { %7791 = vrcp.f32 %v6630_v9  ;;  %v6631_v32 = vadd.f32 1.0, %v6622_v39  ;;  %v6739_v55 = vsub.f32 0.0, %v6613_v46  ;;  %v11304_v15 = vmul.f32 0.70710677, %v11300_v60  ;;  %v11316_v8 = vpop.eup %7783 }
 0x9e3   : > { %v6225_v13 = vsub.f32 1.0, %v6216_v37  ;;  %v11307_v62 = vmul.f32 0.5, %v11257_v5  ;;  %v11310_v29 = vadd.f32 %v11131_v19, %v6269_v34  ;;  %v6154_v16 = vmul.f32 %v11228_v30, %v6145_v44 }
 0x9e4   : > { %7793 = vrcp.f32 %v6631_v32  ;;  %v11313_v43 = vmul.f32 0.5, %v6585_v50  ;;  %v6747_v42 = vmul.f32 %v6738_v28, %v6612_v27  ;;  %v6614_v12 = vand.u32 2147483647, %v11304_v15 }
 0x9e5   : > { %v6243_v49 = vsub.f32 0.0, %v6225_v13  ;;  %v6756_v61 = vmul.f32 1.442695, %v6746_v0  ;;  %v11319_v31 = vmul.f32 0.70710677, %v11310_v29  ;;  %v11322_v10 = vmul.f32 %v6182_v57, %v11236_v20 }
 0x9e6   : > { %v6163_v5 = vadd.f32 0.2548296, %v6154_v16  ;;  %7795 = vpow2.f32 %v6754_v35  ;;  %v6748_v11 = vmul.f32 %v6739_v55, %v6613_v46  ;;  %v6623_v50 = vmul.f32 0.3275911, %v6614_v12 }
 0x9e7   : > { %v6252_v47 = vsel %vm6234_vm13, %v6243_v49, %v6225_v13  ;;  %v6740_v6 = vsub.f32 0.0, %v6614_v12  ;;  %v6615_v45 = vand.u32 2147483647, %v11319_v31  ;;  %v6758_v23 = vmul.f32 1.442695, %v6747_v42 }
 0x9e8   : > { %v6261_v27 = vadd.f32 1.0, %v6252_v47  ;;  %v6632_v53 = vadd.f32 1.0, %v6623_v50  ;;  %v6172_v56 = vmul.f32 %v11228_v30, %v6163_v5  ;;  %v6101_v4 = vmul.f32 1.0614054, %v11316_v8 }
 0x9e9   : > { %v11324_v19 = vpop.eup %7785  ;;  %v6624_v51 = vmul.f32 0.3275911, %v6615_v45  ;;  %v6760_v59 = vmul.f32 1.442695, %v6748_v11  ;;  %v6749_v25 = vmul.f32 %v6740_v6, %v6614_v12  ;;  %v6741_v28 = vsub.f32 0.0, %v6615_v45 }
 0x9ea   : > { %v11328_v48 = vpop.eup %7787  ;;  %v6655_v22 = vmul.f32 1.0614054, %v11324_v19  ;;  %v6270_v54 = vmul.f32 %v6261_v27, %v11241_v21  ;;  %7797 = vrcp.f32 %v6632_v53  ;;  %v6110_v44 = vadd.f32 -1.4531521, %v6101_v4 }
 0x9eb   : > { %v7790_v20 = vpop.eup %7789  ;;  %v6656_v36 = vmul.f32 1.0614054, %v11328_v48  ;;  %v6633_v57 = vadd.f32 1.0, %v6624_v51  ;;  %v6762_v12 = vmul.f32 1.442695, %v6749_v25  ;;  %v6750_v50 = vmul.f32 %v6741_v28, %v6615_v45 }
 0x9ec   : > { %v6664_v63 = vadd.f32 -1.4531521, %v6655_v22  ;;  %v11337_v46 = vpop.eup %7791  ;;  %v6217_v9 = vmul.f32 %v7790_v20, %v6172_v56  ;;  %v11343_v37 = vadd.f32 %v11141_v17, %v6270_v54  ;;  %vm6790_vm9 = vcmp.lt.f32.partialorder %v11263_v7, 0.0 }
 0x9ed   : > { %v6665_v1 = vadd.f32 -1.4531521, %v6656_v36  ;;  %v6657_v39 = vmul.f32 1.0614054, %v11337_v46  ;;  %7799 = vrcp.f32 %v6633_v57  ;;  %v6764_v54 = vmul.f32 1.442695, %v6750_v50 }
 0x9ee   : > { %v6673_v38 = vmul.f32 %v11324_v19, %v6664_v63  ;;  %v6226_v21 = vsub.f32 1.0, %v6217_v9  ;;  %v11345_v0 = vpop.eup %7793  ;;  %7801 = vpow2.f32 %v6756_v61  ;;  %v11351_v17 = vmul.f32 0.70710677, %v11343_v37 }
 0x9ef   : > { %v6674_v30 = vmul.f32 %v11328_v48, %v6665_v1  ;;  %v6666_v34 = vadd.f32 -1.4531521, %v6657_v39  ;;  %v6658_v55 = vmul.f32 1.0614054, %v11345_v0  ;;  %7803 = vpow2.f32 %v6758_v23 }
 0x9f0   : > { %v6682_v32 = vadd.f32 1.4214138, %v6673_v38  ;;  %v6244_v13 = vsub.f32 0.0, %v6226_v21  ;;  %v7796_v49 = vpop.eup %7795  ;;  %v6616_v6 = vand.u32 2147483647, %v11351_v17  ;;  %7805 = vpow2.f32 %v6760_v59 }
 0x9f1   : > { %v6683_v35 = vadd.f32 1.4214138, %v6674_v30  ;;  %v6675_v42 = vmul.f32 %v11337_v46, %v6666_v34  ;;  %v6667_v11 = vadd.f32 -1.4531521, %v6658_v55  ;;  %7807 = vpow2.f32 %v6762_v12 }
 0x9f2   : > { %v6691_v16 = vmul.f32 %v11324_v19, %v6682_v32  ;;  %v6253_v47 = vsel %vm6235_vm8, %v6244_v13, %v6226_v21  ;;  %v6625_v63 = vmul.f32 0.3275911, %v6616_v6  ;;  %v6119_v59 = vmul.f32 %v11316_v8, %v6110_v44 }
 0x9f3   : > { %v6692_v5 = vmul.f32 %v11328_v48, %v6683_v35  ;;  %v6684_v22 = vadd.f32 1.4214138, %v6675_v42  ;;  %v6676_v20 = vmul.f32 %v11345_v0, %v6667_v11  ;;  %v6262_v36 = vadd.f32 1.0, %v6253_v47 }
 0x9f4   : > { %v6700_v61 = vadd.f32 -0.28449672, %v6691_v16  ;;  %v11360_v45 = vpop.eup %7797  ;;  %v6634_v25 = vadd.f32 1.0, %v6625_v63  ;;  %v6742_v57 = vsub.f32 0.0, %v6616_v6  ;;  %vm6791_vm5 = vcmp.lt.f32.partialorder %v11267_v41, 0.0 }
 0x9f5   : > { %v6701_v27 = vadd.f32 -0.28449672, %v6692_v5  ;;  %v6693_v56 = vmul.f32 %v11337_v46, %v6684_v22  ;;  %v6685_v51 = vadd.f32 1.4214138, %v6676_v20  ;;  %v6271_v23 = vmul.f32 %v6262_v36, %v11287_v33 }
 0x9f6   : > { %v6709_v53 = vmul.f32 %v11324_v19, %v6700_v61  ;;  %v6659_v9 = vmul.f32 1.0614054, %v11360_v45  ;;  %7809 = vrcp.f32 %v6634_v25  ;;  %vm6792_vm2 = vcmp.lt.f32.partialorder %v11276_v2, 0.0 }
 0x9f7   : > { %v6710_v14 = vmul.f32 %v11328_v48, %v6701_v27  ;;  %v6702_v1 = vadd.f32 -0.28449672, %v6693_v56  ;;  %v6694_v39 = vmul.f32 %v11345_v0, %v6685_v51  ;;  %v11368_v30 = vpop.eup %7799  ;;  %v11374_v32 = vadd.f32 %v11145_v3, %v6271_v23 }
 0x9f8   : > { %v6718_v4 = vadd.f32 0.2548296, %v6709_v53  ;;  %v6668_v21 = vadd.f32 -1.4531521, %v6659_v9  ;;  %v7802_v34 = vpop.eup %7801  ;;  %v6660_v55 = vmul.f32 1.0614054, %v11368_v30  ;;  %7811 = vpow2.f32 %v6764_v54 }
 0x9f9   : > { %v6719_v38 = vadd.f32 0.2548296, %v6710_v14  ;;  %v6711_v33 = vmul.f32 %v11337_v46, %v6702_v1  ;;  %v6703_v35 = vadd.f32 -0.28449672, %v6694_v39  ;;  %v6128_v5 = vadd.f32 1.4214138, %v6119_v59  ;;  %v7804_v11 = vpop.eup %7803 }
 0x9fa   : > { %v6727_v28 = vmul.f32 %v11324_v19, %v6718_v4  ;;  %v6677_v42 = vmul.f32 %v11360_v45, %v6668_v21  ;;  %v6669_v3 = vadd.f32 -1.4531521, %v6660_v55  ;;  %v11383_v61 = vmul.f32 0.70710677, %v11374_v32 }
 0x9fb   : > { %v6728_v44 = vmul.f32 %v11328_v48, %v6719_v38  ;;  %v6720_v16 = vadd.f32 0.2548296, %v6711_v33  ;;  %v6712_v12 = vmul.f32 %v11345_v0, %v6703_v35  ;;  %v6751_v36 = vmul.f32 %v6742_v57, %v6616_v6 }
 0x9fc   : > { %v6772_v13 = vmul.f32 %v7796_v49, %v6727_v28  ;;  %v6686_v47 = vadd.f32 1.4214138, %v6677_v42  ;;  %v7806_v49 = vpop.eup %7805  ;;  %v6678_v20 = vmul.f32 %v11368_v30, %v6669_v3  ;;  %v11389_v51 = vand.u32 2147483647, %v11383_v61 }
 0x9fd   : > { %v6773_v19 = vmul.f32 %v7802_v34, %v6728_v44  ;;  %v6729_v48 = vmul.f32 %v11337_v46, %v6720_v16  ;;  %v6721_v27 = vadd.f32 0.2548296, %v6712_v12  ;;  %v7808_v53 = vpop.eup %7807  ;;  %v6137_v4 = vmul.f32 %v11316_v8, %v6128_v5 }
 0x9fe   : > { %v6781_v50 = vsub.f32 1.0, %v6772_v13  ;;  %v6695_v14 = vmul.f32 %v11360_v45, %v6686_v47  ;;  %v6687_v23 = vadd.f32 1.4214138, %v6678_v20  ;;  %v6626_v59 = vmul.f32 0.3275911, %v11389_v51 }
 0x9ff   : > { %v6782_v22 = vsub.f32 1.0, %v6773_v19  ;;  %v6774_v63 = vmul.f32 %v7804_v11, %v6729_v48  ;;  %v6730_v54 = vmul.f32 %v11345_v0, %v6721_v27  ;;  %vm6793_vm0 = vcmp.lt.f32.partialorder %v11284_v40, 0.0 }
 0xa00   : > { %v6799_v56 = vsub.f32 0.0, %v6781_v50  ;;  %v6704_v6 = vadd.f32 -0.28449672, %v6695_v14  ;;  %v6696_v57 = vmul.f32 %v11368_v30, %v6687_v23  ;;  %v6635_v33 = vadd.f32 1.0, %v6626_v59  ;;  %v11405_v21 = vpop.eup %7809 }
 0xa01   : > { %v6800_v46 = vsub.f32 0.0, %v6782_v22  ;;  %v6783_v9 = vsub.f32 1.0, %v6774_v63  ;;  %v6775_v25 = vmul.f32 %v7806_v49, %v6730_v54  ;;  %v6661_v42 = vmul.f32 1.0614054, %v11405_v21 }
 0xa02   : > { %v6808_v1 = vsel %vm6790_vm9, %v6799_v56, %v6781_v50  ;;  %v6713_v28 = vmul.f32 %v11360_v45, %v6704_v6  ;;  %v6705_v44 = vadd.f32 -0.28449672, %v6696_v57  ;;  %v7812_v35 = vpop.eup %7811  ;;  %7813 = vrcp.f32 %v6635_v33 }
 0xa03   : > { %v6809_v38 = vsel %vm6791_vm5, %v6800_v46, %v6782_v22  ;;  %v6817_v39 = vadd.f32 1.0, %v6808_v1  ;;  %v6801_v7 = vsub.f32 0.0, %v6783_v9  ;;  %v6784_v34 = vsub.f32 1.0, %v6775_v25 }
 0xa04   : > { %v6818_v0 = vadd.f32 1.0, %v6809_v38  ;;  %v6722_v16 = vadd.f32 0.2548296, %v6713_v28  ;;  %v6714_v3 = vmul.f32 %v11368_v30, %v6705_v44  ;;  %v6670_v5 = vadd.f32 -1.4531521, %v6661_v42 }
 0xa05   : > { %v6826_v41 = vmul.f32 %v6817_v39, %v11296_v58  ;;  %v6810_v13 = vsel %vm6792_vm2, %v6801_v7, %v6783_v9  ;;  %v6802_v12 = vsub.f32 0.0, %v6784_v34  ;;  %v6766_v11 = vmul.f32 1.442695, %v6751_v36 }
 0xa06   : > { %v6827_v55 = vmul.f32 %v6818_v0, %v11307_v62  ;;  %v6819_v19 = vadd.f32 1.0, %v6810_v13  ;;  %v6731_v58 = vmul.f32 %v11360_v45, %v6722_v16  ;;  %v6146_v50 = vadd.f32 -0.28449672, %v6137_v4 }
 0xa07   : > { %6835 = vst [vmem:[%s11402_s8] sm:$0xff] %v6826_v41  ;;  %v6811_v2 = vsel %vm6793_vm0, %v6802_v12, %v6784_v34  ;;  %v6723_v48 = vadd.f32 0.2548296, %v6714_v3  ;;  %v6208_v47 = vmul.f32 1.442695, %v11322_v10  ;;  %v6595_v49 = vmul.f32 0.5, %v11280_v18 }
 0xa08   : > { %6836 = vst [vmem:[%s11402_s8 + $0x8] sm:$0xff] %v6827_v55  ;;  %v6828_v62 = vmul.f32 %v6819_v19, %v11313_v43  ;;  %v6820_v22 = vadd.f32 1.0, %v6811_v2  ;;  %v6776_v27 = vmul.f32 %v7808_v53, %v6731_v58  ;;  %v6679_v20 = vmul.f32 %v11405_v21, %v6670_v5 }
 0xa09   : > { %v6732_v45 = vmul.f32 %v11368_v30, %v6723_v48  ;;  %v6155_v36 = vmul.f32 %v11316_v8, %v6146_v50  ;;  %7815 = vpow2.f32 %v6208_v47  ;;  %v6743_v14 = vsub.f32 0.0, %v11389_v51 }
 0xa0a   : > { %6837 = vst [vmem:[%s11402_s8 + $0x10] sm:$0xff] %v6828_v62  ;;  %v6829_v43 = vmul.f32 %v6820_v22, %v6595_v49  ;;  %v6785_v56 = vsub.f32 1.0, %v6776_v27  ;;  %v6688_v40 = vadd.f32 1.4214138, %v6679_v20  ;;  %7817 = vpow2.f32 %v6766_v11 }
 0xa0b   : > { %v6777_v63 = vmul.f32 %v7812_v35, %v6732_v45  ;;  %v6164_v53 = vadd.f32 0.2548296, %v6155_v36  ;;  %vm6794_vm1 = vcmp.lt.f32.partialorder %v11304_v15, 0.0  ;;  %v6596_v4 = vmul.f32 0.5, %v11300_v60 }
 0xa0c   : > { %6838 = vst [vmem:[%s11402_s8 + $0x18] sm:$0xff] %v6829_v43  ;;  %v6803_v10 = vsub.f32 0.0, %v6785_v56  ;;  %v6697_v18 = vmul.f32 %v11405_v21, %v6688_v40  ;;  %v7814_v23 = vpop.eup %7813  ;;  %v6752_v6 = vmul.f32 %v6743_v14, %v11389_v51  ;;  %vm6795_vm10 = vcmp.lt.f32.partialorder %v11319_v31, 0.0 }
 0xa0d   : > { %v6786_v46 = vsub.f32 1.0, %v6777_v63  ;;  %v6662_v38 = vmul.f32 1.0614054, %v7814_v23  ;;  %v6173_v39 = vmul.f32 %v11316_v8, %v6164_v53  ;;  %v6597_v57 = vmul.f32 0.5, %v11310_v29 }
 0xa0e   : > { %v6812_v54 = vsel %vm6794_vm1, %v6803_v10, %v6785_v56  ;;  %v6706_v30 = vadd.f32 -0.28449672, %v6697_v18  ;;  %v6768_v33 = vmul.f32 1.442695, %v6752_v6  ;;  %vm6796_vm14 = vcmp.lt.f32.partialorder %v11351_v17, 0.0 }
 0xa0f   : > { %v6821_v1 = vadd.f32 1.0, %v6812_v54  ;;  %v6804_v9 = vsub.f32 0.0, %v6786_v46  ;;  %v6671_v28 = vadd.f32 -1.4531521, %v6662_v38  ;;  %v6598_v11 = vmul.f32 0.5, %v11343_v37 }
 0xa10   : > { %v6715_v59 = vmul.f32 %v11405_v21, %v6706_v30  ;;  %7819 = vpow2.f32 %v6768_v33  ;;  %vm6797_vm3 = vcmp.lt.f32.partialorder %v11383_v61, 0.0  ;;  %v6599_v43 = vmul.f32 0.5, %v11374_v32 }
 0xa11   : > { %v6830_v15 = vmul.f32 %v6821_v1, %v6596_v4  ;;  %v6813_v25 = vsel %vm6795_vm10, %v6804_v9, %v6786_v46  ;;  %v6680_v31 = vmul.f32 %v7814_v23, %v6671_v28 }
 0xa12   : > { %v6822_v0 = vadd.f32 1.0, %v6813_v25  ;;  %v6724_v7 = vadd.f32 0.2548296, %v6715_v59 }
 0xa13   : > { %v7816_v60 = vpop.eup %7815  ;;  %6839 = vst [vmem:[%s11402_s8 + $0x20] sm:$0xff] %v6830_v15  ;;  %v6689_v55 = vadd.f32 1.4214138, %v6680_v31 }
 0xa14   : > { %v6831_v41 = vmul.f32 %v6822_v0, %v6597_v57  ;;  %v6733_v51 = vmul.f32 %v11405_v21, %v6724_v7  ;;  %v6218_v34 = vmul.f32 %v7816_v60, %v6173_v39  ;;  %v7818_v44 = vpop.eup %7817  ;;  %v6038_v21 = vmul.f32 0.5, %v11178_v52 }
 0xa15   : > { %v6698_v16 = vmul.f32 %v7814_v23, %v6689_v55 }
 0xa16   : > { %6840 = vst [vmem:[%s11402_s8 + $0x28] sm:$0xff] %v6831_v41  ;;  %v6778_v35 = vmul.f32 %v7818_v44, %v6733_v51  ;;  %v6227_v8 = vsub.f32 1.0, %v6218_v34 }
 0xa17   : > { %v6707_v19 = vadd.f32 -0.28449672, %v6698_v16 }
 0xa18   : > { %v6787_v13 = vsub.f32 1.0, %v6778_v35  ;;  %v6245_v29 = vsub.f32 0.0, %v6227_v8 }
 0xa19   : > { %v6716_v5 = vmul.f32 %v7814_v23, %v6707_v19 }
 0xa1a   : > { %v6805_v42 = vsub.f32 0.0, %v6787_v13  ;;  %v6254_v12 = vsel %vm6236_vm15, %v6245_v29, %v6227_v8  ;;  %v7820_v49 = vpop.eup %7819 }
 0xa1b   : > { %v6263_v3 = vadd.f32 1.0, %v6254_v12  ;;  %v6725_v2 = vadd.f32 0.2548296, %v6716_v5 }
 0xa1c   : > { %v6814_v58 = vsel %vm6796_vm14, %v6805_v42, %v6787_v13 }
 0xa1d   : > { %v6823_v50 = vadd.f32 1.0, %v6814_v58  ;;  %v6272_v62 = vmul.f32 %v6263_v3, %v6038_v21  ;;  %v6734_v24 = vmul.f32 %v7814_v23, %v6725_v2 }
 0xa1f   : > { %v6832_v48 = vmul.f32 %v6823_v50, %v6598_v11  ;;  %v6591_v47 = vadd.f32 %v11184_v26, %v6272_v62  ;;  %v6779_v27 = vmul.f32 %v7820_v49, %v6734_v24 }
 0xa21   : > { %6841 = vst [vmem:[%s11402_s8 + $0x30] sm:$0xff] %v6832_v48  ;;  %v6609_v22 = vmul.f32 0.70710677, %v6591_v47  ;;  %v6788_v20 = vsub.f32 1.0, %v6779_v27  ;;  %v6600_v39 = vmul.f32 0.5, %v6591_v47 }
 0xa23   : > { %v6618_v17 = vand.u32 2147483647, %v6609_v22  ;;  %v6806_v45 = vsub.f32 0.0, %v6788_v20  ;;  %vm6798_vm4 = vcmp.lt.f32.partialorder %v6609_v22, 0.0 }
 0xa25   : > { %v6627_v52 = vmul.f32 0.3275911, %v6618_v17  ;;  %v6815_v37 = vsel %vm6797_vm3, %v6806_v45, %v6788_v20  ;;  %v6744_v26 = vsub.f32 0.0, %v6618_v17 }
 0xa26   : > { %v6824_v56 = vadd.f32 1.0, %v6815_v37 }
 0xa27   : > { %v6636_v36 = vadd.f32 1.0, %v6627_v52  ;;  %v6753_v14 = vmul.f32 %v6744_v26, %v6618_v17 }
 0xa28   : > { %v6833_v40 = vmul.f32 %v6824_v56, %v6599_v43 }
 0xa29   : > { %7821 = vrcp.f32 %v6636_v36  ;;  %v6770_v53 = vmul.f32 1.442695, %v6753_v14 }
 0xa2a   : > { %6842 = vst [vmem:[%s11402_s8 + $0x38] sm:$0xff] %v6833_v40 }
 0xa2b   : > { %7823 = vpow2.f32 %v6770_v53 }
 0xa33   : > { %v7822_v63 = vpop.eup %7821 }
 0xa34   : > { %v6663_v10 = vmul.f32 1.0614054, %v7822_v63 }
 0xa35   : > { %v7824_v32 = vpop.eup %7823 }
 0xa36   : > { %v6672_v18 = vadd.f32 -1.4531521, %v6663_v10 }
 0xa38   : > { %v6681_v46 = vmul.f32 %v7822_v63, %v6672_v18 }
 0xa3a   : > { %v6690_v54 = vadd.f32 1.4214138, %v6681_v46 }
 0xa3c   : > { %v6699_v30 = vmul.f32 %v7822_v63, %v6690_v54 }
 0xa3e   : > { %v6708_v61 = vadd.f32 -0.28449672, %v6699_v30 }
 0xa40   : > { %v6717_v23 = vmul.f32 %v7822_v63, %v6708_v61 }
 0xa42   : > { %v6726_v4 = vadd.f32 0.2548296, %v6717_v23 }
 0xa44   : > { %v6735_v1 = vmul.f32 %v7822_v63, %v6726_v4 }
 0xa46   : > { %v6780_v9 = vmul.f32 %v7824_v32, %v6735_v1 }
 0xa48   : > { %v6789_v6 = vsub.f32 1.0, %v6780_v9 }
 0xa4a   : > { %v6807_v59 = vsub.f32 0.0, %v6789_v6 }
 0xa4c   : > { %v6816_v38 = vsel %vm6798_vm4, %v6807_v59, %v6789_v6 }
 0xa4d   : > { %v6825_v15 = vadd.f32 1.0, %v6816_v38 }
 0xa4f   : > { %v6834_v25 = vmul.f32 %v6825_v15, %v6600_v39 }
 0xa51   : > { %6843 = vst [vmem:[%s11402_s8 + $0x40] sm:$0xff] %v6834_v25 }
 0xa52 PF: > { %s16_s21 = sadd.s32 1, %s7837_s21  }
 0xa53   : > { %p13_p4 = scmp.ge.s32.totalorder %s16_s21, 4  }
 0xa55   :  { %15 = sbr.rel (!%p13_p4) target bundleno = 1 (0x1), region = 74 }

</bundles_post_ra>
